<compile_context>
chip_gen: v7x
topology: tpu7x:2x2x1
jax: 0.10.0
libtpu: 0.0.40
codegen_flags: <defaults>
</compile_context>

<pallas_src>
import functools
import math

import jax
import jax.numpy as jnp
from jax.experimental import pallas as pl
from jax.experimental.pallas import tpu as pltpu

# ----------------------------------------------------------------------------
# Level tables (index = intLevel)
# ----------------------------------------------------------------------------
KSIZE = {2: 7, 3: 5, 4: 5, 5: 3, 6: 3}
KPAD = {2: 3, 3: 2, 4: 2, 5: 1, 6: 1}
FLT = {2: 10.0, 3: 5.0, 4: 2.5, 5: 1.25, 6: 0.625}
FEATC = {2: 32, 3: 64, 4: 96, 5: 128, 6: 192}
SUBPIX_IN = {2: 130, 3: 130, 4: 194, 5: 258, 6: 386}
REG_IN = {2: 131, 3: 131, 4: 131, 5: 131, 6: 195}
NDIST = {2: 49, 3: 25, 4: 25, 5: 9, 6: 9}


def _round_up(v, m):
    return ((v + m - 1) // m) * m


# ----------------------------------------------------------------------------
# Pallas kernel 1: fused direct convolution (NHWC, flattened spatial)
#   out_flat[q, :] = sum_t  x_flat[q + shift_t, :] @ W_t   (+ bias, LeakyReLU)
# ----------------------------------------------------------------------------
def _conv_kernel(x_ref, w_ref, b_ref, o_ref, scr_ref, *, shifts, tmi, win, leaky):
    i = pl.program_id(1)
    base = pl.multiple_of(i * tmi, 8)
    # One aligned dynamic load of the (overlapping) source window; cast to bf16 once.
    scr_ref[...] = x_ref[0, pl.ds(base, win), :].astype(jnp.bfloat16)

    tn = o_ref.shape[-1]
    acc = jnp.zeros((tmi, tn), jnp.float32)
    for t, shift in enumerate(shifts):
        a = scr_ref[shift:shift + tmi, :]                   # (tmi, Cin) bf16
        acc = acc + jnp.dot(a, w_ref[t], preferred_element_type=jnp.float32)

    out = acc + b_ref[...]
    if leaky:
        out = jnp.where(out >= 0, out, 0.1 * out)
    o_ref[0] = out.astype(o_ref.dtype)


def conv2d(x, p, stride=1, padding=0, act=False):
    """Conv2d on NHWC input. Weights are pre-packed (kh*kw, Cin, Np) bf16, bias (1, Np) f32.
    Strided convs are computed at stride 1 and subsampled (exact same result)."""
    w, bias = p['w'], p['b']
    kh, kw, cout = p['kh'], p['kw'], p['cout']
    sh, sw = (stride, stride) if isinstance(stride, int) else stride
    ph, pw = (padding, padding) if isinstance(padding, int) else padding

    B, H, W, Cin = x.shape
    Wp = W + 2 * pw
    Ho1 = H + 2 * ph - kh + 1
    Wo1 = Wp - kw + 1
    Mo = Ho1 * Wp                                            # flat output rows (padded width)

    tmi = 256 if Cin <= 64 else 128                          # M tile
    tmi = min(tmi, _round_up(Mo, 8))
    Mpad = _round_up(Mo, tmi)
    max_shift = (kh - 1) * Wp + (kw - 1)
    s8 = _round_up(max_shift, 8)
    win = tmi + s8                                           # window rows per grid step

    Hp = -(-(Mpad + s8) // Wp)                               # padded rows so base+win fits
    xp = jnp.pad(x, ((0, 0), (ph, Hp - H - ph), (pw, pw), (0, 0)))
    xf = xp.reshape(B, Hp * Wp, Cin)

    Np = w.shape[-1]
    shifts = tuple(dy * Wp + dx for dy in range(kh) for dx in range(kw))
    n_m = Mpad // tmi

    out = pl.pallas_call(
        functools.partial(_conv_kernel, shifts=shifts, tmi=tmi, win=win, leaky=act),
        out_shape=jax.ShapeDtypeStruct((B, Mpad, Np), jnp.float32),
        grid_spec=pltpu.PrefetchScalarGridSpec(
            num_scalar_prefetch=0,
            grid=(B, n_m),
            in_specs=[
                pl.BlockSpec((1, Hp * Wp, Cin), lambda b, i: (b, 0, 0)),
                pl.BlockSpec(w.shape, lambda b, i: (0, 0, 0)),
                pl.BlockSpec((1, Np), lambda b, i: (0, 0)),
            ],
            out_specs=pl.BlockSpec((1, tmi, Np), lambda b, i: (b, i, 0)),
            scratch_shapes=[pltpu.VMEM((win, Cin), jnp.bfloat16)],
        ),
        compiler_params=pltpu.CompilerParams(
            dimension_semantics=("parallel", "parallel")),
    )(xf, w, bias)

    out = out[:, :Mo, :cout].reshape(B, Ho1, Wp, cout)[:, :, :Wo1, :]
    if sh != 1 or sw != 1:
        out = out[:, ::sh, ::sw, :]
    return out


# ----------------------------------------------------------------------------
# Pallas kernel 2: 49-way local correlation (shifts generated in VMEM),
#                  fused 1/C normalization + LeakyReLU.
# ----------------------------------------------------------------------------
def _corr_kernel(f1_ref, f2_ref, o_ref, *, inv_c):
    hs, ws = o_ref.shape[1], o_ref.shape[2]
    a = f1_ref[0]                                            # (Hs, Ws, C)
    d = 0
    for dy in range(7):
        for dx in range(7):
            b = f2_ref[0, dy:dy + hs, dx:dx + ws, :]         # static shifted view
            s = jnp.sum(a * b, axis=-1, keepdims=True) * inv_c
            o_ref[0, :, :, d:d + 1] = jnp.where(s >= 0, s, 0.1 * s)
            d += 1


def correlation_leaky(f1, f2, stride):
    """leaky(FunctionCorrelation(f1, f2, stride)) on NHWC features -> (B, Hs, Ws, 49)."""
    B, H, W, C = f1.shape
    f1s = f1[:, ::stride, ::stride, :]
    f2s = f2[:, ::stride, ::stride, :]
    Hs, Ws = f1s.shape[1], f1s.shape[2]
    f2p = jnp.pad(f2s, ((0, 0), (3, 3), (3, 3), (0, 0)))

    return pl.pallas_call(
        functools.partial(_corr_kernel, inv_c=1.0 / C),
        out_shape=jax.ShapeDtypeStruct((B, Hs, Ws, 49), jnp.float32),
        grid_spec=pltpu.PrefetchScalarGridSpec(
            num_scalar_prefetch=0,
            grid=(B,),
            in_specs=[
                pl.BlockSpec((1, Hs, Ws, C), lambda b: (b, 0, 0, 0)),
                pl.BlockSpec((1, Hs + 6, Ws + 6, C), lambda b: (b, 0, 0, 0)),
            ],
            out_specs=pl.BlockSpec((1, Hs, Ws, 49), lambda b: (b, 0, 0, 0)),
        ),
        compiler_params=pltpu.CompilerParams(dimension_semantics=("parallel",)),
    )(f1s, f2p)


# ----------------------------------------------------------------------------
# Depthwise ConvTranspose2d(groups=C, k=4, s=2, p=1, bias=False): phase decomposition,
# pure elementwise MACs (no GEMM, no zero-upsampled tensor).
# ----------------------------------------------------------------------------
def conv_transpose_depthwise(x, w):
    B, H, W, C = x.shape
    wt = jnp.transpose(w[:, 0], (1, 2, 0))                   # (4, 4, C)
    xp = jnp.pad(x, ((0, 0), (1, 1), (1, 1), (0, 0)))

    def tap(r, c):
        return xp[:, r:r + H, c:c + W, :]

    p00 = (tap(1, 1) * wt[1, 1] + tap(1, 0) * wt[1, 3]
           + tap(0, 1) * wt[3, 1] + tap(0, 0) * wt[3, 3])
    p01 = (tap(1, 2) * wt[1, 0] + tap(1, 1) * wt[1, 2]
           + tap(0, 2) * wt[3, 0] + tap(0, 1) * wt[3, 2])
    p10 = (tap(2, 1) * wt[0, 1] + tap(2, 0) * wt[0, 3]
           + tap(1, 1) * wt[2, 1] + tap(1, 0) * wt[2, 3])
    p11 = (tap(2, 2) * wt[0, 0] + tap(2, 1) * wt[0, 2]
           + tap(1, 2) * wt[2, 0] + tap(1, 1) * wt[2, 2])

    even = jnp.stack([p00, p01], axis=3)                     # (B, H, W, 2, C)
    odd = jnp.stack([p10, p11], axis=3)
    out = jnp.stack([even, odd], axis=2)                     # (B, H, 2, W, 2, C)
    return out.reshape(B, 2 * H, 2 * W, C)


# ----------------------------------------------------------------------------
# JAX glue (NHWC): grid_sample / backwarp / bilinear resize / unfold
# TODO(synk): these gathers stay in plain JAX (no Pallas bilinear-warp kernel here).
# ----------------------------------------------------------------------------
def grid_sample_bilinear(inp, grid):
    B, H, W, C = inp.shape
    gx, gy = grid[..., 0], grid[..., 1]
    ix = ((gx + 1.0) * W - 1.0) * 0.5
    iy = ((gy + 1.0) * H - 1.0) * 0.5
    ix0, iy0 = jnp.floor(ix), jnp.floor(iy)
    ix1, iy1 = ix0 + 1.0, iy0 + 1.0

    def gather(yy, xx):
        valid = (xx >= 0) & (xx <= W - 1) & (yy >= 0) & (yy <= H - 1)
        xc = jnp.clip(xx, 0, W - 1).astype(jnp.int32)
        yc = jnp.clip(yy, 0, H - 1).astype(jnp.int32)
        bidx = jnp.arange(B).reshape(B, 1, 1)
        v = inp[bidx, yc, xc, :]                             # (B, Hg, Wg, C)
        return v * valid[..., None].astype(inp.dtype)

    w00 = (ix1 - ix) * (iy1 - iy)
    w01 = (ix - ix0) * (iy1 - iy)
    w10 = (ix1 - ix) * (iy - iy0)
    w11 = (ix - ix0) * (iy - iy0)
    return (gather(iy0, ix0) * w00[..., None] + gather(iy0, ix1) * w01[..., None]
            + gather(iy1, ix0) * w10[..., None] + gather(iy1, ix1) * w11[..., None])


def backwarp(tenInput, tenFlow):
    B, H, W, C = tenInput.shape
    Hf, Wf = tenFlow.shape[1], tenFlow.shape[2]
    hor = jnp.broadcast_to(jnp.linspace(-1.0, 1.0, Wf).reshape(1, 1, Wf, 1),
                           (B, Hf, Wf, 1))
    ver = jnp.broadcast_to(jnp.linspace(-1.0, 1.0, Hf).reshape(1, Hf, 1, 1),
                           (B, Hf, Wf, 1))
    grid = jnp.concatenate([hor, ver], axis=-1)
    flow = jnp.concatenate([tenFlow[..., 0:1] / ((W - 1.0) / 2.0),
                            tenFlow[..., 1:2] / ((H - 1.0) / 2.0)], axis=-1)
    return grid_sample_bilinear(tenInput, grid + flow)


def interp_bilinear(x, oh, ow):
    B, H, W, C = x.shape

    def coords(in_s, out_s):
        src = (jnp.arange(out_s, dtype=jnp.float32) + 0.5) * (in_s / out_s) - 0.5
        src = jnp.clip(src, 0.0, in_s - 1.0)
        i0 = jnp.floor(src).astype(jnp.int32)
        i1 = jnp.minimum(i0 + 1, in_s - 1)
        w1 = src - i0.astype(jnp.float32)
        return i0, i1, w1

    y0, y1, wy = coords(H, oh)
    x0, x1, wx = coords(W, ow)
    top = (x[:, y0, :, :] * (1.0 - wy)[None, :, None, None]
           + x[:, y1, :, :] * wy[None, :, None, None])
    out = (top[:, :, x0, :] * (1.0 - wx)[None, None, :, None]
           + top[:, :, x1, :] * wx[None, None, :, None])
    return out


def unfold_as_channels(x, k, pad):
    B, H, W, _ = x.shape
    xp = jnp.pad(x, ((0, 0), (pad, pad), (pad, pad), (0, 0)))
    chans = [xp[:, dy:dy + H, dx:dx + W, 0] for dy in range(k) for dx in range(k)]
    return jnp.stack(chans, axis=-1)                         # (B, H, W, k*k)


# ----------------------------------------------------------------------------
# Deterministic parameter construction (pre-packed / pre-padded / pre-cast weights)
# ----------------------------------------------------------------------------
class PRNG:
    def __init__(self, seed):
        self.key = jax.random.PRNGKey(seed)

    def next(self):
        self.key, sub = jax.random.split(self.key)
        return sub


def conv_p(rng, cout, cin, kh, kw):
    fan_in = cin * kh * kw
    w = jax.random.normal(rng.next(), (cout, cin, kh, kw),
                          dtype=jnp.float32) / math.sqrt(fan_in)
    b = jax.random.normal(rng.next(), (cout,), dtype=jnp.float32) * 0.01
    npad = _round_up(cout, 128)
    wp = jnp.transpose(w, (2, 3, 1, 0)).reshape(kh * kw, cin, cout)
    wp = jnp.pad(wp, ((0, 0), (0, 0), (0, npad - cout))).astype(jnp.bfloat16)
    bp = jnp.pad(b, (0, npad - cout)).reshape(1, npad)
    return {'w': wp, 'b': bp, 'kh': kh, 'kw': kw, 'cout': cout}


def deconv_w(rng, channels, k=4):
    return jax.random.normal(rng.next(), (channels, 1, k, k),
                             dtype=jnp.float32) * (2.0 / (k * k))


def build_params(seed=0):
    # TODO(synk): weights are deterministic random (no .pytorch checkpoint load).
    rng = PRNG(seed)
    feats = {
        'one': [conv_p(rng, 32, 3, 7, 7)],
        'two': [conv_p(rng, 32, 32, 3, 3), conv_p(rng, 32, 32, 3, 3),
                conv_p(rng, 32, 32, 3, 3)],
        'thr': [conv_p(rng, 64, 32, 3, 3), conv_p(rng, 64, 64, 3, 3)],
        'fou': [conv_p(rng, 96, 64, 3, 3), conv_p(rng, 96, 96, 3, 3)],
        'fiv': [conv_p(rng, 128, 96, 3, 3)],
        'six': [conv_p(rng, 192, 128, 3, 3)],
    }
    matching, subpixel, regular = [], [], []
    for L in [2, 3, 4, 5, 6]:
        k = KSIZE[L]
        matching.append({
            'level': L, 'flt': FLT[L],
            'feat': conv_p(rng, 64, 32, 1, 1) if L == 2 else None,
            'upflow': deconv_w(rng, 2) if L != 6 else None,
            'upcorr': deconv_w(rng, 49) if L < 4 else None,
            'main': [conv_p(rng, 128, 49, 3, 3), conv_p(rng, 64, 128, 3, 3),
                     conv_p(rng, 32, 64, 3, 3), conv_p(rng, 2, 32, k, k)],
        })
        subpixel.append({
            'level': L, 'flt': FLT[L],
            'feat': conv_p(rng, 64, 32, 1, 1) if L == 2 else None,
            'main': [conv_p(rng, 128, SUBPIX_IN[L], 3, 3),
                     conv_p(rng, 64, 128, 3, 3), conv_p(rng, 32, 64, 3, 3),
                     conv_p(rng, 2, 32, k, k)],
        })
        nd = NDIST[L]
        regular.append({
            'level': L, 'flt': FLT[L], 'unfold': k,
            'feat': conv_p(rng, 128, FEATC[L], 1, 1) if L < 5 else None,
            'main': [conv_p(rng, 128, REG_IN[L], 3, 3),
                     conv_p(rng, 128, 128, 3, 3), conv_p(rng, 64, 128, 3, 3),
                     conv_p(rng, 64, 64, 3, 3), conv_p(rng, 32, 64, 3, 3),
                     conv_p(rng, 32, 32, 3, 3)],
            'dist': ([conv_p(rng, nd, 32, k, k)] if L >= 5 else
                     [conv_p(rng, nd, 32, k, 1), conv_p(rng, nd, nd, 1, k)]),
            'scalex': conv_p(rng, 1, nd, 1, 1),
            'scaley': conv_p(rng, 1, nd, 1, 1),
        })
    return {'features': feats, 'matching': matching,
            'subpixel': subpixel, 'regularization': regular}


# ----------------------------------------------------------------------------
# Sub-module forwards (NHWC)
# ----------------------------------------------------------------------------
def _seq(x, plist, strides, pads, acts):
    for p_, s_, pd_, a_ in zip(plist, strides, pads, acts):
        x = conv2d(x, p_, s_, pd_, a_)
    return x


def features_forward(fp, x):
    one = conv2d(x, fp['one'][0], 1, 3, True)
    two = _seq(one, fp['two'], [2, 1, 1], [1, 1, 1], [True] * 3)
    thr = _seq(two, fp['thr'], [2, 1], [1, 1], [True] * 2)
    fou = _seq(thr, fp['fou'], [2, 1], [1, 1], [True] * 2)
    fiv = conv2d(fou, fp['fiv'][0], 2, 1, True)
    six = conv2d(fiv, fp['six'][0], 2, 1, True)
    return [one, two, thr, fou, fiv, six]


def matching_forward(mp, tenFirst, tenSecond, featF, featS, flow):
    L = mp['level']
    if mp['feat'] is not None:
        featF = conv2d(featF, mp['feat'], 1, 0, True)
        featS = conv2d(featS, mp['feat'], 1, 0, True)
    if flow is not None:
        flow = conv_transpose_depthwise(flow, mp['upflow'])
        featS = backwarp(featS, flow * mp['flt'])
    if mp['upcorr'] is None:
        corr = correlation_leaky(featF, featS, 1)
    else:
        corr = conv_transpose_depthwise(correlation_leaky(featF, featS, 2),
                                        mp['upcorr'])
    x = _seq(corr, mp['main'][:3], [1, 1, 1], [1, 1, 1], [True] * 3)
    x = conv2d(x, mp['main'][3], 1, KPAD[L], False)
    return x if flow is None else flow + x


def subpixel_forward(sp, tenFirst, tenSecond, featF, featS, flow):
    L = sp['level']
    if sp['feat'] is not None:
        featF = conv2d(featF, sp['feat'], 1, 0, True)
        featS = conv2d(featS, sp['feat'], 1, 0, True)
    featS = backwarp(featS, flow * sp['flt'])
    x = jnp.concatenate([featF, featS, flow], axis=-1)
    x = _seq(x, sp['main'][:3], [1, 1, 1], [1, 1, 1], [True] * 3)
    x = conv2d(x, sp['main'][3], 1, KPAD[L], False)
    return flow + x


def regularization_forward(rp, tenFirst, tenSecond, featF, featS, flow):
    k = rp['unfold']
    p = (k - 1) // 2
    warped = backwarp(tenSecond, flow * rp['flt'])
    diff = jnp.sqrt(jnp.sum((tenFirst - warped) ** 2, axis=-1, keepdims=True))
    mean = jnp.mean(flow, axis=(1, 2), keepdims=True)
    feat = featF if rp['feat'] is None else conv2d(featF, rp['feat'], 1, 0, True)
    x = jnp.concatenate([diff, flow - mean, feat], axis=-1)
    x = _seq(x, rp['main'], [1] * 6, [1] * 6, [True] * 6)
    if len(rp['dist']) == 1:
        dist = conv2d(x, rp['dist'][0], 1, p, False)
    else:
        dist = conv2d(x, rp['dist'][0], 1, (p, 0), False)
        dist = conv2d(dist, rp['dist'][1], 1, (0, p), False)
    dist = -(dist ** 2)
    dist = jnp.exp(dist - jnp.max(dist, axis=-1, keepdims=True))
    divisor = 1.0 / jnp.sum(dist, axis=-1, keepdims=True)
    unf_x = unfold_as_channels(flow[..., 0:1], k, p)
    unf_y = unfold_as_channels(flow[..., 1:2], k, p)
    sx = conv2d(dist * unf_x, rp['scalex'], 1, 0, False) * divisor
    sy = conv2d(dist * unf_y, rp['scaley'], 1, 0, False) * divisor
    return jnp.concatenate([sx, sy], axis=-1)


# ----------------------------------------------------------------------------
# Top-level Network.forward (NCHW in / NCHW out, NHWC internally)
# ----------------------------------------------------------------------------
def network_forward(params, tenFirst, tenSecond):
    mean1 = jnp.array([0.411618, 0.434631, 0.454253], jnp.float32)
    mean2 = jnp.array([0.410782, 0.433645, 0.452793], jnp.float32)
    first = jnp.transpose(tenFirst, (0, 2, 3, 1)) - mean1
    second = jnp.transpose(tenSecond, (0, 2, 3, 1)) - mean2

    featF = features_forward(params['features'], first)
    featS = features_forward(params['features'], second)

    firsts, seconds = [first], [second]
    for lvl in [1, 2, 3, 4, 5]:
        h, w = featF[lvl].shape[1], featF[lvl].shape[2]
        firsts.append(interp_bilinear(firsts[-1], h, w))
        seconds.append(interp_bilinear(seconds[-1], h, w))

    flow = None
    for i in [-1, -2, -3, -4, -5]:
        flow = matching_forward(params['matching'][i], firsts[i], seconds[i],
                                featF[i], featS[i], flow)
        flow = subpixel_forward(params['subpixel'][i], firsts[i], seconds[i],
                                featF[i], featS[i], flow)
        flow = regularization_forward(params['regularization'][i], firsts[i],
                                      seconds[i], featF[i], featS[i], flow)
    flow = flow * 20.0
    return jnp.transpose(flow, (0, 3, 1, 2))


# ----------------------------------------------------------------------------
if __name__ == "__main__":
    key = jax.random.PRNGKey(0)
    k1, k2 = jax.random.split(key)
    B, H, W = 2, 64, 64
    tenFirst = jax.random.uniform(k1, (B, 3, H, W), dtype=jnp.float32)
    tenSecond = jax.random.uniform(k2, (B, 3, H, W), dtype=jnp.float32)

    params = build_params(seed=0)
    out = network_forward(params, tenFirst, tenSecond)
    out = jax.block_until_ready(out)
    assert out.shape == (B, 2, H // 2, W // 2), out.shape
    print("KERNEL_OK")
</pallas_src>

<mosaic_0001>
module attributes {stable_mosaic.version = 11 : i64} {
  func.func @_conv_kernel(%arg0: i32, %arg1: i32, %arg2: memref<1x5040x3xf32, #tpu.memory_space<vmem>>, %arg3: memref<49x3x128xbf16, #tpu.memory_space<vmem>>, %arg4: memref<1x128xf32, #tpu.memory_space<vmem>>, %arg5: memref<1x256x128xf32, #tpu.memory_space<vmem>>, %arg6: memref<688x3xbf16, #tpu.memory_space<vmem>>) attributes {dimension_semantics = [#tpu.dimension_semantics<parallel>, #tpu.dimension_semantics<parallel>], iteration_bounds = array<i64: 2, 18>, scalar_prefetch = 0 : i64, scratch_operands = 1 : i64, tpu.core_type = #tpu.core_type<tc>, window_params = [{transform_indices = @transform_0, window_bounds = array<i64: 1, 5040, 3>}, {pipeline_mode = #tpu.pipeline_mode<synchronous>, transform_indices = @transform_1, window_bounds = array<i64: 49, 3, 128>}, {pipeline_mode = #tpu.pipeline_mode<synchronous>, transform_indices = @transform_2, window_bounds = array<i64: 1, 128>}, {transform_indices = @transform_3, window_bounds = array<i64: 1, 256, 128>}]} {
    %c256_i32 = arith.constant 256 : i32
    %0 = arith.muli %arg1, %c256_i32 : i32
    %1 = tpu.assume_multiple %0, 8 : i32
    %c0 = arith.constant 0 : index
    %2 = arith.index_cast %1 : i32 to index
    %c0_0 = arith.constant 0 : index
    %3 = vector.load %arg2[%c0, %2, %c0_0] : memref<1x5040x3xf32, #tpu.memory_space<vmem>>, vector<1x688x3xf32>
    %4 = vector.shape_cast %3 : vector<1x688x3xf32> to vector<688x3xf32>
    %5 = arith.truncf %4 : vector<688x3xf32> to vector<688x3xbf16>
    %c0_1 = arith.constant 0 : index
    %c0_2 = arith.constant 0 : index
    %6 = vector.load %arg6[%c0_1, %c0_2] : memref<688x3xbf16, #tpu.memory_space<vmem>>, vector<688x3xbf16>
    tpu.vector_store %arg6[%c0_1, %c0_2], %5 {strides = array<i32>} : memref<688x3xbf16, #tpu.memory_space<vmem>>, vector<688x3xbf16>,
    %cst = arith.constant 0.000000e+00 : f32
    %7 = vector.broadcast %cst : f32 to vector<256x128xf32>
    %c0_3 = arith.constant 0 : index
    %c0_4 = arith.constant 0 : index
    %8 = vector.load %arg6[%c0_3, %c0_4] : memref<688x3xbf16, #tpu.memory_space<vmem>>, vector<256x3xbf16>
    %c0_5 = arith.constant 0 : index
    %c0_6 = arith.constant 0 : index
    %c0_7 = arith.constant 0 : index
    %9 = vector.load %arg3[%c0_5, %c0_6, %c0_7] : memref<49x3x128xbf16, #tpu.memory_space<vmem>>, vector<1x3x128xbf16>
    %10 = vector.shape_cast %9 : vector<1x3x128xbf16> to vector<3x128xbf16>
    %cst_8 = arith.constant dense<0.000000e+00> : vector<256x128xf32>
    %11 = tpu.matmul %8, %10, %cst_8 {dimension_numbers = #tpu.dot_dimension_numbers<[1], [0], [0], [1], [0, 0, 1, 1], [], []>} : vector<256x3xbf16>, vector<3x128xbf16>, vector<256x128xf32> -> vector<256x128xf32>
    %12 = arith.addf %7, %11 : vector<256x128xf32>
    %c1 = arith.constant 1 : index
    %c0_9 = arith.constant 0 : index
    %13 = vector.load %arg6[%c1, %c0_9] : memref<688x3xbf16, #tpu.memory_space<vmem>>, vector<256x3xbf16>
    %c1_10 = arith.constant 1 : index
    %c0_11 = arith.constant 0 : index
    %c0_12 = arith.constant 0 : index
    %14 = vector.load %arg3[%c1_10, %c0_11, %c0_12] : memref<49x3x128xbf16, #tpu.memory_space<vmem>>, vector<1x3x128xbf16>
    %15 = vector.shape_cast %14 : vector<1x3x128xbf16> to vector<3x128xbf16>
    %cst_13 = arith.constant dense<0.000000e+00> : vector<256x128xf32>
    %16 = tpu.matmul %13, %15, %cst_13 {dimension_numbers = #tpu.dot_dimension_numbers<[1], [0], [0], [1], [0, 0, 1, 1], [], []>} : vector<256x3xbf16>, vector<3x128xbf16>, vector<256x128xf32> -> vector<256x128xf32>
    %17 = arith.addf %12, %16 : vector<256x128xf32>
    %c2 = arith.constant 2 : index
    %c0_14 = arith.constant 0 : index
    %18 = vector.load %arg6[%c2, %c0_14] : memref<688x3xbf16, #tpu.memory_space<vmem>>, vector<256x3xbf16>
    %c2_15 = arith.constant 2 : index
    %c0_16 = arith.constant 0 : index
    %c0_17 = arith.constant 0 : index
    %19 = vector.load %arg3[%c2_15, %c0_16, %c0_17] : memref<49x3x128xbf16, #tpu.memory_space<vmem>>, vector<1x3x128xbf16>
    %20 = vector.shape_cast %19 : vector<1x3x128xbf16> to vector<3x128xbf16>
    %cst_18 = arith.constant dense<0.000000e+00> : vector<256x128xf32>
    %21 = tpu.matmul %18, %20, %cst_18 {dimension_numbers = #tpu.dot_dimension_numbers<[1], [0], [0], [1], [0, 0, 1, 1], [], []>} : vector<256x3xbf16>, vector<3x128xbf16>, vector<256x128xf32> -> vector<256x128xf32>
    %22 = arith.addf %17, %21 : vector<256x128xf32>
    %c3 = arith.constant 3 : index
    %c0_19 = arith.constant 0 : index
    %23 = vector.load %arg6[%c3, %c0_19] : memref<688x3xbf16, #tpu.memory_space<vmem>>, vector<256x3xbf16>
    %c3_20 = arith.constant 3 : index
    %c0_21 = arith.constant 0 : index
    %c0_22 = arith.constant 0 : index
    %24 = vector.load %arg3[%c3_20, %c0_21, %c0_22] : memref<49x3x128xbf16, #tpu.memory_space<vmem>>, vector<1x3x128xbf16>
    %25 = vector.shape_cast %24 : vector<1x3x128xbf16> to vector<3x128xbf16>
    %cst_23 = arith.constant dense<0.000000e+00> : vector<256x128xf32>
    %26 = tpu.matmul %23, %25, %cst_23 {dimension_numbers = #tpu.dot_dimension_numbers<[1], [0], [0], [1], [0, 0, 1, 1], [], []>} : vector<256x3xbf16>, vector<3x128xbf16>, vector<256x128xf32> -> vector<256x128xf32>
    %27 = arith.addf %22, %26 : vector<256x128xf32>
    %c4 = arith.constant 4 : index
    %c0_24 = arith.constant 0 : index
    %28 = vector.load %arg6[%c4, %c0_24] : memref<688x3xbf16, #tpu.memory_space<vmem>>, vector<256x3xbf16>
    %c4_25 = arith.constant 4 : index
    %c0_26 = arith.constant 0 : index
    %c0_27 = arith.constant 0 : index
    %29 = vector.load %arg3[%c4_25, %c0_26, %c0_27] : memref<49x3x128xbf16, #tpu.memory_space<vmem>>, vector<1x3x128xbf16>
    %30 = vector.shape_cast %29 : vector<1x3x128xbf16> to vector<3x128xbf16>
    %cst_28 = arith.constant dense<0.000000e+00> : vector<256x128xf32>
    %31 = tpu.matmul %28, %30, %cst_28 {dimension_numbers = #tpu.dot_dimension_numbers<[1], [0], [0], [1], [0, 0, 1, 1], [], []>} : vector<256x3xbf16>, vector<3x128xbf16>, vector<256x128xf32> -> vector<256x128xf32>
    %32 = arith.addf %27, %31 : vector<256x128xf32>
    %c5 = arith.constant 5 : index
    %c0_29 = arith.constant 0 : index
    %33 = vector.load %arg6[%c5, %c0_29] : memref<688x3xbf16, #tpu.memory_space<vmem>>, vector<256x3xbf16>
    %c5_30 = arith.constant 5 : index
    %c0_31 = arith.constant 0 : index
    %c0_32 = arith.constant 0 : index
    %34 = vector.load %arg3[%c5_30, %c0_31, %c0_32] : memref<49x3x128xbf16, #tpu.memory_space<vmem>>, vector<1x3x128xbf16>
    %35 = vector.shape_cast %34 : vector<1x3x128xbf16> to vector<3x128xbf16>
    %cst_33 = arith.constant dense<0.000000e+00> : vector<256x128xf32>
    %36 = tpu.matmul %33, %35, %cst_33 {dimension_numbers = #tpu.dot_dimension_numbers<[1], [0], [0], [1], [0, 0, 1, 1], [], []>} : vector<256x3xbf16>, vector<3x128xbf16>, vector<256x128xf32> -> vector<256x128xf32>
    %37 = arith.addf %32, %36 : vector<256x128xf32>
    %c6 = arith.constant 6 : index
    %c0_34 = arith.constant 0 : index
    %38 = vector.load %arg6[%c6, %c0_34] : memref<688x3xbf16, #tpu.memory_space<vmem>>, vector<256x3xbf16>
    %c6_35 = arith.constant 6 : index
    %c0_36 = arith.constant 0 : index
    %c0_37 = arith.constant 0 : index
    %39 = vector.load %arg3[%c6_35, %c0_36, %c0_37] : memref<49x3x128xbf16, #tpu.memory_space<vmem>>, vector<1x3x128xbf16>
    %40 = vector.shape_cast %39 : vector<1x3x128xbf16> to vector<3x128xbf16>
    %cst_38 = arith.constant dense<0.000000e+00> : vector<256x128xf32>
    %41 = tpu.matmul %38, %40, %cst_38 {dimension_numbers = #tpu.dot_dimension_numbers<[1], [0], [0], [1], [0, 0, 1, 1], [], []>} : vector<256x3xbf16>, vector<3x128xbf16>, vector<256x128xf32> -> vector<256x128xf32>
    %42 = arith.addf %37, %41 : vector<256x128xf32>
    %c70 = arith.constant 70 : index
    %c0_39 = arith.constant 0 : index
    %43 = vector.load %arg6[%c70, %c0_39] : memref<688x3xbf16, #tpu.memory_space<vmem>>, vector<256x3xbf16>
    %c7 = arith.constant 7 : index
    %c0_40 = arith.constant 0 : index
    %c0_41 = arith.constant 0 : index
    %44 = vector.load %arg3[%c7, %c0_40, %c0_41] : memref<49x3x128xbf16, #tpu.memory_space<vmem>>, vector<1x3x128xbf16>
    %45 = vector.shape_cast %44 : vector<1x3x128xbf16> to vector<3x128xbf16>
    %cst_42 = arith.constant dense<0.000000e+00> : vector<256x128xf32>
    %46 = tpu.matmul %43, %45, %cst_42 {dimension_numbers = #tpu.dot_dimension_numbers<[1], [0], [0], [1], [0, 0, 1, 1], [], []>} : vector<256x3xbf16>, vector<3x128xbf16>, vector<256x128xf32> -> vector<256x128xf32>
    %47 = arith.addf %42, %46 : vector<256x128xf32>
    %c71 = arith.constant 71 : index
    %c0_43 = arith.constant 0 : index
    %48 = vector.load %arg6[%c71, %c0_43] : memref<688x3xbf16, #tpu.memory_space<vmem>>, vector<256x3xbf16>
    %c8 = arith.constant 8 : index
    %c0_44 = arith.constant 0 : index
    %c0_45 = arith.constant 0 : index
    %49 = vector.load %arg3[%c8, %c0_44, %c0_45] : memref<49x3x128xbf16, #tpu.memory_space<vmem>>, vector<1x3x128xbf16>
    %50 = vector.shape_cast %49 : vector<1x3x128xbf16> to vector<3x128xbf16>
    %cst_46 = arith.constant dense<0.000000e+00> : vector<256x128xf32>
    %51 = tpu.matmul %48, %50, %cst_46 {dimension_numbers = #tpu.dot_dimension_numbers<[1], [0], [0], [1], [0, 0, 1, 1], [], []>} : vector<256x3xbf16>, vector<3x128xbf16>, vector<256x128xf32> -> vector<256x128xf32>
    %52 = arith.addf %47, %51 : vector<256x128xf32>
    %c72 = arith.constant 72 : index
    %c0_47 = arith.constant 0 : index
    %53 = vector.load %arg6[%c72, %c0_47] : memref<688x3xbf16, #tpu.memory_space<vmem>>, vector<256x3xbf16>
    %c9 = arith.constant 9 : index
    %c0_48 = arith.constant 0 : index
    %c0_49 = arith.constant 0 : index
    %54 = vector.load %arg3[%c9, %c0_48, %c0_49] : memref<49x3x128xbf16, #tpu.memory_space<vmem>>, vector<1x3x128xbf16>
    %55 = vector.shape_cast %54 : vector<1x3x128xbf16> to vector<3x128xbf16>
    %cst_50 = arith.constant dense<0.000000e+00> : vector<256x128xf32>
    %56 = tpu.matmul %53, %55, %cst_50 {dimension_numbers = #tpu.dot_dimension_numbers<[1], [0], [0], [1], [0, 0, 1, 1], [], []>} : vector<256x3xbf16>, vector<3x128xbf16>, vector<256x128xf32> -> vector<256x128xf32>
    %57 = arith.addf %52, %56 : vector<256x128xf32>
    %c73 = arith.constant 73 : index
    %c0_51 = arith.constant 0 : index
    %58 = vector.load %arg6[%c73, %c0_51] : memref<688x3xbf16, #tpu.memory_space<vmem>>, vector<256x3xbf16>
    %c10 = arith.constant 10 : index
    %c0_52 = arith.constant 0 : index
    %c0_53 = arith.constant 0 : index
    %59 = vector.load %arg3[%c10, %c0_52, %c0_53] : memref<49x3x128xbf16, #tpu.memory_space<vmem>>, vector<1x3x128xbf16>
    %60 = vector.shape_cast %59 : vector<1x3x128xbf16> to vector<3x128xbf16>
    %cst_54 = arith.constant dense<0.000000e+00> : vector<256x128xf32>
    %61 = tpu.matmul %58, %60, %cst_54 {dimension_numbers = #tpu.dot_dimension_numbers<[1], [0], [0], [1], [0, 0, 1, 1], [], []>} : vector<256x3xbf16>, vector<3x128xbf16>, vector<256x128xf32> -> vector<256x128xf32>
    %62 = arith.addf %57, %61 : vector<256x128xf32>
    %c74 = arith.constant 74 : index
    %c0_55 = arith.constant 0 : index
    %63 = vector.load %arg6[%c74, %c0_55] : memref<688x3xbf16, #tpu.memory_space<vmem>>, vector<256x3xbf16>
    %c11 = arith.constant 11 : index
    %c0_56 = arith.constant 0 : index
    %c0_57 = arith.constant 0 : index
    %64 = vector.load %arg3[%c11, %c0_56, %c0_57] : memref<49x3x128xbf16, #tpu.memory_space<vmem>>, vector<1x3x128xbf16>
    %65 = vector.shape_cast %64 : vector<1x3x128xbf16> to vector<3x128xbf16>
    %cst_58 = arith.constant dense<0.000000e+00> : vector<256x128xf32>
    %66 = tpu.matmul %63, %65, %cst_58 {dimension_numbers = #tpu.dot_dimension_numbers<[1], [0], [0], [1], [0, 0, 1, 1], [], []>} : vector<256x3xbf16>, vector<3x128xbf16>, vector<256x128xf32> -> vector<256x128xf32>
    %67 = arith.addf %62, %66 : vector<256x128xf32>
    %c75 = arith.constant 75 : index
    %c0_59 = arith.constant 0 : index
    %68 = vector.load %arg6[%c75, %c0_59] : memref<688x3xbf16, #tpu.memory_space<vmem>>, vector<256x3xbf16>
    %c12 = arith.constant 12 : index
    %c0_60 = arith.constant 0 : index
    %c0_61 = arith.constant 0 : index
    %69 = vector.load %arg3[%c12, %c0_60, %c0_61] : memref<49x3x128xbf16, #tpu.memory_space<vmem>>, vector<1x3x128xbf16>
    %70 = vector.shape_cast %69 : vector<1x3x128xbf16> to vector<3x128xbf16>
    %cst_62 = arith.constant dense<0.000000e+00> : vector<256x128xf32>
    %71 = tpu.matmul %68, %70, %cst_62 {dimension_numbers = #tpu.dot_dimension_numbers<[1], [0], [0], [1], [0, 0, 1, 1], [], []>} : vector<256x3xbf16>, vector<3x128xbf16>, vector<256x128xf32> -> vector<256x128xf32>
    %72 = arith.addf %67, %71 : vector<256x128xf32>
    %c76 = arith.constant 76 : index
    %c0_63 = arith.constant 0 : index
    %73 = vector.load %arg6[%c76, %c0_63] : memref<688x3xbf16, #tpu.memory_space<vmem>>, vector<256x3xbf16>
    %c13 = arith.constant 13 : index
    %c0_64 = arith.constant 0 : index
    %c0_65 = arith.constant 0 : index
    %74 = vector.load %arg3[%c13, %c0_64, %c0_65] : memref<49x3x128xbf16, #tpu.memory_space<vmem>>, vector<1x3x128xbf16>
    %75 = vector.shape_cast %74 : vector<1x3x128xbf16> to vector<3x128xbf16>
    %cst_66 = arith.constant dense<0.000000e+00> : vector<256x128xf32>
    %76 = tpu.matmul %73, %75, %cst_66 {dimension_numbers = #tpu.dot_dimension_numbers<[1], [0], [0], [1], [0, 0, 1, 1], [], []>} : vector<256x3xbf16>, vector<3x128xbf16>, vector<256x128xf32> -> vector<256x128xf32>
    %77 = arith.addf %72, %76 : vector<256x128xf32>
    %c140 = arith.constant 140 : index
    %c0_67 = arith.constant 0 : index
    %78 = vector.load %arg6[%c140, %c0_67] : memref<688x3xbf16, #tpu.memory_space<vmem>>, vector<256x3xbf16>
    %c14 = arith.constant 14 : index
    %c0_68 = arith.constant 0 : index
    %c0_69 = arith.constant 0 : index
    %79 = vector.load %arg3[%c14, %c0_68, %c0_69] : memref<49x3x128xbf16, #tpu.memory_space<vmem>>, vector<1x3x128xbf16>
    %80 = vector.shape_cast %79 : vector<1x3x128xbf16> to vector<3x128xbf16>
    %cst_70 = arith.constant dense<0.000000e+00> : vector<256x128xf32>
    %81 = tpu.matmul %78, %80, %cst_70 {dimension_numbers = #tpu.dot_dimension_numbers<[1], [0], [0], [1], [0, 0, 1, 1], [], []>} : vector<256x3xbf16>, vector<3x128xbf16>, vector<256x128xf32> -> vector<256x128xf32>
    %82 = arith.addf %77, %81 : vector<256x128xf32>
    %c141 = arith.constant 141 : index
    %c0_71 = arith.constant 0 : index
    %83 = vector.load %arg6[%c141, %c0_71] : memref<688x3xbf16, #tpu.memory_space<vmem>>, vector<256x3xbf16>
    %c15 = arith.constant 15 : index
    %c0_72 = arith.constant 0 : index
    %c0_73 = arith.constant 0 : index
    %84 = vector.load %arg3[%c15, %c0_72, %c0_73] : memref<49x3x128xbf16, #tpu.memory_space<vmem>>, vector<1x3x128xbf16>
    %85 = vector.shape_cast %84 : vector<1x3x128xbf16> to vector<3x128xbf16>
    %cst_74 = arith.constant dense<0.000000e+00> : vector<256x128xf32>
    %86 = tpu.matmul %83, %85, %cst_74 {dimension_numbers = #tpu.dot_dimension_numbers<[1], [0], [0], [1], [0, 0, 1, 1], [], []>} : vector<256x3xbf16>, vector<3x128xbf16>, vector<256x128xf32> -> vector<256x128xf32>
    %87 = arith.addf %82, %86 : vector<256x128xf32>
    %c142 = arith.constant 142 : index
    %c0_75 = arith.constant 0 : index
    %88 = vector.load %arg6[%c142, %c0_75] : memref<688x3xbf16, #tpu.memory_space<vmem>>, vector<256x3xbf16>
    %c16 = arith.constant 16 : index
    %c0_76 = arith.constant 0 : index
    %c0_77 = arith.constant 0 : index
    %89 = vector.load %arg3[%c16, %c0_76, %c0_77] : memref<49x3x128xbf16, #tpu.memory_space<vmem>>, vector<1x3x128xbf16>
    %90 = vector.shape_cast %89 : vector<1x3x128xbf16> to vector<3x128xbf16>
    %cst_78 = arith.constant dense<0.000000e+00> : vector<256x128xf32>
    %91 = tpu.matmul %88, %90, %cst_78 {dimension_numbers = #tpu.dot_dimension_numbers<[1], [0], [0], [1], [0, 0, 1, 1], [], []>} : vector<256x3xbf16>, vector<3x128xbf16>, vector<256x128xf32> -> vector<256x128xf32>
    %92 = arith.addf %87, %91 : vector<256x128xf32>
    %c143 = arith.constant 143 : index
    %c0_79 = arith.constant 0 : index
    %93 = vector.load %arg6[%c143, %c0_79] : memref<688x3xbf16, #tpu.memory_space<vmem>>, vector<256x3xbf16>
    %c17 = arith.constant 17 : index
    %c0_80 = arith.constant 0 : index
    %c0_81 = arith.constant 0 : index
    %94 = vector.load %arg3[%c17, %c0_80, %c0_81] : memref<49x3x128xbf16, #tpu.memory_space<vmem>>, vector<1x3x128xbf16>
    %95 = vector.shape_cast %94 : vector<1x3x128xbf16> to vector<3x128xbf16>
    %cst_82 = arith.constant dense<0.000000e+00> : vector<256x128xf32>
    %96 = tpu.matmul %93, %95, %cst_82 {dimension_numbers = #tpu.dot_dimension_numbers<[1], [0], [0], [1], [0, 0, 1, 1], [], []>} : vector<256x3xbf16>, vector<3x128xbf16>, vector<256x128xf32> -> vector<256x128xf32>
    %97 = arith.addf %92, %96 : vector<256x128xf32>
    %c144 = arith.constant 144 : index
    %c0_83 = arith.constant 0 : index
    %98 = vector.load %arg6[%c144, %c0_83] : memref<688x3xbf16, #tpu.memory_space<vmem>>, vector<256x3xbf16>
    %c18 = arith.constant 18 : index
    %c0_84 = arith.constant 0 : index
    %c0_85 = arith.constant 0 : index
    %99 = vector.load %arg3[%c18, %c0_84, %c0_85] : memref<49x3x128xbf16, #tpu.memory_space<vmem>>, vector<1x3x128xbf16>
    %100 = vector.shape_cast %99 : vector<1x3x128xbf16> to vector<3x128xbf16>
    %cst_86 = arith.constant dense<0.000000e+00> : vector<256x128xf32>
    %101 = tpu.matmul %98, %100, %cst_86 {dimension_numbers = #tpu.dot_dimension_numbers<[1], [0], [0], [1], [0, 0, 1, 1], [], []>} : vector<256x3xbf16>, vector<3x128xbf16>, vector<256x128xf32> -> vector<256x128xf32>
    %102 = arith.addf %97, %101 : vector<256x128xf32>
    %c145 = arith.constant 145 : index
    %c0_87 = arith.constant 0 : index
    %103 = vector.load %arg6[%c145, %c0_87] : memref<688x3xbf16, #tpu.memory_space<vmem>>, vector<256x3xbf16>
    %c19 = arith.constant 19 : index
    %c0_88 = arith.constant 0 : index
    %c0_89 = arith.constant 0 : index
    %104 = vector.load %arg3[%c19, %c0_88, %c0_89] : memref<49x3x128xbf16, #tpu.memory_space<vmem>>, vector<1x3x128xbf16>
    %105 = vector.shape_cast %104 : vector<1x3x128xbf16> to vector<3x128xbf16>
    %cst_90 = arith.constant dense<0.000000e+00> : vector<256x128xf32>
    %106 = tpu.matmul %103, %105, %cst_90 {dimension_numbers = #tpu.dot_dimension_numbers<[1], [0], [0], [1], [0, 0, 1, 1], [], []>} : vector<256x3xbf16>, vector<3x128xbf16>, vector<256x128xf32> -> vector<256x128xf32>
    %107 = arith.addf %102, %106 : vector<256x128xf32>
    %c146 = arith.constant 146 : index
    %c0_91 = arith.constant 0 : index
    %108 = vector.load %arg6[%c146, %c0_91] : memref<688x3xbf16, #tpu.memory_space<vmem>>, vector<256x3xbf16>
    %c20 = arith.constant 20 : index
    %c0_92 = arith.constant 0 : index
    %c0_93 = arith.constant 0 : index
    %109 = vector.load %arg3[%c20, %c0_92, %c0_93] : memref<49x3x128xbf16, #tpu.memory_space<vmem>>, vector<1x3x128xbf16>
    %110 = vector.shape_cast %109 : vector<1x3x128xbf16> to vector<3x128xbf16>
    %cst_94 = arith.constant dense<0.000000e+00> : vector<256x128xf32>
    %111 = tpu.matmul %108, %110, %cst_94 {dimension_numbers = #tpu.dot_dimension_numbers<[1], [0], [0], [1], [0, 0, 1, 1], [], []>} : vector<256x3xbf16>, vector<3x128xbf16>, vector<256x128xf32> -> vector<256x128xf32>
    %112 = arith.addf %107, %111 : vector<256x128xf32>
    %c210 = arith.constant 210 : index
    %c0_95 = arith.constant 0 : index
    %113 = vector.load %arg6[%c210, %c0_95] : memref<688x3xbf16, #tpu.memory_space<vmem>>, vector<256x3xbf16>
    %c21 = arith.constant 21 : index
    %c0_96 = arith.constant 0 : index
    %c0_97 = arith.constant 0 : index
    %114 = vector.load %arg3[%c21, %c0_96, %c0_97] : memref<49x3x128xbf16, #tpu.memory_space<vmem>>, vector<1x3x128xbf16>
    %115 = vector.shape_cast %114 : vector<1x3x128xbf16> to vector<3x128xbf16>
    %cst_98 = arith.constant dense<0.000000e+00> : vector<256x128xf32>
    %116 = tpu.matmul %113, %115, %cst_98 {dimension_numbers = #tpu.dot_dimension_numbers<[1], [0], [0], [1], [0, 0, 1, 1], [], []>} : vector<256x3xbf16>, vector<3x128xbf16>, vector<256x128xf32> -> vector<256x128xf32>
    %117 = arith.addf %112, %116 : vector<256x128xf32>
    %c211 = arith.constant 211 : index
    %c0_99 = arith.constant 0 : index
    %118 = vector.load %arg6[%c211, %c0_99] : memref<688x3xbf16, #tpu.memory_space<vmem>>, vector<256x3xbf16>
    %c22 = arith.constant 22 : index
    %c0_100 = arith.constant 0 : index
    %c0_101 = arith.constant 0 : index
    %119 = vector.load %arg3[%c22, %c0_100, %c0_101] : memref<49x3x128xbf16, #tpu.memory_space<vmem>>, vector<1x3x128xbf16>
    %120 = vector.shape_cast %119 : vector<1x3x128xbf16> to vector<3x128xbf16>
    %cst_102 = arith.constant dense<0.000000e+00> : vector<256x128xf32>
    %121 = tpu.matmul %118, %120, %cst_102 {dimension_numbers = #tpu.dot_dimension_numbers<[1], [0], [0], [1], [0, 0, 1, 1], [], []>} : vector<256x3xbf16>, vector<3x128xbf16>, vector<256x128xf32> -> vector<256x128xf32>
    %122 = arith.addf %117, %121 : vector<256x128xf32>
    %c212 = arith.constant 212 : index
    %c0_103 = arith.constant 0 : index
    %123 = vector.load %arg6[%c212, %c0_103] : memref<688x3xbf16, #tpu.memory_space<vmem>>, vector<256x3xbf16>
    %c23 = arith.constant 23 : index
    %c0_104 = arith.constant 0 : index
    %c0_105 = arith.constant 0 : index
    %124 = vector.load %arg3[%c23, %c0_104, %c0_105] : memref<49x3x128xbf16, #tpu.memory_space<vmem>>, vector<1x3x128xbf16>
    %125 = vector.shape_cast %124 : vector<1x3x128xbf16> to vector<3x128xbf16>
    %cst_106 = arith.constant dense<0.000000e+00> : vector<256x128xf32>
    %126 = tpu.matmul %123, %125, %cst_106 {dimension_numbers = #tpu.dot_dimension_numbers<[1], [0], [0], [1], [0, 0, 1, 1], [], []>} : vector<256x3xbf16>, vector<3x128xbf16>, vector<256x128xf32> -> vector<256x128xf32>
    %127 = arith.addf %122, %126 : vector<256x128xf32>
    %c213 = arith.constant 213 : index
    %c0_107 = arith.constant 0 : index
    %128 = vector.load %arg6[%c213, %c0_107] : memref<688x3xbf16, #tpu.memory_space<vmem>>, vector<256x3xbf16>
    %c24 = arith.constant 24 : index
    %c0_108 = arith.constant 0 : index
    %c0_109 = arith.constant 0 : index
    %129 = vector.load %arg3[%c24, %c0_108, %c0_109] : memref<49x3x128xbf16, #tpu.memory_space<vmem>>, vector<1x3x128xbf16>
    %130 = vector.shape_cast %129 : vector<1x3x128xbf16> to vector<3x128xbf16>
    %cst_110 = arith.constant dense<0.000000e+00> : vector<256x128xf32>
    %131 = tpu.matmul %128, %130, %cst_110 {dimension_numbers = #tpu.dot_dimension_numbers<[1], [0], [0], [1], [0, 0, 1, 1], [], []>} : vector<256x3xbf16>, vector<3x128xbf16>, vector<256x128xf32> -> vector<256x128xf32>
    %132 = arith.addf %127, %131 : vector<256x128xf32>
    %c214 = arith.constant 214 : index
    %c0_111 = arith.constant 0 : index
    %133 = vector.load %arg6[%c214, %c0_111] : memref<688x3xbf16, #tpu.memory_space<vmem>>, vector<256x3xbf16>
    %c25 = arith.constant 25 : index
    %c0_112 = arith.constant 0 : index
    %c0_113 = arith.constant 0 : index
    %134 = vector.load %arg3[%c25, %c0_112, %c0_113] : memref<49x3x128xbf16, #tpu.memory_space<vmem>>, vector<1x3x128xbf16>
    %135 = vector.shape_cast %134 : vector<1x3x128xbf16> to vector<3x128xbf16>
    %cst_114 = arith.constant dense<0.000000e+00> : vector<256x128xf32>
    %136 = tpu.matmul %133, %135, %cst_114 {dimension_numbers = #tpu.dot_dimension_numbers<[1], [0], [0], [1], [0, 0, 1, 1], [], []>} : vector<256x3xbf16>, vector<3x128xbf16>, vector<256x128xf32> -> vector<256x128xf32>
    %137 = arith.addf %132, %136 : vector<256x128xf32>
    %c215 = arith.constant 215 : index
    %c0_115 = arith.constant 0 : index
    %138 = vector.load %arg6[%c215, %c0_115] : memref<688x3xbf16, #tpu.memory_space<vmem>>, vector<256x3xbf16>
    %c26 = arith.constant 26 : index
    %c0_116 = arith.constant 0 : index
    %c0_117 = arith.constant 0 : index
    %139 = vector.load %arg3[%c26, %c0_116, %c0_117] : memref<49x3x128xbf16, #tpu.memory_space<vmem>>, vector<1x3x128xbf16>
    %140 = vector.shape_cast %139 : vector<1x3x128xbf16> to vector<3x128xbf16>
    %cst_118 = arith.constant dense<0.000000e+00> : vector<256x128xf32>
    %141 = tpu.matmul %138, %140, %cst_118 {dimension_numbers = #tpu.dot_dimension_numbers<[1], [0], [0], [1], [0, 0, 1, 1], [], []>} : vector<256x3xbf16>, vector<3x128xbf16>, vector<256x128xf32> -> vector<256x128xf32>
    %142 = arith.addf %137, %141 : vector<256x128xf32>
    %c216 = arith.constant 216 : index
    %c0_119 = arith.constant 0 : index
    %143 = vector.load %arg6[%c216, %c0_119] : memref<688x3xbf16, #tpu.memory_space<vmem>>, vector<256x3xbf16>
    %c27 = arith.constant 27 : index
    %c0_120 = arith.constant 0 : index
    %c0_121 = arith.constant 0 : index
    %144 = vector.load %arg3[%c27, %c0_120, %c0_121] : memref<49x3x128xbf16, #tpu.memory_space<vmem>>, vector<1x3x128xbf16>
    %145 = vector.shape_cast %144 : vector<1x3x128xbf16> to vector<3x128xbf16>
    %cst_122 = arith.constant dense<0.000000e+00> : vector<256x128xf32>
    %146 = tpu.matmul %143, %145, %cst_122 {dimension_numbers = #tpu.dot_dimension_numbers<[1], [0], [0], [1], [0, 0, 1, 1], [], []>} : vector<256x3xbf16>, vector<3x128xbf16>, vector<256x128xf32> -> vector<256x128xf32>
    %147 = arith.addf %142, %146 : vector<256x128xf32>
    %c280 = arith.constant 280 : index
    %c0_123 = arith.constant 0 : index
    %148 = vector.load %arg6[%c280, %c0_123] : memref<688x3xbf16, #tpu.memory_space<vmem>>, vector<256x3xbf16>
    %c28 = arith.constant 28 : index
    %c0_124 = arith.constant 0 : index
    %c0_125 = arith.constant 0 : index
    %149 = vector.load %arg3[%c28, %c0_124, %c0_125] : memref<49x3x128xbf16, #tpu.memory_space<vmem>>, vector<1x3x128xbf16>
    %150 = vector.shape_cast %149 : vector<1x3x128xbf16> to vector<3x128xbf16>
    %cst_126 = arith.constant dense<0.000000e+00> : vector<256x128xf32>
    %151 = tpu.matmul %148, %150, %cst_126 {dimension_numbers = #tpu.dot_dimension_numbers<[1], [0], [0], [1], [0, 0, 1, 1], [], []>} : vector<256x3xbf16>, vector<3x128xbf16>, vector<256x128xf32> -> vector<256x128xf32>
    %152 = arith.addf %147, %151 : vector<256x128xf32>
    %c281 = arith.constant 281 : index
    %c0_127 = arith.constant 0 : index
    %153 = vector.load %arg6[%c281, %c0_127] : memref<688x3xbf16, #tpu.memory_space<vmem>>, vector<256x3xbf16>
    %c29 = arith.constant 29 : index
    %c0_128 = arith.constant 0 : index
    %c0_129 = arith.constant 0 : index
    %154 = vector.load %arg3[%c29, %c0_128, %c0_129] : memref<49x3x128xbf16, #tpu.memory_space<vmem>>, vector<1x3x128xbf16>
    %155 = vector.shape_cast %154 : vector<1x3x128xbf16> to vector<3x128xbf16>
    %cst_130 = arith.constant dense<0.000000e+00> : vector<256x128xf32>
    %156 = tpu.matmul %153, %155, %cst_130 {dimension_numbers = #tpu.dot_dimension_numbers<[1], [0], [0], [1], [0, 0, 1, 1], [], []>} : vector<256x3xbf16>, vector<3x128xbf16>, vector<256x128xf32> -> vector<256x128xf32>
    %157 = arith.addf %152, %156 : vector<256x128xf32>
    %c282 = arith.constant 282 : index
    %c0_131 = arith.constant 0 : index
    %158 = vector.load %arg6[%c282, %c0_131] : memref<688x3xbf16, #tpu.memory_space<vmem>>, vector<256x3xbf16>
    %c30 = arith.constant 30 : index
    %c0_132 = arith.constant 0 : index
    %c0_133 = arith.constant 0 : index
    %159 = vector.load %arg3[%c30, %c0_132, %c0_133] : memref<49x3x128xbf16, #tpu.memory_space<vmem>>, vector<1x3x128xbf16>
    %160 = vector.shape_cast %159 : vector<1x3x128xbf16> to vector<3x128xbf16>
    %cst_134 = arith.constant dense<0.000000e+00> : vector<256x128xf32>
    %161 = tpu.matmul %158, %160, %cst_134 {dimension_numbers = #tpu.dot_dimension_numbers<[1], [0], [0], [1], [0, 0, 1, 1], [], []>} : vector<256x3xbf16>, vector<3x128xbf16>, vector<256x128xf32> -> vector<256x128xf32>
    %162 = arith.addf %157, %161 : vector<256x128xf32>
    %c283 = arith.constant 283 : index
    %c0_135 = arith.constant 0 : index
    %163 = vector.load %arg6[%c283, %c0_135] : memref<688x3xbf16, #tpu.memory_space<vmem>>, vector<256x3xbf16>
    %c31 = arith.constant 31 : index
    %c0_136 = arith.constant 0 : index
    %c0_137 = arith.constant 0 : index
    %164 = vector.load %arg3[%c31, %c0_136, %c0_137] : memref<49x3x128xbf16, #tpu.memory_space<vmem>>, vector<1x3x128xbf16>
    %165 = vector.shape_cast %164 : vector<1x3x128xbf16> to vector<3x128xbf16>
    %cst_138 = arith.constant dense<0.000000e+00> : vector<256x128xf32>
    %166 = tpu.matmul %163, %165, %cst_138 {dimension_numbers = #tpu.dot_dimension_numbers<[1], [0], [0], [1], [0, 0, 1, 1], [], []>} : vector<256x3xbf16>, vector<3x128xbf16>, vector<256x128xf32> -> vector<256x128xf32>
    %167 = arith.addf %162, %166 : vector<256x128xf32>
    %c284 = arith.constant 284 : index
    %c0_139 = arith.constant 0 : index
    %168 = vector.load %arg6[%c284, %c0_139] : memref<688x3xbf16, #tpu.memory_space<vmem>>, vector<256x3xbf16>
    %c32 = arith.constant 32 : index
    %c0_140 = arith.constant 0 : index
    %c0_141 = arith.constant 0 : index
    %169 = vector.load %arg3[%c32, %c0_140, %c0_141] : memref<49x3x128xbf16, #tpu.memory_space<vmem>>, vector<1x3x128xbf16>
    %170 = vector.shape_cast %169 : vector<1x3x128xbf16> to vector<3x128xbf16>
    %cst_142 = arith.constant dense<0.000000e+00> : vector<256x128xf32>
    %171 = tpu.matmul %168, %170, %cst_142 {dimension_numbers = #tpu.dot_dimension_numbers<[1], [0], [0], [1], [0, 0, 1, 1], [], []>} : vector<256x3xbf16>, vector<3x128xbf16>, vector<256x128xf32> -> vector<256x128xf32>
    %172 = arith.addf %167, %171 : vector<256x128xf32>
    %c285 = arith.constant 285 : index
    %c0_143 = arith.constant 0 : index
    %173 = vector.load %arg6[%c285, %c0_143] : memref<688x3xbf16, #tpu.memory_space<vmem>>, vector<256x3xbf16>
    %c33 = arith.constant 33 : index
    %c0_144 = arith.constant 0 : index
    %c0_145 = arith.constant 0 : index
    %174 = vector.load %arg3[%c33, %c0_144, %c0_145] : memref<49x3x128xbf16, #tpu.memory_space<vmem>>, vector<1x3x128xbf16>
    %175 = vector.shape_cast %174 : vector<1x3x128xbf16> to vector<3x128xbf16>
    %cst_146 = arith.constant dense<0.000000e+00> : vector<256x128xf32>
    %176 = tpu.matmul %173, %175, %cst_146 {dimension_numbers = #tpu.dot_dimension_numbers<[1], [0], [0], [1], [0, 0, 1, 1], [], []>} : vector<256x3xbf16>, vector<3x128xbf16>, vector<256x128xf32> -> vector<256x128xf32>
    %177 = arith.addf %172, %176 : vector<256x128xf32>
    %c286 = arith.constant 286 : index
    %c0_147 = arith.constant 0 : index
    %178 = vector.load %arg6[%c286, %c0_147] : memref<688x3xbf16, #tpu.memory_space<vmem>>, vector<256x3xbf16>
    %c34 = arith.constant 34 : index
    %c0_148 = arith.constant 0 : index
    %c0_149 = arith.constant 0 : index
    %179 = vector.load %arg3[%c34, %c0_148, %c0_149] : memref<49x3x128xbf16, #tpu.memory_space<vmem>>, vector<1x3x128xbf16>
    %180 = vector.shape_cast %179 : vector<1x3x128xbf16> to vector<3x128xbf16>
    %cst_150 = arith.constant dense<0.000000e+00> : vector<256x128xf32>
    %181 = tpu.matmul %178, %180, %cst_150 {dimension_numbers = #tpu.dot_dimension_numbers<[1], [0], [0], [1], [0, 0, 1, 1], [], []>} : vector<256x3xbf16>, vector<3x128xbf16>, vector<256x128xf32> -> vector<256x128xf32>
    %182 = arith.addf %177, %181 : vector<256x128xf32>
    %c350 = arith.constant 350 : index
    %c0_151 = arith.constant 0 : index
    %183 = vector.load %arg6[%c350, %c0_151] : memref<688x3xbf16, #tpu.memory_space<vmem>>, vector<256x3xbf16>
    %c35 = arith.constant 35 : index
    %c0_152 = arith.constant 0 : index
    %c0_153 = arith.constant 0 : index
    %184 = vector.load %arg3[%c35, %c0_152, %c0_153] : memref<49x3x128xbf16, #tpu.memory_space<vmem>>, vector<1x3x128xbf16>
    %185 = vector.shape_cast %184 : vector<1x3x128xbf16> to vector<3x128xbf16>
    %cst_154 = arith.constant dense<0.000000e+00> : vector<256x128xf32>
    %186 = tpu.matmul %183, %185, %cst_154 {dimension_numbers = #tpu.dot_dimension_numbers<[1], [0], [0], [1], [0, 0, 1, 1], [], []>} : vector<256x3xbf16>, vector<3x128xbf16>, vector<256x128xf32> -> vector<256x128xf32>
    %187 = arith.addf %182, %186 : vector<256x128xf32>
    %c351 = arith.constant 351 : index
    %c0_155 = arith.constant 0 : index
    %188 = vector.load %arg6[%c351, %c0_155] : memref<688x3xbf16, #tpu.memory_space<vmem>>, vector<256x3xbf16>
    %c36 = arith.constant 36 : index
    %c0_156 = arith.constant 0 : index
    %c0_157 = arith.constant 0 : index
    %189 = vector.load %arg3[%c36, %c0_156, %c0_157] : memref<49x3x128xbf16, #tpu.memory_space<vmem>>, vector<1x3x128xbf16>
    %190 = vector.shape_cast %189 : vector<1x3x128xbf16> to vector<3x128xbf16>
    %cst_158 = arith.constant dense<0.000000e+00> : vector<256x128xf32>
    %191 = tpu.matmul %188, %190, %cst_158 {dimension_numbers = #tpu.dot_dimension_numbers<[1], [0], [0], [1], [0, 0, 1, 1], [], []>} : vector<256x3xbf16>, vector<3x128xbf16>, vector<256x128xf32> -> vector<256x128xf32>
    %192 = arith.addf %187, %191 : vector<256x128xf32>
    %c352 = arith.constant 352 : index
    %c0_159 = arith.constant 0 : index
    %193 = vector.load %arg6[%c352, %c0_159] : memref<688x3xbf16, #tpu.memory_space<vmem>>, vector<256x3xbf16>
    %c37 = arith.constant 37 : index
    %c0_160 = arith.constant 0 : index
    %c0_161 = arith.constant 0 : index
    %194 = vector.load %arg3[%c37, %c0_160, %c0_161] : memref<49x3x128xbf16, #tpu.memory_space<vmem>>, vector<1x3x128xbf16>
    %195 = vector.shape_cast %194 : vector<1x3x128xbf16> to vector<3x128xbf16>
    %cst_162 = arith.constant dense<0.000000e+00> : vector<256x128xf32>
    %196 = tpu.matmul %193, %195, %cst_162 {dimension_numbers = #tpu.dot_dimension_numbers<[1], [0], [0], [1], [0, 0, 1, 1], [], []>} : vector<256x3xbf16>, vector<3x128xbf16>, vector<256x128xf32> -> vector<256x128xf32>
    %197 = arith.addf %192, %196 : vector<256x128xf32>
    %c353 = arith.constant 353 : index
    %c0_163 = arith.constant 0 : index
    %198 = vector.load %arg6[%c353, %c0_163] : memref<688x3xbf16, #tpu.memory_space<vmem>>, vector<256x3xbf16>
    %c38 = arith.constant 38 : index
    %c0_164 = arith.constant 0 : index
    %c0_165 = arith.constant 0 : index
    %199 = vector.load %arg3[%c38, %c0_164, %c0_165] : memref<49x3x128xbf16, #tpu.memory_space<vmem>>, vector<1x3x128xbf16>
    %200 = vector.shape_cast %199 : vector<1x3x128xbf16> to vector<3x128xbf16>
    %cst_166 = arith.constant dense<0.000000e+00> : vector<256x128xf32>
    %201 = tpu.matmul %198, %200, %cst_166 {dimension_numbers = #tpu.dot_dimension_numbers<[1], [0], [0], [1], [0, 0, 1, 1], [], []>} : vector<256x3xbf16>, vector<3x128xbf16>, vector<256x128xf32> -> vector<256x128xf32>
    %202 = arith.addf %197, %201 : vector<256x128xf32>
    %c354 = arith.constant 354 : index
    %c0_167 = arith.constant 0 : index
    %203 = vector.load %arg6[%c354, %c0_167] : memref<688x3xbf16, #tpu.memory_space<vmem>>, vector<256x3xbf16>
    %c39 = arith.constant 39 : index
    %c0_168 = arith.constant 0 : index
    %c0_169 = arith.constant 0 : index
    %204 = vector.load %arg3[%c39, %c0_168, %c0_169] : memref<49x3x128xbf16, #tpu.memory_space<vmem>>, vector<1x3x128xbf16>
    %205 = vector.shape_cast %204 : vector<1x3x128xbf16> to vector<3x128xbf16>
    %cst_170 = arith.constant dense<0.000000e+00> : vector<256x128xf32>
    %206 = tpu.matmul %203, %205, %cst_170 {dimension_numbers = #tpu.dot_dimension_numbers<[1], [0], [0], [1], [0, 0, 1, 1], [], []>} : vector<256x3xbf16>, vector<3x128xbf16>, vector<256x128xf32> -> vector<256x128xf32>
    %207 = arith.addf %202, %206 : vector<256x128xf32>
    %c355 = arith.constant 355 : index
    %c0_171 = arith.constant 0 : index
    %208 = vector.load %arg6[%c355, %c0_171] : memref<688x3xbf16, #tpu.memory_space<vmem>>, vector<256x3xbf16>
    %c40 = arith.constant 40 : index
    %c0_172 = arith.constant 0 : index
    %c0_173 = arith.constant 0 : index
    %209 = vector.load %arg3[%c40, %c0_172, %c0_173] : memref<49x3x128xbf16, #tpu.memory_space<vmem>>, vector<1x3x128xbf16>
    %210 = vector.shape_cast %209 : vector<1x3x128xbf16> to vector<3x128xbf16>
    %cst_174 = arith.constant dense<0.000000e+00> : vector<256x128xf32>
    %211 = tpu.matmul %208, %210, %cst_174 {dimension_numbers = #tpu.dot_dimension_numbers<[1], [0], [0], [1], [0, 0, 1, 1], [], []>} : vector<256x3xbf16>, vector<3x128xbf16>, vector<256x128xf32> -> vector<256x128xf32>
    %212 = arith.addf %207, %211 : vector<256x128xf32>
    %c356 = arith.constant 356 : index
    %c0_175 = arith.constant 0 : index
    %213 = vector.load %arg6[%c356, %c0_175] : memref<688x3xbf16, #tpu.memory_space<vmem>>, vector<256x3xbf16>
    %c41 = arith.constant 41 : index
    %c0_176 = arith.constant 0 : index
    %c0_177 = arith.constant 0 : index
    %214 = vector.load %arg3[%c41, %c0_176, %c0_177] : memref<49x3x128xbf16, #tpu.memory_space<vmem>>, vector<1x3x128xbf16>
    %215 = vector.shape_cast %214 : vector<1x3x128xbf16> to vector<3x128xbf16>
    %cst_178 = arith.constant dense<0.000000e+00> : vector<256x128xf32>
    %216 = tpu.matmul %213, %215, %cst_178 {dimension_numbers = #tpu.dot_dimension_numbers<[1], [0], [0], [1], [0, 0, 1, 1], [], []>} : vector<256x3xbf16>, vector<3x128xbf16>, vector<256x128xf32> -> vector<256x128xf32>
    %217 = arith.addf %212, %216 : vector<256x128xf32>
    %c420 = arith.constant 420 : index
    %c0_179 = arith.constant 0 : index
    %218 = vector.load %arg6[%c420, %c0_179] : memref<688x3xbf16, #tpu.memory_space<vmem>>, vector<256x3xbf16>
    %c42 = arith.constant 42 : index
    %c0_180 = arith.constant 0 : index
    %c0_181 = arith.constant 0 : index
    %219 = vector.load %arg3[%c42, %c0_180, %c0_181] : memref<49x3x128xbf16, #tpu.memory_space<vmem>>, vector<1x3x128xbf16>
    %220 = vector.shape_cast %219 : vector<1x3x128xbf16> to vector<3x128xbf16>
    %cst_182 = arith.constant dense<0.000000e+00> : vector<256x128xf32>
    %221 = tpu.matmul %218, %220, %cst_182 {dimension_numbers = #tpu.dot_dimension_numbers<[1], [0], [0], [1], [0, 0, 1, 1], [], []>} : vector<256x3xbf16>, vector<3x128xbf16>, vector<256x128xf32> -> vector<256x128xf32>
    %222 = arith.addf %217, %221 : vector<256x128xf32>
    %c421 = arith.constant 421 : index
    %c0_183 = arith.constant 0 : index
    %223 = vector.load %arg6[%c421, %c0_183] : memref<688x3xbf16, #tpu.memory_space<vmem>>, vector<256x3xbf16>
    %c43 = arith.constant 43 : index
    %c0_184 = arith.constant 0 : index
    %c0_185 = arith.constant 0 : index
    %224 = vector.load %arg3[%c43, %c0_184, %c0_185] : memref<49x3x128xbf16, #tpu.memory_space<vmem>>, vector<1x3x128xbf16>
    %225 = vector.shape_cast %224 : vector<1x3x128xbf16> to vector<3x128xbf16>
    %cst_186 = arith.constant dense<0.000000e+00> : vector<256x128xf32>
    %226 = tpu.matmul %223, %225, %cst_186 {dimension_numbers = #tpu.dot_dimension_numbers<[1], [0], [0], [1], [0, 0, 1, 1], [], []>} : vector<256x3xbf16>, vector<3x128xbf16>, vector<256x128xf32> -> vector<256x128xf32>
    %227 = arith.addf %222, %226 : vector<256x128xf32>
    %c422 = arith.constant 422 : index
    %c0_187 = arith.constant 0 : index
    %228 = vector.load %arg6[%c422, %c0_187] : memref<688x3xbf16, #tpu.memory_space<vmem>>, vector<256x3xbf16>
    %c44 = arith.constant 44 : index
    %c0_188 = arith.constant 0 : index
    %c0_189 = arith.constant 0 : index
    %229 = vector.load %arg3[%c44, %c0_188, %c0_189] : memref<49x3x128xbf16, #tpu.memory_space<vmem>>, vector<1x3x128xbf16>
    %230 = vector.shape_cast %229 : vector<1x3x128xbf16> to vector<3x128xbf16>
    %cst_190 = arith.constant dense<0.000000e+00> : vector<256x128xf32>
    %231 = tpu.matmul %228, %230, %cst_190 {dimension_numbers = #tpu.dot_dimension_numbers<[1], [0], [0], [1], [0, 0, 1, 1], [], []>} : vector<256x3xbf16>, vector<3x128xbf16>, vector<256x128xf32> -> vector<256x128xf32>
    %232 = arith.addf %227, %231 : vector<256x128xf32>
    %c423 = arith.constant 423 : index
    %c0_191 = arith.constant 0 : index
    %233 = vector.load %arg6[%c423, %c0_191] : memref<688x3xbf16, #tpu.memory_space<vmem>>, vector<256x3xbf16>
    %c45 = arith.constant 45 : index
    %c0_192 = arith.constant 0 : index
    %c0_193 = arith.constant 0 : index
    %234 = vector.load %arg3[%c45, %c0_192, %c0_193] : memref<49x3x128xbf16, #tpu.memory_space<vmem>>, vector<1x3x128xbf16>
    %235 = vector.shape_cast %234 : vector<1x3x128xbf16> to vector<3x128xbf16>
    %cst_194 = arith.constant dense<0.000000e+00> : vector<256x128xf32>
    %236 = tpu.matmul %233, %235, %cst_194 {dimension_numbers = #tpu.dot_dimension_numbers<[1], [0], [0], [1], [0, 0, 1, 1], [], []>} : vector<256x3xbf16>, vector<3x128xbf16>, vector<256x128xf32> -> vector<256x128xf32>
    %237 = arith.addf %232, %236 : vector<256x128xf32>
    %c424 = arith.constant 424 : index
    %c0_195 = arith.constant 0 : index
    %238 = vector.load %arg6[%c424, %c0_195] : memref<688x3xbf16, #tpu.memory_space<vmem>>, vector<256x3xbf16>
    %c46 = arith.constant 46 : index
    %c0_196 = arith.constant 0 : index
    %c0_197 = arith.constant 0 : index
    %239 = vector.load %arg3[%c46, %c0_196, %c0_197] : memref<49x3x128xbf16, #tpu.memory_space<vmem>>, vector<1x3x128xbf16>
    %240 = vector.shape_cast %239 : vector<1x3x128xbf16> to vector<3x128xbf16>
    %cst_198 = arith.constant dense<0.000000e+00> : vector<256x128xf32>
    %241 = tpu.matmul %238, %240, %cst_198 {dimension_numbers = #tpu.dot_dimension_numbers<[1], [0], [0], [1], [0, 0, 1, 1], [], []>} : vector<256x3xbf16>, vector<3x128xbf16>, vector<256x128xf32> -> vector<256x128xf32>
    %242 = arith.addf %237, %241 : vector<256x128xf32>
    %c425 = arith.constant 425 : index
    %c0_199 = arith.constant 0 : index
    %243 = vector.load %arg6[%c425, %c0_199] : memref<688x3xbf16, #tpu.memory_space<vmem>>, vector<256x3xbf16>
    %c47 = arith.constant 47 : index
    %c0_200 = arith.constant 0 : index
    %c0_201 = arith.constant 0 : index
    %244 = vector.load %arg3[%c47, %c0_200, %c0_201] : memref<49x3x128xbf16, #tpu.memory_space<vmem>>, vector<1x3x128xbf16>
    %245 = vector.shape_cast %244 : vector<1x3x128xbf16> to vector<3x128xbf16>
    %cst_202 = arith.constant dense<0.000000e+00> : vector<256x128xf32>
    %246 = tpu.matmul %243, %245, %cst_202 {dimension_numbers = #tpu.dot_dimension_numbers<[1], [0], [0], [1], [0, 0, 1, 1], [], []>} : vector<256x3xbf16>, vector<3x128xbf16>, vector<256x128xf32> -> vector<256x128xf32>
    %247 = arith.addf %242, %246 : vector<256x128xf32>
    %c426 = arith.constant 426 : index
    %c0_203 = arith.constant 0 : index
    %248 = vector.load %arg6[%c426, %c0_203] : memref<688x3xbf16, #tpu.memory_space<vmem>>, vector<256x3xbf16>
    %c48 = arith.constant 48 : index
    %c0_204 = arith.constant 0 : index
    %c0_205 = arith.constant 0 : index
    %249 = vector.load %arg3[%c48, %c0_204, %c0_205] : memref<49x3x128xbf16, #tpu.memory_space<vmem>>, vector<1x3x128xbf16>
    %250 = vector.shape_cast %249 : vector<1x3x128xbf16> to vector<3x128xbf16>
    %cst_206 = arith.constant dense<0.000000e+00> : vector<256x128xf32>
    %251 = tpu.matmul %248, %250, %cst_206 {dimension_numbers = #tpu.dot_dimension_numbers<[1], [0], [0], [1], [0, 0, 1, 1], [], []>} : vector<256x3xbf16>, vector<3x128xbf16>, vector<256x128xf32> -> vector<256x128xf32>
    %252 = arith.addf %247, %251 : vector<256x128xf32>
    %c0_207 = arith.constant 0 : index
    %c0_208 = arith.constant 0 : index
    %253 = vector.load %arg4[%c0_207, %c0_208] : memref<1x128xf32, #tpu.memory_space<vmem>>, vector<1x128xf32>
    %254 = vector.broadcast %253 : vector<1x128xf32> to vector<256x128xf32>
    %255 = arith.addf %252, %254 : vector<256x128xf32>
    %cst_209 = arith.constant 0.000000e+00 : f32
    %256 = vector.broadcast %cst_209 : f32 to vector<256x128xf32>
    %257 = arith.cmpf oge, %255, %256 : vector<256x128xf32>
    %cst_210 = arith.constant 1.000000e-01 : f32
    %258 = vector.broadcast %cst_210 : f32 to vector<256x128xf32>
    %259 = arith.mulf %258, %255 : vector<256x128xf32>
    %260 = arith.select %257, %255, %259 : vector<256x128xi1>, vector<256x128xf32>
    %c0_211 = arith.constant 0 : index
    %c0_212 = arith.constant 0 : index
    %c0_213 = arith.constant 0 : index
    %261 = vector.load %arg5[%c0_211, %c0_212, %c0_213] : memref<1x256x128xf32, #tpu.memory_space<vmem>>, vector<1x256x128xf32>
    %262 = vector.shape_cast %261 : vector<1x256x128xf32> to vector<256x128xf32>
    %263 = vector.shape_cast %260 : vector<256x128xf32> to vector<1x256x128xf32>
    tpu.vector_store %arg5[%c0_211, %c0_212, %c0_213], %263 {strides = array<i32>} : memref<1x256x128xf32, #tpu.memory_space<vmem>>, vector<1x256x128xf32>,
    return
  }
  func.func @transform_0(%arg0: i32, %arg1: i32) -> (i32, i32, i32) {
    %c0_i32 = arith.constant 0 : i32
    %c0_i32_0 = arith.constant 0 : i32
    %c0_i32_1 = arith.constant 0 : i32
    return %arg0, %c0_i32, %c0_i32_0 : i32, i32, i32
  }
  func.func @transform_1(%arg0: i32, %arg1: i32) -> (i32, i32, i32) {
    %c0_i32 = arith.constant 0 : i32
    %c0_i32_0 = arith.constant 0 : i32
    %c0_i32_1 = arith.constant 0 : i32
    %c0_i32_2 = arith.constant 0 : i32
    return %c0_i32, %c0_i32_0, %c0_i32_1 : i32, i32, i32
  }
  func.func @transform_2(%arg0: i32, %arg1: i32) -> (i32, i32) {
    %c0_i32 = arith.constant 0 : i32
    %c0_i32_0 = arith.constant 0 : i32
    %c0_i32_1 = arith.constant 0 : i32
    return %c0_i32, %c0_i32_0 : i32, i32
  }
  func.func @transform_3(%arg0: i32, %arg1: i32) -> (i32, i32, i32) {
    %c0_i32 = arith.constant 0 : i32
    %c0_i32_0 = arith.constant 0 : i32
    return %arg0, %arg1, %c0_i32 : i32, i32, i32
  }
}

</mosaic_0001>

<bundles_post_ra>
// kernel: tpu_custom_call.1
= control target key start
LH: loop header
LB: loop body
LE: loop exit
PB: predicated region body
PF: predicated region fallthrough
CT: control target
= control target key end

     0   :  { %8 = vsyncpa [#allocation4], 0  ;;  %s25748_s0 = inlined_call_operand.vmem [shape: f32[2,5040,3], index: 0, kind: input, shape index: {}]   ;;  %s25749_s1 = inlined_call_operand.vmem [shape: bf16[49,3,128], index: 1, kind: input, shape index: {}]   ;;  %s25750_s2 = inlined_call_operand.vmem [shape: f32[1,128], index: 2, kind: input, shape index: {}]   ;;  %s25751_s3 = inlined_call_operand.hbm [shape: f32[2,4608,128], index: 3, kind: output, shape index: {}]  }
   0x1   :  { %10 = vsyncpa [#allocation4 + $0x1], 0  ;;  %s21167_s12 = smov 0   ;;  %s21169_s13 = smov 0  }
   0x2   :  { %s21171_s14 = smov 0   ;;  %s21173_s15 = smov 0  }
   0x3   :  { %s21175_s16 = smov 0   ;;  %s21177_s17 = smov 0  }
   0x4   :  { %s21179_s18 = smov 0   ;;  %s21181_s19 = smov 0  }
   0x5 LB: > { %s15973_s20 = sadd.s32 4294967295, %s21141_s19   ;;  %s15974_s21 = sadd.s32 4294967294, %s21141_s19   ;;  %s21141_s19 = sphi %s21181_s19, %s16_s19   ;;  %s21137_s18 = sphi %s21179_s18, %s26584_s18   ;;  %s21133_s17 = sphi %s21177_s17, %s26583_s17   ;;  %s21129_s16 = sphi %s21175_s16, %s26582_s16   ;;  %s21125_s15 = sphi %s21173_s15, %s26581_s15   ;;  %s21121_s14 = sphi %s21171_s14, %s26580_s14   ;;  %s21117_s13 = sphi %s21169_s13, %s26579_s13   ;;  %s21113_s12 = sphi %s21167_s12, %s26578_s12  }
   0x6   : > { %s25_s22 = sadd.s32 1, %s21133_s17  ;;  %s28_s23 = sadd.s32 1, %s21137_s18 }
   0x7   : > { %p26_p0 = scmp.ge.s32.totalorder %s25_s22, 18  ;;  %p115_p1 = scmp.ne.s32.totalorder %s21121_s14, %s21117_s13 }
   0x8   : > { %p116_p2 = scmp.eq.s32.totalorder %s15973_s20, 35  ;;  %p121_p5 = scmp.ne.s32.totalorder %s21117_s13, %s21113_s12 }
   0x9   : > { %s26586_s22 = smov (%p26_p0, %s25_s22), 0  ;;  %s26588_s23 = smov (!%p26_p0, %s28_s23), %s21137_s18 }
   0xa   : > { %s101_s24 = ssub.s32 %s21133_s17, %s26586_s22  ;;  %p21218_p3 = por %p116_p2, %p115_p1 }
   0xb   : > { %p30_p4 = scmp.ge.s32.totalorder %s26588_s23, 2  ;;  %p122_p6 = scmp.eq.s32.totalorder %s15974_s21, 35 }
   0xc   : > { %p15977_p7 = scmp.ge.s32.totalorder %s21141_s19, 1  ;;  %p154_p9 = scmp.lt.s32.totalorder %s21141_s19, 37 }
   0xd   : > { %s26590_s23 = smov (%p30_p4, %s26588_s23), 0  ;;  %p21227_p8 = por %p122_p6, %p121_p5 }
   0xe   : > { %s100_s27 = ssub.s32 %s21137_s18, %s26590_s23  ;;  %s105_s28 = sadd.s32 1, %s21121_s14 }
   0xf   : > { %s102_s29 = sor.u32 %s101_s24, %s100_s27  ;;  %p155_p10 = pnand %p15977_p7, %p154_p9 }
  0x10   : > { %p103_p11 = scmp.eq.s32.totalorder %s102_s29, 0 }
  0x11   : > { %158 = sbr.rel (%p155_p10) target bundleno = 1855 (0x73f), region = 32 }
  0x12   : > { %s21236_s30 = scalar_select %p103_p11, %s21121_s14, %s105_s28  }
  0x18   : > { %v15981_v0 = vld [vmem:[%s25749_s1 + $0x2] sm:$0x3]  ;;  %vm561_vm0 = vcmask 1040384   ;;  %vm562_vm1 = vcmask 1041408   ;;  %p178_p12 = scmp.lt.s32.totalorder %s21129_s16, 1  ;;  %v21143_v1 = vmov 65535  }
  0x19   : > { %v563_v2 = vsel %vm561_vm0, 4294967295, %v21143_v1  ;;  %v16388_v3 = vld [vmem:[%s25749_s1 + $0x30] sm:$0x3]  ;;  %v376_v5 = vld [vmem:[%s25749_s1] sm:$0x3]  ;;  %s15980_s24 = sshll.u32 %s21125_s15, 8 }
  0x1a   : > { %v21247_v4 = vsel %vm562_vm1, %v563_v2, 0  ;;  %s179_s8 = scalar_select %p178_p12, %s21129_s16, 1  ;;  %v16405_v9 = vld [vmem:[%s25749_s1 + $0x32] sm:$0x3]  ;;  %vm316_vm2 = vcmask 23552   ;;  %vm2161_vm5 = vcmask 1044480  }
  0x1b   : > { %v566_v6 = vand.u32 %v15981_v0, %v21247_v4  ;;  %v21255_v7 = vand.u32 %v16388_v3, %v21247_v4  ;;  %v21258_v8 = vand.u32 %v21247_v4, %v376_v5  ;;  %v21265_v10 = vand.u32 %v16405_v9, %v21247_v4  ;;  %v16422_v36 = vld [vmem:[%s25749_s1 + $0x34] sm:$0x3]  ;;  %v16014_v42 = vld [vmem:[%s25749_s1 + $0x4] sm:$0x3]  ;;  %s175_s27 = sand.u32 1, %s21117_s13   ;;  %s20857_s7 = smul.u32 576, %s21129_s16 }
  0x1c   : > { %s20856_s21 = smul.u32 5040, %s179_s8  ;;  %vm380_vm3 = vsmask.f32 7424  ;;  %vm1834_vm4 = vsmask.f32 5376  ;;  %v21329_v61 = vand.u32 %v16422_v36, %v21247_v4  ;;  %v21338_v5 = vand.u32 %v16014_v42, %v21247_v4  ;;  %s15978_s5 = sshll.u32 %s175_s27, 8 }
  0x1d   : > { %26099 = vst [vmem:[#allocation6_spill] sm:$0xff] %v21255_v7  ;;  %17652 = vmatprep.subr.bf16.mxu1 %v566_v6  ;;  %18468 = vmatprep.subr.bf16.mxu0 %v21255_v7  ;;  %vm2755_vm6 = vsmask.f32 4352  ;;  %vm945_vm7 = vcmask 1046528   ;;  %vm3157_vm8 = vcmask 1043456   ;;  %vm1553_vm10 = vcmask 1045504  }
  0x1e   : > { %17653 = vmatpush3.bf16.msra.mxu1 %v566_v6  ;;  %18469 = vmatpush3.bf16.msra.mxu0 %v21255_v7  ;;  %s182_s29 = scalar_lea.vmem %s25748_s0, %s20856_s21  ;;  %vm1226_vm9 = vsmask.f32 6400  ;;  %vm3438_vm11 = vsmask.f32 3328  ;;  %vm3765_vm12 = vcmask 1042432   ;;  %s25614_s6 = scalar_lea.vmem [#allocation3], %s15978_s5 }
  0x1f   : > { %s21272_s4 = scalar_lea.vmem %s182_s29, %s15980_s24  ;;  %17686 = vmatprep.subr.bf16.mxu1 %v21258_v8  ;;  %18502 = vmatprep.subr.bf16.mxu0 %v21265_v10  ;;  %vm4046_vm13 = vsmask.f32 2304  ;;  %vm4967_vm14 = vsmask.f32 1280  ;;  %vm5650_vm15 = vsmask.f32 256 }
  0x20   : > { %v187_v11 = vld [vmem:[%s21272_s4] sm:$0xff]  ;;  %v188_v12 = vld [vmem:[%s21272_s4 + $0x8] sm:$0xff]  ;;  %v189_v13 = vld [vmem:[%s21272_s4 + $0x10] sm:$0xff]  ;;  %s15895_s8 = sshll.u32 %s25614_s6, 4  ;;  %s25696_s20 = scalar_lea.sflag [#allocation4], %s175_s27  ;;  %s25689_s8 = int_to_ptr.vmem [resolvable:$true] %s15895_s8 }
  0x21   : > { %v190_v14 = vld [vmem:[%s21272_s4 + $0x18] sm:$0xff]  ;;  %v273_v15 = vpack.c.bf16 %v188_v12, %v187_v11  ;;  %v213_v16 = vld [vmem:[%s21272_s4 + $0xd0] sm:$0xff]  ;;  %v215_v19 = vld [vmem:[%s21272_s4 + $0xe0] sm:$0xff]  ;;  %s21047_s21 = scalar_lea.vmem %s25689_s8, 4096  ;;  %s21144_s24 = smov [#allocation3]  }
  0x22   : > { %v214_v17 = vld [vmem:[%s21272_s4 + $0xd8] sm:$0xff]  ;;  %v274_v18 = vpack.c.bf16 %v190_v14, %v189_v13  ;;  %v216_v20 = vld [vmem:[%s21272_s4 + $0xe8] sm:$0xff]  ;;  %v191_v22 = vld [vmem:[%s21272_s4 + $0x20] sm:$0xff]  ;;  %p21048_p13 = scmp.ne.s32.totalorder %s25689_s8, %s21047_s21  ;;  %s21051_s28 = sshll.u32 %s21144_s24, 4  ;;  %s21052_s28 = int_to_ptr.vmem [resolvable:$false] %s21051_s28 }
  0x23   : > { %v286_v21 = vpack.c.bf16 %v214_v17, %v213_v16  ;;  %317 = vst.msk [vmem:[#allocation2] sm:$0xff] %vm316_vm2, %v273_v15  ;;  %v287_v23 = vpack.c.bf16 %v216_v20, %v215_v19  ;;  %v192_v24 = vld [vmem:[%s21272_s4 + $0x28] sm:$0xff]  ;;  %v217_v25 = vld [vmem:[%s21272_s4 + $0xf0] sm:$0xff]  ;;  %v218_v26 = vld [vmem:[%s21272_s4 + $0xf8] sm:$0xff]  ;;  %s21053_s29 = scalar_lea.vmem %s21052_s28, 8192  ;;  %p21054_p2 = scmp.lt.s32.totalorder %s25689_s8, %s21052_s28 }
  0x24   : > { %318 = vst.msk [vmem:[#allocation2 + $0x8] sm:$0xff] %vm316_vm2, %v274_v18  ;;  %v275_v27 = vpack.c.bf16 %v192_v24, %v191_v22  ;;  %v288_v28 = vpack.c.bf16 %v218_v26, %v217_v25  ;;  %v193_v29 = vld [vmem:[%s21272_s4 + $0x30] sm:$0xff]  ;;  %v194_v30 = vld [vmem:[%s21272_s4 + $0x38] sm:$0xff]  ;;  %v219_v31 = vld [vmem:[%s21272_s4 + $0x100] sm:$0xff]  ;;  %p21049_p0 = pnand %p21048_p13, %p21218_p3  ;;  %p21055_p4 = scmp.lt.s32.totalorder %s21053_s29, %s21047_s21 }
  0x25   : > { %330 = vst.msk [vmem:[#allocation2 + $0x68] sm:$0xff] %vm316_vm2, %v286_v21  ;;  %331 = vst.msk [vmem:[#allocation2 + $0x70] sm:$0xff] %vm316_vm2, %v287_v23  ;;  %v276_v32 = vpack.c.bf16 %v194_v30, %v193_v29  ;;  %v220_v33 = vld [vmem:[%s21272_s4 + $0x108] sm:$0xff]  ;;  %v195_v34 = vld [vmem:[%s21272_s4 + $0x40] sm:$0xff] }
  0x26   : > { %v196_v35 = vld [vmem:[%s21272_s4 + $0x48] sm:$0xff]  ;;  %319 = vst.msk [vmem:[#allocation2 + $0x10] sm:$0xff] %vm316_vm2, %v275_v27  ;;  %332 = vst.msk [vmem:[#allocation2 + $0x78] sm:$0xff] %vm316_vm2, %v288_v28  ;;  %v289_v37 = vpack.c.bf16 %v220_v33, %v219_v31  ;;  %v221_v39 = vld [vmem:[%s21272_s4 + $0x110] sm:$0xff]  ;;  %p21050_p1 = pneg %p21049_p0  ;;  %p21056_p5 = por %p21055_p4, %p21054_p2 }
  0x27   : > { %v277_v38 = vpack.c.bf16 %v196_v35, %v195_v34  ;;  %v222_v40 = vld [vmem:[%s21272_s4 + $0x118] sm:$0xff]  ;;  %v197_v41 = vld [vmem:[%s21272_s4 + $0x50] sm:$0xff]  ;;  %320 = vst.msk [vmem:[#allocation2 + $0x18] sm:$0xff] %vm316_vm2, %v276_v32  ;;  %v223_v45 = vld [vmem:[%s21272_s4 + $0x120] sm:$0xff] }
  0x28   : > { %v290_v43 = vpack.c.bf16 %v222_v40, %v221_v39  ;;  %v198_v44 = vld [vmem:[%s21272_s4 + $0x58] sm:$0xff]  ;;  %v224_v46 = vld [vmem:[%s21272_s4 + $0x128] sm:$0xff]  ;;  %333 = vst.msk [vmem:[#allocation2 + $0x80] sm:$0xff] %vm316_vm2, %v289_v37  ;;  %v199_v49 = vld [vmem:[%s21272_s4 + $0x60] sm:$0xff]  ;;  %p21057_p6 = pnand %p21056_p5, %p21050_p1 }
  0x29   : > { %321 = vst.msk [vmem:[#allocation2 + $0x20] sm:$0xff] %vm316_vm2, %v277_v38  ;;  %v278_v47 = vpack.c.bf16 %v198_v44, %v197_v41  ;;  %v291_v48 = vpack.c.bf16 %v224_v46, %v223_v45  ;;  %v200_v50 = vld [vmem:[%s21272_s4 + $0x68] sm:$0xff]  ;;  %v225_v51 = vld [vmem:[%s21272_s4 + $0x130] sm:$0xff]  ;;  %v226_v53 = vld [vmem:[%s21272_s4 + $0x138] sm:$0xff] }
  0x2a   : > { %334 = vst.msk [vmem:[#allocation2 + $0x88] sm:$0xff] %vm316_vm2, %v290_v43  ;;  %v279_v52 = vpack.c.bf16 %v200_v50, %v199_v49  ;;  %v201_v54 = vld [vmem:[%s21272_s4 + $0x70] sm:$0xff]  ;;  %v202_v55 = vld [vmem:[%s21272_s4 + $0x78] sm:$0xff]  ;;  %v21322_v56 = vld [vmem:[#allocation2] sm:$0xff]  ;;  %v292_v57 = vpack.c.bf16 %v226_v53, %v225_v51 }
  0x2b   : > { %322 = vst.msk [vmem:[#allocation2 + $0x28] sm:$0xff] %vm316_vm2, %v278_v47  ;;  %335 = vst.msk [vmem:[#allocation2 + $0x90] sm:$0xff] %vm316_vm2, %v291_v48  ;;  %v280_v58 = vpack.c.bf16 %v202_v55, %v201_v54  ;;  %v227_v59 = vld [vmem:[%s21272_s4 + $0x140] sm:$0xff]  ;;  %v228_v60 = vld [vmem:[%s21272_s4 + $0x148] sm:$0xff]  ;;  %v382_v63 = vshrl.u32 %v21322_v56, 16  ;;  %v384_v0 = vshll.u32 %v21322_v56, 16 }
  0x2c   : > { %v21331_v62 = vld [vmem:[#allocation2 + $0x8] sm:$0xff]  ;;  %323 = vst.msk [vmem:[#allocation2 + $0x30] sm:$0xff] %vm316_vm2, %v279_v52  ;;  %v293_v2 = vpack.c.bf16 %v228_v60, %v227_v59  ;;  %v203_v3 = vld [vmem:[%s21272_s4 + $0x80] sm:$0xff]  ;;  %v21346_v11 = vld [vmem:[#allocation2 + $0x70] sm:$0xff] }
  0x2d   : > { %v7586_v1 = vld [vmem:[#allocation2 + $0x68] sm:$0xfc]  ;;  %v21341_v6 = vshll.u32 %v21331_v62, 16  ;;  %v21344_v9 = vshrl.u32 %v21331_v62, 16  ;;  %336 = vst.msk [vmem:[#allocation2 + $0x98] sm:$0xff] %vm316_vm2, %v292_v57  ;;  %324 = vst.msk [vmem:[#allocation2 + $0x38] sm:$0xff] %vm316_vm2, %v280_v58 }
  0x2e   : > { %v7872_v12 = vshrl.u32 %v7586_v1, 16  ;;  %v7875_v13 = vshll.u32 %v7586_v1, 16  ;;  %v204_v14 = vld [vmem:[%s21272_s4 + $0x88] sm:$0xff]  ;;  %v386_v15 = vrot.slane %v384_v0, 1  ;;  %v21352_v16 = vshrl.u32 %v21346_v11, 16  ;;  %v21357_v18 = vld [vmem:[#allocation2 + $0x10] sm:$0xff] }
  0x2f   : > { %26100 = vst [vmem:[#allocation7_spill] sm:$0xff] %v21341_v6  ;;  %26101 = vst [vmem:[#allocation8_spill] sm:$0xff] %v21344_v9  ;;  %v21355_v17 = vshll.u32 %v21346_v11, 16  ;;  %v21359_v19 = vld [vmem:[#allocation2 + $0x78] sm:$0xff]  ;;  %v281_v20 = vpack.c.bf16 %v204_v14, %v203_v3  ;;  %v391_v21 = vrot.slane %v21341_v6, 1  ;;  %v21364_v24 = vshll.u32 %v21357_v18, 16 }
  0x30   : > { %26102 = vst [vmem:[#allocation9_spill] sm:$0xff] %v21359_v19  ;;  %337 = vst.msk [vmem:[#allocation2 + $0xa0] sm:$0xff] %vm316_vm2, %v293_v2  ;;  %v7874_v22 = vrot.slane %v7872_v12, 2  ;;  %v7877_v23 = vrot.slane %v7875_v13, 3  ;;  %v387_v25 = vor.u32 %v386_v15, %v382_v63  ;;  %v7879_v26 = vrot.slane %v21352_v16, 2  ;;  %v21371_v29 = vld [vmem:[#allocation2 + $0x18] sm:$0xff] }
  0x31   : > { %26103 = vst [vmem:[#allocation10_spill] sm:$0xff] %v21364_v24  ;;  %v7880_v27 = vrot.slane %v21355_v17, 3  ;;  %v21369_v28 = vshrl.u32 %v21359_v19, 16  ;;  %v21373_v30 = vld [vmem:[#allocation2 + $0x80] sm:$0xff]  ;;  %325 = vst.msk [vmem:[#allocation2 + $0x40] sm:$0xff] %vm316_vm2, %v281_v20  ;;  %v395_v31 = vor.u32 %v21344_v9, %v391_v21  ;;  %v399_v33 = vrot.slane %v21364_v24, 1 }
  0x32   : > { %v7878_v32 = vor.u32 %v7877_v23, %v7874_v22  ;;  %v21379_v34 = vshll.u32 %v21359_v19, 16  ;;  %v392_v35 = vsel %vm380_vm3, %v387_v25, %v391_v21  ;;  %v21386_v38 = vshrl.u32 %v21357_v18, 16  ;;  %v21388_v39 = vld [vmem:[#allocation2 + $0x20] sm:$0xff]  ;;  %v21399_v44 = vld [vmem:[#allocation2 + $0x88] sm:$0xff]  ;;  %v21432_v58 = vld [vmem:[#allocation2 + $0x90] sm:$0xff] }
  0x33   : > { %v21382_v36 = vor.u32 %v7880_v27, %v7879_v26  ;;  %v7883_v37 = vrot.slane %v21369_v28, 2  ;;  %17654 = vmatprep.mubr.msk.bf16.mxu1 %vm316_vm2, %v392_v35  ;;  %v400_v40 = vsel %vm380_vm3, %v395_v31, %v399_v33  ;;  %v21394_v42 = vshll.u32 %v21371_v29, 16  ;;  %v21420_v53 = vld [vmem:[#allocation2 + $0x28] sm:$0xff]  ;;  %v21451_v13 = vld [vmem:[#allocation2 + $0x30] sm:$0xff]  ;;  %v239_v9 = vld [vmem:[%s21272_s4 + $0x1a0] sm:$0xff] }
  0x34   : > { %26105 = vst [vmem:[#allocation12_spill] sm:$0xff] %v21386_v38  ;;  %v7884_v41 = vrot.slane %v21379_v34, 3  ;;  %v21397_v43 = vshrl.u32 %v21373_v30, 16  ;;  %17655 = vmatmul.mubr.msk.bf16.vlgmr.msra.gmra.mrb[0].mxu1 %vm316_vm2, %v400_v40  ;;  %v403_v46 = vor.u32 %v21386_v38, %v399_v33  ;;  %v21406_v47 = vshll.u32 %v21373_v30, 16  ;;  %v21453_v14 = vld [vmem:[#allocation2 + $0x98] sm:$0xff] }
  0x35   : > { %26104 = vst [vmem:[#allocation11_spill] sm:$0xff] %v21382_v36  ;;  %26106 = vst [vmem:[#allocation13_spill] sm:$0xff] %v21394_v42  ;;  %v7882_v45 = vsel %vm1834_vm4, %v7878_v32, %v21382_v36  ;;  %v21409_v48 = vshrl.u32 %v21371_v29, 16  ;;  %17687 = vmatpush3.bf16.msra.mxu1 %v21258_v8  ;;  %v407_v50 = vrot.slane %v21394_v42, 1  ;;  %v21418_v52 = vshll.u32 %v21388_v39, 16  ;;  %v21480_v35 = vld [vmem:[#allocation2 + $0x38] sm:$0xff] }
  0x36   : > { %26107 = vst [vmem:[#allocation14_spill] sm:$0xff] %v21397_v43  ;;  %26108 = vst [vmem:[#allocation15_spill] sm:$0xff] %v21406_v47  ;;  %18470 = vmatprep.mubr.msk.bf16.mxu0 %vm316_vm2, %v7882_v45  ;;  %v21413_v49 = vor.u32 %v7884_v41, %v7883_v37  ;;  %v7887_v51 = vrot.slane %v21397_v43, 2  ;;  %v7888_v54 = vrot.slane %v21406_v47, 3  ;;  %v21424_v55 = vshrl.u32 %v21399_v44, 16  ;;  %17720 = vmatprep.subr.bf16.mxu1 %v21338_v5  ;;  %v212_v42 = vld [vmem:[%s21272_s4 + $0xc8] sm:$0xff] }
  0x37   : > { %26109 = vst [vmem:[#allocation16_spill] sm:$0xff] %v21409_v48  ;;  %26111 = vst [vmem:[#allocation18_spill] sm:$0xff] %v21418_v52  ;;  %v21427_v57 = vshll.u32 %v21399_v44, 16  ;;  %v21430_v8 = vshrl.u32 %v21388_v39, 16  ;;  %v408_v60 = vsel %vm380_vm3, %v403_v46, %v407_v50  ;;  %v411_v63 = vor.u32 %v21409_v48, %v407_v50  ;;  %v21482_v37 = vld [vmem:[#allocation2 + $0xa0] sm:$0xff] }
  0x38   : > { %26110 = vst [vmem:[#allocation17_spill] sm:$0xff] %v21413_v49  ;;  %26112 = vst [vmem:[#allocation19_spill] sm:$0xff] %v21424_v55  ;;  %v21438_v59 = vsel %vm1834_vm4, %v21382_v36, %v21413_v49  ;;  %v415_v0 = vrot.slane %v21418_v52, 1  ;;  %17658 = vmatprep.mubr.msk.bf16.mxu1 %vm316_vm2, %v408_v60  ;;  %v7889_v1 = vor.u32 %v7888_v54, %v7887_v51  ;;  %v7891_v2 = vrot.slane %v21424_v55, 2 }
  0x39   : > { %26113 = vst [vmem:[#allocation20_spill] sm:$0xff] %v21427_v57  ;;  %26114 = vst [vmem:[#allocation21_spill] sm:$0xff] %v21430_v8  ;;  %18471 = vmatmul.mubr.msk.bf16.vlgmr.msra.gmra.mrb[0].mxu0 %vm316_vm2, %v21438_v59  ;;  %v7892_v3 = vrot.slane %v21427_v57, 3  ;;  %v21449_v12 = vshll.u32 %v21420_v53, 16  ;;  %v21459_v21 = vshrl.u32 %v21432_v58, 16  ;;  %v21462_v22 = vshll.u32 %v21432_v58, 16 }
  0x3a   : > { %26115 = vst [vmem:[#allocation22_spill] sm:$0xff] %v21438_v59  ;;  %18503 = vmatpush3.bf16.msra.mxu0 %v21265_v10  ;;  %v416_v15 = vsel %vm380_vm3, %v411_v63, %v415_v0  ;;  %v419_v20 = vor.u32 %v21430_v8, %v415_v0  ;;  %v7890_v23 = vsel %vm1834_vm4, %v21413_v49, %v7889_v1  ;;  %v21468_v27 = vshrl.u32 %v21420_v53, 16  ;;  %v229_v63 = vld [vmem:[%s21272_s4 + $0x150] sm:$0xff]  ;;  %v230_v0 = vld [vmem:[%s21272_s4 + $0x158] sm:$0xff]  ;;  %v211_v8 = vld [vmem:[%s21272_s4 + $0xc0] sm:$0xff] }
  0x3b   : > { %26116 = vst [vmem:[#allocation23_spill] sm:$0xff] %v21449_v12  ;;  %26117 = vst [vmem:[#allocation24_spill] sm:$0xff] %v21459_v21  ;;  %v7893_v25 = vor.u32 %v7892_v3, %v7891_v2  ;;  %v423_v26 = vrot.slane %v21449_v12, 1  ;;  %18536 = vmatprep.subr.bf16.mxu0 %v21329_v61  ;;  %18474 = vmatprep.mubr.msk.bf16.mxu0 %vm316_vm2, %v7890_v23  ;;  %v7895_v10 = vrot.slane %v21459_v21, 2  ;;  %v7896_v31 = vrot.slane %v21462_v22, 3  ;;  %v21510_v23 = vld [vmem:[#allocation2 + $0x40] sm:$0xff] }
  0x3c   : > { %26118 = vst [vmem:[#allocation25_spill] sm:$0xff] %v21462_v22  ;;  %26119 = vst [vmem:[#allocation26_spill] sm:$0xff] %v21468_v27  ;;  %v21475_v32 = vshll.u32 %v21451_v13, 16  ;;  %v21478_v33 = vshrl.u32 %v21453_v14, 16  ;;  %17659 = vmatmul.mubr.msk.bf16.gmra.mrb[4].mxu1 %vm316_vm2, %v416_v15  ;;  %v21489_v46 = vshll.u32 %v21453_v14, 16  ;;  %v21495_v60 = vshrl.u32 %v21451_v13, 16 }
  0x3d   : > { %v7894_v40 = vsel %vm1834_vm4, %v7889_v1, %v7893_v25  ;;  %v424_v41 = vsel %vm380_vm3, %v419_v20, %v423_v26  ;;  %v427_v45 = vor.u32 %v21468_v27, %v423_v26  ;;  %v7897_v50 = vor.u32 %v7896_v31, %v7895_v10  ;;  %v205_v1 = vld [vmem:[%s21272_s4 + $0x90] sm:$0xff]  ;;  %v206_v26 = vld [vmem:[%s21272_s4 + $0x98] sm:$0xff] }
  0x3e   : > { %26120 = vst [vmem:[#allocation27_spill] sm:$0xff] %v21475_v32  ;;  %26121 = vst [vmem:[#allocation28_spill] sm:$0xff] %v21478_v33  ;;  %17662 = vmatprep.mubr.msk.bf16.mxu1 %vm316_vm2, %v424_v41  ;;  %v431_v51 = vrot.slane %v21475_v32, 1  ;;  %v7899_v54 = vrot.slane %v21478_v33, 2  ;;  %v7900_v2 = vrot.slane %v21489_v46, 3  ;;  %v21502_v3 = vshll.u32 %v21480_v35, 16 }
  0x3f   : > { %26122 = vst [vmem:[#allocation29_spill] sm:$0xff] %v21489_v46  ;;  %26123 = vst [vmem:[#allocation30_spill] sm:$0xff] %v21495_v60  ;;  %v21505_v15 = vshrl.u32 %v21482_v37, 16  ;;  %v21508_v20 = vshll.u32 %v21482_v37, 16  ;;  %v7898_v10 = vsel %vm1834_vm4, %v7893_v25, %v7897_v50  ;;  %v21521_v36 = vshrl.u32 %v21480_v35, 16  ;;  %v207_v32 = vld [vmem:[%s21272_s4 + $0xa0] sm:$0xff] }
  0x40   : > { %26124 = vst [vmem:[#allocation31_spill] sm:$0xff] %v21502_v3  ;;  %v432_v31 = vsel %vm380_vm3, %v427_v45, %v431_v51  ;;  %v435_v41 = vor.u32 %v21495_v60, %v431_v51  ;;  %v439_v7 = vrot.slane %v21502_v3, 1  ;;  %v208_v25 = vld [vmem:[%s21272_s4 + $0xa8] sm:$0xff]  ;;  %v7901_v45 = vor.u32 %v7900_v2, %v7899_v54  ;;  %v209_v12 = vld [vmem:[%s21272_s4 + $0xb0] sm:$0xff]  ;;  %v210_v3 = vld [vmem:[%s21272_s4 + $0xb8] sm:$0xff] }
  0x41   : > { %26125 = vst [vmem:[#allocation32_spill] sm:$0xff] %v21505_v15  ;;  %26126 = vst [vmem:[#allocation33_spill] sm:$0xff] %v21508_v20  ;;  %18475 = vmatmul.mubr.msk.bf16.gmra.mrb[4].mxu0 %vm316_vm2, %v7894_v40  ;;  %v7903_v49 = vrot.slane %v21505_v15, 2  ;;  %v7904_v59 = vrot.slane %v21508_v20, 3  ;;  %v21527_v51 = vshll.u32 %v21510_v23, 16  ;;  %v294_v40 = vpack.c.bf16 %v230_v0, %v229_v63 }
  0x42   : > { %26127 = vst [vmem:[#allocation34_spill] sm:$0xff] %v21521_v36  ;;  %18478 = vmatprep.mubr.msk.bf16.mxu0 %vm316_vm2, %v7898_v10  ;;  %v282_v60 = vpack.c.bf16 %v206_v26, %v205_v1  ;;  %v440_v27 = vsel %vm380_vm3, %v435_v41, %v439_v7  ;;  %v283_v54 = vpack.c.bf16 %v208_v25, %v207_v32  ;;  %v232_v32 = vld [vmem:[%s21272_s4 + $0x168] sm:$0xff] }
  0x43   : > { %26128 = vst [vmem:[#allocation35_spill] sm:$0xff] %v21527_v51  ;;  %v21532_v52 = vor.u32 %v7904_v59, %v7903_v49  ;;  %338 = vst.msk [vmem:[#allocation2 + $0xa8] sm:$0xff] %vm316_vm2, %v294_v40  ;;  %v284_v2 = vpack.c.bf16 %v210_v3, %v209_v12  ;;  %v7902_v63 = vsel %vm1834_vm4, %v7897_v50, %v7901_v45  ;;  %v447_v49 = vrot.slane %v21527_v51, 1  ;;  %v231_v12 = vld [vmem:[%s21272_s4 + $0x160] sm:$0xff] }
  0x44   : > { %326 = vst.msk [vmem:[#allocation2 + $0x48] sm:$0xff] %vm316_vm2, %v282_v60  ;;  %17663 = vmatmul.mubr.msk.bf16.gmra.mrb[8].mxu1 %vm316_vm2, %v432_v31  ;;  %v443_v0 = vor.u32 %v21521_v36, %v439_v7  ;;  %327 = vst.msk [vmem:[#allocation2 + $0x50] sm:$0xff] %vm316_vm2, %v283_v54  ;;  %v285_v59 = vpack.c.bf16 %v212_v42, %v211_v8  ;;  %v21547_v60 = vshrl.u32 %v21510_v23, 16  ;;  %v21556_v42 = vld [vmem:[#allocation2 + $0x68] sm:$0xf8]  ;;  %v233_v54 = vld [vmem:[%s21272_s4 + $0x170] sm:$0xff] }
  0x45   : > { %17666 = vmatprep.mubr.msk.bf16.mxu1 %vm316_vm2, %v440_v27  ;;  %v7906_v1 = vsel %vm1834_vm4, %v7901_v45, %v21532_v52  ;;  %328 = vst.msk [vmem:[#allocation2 + $0x58] sm:$0xff] %vm316_vm2, %v284_v2  ;;  %v295_v3 = vpack.c.bf16 %v232_v32, %v231_v12  ;;  %v8197_v25 = vrot.slane %v21556_v42, 3  ;;  %v234_v2 = vld [vmem:[%s21272_s4 + $0x178] sm:$0xff]  ;;  %v21591_v12 = vld [vmem:[#allocation2 + $0x68] sm:$0xff]  ;;  %v235_v32 = vld [vmem:[%s21272_s4 + $0x180] sm:$0xff] }
  0x46   : > { %26129 = vst [vmem:[#allocation36_spill] sm:$0xff] %v21547_v60  ;;  %329 = vst.msk [vmem:[#allocation2 + $0x60] sm:$0xff] %vm316_vm2, %v285_v59  ;;  %v448_v7 = vsel %vm380_vm3, %v443_v0, %v447_v49  ;;  %v451_v50 = vor.u32 %v21547_v60, %v447_v49  ;;  %v237_v60 = vld [vmem:[%s21272_s4 + $0x190] sm:$0xff]  ;;  %v238_v36 = vld [vmem:[%s21272_s4 + $0x198] sm:$0xff] }
  0x47   : > { %339 = vst.msk [vmem:[#allocation2 + $0xb0] sm:$0xff] %vm316_vm2, %v295_v3  ;;  %v8200_v3 = vrot.slane %v21359_v19, 3  ;;  %v240_v19 = vld [vmem:[%s21272_s4 + $0x1a8] sm:$0xff]  ;;  %v298_v21 = vpack.c.bf16 %v238_v36, %v237_v60 }
  0x49   : > { %18479 = vmatmul.mubr.msk.bf16.gmra.mrb[8].mxu0 %vm316_vm2, %v7902_v63  ;;  %342 = vst.msk [vmem:[#allocation2 + $0xc8] sm:$0xff] %vm316_vm2, %v298_v21  ;;  %v26142_v21 = vrot.slane %v21346_v11, 3 }
  0x4a   : > { %18482 = vmatprep.mubr.msk.bf16.mxu0 %vm316_vm2, %v7906_v1  ;;  %v21558_v8 = vld [vmem:[#allocation2 + $0xa8] sm:$0xff] }
  0x4b   : > { %v21560_v27 = vld [vmem:[#allocation2 + $0x48] sm:$0xff]  ;;  %v21564_v26 = vshrl.u32 %v21558_v8, 16  ;;  %v21567_v10 = vshll.u32 %v21558_v8, 16  ;;  %v21578_v40 = vld [vmem:[#allocation2 + $0x50] sm:$0xff] }
  0x4c   : > { %v21570_v31 = vshll.u32 %v21560_v27, 16  ;;  %v21573_v41 = vshrl.u32 %v21560_v27, 16  ;;  %17667 = vmatmul.mubr.msk.bf16.gmra.mrb[12].mxu1 %vm316_vm2, %v448_v7  ;;  %v21587_v59 = vshll.u32 %v21578_v40, 16  ;;  %v21589_v1 = vld [vmem:[#allocation2 + $0x58] sm:$0xff]  ;;  %v236_v7 = vld [vmem:[%s21272_s4 + $0x188] sm:$0xff]  ;;  %v21597_v45 = vshrl.u32 %v21578_v40, 16 }
  0x4d   : > { %26130 = vst [vmem:[#allocation37_spill] sm:$0xff] %v21564_v26  ;;  %26131 = vst [vmem:[#allocation38_spill] sm:$0xff] %v21567_v10  ;;  %v7907_v63 = vrot.slane %v21564_v26, 2  ;;  %v7908_v0 = vrot.slane %v21567_v10, 3  ;;  %v21600_v51 = vshll.u32 %v21589_v1, 16  ;;  %v241_v10 = vld [vmem:[%s21272_s4 + $0x1b0] sm:$0xff]  ;;  %v297_v22 = vpack.c.bf16 %v236_v7, %v235_v32 }
  0x4e   : > { %26132 = vst [vmem:[#allocation39_spill] sm:$0xff] %v21570_v31  ;;  %26133 = vst [vmem:[#allocation40_spill] sm:$0xff] %v21573_v41  ;;  %v455_v49 = vrot.slane %v21570_v31, 1  ;;  %v21602_v31 = vld [vmem:[#allocation2 + $0x60] sm:$0xff]  ;;  %v463_v6 = vrot.slane %v21587_v59, 1  ;;  %v26139_v26 = vrot.slane %v21346_v11, 3 }
  0x4f   : > { %26134 = vst [vmem:[#allocation41_spill] sm:$0xff] %v21587_v59  ;;  %26135 = vst [vmem:[#allocation42_spill] sm:$0xff] %v21589_v1  ;;  %v21606_v48 = vor.u32 %v7908_v0, %v7907_v63  ;;  %v471_v63 = vrot.slane %v21600_v51, 1  ;;  %v21620_v0 = vshrl.u32 %v21589_v1, 16  ;;  %v243_v59 = vld [vmem:[%s21272_s4 + $0x1c0] sm:$0xff]  ;;  %v21637_v33 = vshrl.u32 %v21602_v31, 16 }
  0x50   : > { %26136 = vst [vmem:[#allocation43_spill] sm:$0xff] %v21597_v45  ;;  %26137 = vst [vmem:[#allocation44_spill] sm:$0xff] %v21600_v51  ;;  %v456_v24 = vsel %vm380_vm3, %v451_v50, %v455_v49  ;;  %v459_v38 = vor.u32 %v21573_v41, %v455_v49  ;;  %v8199_v20 = vsel %vm2161_vm5, %v8197_v25, %v26139_v26  ;;  %v21623_v50 = vshll.u32 %v21602_v31, 16  ;;  %v242_v49 = vld [vmem:[%s21272_s4 + $0x1b8] sm:$0xff]  ;;  %v244_v41 = vld [vmem:[%s21272_s4 + $0x1c8] sm:$0xff] }
  0x51   : > { %26138 = vst [vmem:[#allocation45_spill] sm:$0xff] %v21606_v48  ;;  %17670 = vmatprep.mubr.msk.bf16.mxu1 %vm316_vm2, %v456_v24  ;;  %26140 = vst [vmem:[#allocation46_spill] sm:$0xff] %v21620_v0  ;;  %v7910_v15 = vsel %vm1834_vm4, %v21532_v52, %v21606_v48  ;;  %v467_v46 = vor.u32 %v21597_v45, %v463_v6  ;;  %v296_v26 = vpack.c.bf16 %v234_v2, %v233_v54  ;;  %v245_v25 = vld [vmem:[%s21272_s4 + $0x1d0] sm:$0xff]  ;;  %v246_v51 = vld [vmem:[%s21272_s4 + $0x1d8] sm:$0xff] }
  0x52   : > { %v464_v24 = vsel %vm380_vm3, %v459_v38, %v463_v6  ;;  %18483 = vmatmul.mubr.msk.bf16.gmra.mrb[12].mxu0 %vm316_vm2, %v7910_v15  ;;  %v21640_v1 = vshll.u32 %v21591_v12, 16  ;;  %v299_v6 = vpack.c.bf16 %v240_v19, %v239_v9  ;;  %v300_v38 = vpack.c.bf16 %v242_v49, %v241_v10  ;;  %341 = vst.msk [vmem:[#allocation2 + $0xc0] sm:$0xff] %vm316_vm2, %v297_v22  ;;  %v16439_v9 = vld [vmem:[%s25749_s1 + $0x36] sm:$0x3] }
  0x53   : > { %18504 = vmatprep.mubr.msk.bf16.mxu0 %vm316_vm2, %v8199_v20  ;;  %v472_v52 = vsel %vm380_vm3, %v467_v46, %v471_v63  ;;  %340 = vst.msk [vmem:[#allocation2 + $0xb8] sm:$0xff] %vm316_vm2, %v296_v26  ;;  %v301_v54 = vpack.c.bf16 %v244_v41, %v243_v59  ;;  %v8202_v15 = vrot.slane %v21373_v30, 3  ;;  %v479_v2 = vrot.slane %v21623_v50, 1 }
  0x54   : > { %26141 = vst [vmem:[#allocation47_spill] sm:$0xff] %v21640_v1  ;;  %17671 = vmatmul.mubr.msk.bf16.gmra.mrb[16].mxu1 %vm316_vm2, %v464_v24  ;;  %v302_v36 = vpack.c.bf16 %v246_v51, %v245_v25  ;;  %v475_v46 = vor.u32 %v21620_v0, %v471_v63  ;;  %343 = vst.msk [vmem:[#allocation2 + $0xd0] sm:$0xff] %vm316_vm2, %v299_v6  ;;  %v487_v22 = vrot.slane %v21640_v1, 1  ;;  %v21670_v41 = vshrl.u32 %v21591_v12, 16  ;;  %v21685_v24 = vld [vmem:[#allocation2 + $0x80] sm:$0x1] }
  0x55   : > { %17674 = vmatprep.mubr.msk.bf16.mxu1 %vm316_vm2, %v472_v52  ;;  %344 = vst.msk [vmem:[#allocation2 + $0xd8] sm:$0xff] %vm316_vm2, %v300_v38  ;;  %345 = vst.msk [vmem:[#allocation2 + $0xe0] sm:$0xff] %vm316_vm2, %v301_v54  ;;  %v483_v19 = vor.u32 %v21637_v33, %v479_v2  ;;  %v8201_v20 = vsel %vm2161_vm5, %v26142_v21, %v8200_v3  ;;  %v8203_v51 = vsel %vm2161_vm5, %v8200_v3, %v8202_v15 }
  0x56   : > { %346 = vst.msk [vmem:[#allocation2 + $0xe8] sm:$0xff] %vm316_vm2, %v302_v36  ;;  %v21666_v60 = vand.u32 %v16439_v9, %v21247_v4  ;;  %v480_v10 = vsel %vm380_vm3, %v475_v46, %v479_v2  ;;  %26143 = vst [vmem:[#allocation48_spill] sm:$0xff] %v21670_v41  ;;  %v8204_v32 = vrot.slane %v21399_v44, 3  ;;  %v8206_v7 = vrot.slane %v21432_v58, 3 }
  0x57   : > { %v488_v59 = vsel %vm380_vm3, %v483_v19, %v487_v22  ;;  %v495_v3 = vrot.slane %v21355_v17, 1  ;;  %v491_v63 = vor.u32 %v21670_v41, %v487_v22  ;;  %v509_v6 = vshll.u32 %v21685_v24, 16  ;;  %v21702_v22 = vld [vmem:[#allocation2 + $0xb0] sm:$0xff] }
  0x58   : > { %v8205_v26 = vsel %vm2161_vm5, %v8202_v15, %v8204_v32  ;;  %v8207_v25 = vsel %vm2161_vm5, %v8204_v32, %v8206_v7  ;;  %v8208_v54 = vrot.slane %v21453_v14, 3  ;;  %v8210_v2 = vrot.slane %v21482_v37, 3 }
  0x59   : > { %v499_v49 = vor.u32 %v21352_v16, %v495_v3  ;;  %v496_v52 = vsel %vm380_vm3, %v491_v63, %v495_v3  ;;  %v511_v36 = vrot.slane %v509_v6, 1  ;;  %v8212_v21 = vrot.slane %v21558_v8, 3 }
  0x5a   : > { %18505 = vmatmul.mubr.msk.bf16.vlgmr.msra.gmra.mrb[0].mxu0 %vm316_vm2, %v8201_v20  ;;  %v8209_v46 = vsel %vm2161_vm5, %v8206_v7, %v8208_v54  ;;  %v8211_v9 = vsel %vm2161_vm5, %v8208_v54, %v8210_v2  ;;  %v8214_v20 = vrot.slane %v21702_v22, 3  ;;  %v21716_v32 = vld [vmem:[#allocation2 + $0xb8] sm:$0xff]  ;;  %v21718_v7 = vld [vmem:[#allocation2 + $0xc0] sm:$0xff] }
  0x5b   : > { %18537 = vmatpush3.bf16.msra.mxu0 %v21329_v61  ;;  %18508 = vmatprep.mubr.msk.bf16.mxu0 %vm316_vm2, %v8203_v51  ;;  %v503_v61 = vrot.slane %v21379_v34, 1  ;;  %v8213_v51 = vsel %vm2161_vm5, %v8210_v2, %v8212_v21  ;;  %v8218_v63 = vrot.slane %v21718_v7, 3 }
  0x5c   : > { %17675 = vmatmul.mubr.msk.bf16.gmra.mrb[20].mxu1 %vm316_vm2, %v480_v10  ;;  %18570 = vmatprep.subr.bf16.mxu0 %v21666_v60  ;;  %v16031_v10 = vld [vmem:[%s25749_s1 + $0x6] sm:$0x3]  ;;  %v21749_v54 = vld [vmem:[#allocation2 + $0xd8] sm:$0xff] }
  0x5d   : > { %17678 = vmatprep.mubr.msk.bf16.mxu1 %vm316_vm2, %v488_v59  ;;  %v504_v38 = vsel %vm380_vm3, %v499_v49, %v503_v61  ;;  %v507_v15 = vor.u32 %v21369_v28, %v503_v61  ;;  %v8215_v59 = vsel %vm2161_vm5, %v8212_v21, %v8214_v20  ;;  %v21722_v3 = vand.u32 %v16031_v10, %v21247_v4  ;;  %v21751_v2 = vld [vmem:[#allocation2 + $0xe0] sm:$0xff] }
  0x5e   : > { %v8485_v21 = vrot.slane %v21352_v16, 3 }
  0x5f   : > { %v512_v19 = vsel %vm380_vm3, %v507_v15, %v511_v36  ;;  %v8224_v15 = vrot.slane %v21749_v54, 3  ;;  %v8226_v36 = vrot.slane %v21751_v2, 3 }
  0x62   : > { %18509 = vmatmul.mubr.msk.bf16.gmra.mrb[4].mxu0 %vm316_vm2, %v8205_v26  ;;  %v21735_v26 = vld [vmem:[#allocation2 + $0xc8] sm:$0xff] }
  0x63   : > { %18512 = vmatprep.mubr.msk.bf16.mxu0 %vm316_vm2, %v8207_v25  ;;  %v21737_v25 = vld [vmem:[#allocation2 + $0xd0] sm:$0xff] }
  0x64   : > { %17679 = vmatmul.mubr.msk.bf16.gmra.mrb[24].mxu1 %vm316_vm2, %v496_v52  ;;  %v8220_v52 = vrot.slane %v21735_v26, 3 }
  0x65   : > { %17682 = vmatprep.mubr.msk.bf16.mxu1 %vm316_vm2, %v504_v38 }
  0x66   : > { %v8221_v6 = vsel %vm2161_vm5, %v8218_v63, %v8220_v52 }
  0x6a   : > { %18513 = vmatmul.mubr.msk.bf16.gmra.mrb[8].mxu0 %vm316_vm2, %v8209_v46  ;;  %v8478_v46 = vshrl.u32 %v21556_v42, 16 }
  0x6b   : > { %18516 = vmatprep.mubr.msk.bf16.mxu0 %vm316_vm2, %v8211_v9  ;;  %v8481_v9 = vshll.u32 %v21556_v42, 16 }
  0x6c   : > { %17683 = vmatmul.mubr.msk.bf16.gmra.mrb[28].mxu1 %vm316_vm2, %v512_v19  ;;  %v8480_v10 = vrot.slane %v8478_v46, 3 }
  0x6d   : > { %17688 = vmatprep.mubr.msk.bf16.mxu1 %vm316_vm2, %v21322_v56  ;;  %v8216_v56 = vrot.slane %v21716_v32, 3 }
  0x6f   : > { %v8217_v49 = vsel %vm2161_vm5, %v8214_v20, %v8216_v56  ;;  %v8219_v61 = vsel %vm2161_vm5, %v8216_v56, %v8218_v63  ;;  %v8227_v20 = vsel %vm2161_vm5, %v8224_v15, %v8226_v36  ;;  %v8486_v56 = vrot.slane %v21355_v17, 4 }
  0x72   : > { %18517 = vmatmul.mubr.msk.bf16.gmra.mrb[12].mxu0 %vm316_vm2, %v8213_v51  ;;  %v7868_v51 = vld [vmem:[#allocation2 + $0xe8] sm:$0x7] }
  0x73   : > { %18520 = vmatprep.mubr.msk.bf16.mxu0 %vm316_vm2, %v8215_v59  ;;  %v8483_v59 = vrot.slane %v8481_v9, 4  ;;  %v8228_v63 = vrot.slane %v7868_v51, 3 }
  0x74   : > { %17689 = vmatmul.mubr.msk.bf16.vlgmr.msra.gmra.mrb[0].mxu1 %vm316_vm2, %v21331_v62 }
  0x75   : > { %17721 = vmatpush3.bf16.msra.mxu1 %v21338_v5  ;;  %17692 = vmatprep.mubr.msk.bf16.mxu1 %vm316_vm2, %v21357_v18  ;;  %v8222_v5 = vrot.slane %v21737_v25, 3  ;;  %v8484_v42 = vor.u32 %v8483_v59, %v8480_v10  ;;  %v26144_v10 = vld [vmem:[#allocation24_spill] sm:$0xff] }
  0x76   : > { %17754 = vmatprep.subr.bf16.mxu1 %v21722_v3  ;;  %v8501_v59 = vrot.slane %v26144_v10, 3 }
  0x77   : > { %v8223_v38 = vsel %vm2161_vm5, %v8220_v52, %v8222_v5  ;;  %v8225_v19 = vsel %vm2161_vm5, %v8222_v5, %v8224_v15  ;;  %v8489_v52 = vrot.slane %v21369_v28, 3  ;;  %v8490_v5 = vrot.slane %v21379_v34, 4 }
  0x78   : > { %v8494_v15 = vrot.slane %v21406_v47, 4  ;;  %v21870_v47 = vshrl.u32 %v21735_v26, 16 }
  0x79   : > { %v8491_v46 = vor.u32 %v8490_v5, %v8489_v52 }
  0x7a   : > { %18521 = vmatmul.mubr.msk.bf16.gmra.mrb[16].mxu0 %vm316_vm2, %v8217_v49  ;;  %v8487_v49 = vor.u32 %v8486_v56, %v8485_v21  ;;  %v8497_v21 = vrot.slane %v21424_v55, 3  ;;  %v26145_v56 = vld [vmem:[#allocation25_spill] sm:$0xff]  ;;  %26160 = vst [vmem:[#allocation53_spill] sm:$0xff] %v21870_v47 }
  0x7b   : > { %18524 = vmatprep.mubr.msk.bf16.mxu0 %vm316_vm2, %v8219_v61  ;;  %v8229_v61 = vsel %vm2161_vm5, %v8226_v36, %v8228_v63  ;;  %v16456_v36 = vld [vmem:[%s25749_s1 + $0x38] sm:$0x3]  ;;  %v8502_v63 = vrot.slane %v26145_v56, 4  ;;  %v21845_v56 = vshrl.u32 %v21718_v7, 16 }
  0x7c   : > { %17693 = vmatmul.mubr.msk.bf16.gmra.mrb[4].mxu1 %vm316_vm2, %v21371_v29 }
  0x7d   : > { %17696 = vmatprep.mubr.msk.bf16.mxu1 %vm316_vm2, %v21388_v39  ;;  %v8503_v52 = vor.u32 %v8502_v63, %v8501_v59  ;;  %v21813_v59 = vld [vmem:[#allocation2] sm:$0xfe]  ;;  %v21818_v63 = vshrl.u32 %v21702_v22, 16 }
  0x82   : > { %18525 = vmatmul.mubr.msk.bf16.gmra.mrb[20].mxu0 %vm316_vm2, %v8221_v6  ;;  %v8488_v6 = vsel %vm2755_vm6, %v8484_v42, %v8487_v49  ;;  %v21795_v42 = vand.u32 %v16456_v36, %v21247_v4  ;;  %v26149_v36 = vld [vmem:[#allocation32_spill] sm:$0xff] }
  0x83   : > { %18528 = vmatprep.mubr.msk.bf16.mxu0 %vm316_vm2, %v8223_v38  ;;  %v8493_v38 = vrot.slane %v21397_v43, 3 }
  0x84   : > { %17697 = vmatmul.mubr.msk.bf16.gmra.mrb[8].mxu1 %vm316_vm2, %v21420_v53 }
  0x85   : > { %17700 = vmatprep.mubr.msk.bf16.mxu1 %vm316_vm2, %v21451_v13  ;;  %v8495_v9 = vor.u32 %v8494_v15, %v8493_v38  ;;  %v26148_v15 = vld [vmem:[#allocation29_spill] sm:$0xff] }
  0x87   : > { %v8496_v51 = vsel %vm2755_vm6, %v8491_v46, %v8495_v9 }
  0x8a   : > { %18529 = vmatmul.mubr.msk.bf16.gmra.mrb[24].mxu0 %vm316_vm2, %v8225_v19  ;;  %v8492_v19 = vsel %vm2755_vm6, %v8487_v49, %v8491_v46  ;;  %v8506_v46 = vrot.slane %v26148_v15, 4 }
  0x8b   : > { %18532 = vmatprep.mubr.msk.bf16.mxu0 %vm316_vm2, %v8227_v20  ;;  %v8498_v20 = vrot.slane %v21427_v57, 4  ;;  %v8525_v57 = vrot.slane %v21845_v56, 3 }
  0x8c   : > { %17701 = vmatmul.mubr.msk.bf16.gmra.mrb[12].mxu1 %vm316_vm2, %v21480_v35 }
  0x8d   : > { %17704 = vmatprep.mubr.msk.bf16.mxu1 %vm316_vm2, %v21510_v23  ;;  %v8499_v49 = vor.u32 %v8498_v20, %v8497_v21  ;;  %v26150_v21 = vld [vmem:[#allocation33_spill] sm:$0xff] }
  0x8e   : > { %v8510_v20 = vrot.slane %v26150_v21, 4  ;;  %v26154_v21 = vld [vmem:[#allocation38_spill] sm:$0xff] }
  0x8f   : > { %v8500_v5 = vsel %vm2755_vm6, %v8495_v9, %v8499_v49 }
  0x92   : > { %18533 = vmatmul.mubr.msk.bf16.gmra.mrb[28].mxu0 %vm316_vm2, %v8229_v61  ;;  %v26146_v61 = vld [vmem:[#allocation42_spill] sm:$0xff] }
  0x93   : > { %18538 = vmatprep.mubr.msk.bf16.mxu0 %vm316_vm2, %v8488_v6  ;;  %v26147_v6 = vld [vmem:[#allocation28_spill] sm:$0xff]  ;;  %26151 = vst [vmem:[#allocation42_spill] sm:$0xff] %v21818_v63 }
  0x94   : > { %17705 = vmatmul.mubr.msk.bf16.gmra.mrb[16].mxu1 %vm316_vm2, %v21560_v27  ;;  %v8505_v38 = vrot.slane %v26147_v6, 3 }
  0x95   : > { %17708 = vmatprep.mubr.msk.bf16.mxu1 %vm316_vm2, %v21578_v40 }
  0x9a   : > { %18539 = vmatmul.mubr.msk.bf16.vlgmr.msra.gmra.mrb[0].mxu0 %vm316_vm2, %v8492_v19  ;;  %v8509_v19 = vrot.slane %v26149_v36, 3  ;;  %v8514_v36 = vrot.slane %v26154_v21, 4  ;;  %v26157_v21 = vld [vmem:[#allocation9_spill] sm:$0xff] }
  0x9b   : > { %18571 = vmatpush3.bf16.msra.mxu0 %v21666_v60  ;;  %18542 = vmatprep.mubr.msk.bf16.mxu0 %vm316_vm2, %v8496_v51  ;;  %v8504_v60 = vsel %vm2755_vm6, %v8499_v49, %v8503_v52  ;;  %v8507_v51 = vor.u32 %v8506_v46, %v8505_v38  ;;  %v21821_v49 = vshll.u32 %v21702_v22, 16  ;;  %v26153_v46 = vld [vmem:[#allocation37_spill] sm:$0xff]  ;;  %26158 = vst [vmem:[#allocation9_spill] sm:$0xff] %v21845_v56 }
  0x9c   : > { %17709 = vmatmul.mubr.msk.bf16.gmra.mrb[20].mxu1 %vm316_vm2, %v26146_v61  ;;  %18604 = vmatprep.subr.bf16.mxu0 %v21795_v42  ;;  %v8511_v9 = vor.u32 %v8510_v20, %v8509_v19  ;;  %v8513_v48 = vrot.slane %v26153_v46, 3  ;;  %v8517_v20 = vrot.slane %v21818_v63, 3  ;;  %v21840_v46 = vshll.u32 %v21716_v32, 16 }
  0x9d   : > { %17712 = vmatprep.mubr.msk.bf16.mxu1 %vm316_vm2, %v21602_v31  ;;  %26152 = vst [vmem:[#allocation49_spill] sm:$0xff] %v21821_v49  ;;  %v8508_v38 = vsel %vm2755_vm6, %v8503_v52, %v8507_v51  ;;  %v8518_v15 = vrot.slane %v21821_v49, 4  ;;  %v21837_v52 = vshrl.u32 %v21716_v32, 16 }
  0x9e   : > { %v8512_v19 = vsel %vm2755_vm6, %v8507_v51, %v8511_v9  ;;  %26156 = vst [vmem:[#allocation51_spill] sm:$0xff] %v21840_v46  ;;  %v8522_v10 = vrot.slane %v21840_v46, 4 }
  0x9f   : > { %26155 = vst [vmem:[#allocation50_spill] sm:$0xff] %v21837_v52  ;;  %v8519_v51 = vor.u32 %v8518_v15, %v8517_v20  ;;  %v16048_v15 = vld [vmem:[%s25749_s1 + $0x8] sm:$0x3] }
  0xa2   : > { %18543 = vmatmul.mubr.msk.bf16.gmra.mrb[4].mxu0 %vm316_vm2, %v8500_v5  ;;  %v946_v5 = vrot.slane %v21813_v59, 1 }
  0xa3   : > { %18546 = vmatprep.mubr.msk.bf16.mxu0 %vm316_vm2, %v8504_v60  ;;  %v947_v60 = vrot.slane %v21331_v62, 1  ;;  %v8515_v62 = vor.u32 %v8514_v36, %v8513_v48  ;;  %v949_v48 = vrot.slane %v21357_v18, 1  ;;  %v951_v36 = vrot.slane %v21371_v29, 1 }
  0xa4   : > { %17713 = vmatmul.mubr.msk.bf16.gmra.mrb[24].mxu1 %vm316_vm2, %v21591_v12 }
  0xa5   : > { %17716 = vmatprep.mubr.msk.bf16.mxu1 %vm316_vm2, %v21346_v11  ;;  %v948_v6 = vsel %vm945_vm7, %v946_v5, %v947_v60  ;;  %v8516_v5 = vsel %vm2755_vm6, %v8511_v9, %v8515_v62  ;;  %v8520_v20 = vsel %vm2755_vm6, %v8515_v62, %v8519_v51  ;;  %v950_v18 = vsel %vm945_vm7, %v947_v60, %v949_v48 }
  0xa6   : > { %v952_v29 = vsel %vm945_vm7, %v949_v48, %v951_v36  ;;  %v21866_v9 = vand.u32 %v16048_v15, %v21247_v4  ;;  %v21873_v62 = vshll.u32 %v21735_v26, 16  ;;  %v21877_v60 = vshrl.u32 %v21737_v25, 16 }
  0xa7   : > { %v21880_v48 = vshll.u32 %v21737_v25, 16 }
  0xa8   : > { %26161 = vst [vmem:[#allocation54_spill] sm:$0xff] %v21873_v62  ;;  %26162 = vst [vmem:[#allocation55_spill] sm:$0xff] %v21877_v60  ;;  %v8530_v15 = vrot.slane %v21873_v62, 4 }
  0xa9   : > { %26163 = vst [vmem:[#allocation56_spill] sm:$0xff] %v21880_v48 }
  0xaa   : > { %18547 = vmatmul.mubr.msk.bf16.gmra.mrb[8].mxu0 %vm316_vm2, %v8508_v38  ;;  %v21848_v38 = vshll.u32 %v21718_v7, 16 }
  0xab   : > { %18550 = vmatprep.mubr.msk.bf16.mxu0 %vm316_vm2, %v8512_v19  ;;  %v8521_v19 = vrot.slane %v21837_v52, 3 }
  0xac   : > { %17717 = vmatmul.mubr.msk.bf16.gmra.mrb[28].mxu1 %vm316_vm2, %v26157_v21  ;;  %26159 = vst [vmem:[#allocation52_spill] sm:$0xff] %v21848_v38 }
  0xad   : > { %17722 = vmatprep.mubr.msk.bf16.mxu1 %vm316_vm2, %v948_v6  ;;  %v8526_v6 = vrot.slane %v21848_v38, 4  ;;  %v8523_v55 = vor.u32 %v8522_v10, %v8521_v19  ;;  %v953_v10 = vrot.slane %v21388_v39, 1  ;;  %v8529_v19 = vrot.slane %v21870_v47, 3 }
  0xae   : > { %v959_v47 = vrot.slane %v21480_v35, 1 }
  0xaf   : > { %v8527_v43 = vor.u32 %v8526_v6, %v8525_v57  ;;  %v8524_v57 = vsel %vm2755_vm6, %v8519_v51, %v8523_v55  ;;  %v8534_v6 = vrot.slane %v21880_v48, 4  ;;  %v954_v39 = vsel %vm945_vm7, %v951_v36, %v953_v10 }
  0xb0   : > { %v8531_v51 = vor.u32 %v8530_v15, %v8529_v19  ;;  %v21907_v36 = vshrl.u32 %v21751_v2, 16  ;;  %v250_v19 = vld [vmem:[%s21272_s4 + $0x1f8] sm:$0xff]  ;;  %v957_v15 = vrot.slane %v21451_v13, 1 }
  0xb2   : > { %18551 = vmatmul.mubr.msk.bf16.gmra.mrb[12].mxu0 %vm316_vm2, %v8516_v5  ;;  %v955_v5 = vrot.slane %v21420_v53, 1  ;;  %26166 = vst [vmem:[#allocation59_spill] sm:$0xff] %v21907_v36  ;;  %v8541_v13 = vrot.slane %v21907_v36, 3 }
  0xb3   : > { %18554 = vmatprep.mubr.msk.bf16.mxu0 %vm316_vm2, %v8520_v20  ;;  %v8528_v20 = vsel %vm2755_vm6, %v8523_v55, %v8527_v43  ;;  %v21901_v55 = vshll.u32 %v21749_v54, 16 }
  0xb4   : > { %17723 = vmatmul.mubr.msk.bf16.vlgmr.msra.gmra.mrb[0].mxu1 %vm316_vm2, %v950_v18  ;;  %v956_v53 = vsel %vm945_vm7, %v953_v10, %v955_v5  ;;  %v21898_v18 = vshrl.u32 %v21749_v54, 16 }
  0xb5   : > { %17755 = vmatpush3.bf16.msra.mxu1 %v21722_v3  ;;  %17726 = vmatprep.mubr.msk.bf16.mxu1 %vm316_vm2, %v952_v29  ;;  %v8533_v3 = vrot.slane %v21877_v60, 3  ;;  %26165 = vst [vmem:[#allocation58_spill] sm:$0xff] %v21901_v55  ;;  %v247_v29 = vld [vmem:[%s21272_s4 + $0x1e0] sm:$0xff]  ;;  %v248_v60 = vld [vmem:[%s21272_s4 + $0x1e8] sm:$0xff] }
  0xb6   : > { %17788 = vmatprep.subr.bf16.mxu1 %v21866_v9  ;;  %26164 = vst [vmem:[#allocation57_spill] sm:$0xff] %v21898_v18  ;;  %v303_v10 = vpack.c.bf16 %v248_v60, %v247_v29  ;;  %v958_v29 = vsel %vm945_vm7, %v955_v5, %v957_v15  ;;  %v961_v5 = vrot.slane %v21510_v23, 1 }
  0xb7   : > { %v8535_v48 = vor.u32 %v8534_v6, %v8533_v3  ;;  %v8532_v3 = vsel %vm2755_vm6, %v8527_v43, %v8531_v51  ;;  %v8537_v6 = vrot.slane %v21898_v18, 3  ;;  %v960_v43 = vsel %vm945_vm7, %v957_v15, %v959_v47  ;;  %v254_v18 = vld [vmem:[%s21272_s4 + $0x218] sm:$0xff] }
  0xb8   : > { %347 = vst.msk [vmem:[#allocation2 + $0xf0] sm:$0xff] %vm316_vm2, %v303_v10 }
  0xb9   : > { %v8536_v60 = vsel %vm2755_vm6, %v8531_v51, %v8535_v48 }
  0xba   : > { %18555 = vmatmul.mubr.msk.bf16.gmra.mrb[16].mxu0 %vm316_vm2, %v8524_v57  ;;  %v21910_v57 = vshll.u32 %v21751_v2, 16 }
  0xbb   : > { %18558 = vmatprep.mubr.msk.bf16.mxu0 %vm316_vm2, %v8528_v20  ;;  %v249_v20 = vld [vmem:[%s21272_s4 + $0x1f0] sm:$0xff] }
  0xbc   : > { %17727 = vmatmul.mubr.msk.bf16.gmra.mrb[4].mxu1 %vm316_vm2, %v954_v39  ;;  %26167 = vst [vmem:[#allocation60_spill] sm:$0xff] %v21910_v57  ;;  %v304_v62 = vpack.c.bf16 %v250_v19, %v249_v20  ;;  %v8538_v39 = vrot.slane %v21901_v55, 4  ;;  %v8542_v35 = vrot.slane %v21910_v57, 4  ;;  %v251_v20 = vld [vmem:[%s21272_s4 + $0x200] sm:$0xff]  ;;  %v252_v19 = vld [vmem:[%s21272_s4 + $0x208] sm:$0xff]  ;;  %v253_v55 = vld [vmem:[%s21272_s4 + $0x210] sm:$0xff] }
  0xbd   : > { %17730 = vmatprep.mubr.msk.bf16.mxu1 %vm316_vm2, %v956_v53  ;;  %v21925_v53 = vld [vmem:[#allocation2 + $0xe8] sm:$0xf]  ;;  %v305_v36 = vpack.c.bf16 %v252_v19, %v251_v20  ;;  %v306_v15 = vpack.c.bf16 %v254_v18, %v253_v55  ;;  %v965_v55 = vrot.slane %v21578_v40, 1  ;;  %v8808_v40 = vrot.slane %v21373_v30, 4 }
  0xbe   : > { %348 = vst.msk [vmem:[#allocation2 + $0xf8] sm:$0xff] %vm316_vm2, %v304_v62  ;;  %v8539_v10 = vor.u32 %v8538_v39, %v8537_v6  ;;  %v8546_v62 = vshrl.u32 %v21925_v53, 16  ;;  %v8549_v51 = vshll.u32 %v21925_v53, 16  ;;  %v8543_v57 = vor.u32 %v8542_v35, %v8541_v13 }
  0xbf   : > { %349 = vst.msk [vmem:[#allocation2 + $0x100] sm:$0xff] %vm316_vm2, %v305_v36  ;;  %350 = vst.msk [vmem:[#allocation2 + $0x108] sm:$0xff] %vm316_vm2, %v306_v15  ;;  %v962_v35 = vsel %vm945_vm7, %v959_v47, %v961_v5  ;;  %v967_v47 = vrot.slane %v26146_v61, 1  ;;  %v969_v61 = vrot.slane %v21602_v31, 1  ;;  %v971_v20 = vrot.slane %v21591_v12, 1 }
  0xc0   : > { %v8540_v6 = vsel %vm2755_vm6, %v8535_v48, %v8539_v10  ;;  %v8548_v39 = vrot.slane %v8546_v62, 3  ;;  %v8544_v13 = vsel %vm2755_vm6, %v8539_v10, %v8543_v57  ;;  %v8804_v48 = vrot.slane %v21346_v11, 4 }
  0xc1   : > { %v968_v62 = vsel %vm945_vm7, %v965_v55, %v967_v47  ;;  %v972_v30 = vsel %vm945_vm7, %v969_v61, %v971_v20  ;;  %v8810_v31 = vrot.slane %v21399_v44, 4  ;;  %v8812_v12 = vrot.slane %v21432_v58, 4 }
  0xc2   : > { %18559 = vmatmul.mubr.msk.bf16.gmra.mrb[20].mxu0 %vm316_vm2, %v8532_v3  ;;  %v963_v3 = vrot.slane %v21560_v27, 1 }
  0xc3   : > { %18562 = vmatprep.mubr.msk.bf16.mxu0 %vm316_vm2, %v8536_v60  ;;  %v8551_v60 = vrot.slane %v8549_v51, 4  ;;  %v8806_v51 = vrot.slane %v26157_v21, 4  ;;  %v8813_v44 = vsel %vm3157_vm8, %v8810_v31, %v8812_v12 }
  0xc4   : > { %17731 = vmatmul.mubr.msk.bf16.gmra.mrb[8].mxu1 %vm316_vm2, %v958_v29  ;;  %v8798_v29 = vld [vmem:[#allocation2 + $0x68] sm:$0xf0]  ;;  %v964_v23 = vsel %vm945_vm7, %v961_v5, %v963_v3  ;;  %v966_v10 = vsel %vm945_vm7, %v963_v3, %v965_v55  ;;  %v970_v3 = vsel %vm945_vm7, %v967_v47, %v969_v61  ;;  %v977_v55 = vrot.slane %v21685_v24, 1  ;;  %v26173_v24 = vld [vmem:[#allocation13_spill] sm:$0xff] }
  0xc5   : > { %17734 = vmatprep.mubr.msk.bf16.mxu1 %vm316_vm2, %v960_v43  ;;  %v8552_v27 = vor.u32 %v8551_v60, %v8548_v39  ;;  %v8803_v18 = vrot.slane %v8798_v29, 4  ;;  %v8807_v19 = vsel %vm3157_vm8, %v8804_v48, %v8806_v51  ;;  %v8809_v5 = vsel %vm3157_vm8, %v8806_v51, %v8808_v40  ;;  %v26170_v51 = vld [vmem:[#allocation12_spill] sm:$0xff] }
  0xc6   : > { %v975_v39 = vrot.slane %v26157_v21, 1  ;;  %v1228_v60 = vshrl.u32 %v21813_v59, 16 }
  0xc7   : > { %v8553_v36 = vsel %vm2755_vm6, %v8543_v57, %v8552_v27  ;;  %v8805_v43 = vsel %vm3157_vm8, %v8803_v18, %v8804_v48  ;;  %v16473_v57 = vld [vmem:[%s25749_s1 + $0x3a] sm:$0x3]  ;;  %v26168_v27 = vld [vmem:[#allocation8_spill] sm:$0xff]  ;;  %v26169_v18 = vld [vmem:[#allocation7_spill] sm:$0xff]  ;;  %v8816_v48 = vrot.slane %v21482_v37, 4 }
  0xc8   : > { %v21972_v15 = vand.u32 %v16473_v57, %v21247_v4  ;;  %v1230_v29 = vrot.slane %v1228_v60, 1  ;;  %v1236_v21 = vrot.slane %v26169_v18, 2  ;;  %v26172_v57 = vld [vmem:[#allocation16_spill] sm:$0xff]  ;;  %v26174_v60 = vld [vmem:[#allocation21_spill] sm:$0xff] }
  0xca   : > { %18563 = vmatmul.mubr.msk.bf16.gmra.mrb[24].mxu0 %vm316_vm2, %v8540_v6  ;;  %v973_v6 = vrot.slane %v21346_v11, 1  ;;  %v1235_v11 = vrot.slane %v26168_v27, 1 }
  0xcb   : > { %18566 = vmatprep.mubr.msk.bf16.mxu0 %vm316_vm2, %v8544_v13  ;;  %v8811_v13 = vsel %vm3157_vm8, %v8808_v40, %v8810_v31  ;;  %v1239_v40 = vrot.slane %v26170_v51, 1 }
  0xcc   : > { %17735 = vmatmul.mubr.msk.bf16.gmra.mrb[12].mxu1 %vm316_vm2, %v962_v35  ;;  %v974_v35 = vsel %vm945_vm7, %v971_v20, %v973_v6  ;;  %v976_v58 = vsel %vm945_vm7, %v973_v6, %v975_v39  ;;  %v1243_v20 = vrot.slane %v26172_v57, 1  ;;  %v16065_v6 = vld [vmem:[%s25749_s1 + $0xa] sm:$0x3] }
  0xcd   : > { %17738 = vmatprep.mubr.msk.bf16.mxu1 %vm316_vm2, %v964_v23 }
  0xd2   : > { %18567 = vmatmul.mubr.msk.bf16.gmra.mrb[28].mxu0 %vm316_vm2, %v8553_v36  ;;  %v1237_v36 = vor.u32 %v1236_v21, %v1235_v11  ;;  %v22034_v11 = vand.u32 %v16065_v6, %v21247_v4  ;;  %v8822_v21 = vrot.slane %v21716_v32, 4 }
  0xd3   : > { %18572 = vmatprep.mubr.msk.bf16.mxu0 %vm316_vm2, %v8805_v43 }
  0xd4   : > { %17739 = vmatmul.mubr.msk.bf16.gmra.mrb[16].mxu1 %vm316_vm2, %v966_v10 }
  0xd5   : > { %17742 = vmatprep.mubr.msk.bf16.mxu1 %vm316_vm2, %v968_v62  ;;  %v978_v62 = vsel %vm945_vm7, %v975_v39, %v977_v55 }
  0xda   : > { %18573 = vmatmul.mubr.msk.bf16.vlgmr.msra.gmra.mrb[0].mxu0 %vm316_vm2, %v8807_v19  ;;  %v1244_v19 = vrot.slane %v26173_v24, 2 }
  0xdb   : > { %18605 = vmatpush3.bf16.msra.mxu0 %v21795_v42  ;;  %18576 = vmatprep.mubr.msk.bf16.mxu0 %vm316_vm2, %v8809_v5  ;;  %v1231_v42 = vshll.u32 %v21813_v59, 16  ;;  %v8814_v59 = vrot.slane %v21453_v14, 4  ;;  %v26171_v14 = vld [vmem:[#allocation10_spill] sm:$0xff]  ;;  %v22012_v5 = vrot.slane %v21558_v8, 4 }
  0xdc   : > { %17743 = vmatmul.mubr.msk.bf16.gmra.mrb[20].mxu1 %vm316_vm2, %v970_v3  ;;  %18638 = vmatprep.subr.bf16.mxu0 %v21972_v15  ;;  %v1240_v61 = vrot.slane %v26171_v14, 2  ;;  %v8820_v3 = vrot.slane %v21702_v22, 4  ;;  %v1245_v31 = vor.u32 %v1244_v19, %v1243_v20  ;;  %v26175_v22 = vld [vmem:[#allocation18_spill] sm:$0xff]  ;;  %v8826_v19 = vrot.slane %v21735_v26, 4 }
  0xdd   : > { %17746 = vmatprep.mubr.msk.bf16.mxu1 %vm316_vm2, %v972_v30  ;;  %v1233_v23 = vrot.slane %v1231_v42, 2  ;;  %v8815_v43 = vsel %vm3157_vm8, %v8812_v12, %v8814_v59  ;;  %v8817_v10 = vsel %vm3157_vm8, %v8814_v59, %v8816_v48  ;;  %v8819_v12 = vsel %vm3157_vm8, %v8816_v48, %v22012_v5 }
  0xde   : > { %v1241_v30 = vor.u32 %v1240_v61, %v1239_v40  ;;  %v22024_v39 = vsel %vm3157_vm8, %v22012_v5, %v8820_v3  ;;  %v1247_v42 = vrot.slane %v26174_v60, 1  ;;  %v8824_v59 = vrot.slane %v21718_v7, 4  ;;  %v26180_v40 = vld [vmem:[#allocation34_spill] sm:$0xff] }
  0xdf   : > { %v1234_v47 = vor.u32 %v1233_v23, %v1230_v29  ;;  %v26177_v29 = vld [vmem:[#allocation23_spill] sm:$0xff]  ;;  %v1259_v61 = vrot.slane %v26180_v40, 1 }
  0xe0   : > { %v1242_v8 = vsel %vm1226_vm9, %v1237_v36, %v1241_v30  ;;  %v1252_v23 = vrot.slane %v26177_v29, 2 }
  0xe1   : > { %v1238_v37 = vsel %vm1226_vm9, %v1234_v47, %v1237_v36  ;;  %v22045_v47 = vsel %vm3157_vm8, %v8820_v3, %v8822_v21  ;;  %v22048_v36 = vsel %vm3157_vm8, %v8822_v21, %v8824_v59  ;;  %v8828_v3 = vrot.slane %v21737_v25, 4  ;;  %v26185_v21 = vld [vmem:[#allocation39_spill] sm:$0xff] }
  0xe2   : > { %18577 = vmatmul.mubr.msk.bf16.gmra.mrb[4].mxu0 %vm316_vm2, %v8811_v13  ;;  %v1248_v13 = vrot.slane %v26175_v22, 2 }
  0xe3   : > { %18580 = vmatprep.mubr.msk.bf16.mxu0 %vm316_vm2, %v8813_v44  ;;  %v1246_v44 = vsel %vm1226_vm9, %v1241_v30, %v1245_v31  ;;  %v22068_v6 = vsel %vm3157_vm8, %v8826_v19, %v8828_v3 }
  0xe4   : > { %17747 = vmatmul.mubr.msk.bf16.gmra.mrb[24].mxu1 %vm316_vm2, %v974_v35  ;;  %v26176_v35 = vld [vmem:[#allocation26_spill] sm:$0xff]  ;;  %v1249_v48 = vor.u32 %v1248_v13, %v1247_v42  ;;  %v26182_v42 = vld [vmem:[#allocation36_spill] sm:$0xff] }
  0xe5   : > { %17750 = vmatprep.mubr.msk.bf16.mxu1 %vm316_vm2, %v976_v58  ;;  %v1251_v58 = vrot.slane %v26176_v35, 1  ;;  %v1263_v13 = vrot.slane %v26182_v42, 1 }
  0xe6   : > { %v1250_v32 = vsel %vm1226_vm9, %v1245_v31, %v1249_v48 }
  0xe7   : > { %v1253_v55 = vor.u32 %v1252_v23, %v1251_v58  ;;  %v26184_v58 = vld [vmem:[#allocation40_spill] sm:$0xff] }
  0xe8   : > { %v1267_v23 = vrot.slane %v26184_v58, 1 }
  0xea   : > { %18581 = vmatmul.mubr.msk.bf16.gmra.mrb[8].mxu0 %vm316_vm2, %v8815_v43  ;;  %v26178_v43 = vld [vmem:[#allocation30_spill] sm:$0xff] }
  0xeb   : > { %18584 = vmatprep.mubr.msk.bf16.mxu0 %vm316_vm2, %v8817_v10  ;;  %v1255_v10 = vrot.slane %v26178_v43, 1 }
  0xec   : > { %17751 = vmatmul.mubr.msk.bf16.gmra.mrb[28].mxu1 %vm316_vm2, %v978_v62  ;;  %v26179_v62 = vld [vmem:[#allocation27_spill] sm:$0xff] }
  0xed   : > { %17756 = vmatprep.mubr.msk.bf16.mxu1 %vm316_vm2, %v1238_v37  ;;  %v1256_v7 = vrot.slane %v26179_v62, 2  ;;  %v26181_v37 = vld [vmem:[#allocation31_spill] sm:$0xff] }
  0xee   : > { %v1260_v20 = vrot.slane %v26181_v37, 2 }
  0xef   : > { %v1257_v30 = vor.u32 %v1256_v7, %v1255_v10 }
  0xf0   : > { %v1261_v31 = vor.u32 %v1260_v20, %v1259_v61  ;;  %v22094_v20 = vld [vmem:[#allocation2 + $0x88] sm:$0xf0] }
  0xf2   : > { %18585 = vmatmul.mubr.msk.bf16.gmra.mrb[12].mxu0 %vm316_vm2, %v8819_v12  ;;  %v22065_v12 = vsel %vm3157_vm8, %v8824_v59, %v8826_v19  ;;  %v1262_v25 = vsel %vm1226_vm9, %v1257_v30, %v1261_v31  ;;  %v8830_v59 = vrot.slane %v21749_v54, 4  ;;  %v22096_v54 = vld [vmem:[#allocation2 + $0x90] sm:$0xff] }
  0xf3   : > { %18588 = vmatprep.mubr.msk.bf16.mxu0 %vm316_vm2, %v22024_v39  ;;  %v26186_v19 = vld [vmem:[#allocation41_spill] sm:$0xff] }
  0xf4   : > { %17757 = vmatmul.mubr.msk.bf16.vlgmr.msra.gmra.mrb[0].mxu1 %vm316_vm2, %v1242_v8  ;;  %v1258_v8 = vsel %vm1226_vm9, %v1253_v55, %v1257_v30  ;;  %v22087_v7 = vsel %vm3157_vm8, %v8828_v3, %v8830_v59  ;;  %v1272_v30 = vrot.slane %v26186_v19, 2 }
  0xf5   : > { %17789 = vmatpush3.bf16.msra.mxu1 %v21866_v9  ;;  %17760 = vmatprep.mubr.msk.bf16.mxu1 %vm316_vm2, %v1246_v44  ;;  %v1254_v9 = vsel %vm1226_vm9, %v1249_v48, %v1253_v55  ;;  %v26183_v44 = vld [vmem:[#allocation35_spill] sm:$0xff]  ;;  %v1268_v48 = vrot.slane %v26185_v21, 2  ;;  %v22083_v55 = vrot.slane %v21751_v2, 4  ;;  %v1271_v2 = vrot.slane %v21597_v45, 1 }
  0xf6   : > { %17822 = vmatprep.subr.bf16.mxu1 %v22034_v11  ;;  %v1264_v26 = vrot.slane %v26183_v44, 2  ;;  %v1280_v45 = vrot.slane %v21623_v50, 2 }
  0xf7   : > { %v1269_v10 = vor.u32 %v1268_v48, %v1267_v23  ;;  %v9117_v23 = vrot.slane %v22096_v54, 4  ;;  %v1273_v48 = vor.u32 %v1272_v30, %v1271_v2  ;;  %v1283_v30 = vrot.slane %v21670_v41, 1 }
  0xf8   : > { %v1288_v41 = vrot.slane %v21355_v17, 2 }
  0xf9   : > { %v1274_v19 = vsel %vm1226_vm9, %v1269_v10, %v1273_v48 }
  0xfa   : > { %18589 = vmatmul.mubr.msk.bf16.gmra.mrb[16].mxu0 %vm316_vm2, %v22045_v47 }
  0xfb   : > { %18592 = vmatprep.mubr.msk.bf16.mxu0 %vm316_vm2, %v22048_v36 }
  0xfc   : > { %17761 = vmatmul.mubr.msk.bf16.gmra.mrb[4].mxu1 %vm316_vm2, %v1250_v32  ;;  %v1265_v32 = vor.u32 %v1264_v26, %v1263_v13  ;;  %v26187_v13 = vld [vmem:[#allocation44_spill] sm:$0xff] }
  0xfd   : > { %17764 = vmatprep.mubr.msk.bf16.mxu1 %vm316_vm2, %v1254_v9  ;;  %v22091_v9 = vsel %vm3157_vm8, %v8830_v59, %v22083_v55  ;;  %v1276_v26 = vrot.slane %v26187_v13, 2 }
  0xfe   : > { %v1266_v61 = vsel %vm1226_vm9, %v1261_v31, %v1265_v32  ;;  %v1270_v3 = vsel %vm1226_vm9, %v1265_v32, %v1269_v10  ;;  %v8834_v31 = vrot.slane %v21925_v53, 4  ;;  %v22118_v53 = vld [vmem:[#allocation2 + $0xa0] sm:$0xff] }
  0xff   : > { %v9121_v10 = vrot.slane %v22118_v53, 4 }
 0x100   : > { %v8835_v32 = vsel %vm3157_vm8, %v22083_v55, %v8834_v31  ;;  %v16490_v31 = vld [vmem:[%s25749_s1 + $0x3c] sm:$0x3] }
 0x102   : > { %18593 = vmatmul.mubr.msk.bf16.gmra.mrb[20].mxu0 %vm316_vm2, %v22065_v12 }
 0x103   : > { %18596 = vmatprep.mubr.msk.bf16.mxu0 %vm316_vm2, %v22068_v6 }
 0x104   : > { %17765 = vmatmul.mubr.msk.bf16.gmra.mrb[8].mxu1 %vm316_vm2, %v1258_v8  ;;  %v1275_v8 = vrot.slane %v21620_v0, 1  ;;  %v22115_v0 = vld [vmem:[#allocation2 + $0x98] sm:$0xff] }
 0x105   : > { %17768 = vmatprep.mubr.msk.bf16.mxu1 %vm316_vm2, %v1262_v25  ;;  %v9116_v25 = vrot.slane %v22094_v20, 4 }
 0x106   : > { %v1277_v59 = vor.u32 %v1276_v26, %v1275_v8  ;;  %v9119_v8 = vrot.slane %v22115_v0, 4 }
 0x107   : > { %v9118_v13 = vsel %vm3157_vm8, %v9116_v25, %v9117_v23 }
 0x108   : > { %v1278_v2 = vsel %vm1226_vm9, %v1273_v48, %v1277_v59  ;;  %v9120_v48 = vsel %vm3157_vm8, %v9117_v23, %v9119_v8  ;;  %v22146_v23 = vld [vmem:[#allocation2 + $0x80] sm:$0x3] }
 0x109   : > { %v1296_v17 = vshrl.u32 %v22146_v23, 16 }
 0x10a   : > { %18597 = vmatmul.mubr.msk.bf16.gmra.mrb[24].mxu0 %vm316_vm2, %v22087_v7 }
 0x10b   : > { %18600 = vmatprep.mubr.msk.bf16.mxu0 %vm316_vm2, %v22091_v9 }
 0x10c   : > { %17769 = vmatmul.mubr.msk.bf16.gmra.mrb[12].mxu1 %vm316_vm2, %v1266_v61  ;;  %v1279_v61 = vrot.slane %v21637_v33, 1 }
 0x10d   : > { %17772 = vmatprep.mubr.msk.bf16.mxu1 %vm316_vm2, %v1270_v3  ;;  %v1284_v3 = vrot.slane %v21640_v1, 2 }
 0x10e   : > { %v1281_v26 = vor.u32 %v1280_v45, %v1279_v61  ;;  %v1291_v61 = vrot.slane %v21369_v28, 1  ;;  %v1299_v28 = vshll.u32 %v22146_v23, 16 }
 0x10f   : > { %v1285_v25 = vor.u32 %v1284_v3, %v1283_v30  ;;  %v1298_v30 = vrot.slane %v1296_v17, 1  ;;  %v22171_v3 = vld [vmem:[#allocation2] sm:$0xfc] }
 0x110   : > { %v1282_v1 = vsel %vm1226_vm9, %v1277_v59, %v1281_v26 }
 0x111   : > { %v1286_v45 = vsel %vm1226_vm9, %v1281_v26, %v1285_v25 }
 0x112   : > { %18601 = vmatmul.mubr.msk.bf16.gmra.mrb[28].mxu0 %vm316_vm2, %v8835_v32  ;;  %v9122_v32 = vsel %vm3157_vm8, %v9119_v8, %v9121_v10  ;;  %v1554_v8 = vrot.slane %v22171_v3, 2 }
 0x113   : > { %18606 = vmatprep.mubr.msk.bf16.mxu0 %vm316_vm2, %v9118_v13  ;;  %v22137_v13 = vand.u32 %v16490_v31, %v21247_v4 }
 0x114   : > { %17773 = vmatmul.mubr.msk.bf16.gmra.mrb[16].mxu1 %vm316_vm2, %v1274_v19  ;;  %v1287_v19 = vrot.slane %v21352_v16, 1 }
 0x115   : > { %17776 = vmatprep.mubr.msk.bf16.mxu1 %vm316_vm2, %v1278_v2  ;;  %v1292_v2 = vrot.slane %v21379_v34, 2  ;;  %v9124_v34 = vsel %vm3157_vm8, %v9121_v10, %v22012_v5  ;;  %v22177_v10 = vld [vmem:[#allocation2 + $0x8] sm:$0xff] }
 0x116   : > { %v22153_v16 = vor.u32 %v1288_v41, %v1287_v19  ;;  %v1555_v26 = vrot.slane %v22177_v10, 2 }
 0x117   : > { %v22157_v59 = vor.u32 %v1292_v2, %v1291_v61  ;;  %v22210_v2 = vld [vmem:[#allocation2 + $0x20] sm:$0xff] }
 0x118   : > { %26188 = vst [vmem:[#allocation8_spill] sm:$0xff] %v22153_v16  ;;  %v1561_v17 = vrot.slane %v22210_v2, 2 }
 0x119   : > { %26189 = vst [vmem:[#allocation7_spill] sm:$0xff] %v22157_v59  ;;  %v22167_v41 = vsel %vm1226_vm9, %v22153_v16, %v22157_v59 }
 0x11a   : > { %18607 = vmatmul.mubr.msk.bf16.vlgmr.msra.gmra.mrb[0].mxu0 %vm316_vm2, %v9120_v48  ;;  %26190 = vst [vmem:[#allocation12_spill] sm:$0xff] %v22167_v41 }
 0x11b   : > { %18639 = vmatpush3.bf16.msra.mxu0 %v21972_v15  ;;  %18610 = vmatprep.mubr.msk.bf16.mxu0 %vm316_vm2, %v9122_v32  ;;  %v1290_v15 = vsel %vm1226_vm9, %v1285_v25, %v22153_v16  ;;  %v22189_v25 = vld [vmem:[#allocation2 + $0x10] sm:$0xff]  ;;  %v22192_v32 = vld [vmem:[#allocation2 + $0x18] sm:$0xff] }
 0x11c   : > { %17777 = vmatmul.mubr.msk.bf16.gmra.mrb[20].mxu1 %vm316_vm2, %v1282_v1  ;;  %18672 = vmatprep.subr.bf16.mxu0 %v22137_v13  ;;  %v1301_v1 = vrot.slane %v1299_v28, 2  ;;  %v1557_v48 = vrot.slane %v22189_v25, 2  ;;  %v1559_v19 = vrot.slane %v22192_v32, 2  ;;  %v22213_v28 = vld [vmem:[#allocation2 + $0x28] sm:$0xff] }
 0x11d   : > { %17780 = vmatprep.mubr.msk.bf16.mxu1 %vm316_vm2, %v1286_v45 }
 0x11e   : > { %v1302_v5 = vor.u32 %v1301_v1, %v1298_v30  ;;  %v1558_v45 = vsel %vm1553_vm10, %v1555_v26, %v1557_v48 }
 0x120   : > { %v1303_v31 = vsel %vm1226_vm9, %v22157_v59, %v1302_v5  ;;  %v22231_v5 = vld [vmem:[#allocation2 + $0x30] sm:$0xff] }
 0x122   : > { %18611 = vmatmul.mubr.msk.bf16.gmra.mrb[4].mxu0 %vm316_vm2, %v9124_v34  ;;  %v22217_v34 = vld [vmem:[#allocation2 + $0xe8] sm:$0xff] }
 0x123   : > { %18614 = vmatprep.mubr.msk.bf16.mxu0 %vm316_vm2, %v22024_v39  ;;  %v1556_v39 = vsel %vm1553_vm10, %v1554_v8, %v1555_v26  ;;  %v9139_v30 = vrot.slane %v22217_v34, 4  ;;  %v1565_v8 = vrot.slane %v22231_v5, 2  ;;  %v22234_v26 = vld [vmem:[#allocation2 + $0x38] sm:$0xff] }
 0x124   : > { %17781 = vmatmul.mubr.msk.bf16.gmra.mrb[24].mxu1 %vm316_vm2, %v1290_v15  ;;  %v22220_v15 = vld [vmem:[#allocation2 + $0xf0] sm:$0xff]  ;;  %26191 = vst [vmem:[#allocation10_spill] sm:$0xff] %v22234_v26 }
 0x125   : > { %17784 = vmatprep.mubr.msk.bf16.mxu1 %vm316_vm2, %v22167_v41  ;;  %v9141_v1 = vrot.slane %v22220_v15, 4 }
 0x12a   : > { %18615 = vmatmul.mubr.msk.bf16.gmra.mrb[8].mxu0 %vm316_vm2, %v22045_v47  ;;  %v16082_v47 = vld [vmem:[%s25749_s1 + $0xc] sm:$0x3] }
 0x12b   : > { %18618 = vmatprep.mubr.msk.bf16.mxu0 %vm316_vm2, %v22048_v36  ;;  %v1560_v36 = vsel %vm1553_vm10, %v1557_v48, %v1559_v19  ;;  %v22203_v61 = vand.u32 %v16082_v47, %v21247_v4  ;;  %v22242_v48 = vld [vmem:[#allocation2 + $0x100] sm:$0xff] }
 0x12c   : > { %17785 = vmatmul.mubr.msk.bf16.gmra.mrb[28].mxu1 %vm316_vm2, %v1303_v31  ;;  %v9140_v31 = vsel %vm3157_vm8, %v22083_v55, %v9139_v30  ;;  %v9397_v55 = vshrl.u32 %v22094_v20, 16 }
 0x12d   : > { %17790 = vmatprep.mubr.msk.bf16.mxu1 %vm316_vm2, %v1556_v39  ;;  %v22240_v39 = vld [vmem:[#allocation2 + $0xf8] sm:$0xff] }
 0x12e   : > { %v9399_v41 = vrot.slane %v9397_v55, 4 }
 0x132   : > { %18619 = vmatmul.mubr.msk.bf16.gmra.mrb[12].mxu0 %vm316_vm2, %v22065_v12  ;;  %v1563_v12 = vrot.slane %v22213_v28, 2 }
 0x133   : > { %18622 = vmatprep.mubr.msk.bf16.mxu0 %vm316_vm2, %v22068_v6  ;;  %v1562_v6 = vsel %vm1553_vm10, %v1559_v19, %v1561_v17 }
 0x134   : > { %17791 = vmatmul.mubr.msk.bf16.vlgmr.msra.gmra.mrb[0].mxu1 %vm316_vm2, %v1558_v45  ;;  %v1566_v19 = vsel %vm1553_vm10, %v1563_v12, %v1565_v8  ;;  %v9143_v45 = vrot.slane %v22240_v39, 4 }
 0x135   : > { %17823 = vmatpush3.bf16.msra.mxu1 %v22034_v11  ;;  %17794 = vmatprep.mubr.msk.bf16.mxu1 %vm316_vm2, %v1560_v36  ;;  %v1564_v11 = vsel %vm1553_vm10, %v1561_v17, %v1563_v12  ;;  %v9145_v36 = vrot.slane %v22242_v48, 4  ;;  %v9400_v17 = vshll.u32 %v22094_v20, 16  ;;  %v22257_v12 = vshll.u32 %v22096_v54, 16 }
 0x136   : > { %17856 = vmatprep.subr.bf16.mxu1 %v22203_v61 }
 0x137   : > { %26193 = vst [vmem:[#allocation13_spill] sm:$0xff] %v22257_v12  ;;  %v9146_v20 = vsel %vm3157_vm8, %v9143_v45, %v9145_v36  ;;  %v9402_v59 = vrot.slane %v9400_v17, 5 }
 0x139   : > { %v9403_v55 = vor.u32 %v9402_v59, %v9399_v41 }
 0x13a   : > { %18623 = vmatmul.mubr.msk.bf16.gmra.mrb[16].mxu0 %vm316_vm2, %v22087_v7  ;;  %v1567_v7 = vrot.slane %v22234_v26, 2  ;;  %v9410_v26 = vrot.slane %v22257_v12, 5  ;;  %v22282_v12 = vshrl.u32 %v22118_v53, 16 }
 0x13b   : > { %18626 = vmatprep.mubr.msk.bf16.mxu0 %vm316_vm2, %v22091_v9  ;;  %v9142_v9 = vsel %vm3157_vm8, %v9139_v30, %v9141_v1 }
 0x13c   : > { %17795 = vmatmul.mubr.msk.bf16.gmra.mrb[4].mxu1 %vm316_vm2, %v1562_v6  ;;  %v1568_v47 = vsel %vm1553_vm10, %v1565_v8, %v1567_v7  ;;  %v22254_v6 = vshrl.u32 %v22096_v54, 16  ;;  %v22263_v8 = vld [vmem:[#allocation2 + $0x48] sm:$0xff]  ;;  %26197 = vst [vmem:[#allocation23_spill] sm:$0xff] %v22282_v12 }
 0x13d   : > { %17798 = vmatprep.mubr.msk.bf16.mxu1 %vm316_vm2, %v1564_v11  ;;  %v22260_v11 = vld [vmem:[#allocation2 + $0x40] sm:$0xff]  ;;  %26195 = vst [vmem:[#allocation18_spill] sm:$0xff] %v22263_v8 }
 0x13e   : > { %26192 = vst [vmem:[#allocation16_spill] sm:$0xff] %v22254_v6  ;;  %26194 = vst [vmem:[#allocation21_spill] sm:$0xff] %v22260_v11  ;;  %v1569_v30 = vrot.slane %v22260_v11, 2  ;;  %v9407_v16 = vrot.slane %v22254_v6, 4 }
 0x140   : > { %v9411_v17 = vor.u32 %v9410_v26, %v9407_v16 }
 0x142   : > { %18627 = vmatmul.mubr.msk.bf16.gmra.mrb[20].mxu0 %vm316_vm2, %v9140_v31  ;;  %v1571_v31 = vrot.slane %v22263_v8, 2  ;;  %v9412_v26 = vsel %vm3438_vm11, %v9403_v55, %v9411_v17 }
 0x143   : > { %18630 = vmatprep.mubr.msk.bf16.mxu0 %vm316_vm2, %v9142_v9  ;;  %v9144_v9 = vsel %vm3157_vm8, %v9141_v1, %v9143_v45  ;;  %v22275_v1 = vshrl.u32 %v22115_v0, 16  ;;  %v22278_v45 = vshll.u32 %v22115_v0, 16 }
 0x144   : > { %17799 = vmatmul.mubr.msk.bf16.gmra.mrb[8].mxu1 %vm316_vm2, %v1566_v19  ;;  %v9096_v19 = vld [vmem:[#allocation2 + $0x108] sm:$0xf]  ;;  %v1572_v11 = vsel %vm1553_vm10, %v1569_v30, %v1571_v31 }
 0x145   : > { %17802 = vmatprep.mubr.msk.bf16.mxu1 %vm316_vm2, %v1568_v47  ;;  %v1570_v47 = vsel %vm1553_vm10, %v1567_v7, %v1569_v30  ;;  %v9147_v8 = vrot.slane %v9096_v19, 4  ;;  %26196 = vst [vmem:[#allocation26_spill] sm:$0xff] %v22278_v45  ;;  %v22285_v7 = vshll.u32 %v22118_v53, 16  ;;  %v22288_v30 = vld [vmem:[#allocation2 + $0x50] sm:$0xff]  ;;  %v9416_v16 = vrot.slane %v22275_v1, 4 }
 0x146   : > { %26199 = vst [vmem:[#allocation27_spill] sm:$0xff] %v22288_v30  ;;  %v9419_v41 = vrot.slane %v22278_v45, 5 }
 0x147   : > { %26198 = vst [vmem:[#allocation30_spill] sm:$0xff] %v22285_v7  ;;  %v9148_v59 = vsel %vm3157_vm8, %v9145_v36, %v9147_v8  ;;  %v22304_v36 = vld [vmem:[#allocation2 + $0xa8] sm:$0xff] }
 0x148   : > { %v22307_v8 = vshrl.u32 %v22304_v36, 16  ;;  %v22310_v55 = vshll.u32 %v22304_v36, 16 }
 0x14a   : > { %18631 = vmatmul.mubr.msk.bf16.gmra.mrb[24].mxu0 %vm316_vm2, %v9144_v9  ;;  %v1573_v9 = vrot.slane %v22288_v30, 2 }
 0x14b   : > { %18634 = vmatprep.mubr.msk.bf16.mxu0 %vm316_vm2, %v9146_v20  ;;  %v22291_v20 = vld [vmem:[#allocation2 + $0x58] sm:$0xff] }
 0x14c   : > { %17803 = vmatmul.mubr.msk.bf16.gmra.mrb[12].mxu1 %vm316_vm2, %v1570_v47  ;;  %26200 = vst [vmem:[#allocation34_spill] sm:$0xff] %v22291_v20  ;;  %v1575_v19 = vrot.slane %v22291_v20, 2  ;;  %v9425_v47 = vrot.slane %v22282_v12, 4  ;;  %v1574_v6 = vsel %vm1553_vm10, %v1571_v31, %v1573_v9  ;;  %v9420_v20 = vor.u32 %v9419_v41, %v9416_v16  ;;  %v22314_v31 = vld [vmem:[#allocation2 + $0x60] sm:$0xff]  ;;  %v22320_v16 = vld [vmem:[#allocation2 + $0x68] sm:$0xff] }
 0x14d   : > { %17806 = vmatprep.mubr.msk.bf16.mxu1 %vm316_vm2, %v1572_v11  ;;  %v9428_v11 = vrot.slane %v22285_v7, 5  ;;  %26201 = vst [vmem:[#allocation31_spill] sm:$0xff] %v22314_v31  ;;  %26202 = vst [vmem:[#allocation36_spill] sm:$0xff] %v22320_v16  ;;  %v1579_v41 = vrot.slane %v22320_v16, 2  ;;  %v9434_v12 = vrot.slane %v22307_v8, 4 }
 0x14e   : > { %v1576_v30 = vsel %vm1553_vm10, %v1573_v9, %v1575_v19  ;;  %v1577_v9 = vrot.slane %v22314_v31, 2 }
 0x14f   : > { %v9429_v7 = vor.u32 %v9428_v11, %v9425_v47  ;;  %v9443_v47 = vrot.slane %v21818_v63, 4  ;;  %v9446_v11 = vrot.slane %v21821_v49, 5  ;;  %v22343_v49 = vld [vmem:[#allocation2 + $0x78] sm:$0xff]  ;;  %v26207_v63 = vld [vmem:[#allocation55_spill] sm:$0xff] }
 0x150   : > { %v1578_v45 = vsel %vm1553_vm10, %v1575_v19, %v1577_v9  ;;  %v1580_v16 = vsel %vm1553_vm10, %v1577_v9, %v1579_v41  ;;  %26204 = vst [vmem:[#allocation40_spill] sm:$0xff] %v22343_v49  ;;  %v1583_v9 = vrot.slane %v22343_v49, 2 }
 0x152   : > { %18635 = vmatmul.mubr.msk.bf16.gmra.mrb[28].mxu0 %vm316_vm2, %v9148_v59  ;;  %v16507_v59 = vld [vmem:[%s25749_s1 + $0x3e] sm:$0x3] }
 0x153   : > { %18640 = vmatprep.mubr.msk.bf16.mxu0 %vm316_vm2, %v9412_v26  ;;  %v9421_v26 = vsel %vm3438_vm11, %v9411_v17, %v9420_v20  ;;  %v22330_v31 = vand.u32 %v16507_v59, %v21247_v4  ;;  %v22340_v59 = vld [vmem:[#allocation2 + $0x70] sm:$0xff] }
 0x154   : > { %17807 = vmatmul.mubr.msk.bf16.gmra.mrb[16].mxu1 %vm316_vm2, %v1574_v6  ;;  %v9437_v6 = vrot.slane %v22310_v55, 5  ;;  %26203 = vst [vmem:[#allocation35_spill] sm:$0xff] %v22340_v59  ;;  %v1581_v19 = vrot.slane %v22340_v59, 2 }
 0x155   : > { %17810 = vmatprep.mubr.msk.bf16.mxu1 %vm316_vm2, %v1576_v30  ;;  %v9430_v30 = vsel %vm3438_vm11, %v9420_v20, %v9429_v7  ;;  %v9447_v20 = vor.u32 %v9446_v11, %v9443_v47  ;;  %v9464_v47 = vrot.slane %v21848_v38, 5 }
 0x156   : > { %v9438_v17 = vor.u32 %v9437_v6, %v9434_v12  ;;  %v9455_v6 = vrot.slane %v21840_v46, 5  ;;  %v1582_v11 = vsel %vm1553_vm10, %v1579_v41, %v1581_v19  ;;  %v1584_v49 = vsel %vm1553_vm10, %v1581_v19, %v1583_v9 }
 0x157   : > { %v1585_v41 = vrot.slane %v22146_v23, 2  ;;  %v1848_v23 = vrot.slane %v26171_v14, 3 }
 0x158   : > { %v9439_v12 = vsel %vm3438_vm11, %v9429_v7, %v9438_v17  ;;  %v1843_v7 = vrot.slane %v26168_v27, 2 }
 0x15a   : > { %18641 = vmatmul.mubr.msk.bf16.vlgmr.msra.gmra.mrb[0].mxu0 %vm316_vm2, %v9421_v26  ;;  %v1839_v26 = vshll.u32 %v22171_v3, 16 }
 0x15b   : > { %18673 = vmatpush3.bf16.msra.mxu0 %v22137_v13  ;;  %18644 = vmatprep.mubr.msk.bf16.mxu0 %vm316_vm2, %v9430_v30  ;;  %v1836_v13 = vshrl.u32 %v22171_v3, 16  ;;  %v9461_v30 = vrot.slane %v21845_v56, 4  ;;  %v26206_v56 = vld [vmem:[#allocation54_spill] sm:$0xff] }
 0x15c   : > { %17811 = vmatmul.mubr.msk.bf16.gmra.mrb[20].mxu1 %vm316_vm2, %v1578_v45  ;;  %18706 = vmatprep.subr.bf16.mxu0 %v22330_v31  ;;  %v9452_v45 = vrot.slane %v21837_v52, 4  ;;  %v1841_v3 = vrot.slane %v1839_v26, 3  ;;  %v1844_v52 = vrot.slane %v26169_v18, 3  ;;  %v9473_v27 = vrot.slane %v26206_v56, 5 }
 0x15d   : > { %17814 = vmatprep.mubr.msk.bf16.mxu1 %vm316_vm2, %v1580_v16  ;;  %v9448_v16 = vsel %vm3438_vm11, %v9438_v17, %v9447_v20  ;;  %v1838_v59 = vrot.slane %v1836_v13, 2  ;;  %v9465_v17 = vor.u32 %v9464_v47, %v9461_v30  ;;  %v26205_v13 = vld [vmem:[#allocation53_spill] sm:$0xff]  ;;  %v1586_v30 = vsel %vm1553_vm10, %v1583_v9, %v1585_v41  ;;  %v26211_v41 = vld [vmem:[#allocation59_spill] sm:$0xff] }
 0x15e   : > { %v9456_v46 = vor.u32 %v9455_v6, %v9452_v45  ;;  %v1845_v19 = vor.u32 %v1844_v52, %v1843_v7  ;;  %v9470_v26 = vrot.slane %v26205_v13, 4  ;;  %v26208_v45 = vld [vmem:[#allocation56_spill] sm:$0xff]  ;;  %v26210_v7 = vld [vmem:[#allocation58_spill] sm:$0xff] }
 0x15f   : > { %v1842_v38 = vor.u32 %v1841_v3, %v1838_v59  ;;  %v9482_v6 = vrot.slane %v26208_v45, 5  ;;  %v1852_v59 = vrot.slane %v26173_v24, 3 }
 0x160   : > { %v9466_v18 = vsel %vm3438_vm11, %v9456_v46, %v9465_v17 }
 0x161   : > { %v1846_v52 = vsel %vm1834_vm4, %v1842_v38, %v1845_v19  ;;  %v9491_v38 = vrot.slane %v26210_v7, 5 }
 0x162   : > { %18645 = vmatmul.mubr.msk.bf16.gmra.mrb[4].mxu0 %vm316_vm2, %v9439_v12  ;;  %v9457_v12 = vsel %vm3438_vm11, %v9447_v20, %v9456_v46  ;;  %v1851_v20 = vrot.slane %v26172_v57, 2  ;;  %v9474_v46 = vor.u32 %v9473_v27, %v9470_v26  ;;  %v16099_v57 = vld [vmem:[%s25749_s1 + $0xe] sm:$0x3] }
 0x163   : > { %18648 = vmatprep.mubr.msk.bf16.mxu0 %vm316_vm2, %v9448_v16  ;;  %v9479_v16 = vrot.slane %v26207_v63, 4  ;;  %v26212_v26 = vld [vmem:[#allocation60_spill] sm:$0xff] }
 0x164   : > { %17815 = vmatmul.mubr.msk.bf16.gmra.mrb[24].mxu1 %vm316_vm2, %v1582_v11  ;;  %v9475_v14 = vsel %vm3438_vm11, %v9465_v17, %v9474_v46  ;;  %v26209_v11 = vld [vmem:[#allocation57_spill] sm:$0xff]  ;;  %v9500_v27 = vrot.slane %v26212_v26, 5  ;;  %v1856_v17 = vrot.slane %v26175_v22, 3 }
 0x165   : > { %17818 = vmatprep.mubr.msk.bf16.mxu1 %vm316_vm2, %v1584_v49  ;;  %v1847_v49 = vrot.slane %v26170_v51, 2  ;;  %v9483_v47 = vor.u32 %v9482_v6, %v9479_v16  ;;  %v1853_v51 = vor.u32 %v1852_v59, %v1851_v20  ;;  %v9488_v3 = vrot.slane %v26209_v11, 4 }
 0x166   : > { %v1855_v16 = vrot.slane %v26174_v60, 2  ;;  %v22403_v60 = vshll.u32 %v22217_v34, 16  ;;  %v22407_v20 = vshrl.u32 %v22220_v15, 16 }
 0x167   : > { %v1849_v9 = vor.u32 %v1848_v23, %v1847_v49  ;;  %v9484_v24 = vsel %vm3438_vm11, %v9474_v46, %v9483_v47  ;;  %v1860_v49 = vrot.slane %v26177_v29, 3  ;;  %v22396_v23 = vand.u32 %v16099_v57, %v21247_v4 }
 0x168   : > { %26214 = vst [vmem:[#allocation61_spill] sm:$0xff] %v22403_v60  ;;  %26215 = vst [vmem:[#allocation62_spill] sm:$0xff] %v22407_v20  ;;  %v1857_v29 = vor.u32 %v1856_v17, %v1855_v16  ;;  %v22430_v17 = vshrl.u32 %v22240_v39, 16 }
 0x169   : > { %v1854_v6 = vsel %vm1834_vm4, %v1849_v9, %v1853_v51 }
 0x16a   : > { %18649 = vmatmul.mubr.msk.bf16.gmra.mrb[8].mxu0 %vm316_vm2, %v9457_v12  ;;  %v9497_v12 = vrot.slane %v26211_v41, 4  ;;  %26217 = vst [vmem:[#allocation64_spill] sm:$0xff] %v22430_v17 }
 0x16b   : > { %18652 = vmatprep.mubr.msk.bf16.mxu0 %vm316_vm2, %v9466_v18  ;;  %v1850_v18 = vsel %vm1834_vm4, %v1845_v19, %v1849_v9  ;;  %v22400_v19 = vshrl.u32 %v22217_v34, 16 }
 0x16c   : > { %17819 = vmatmul.mubr.msk.bf16.gmra.mrb[28].mxu1 %vm316_vm2, %v1586_v30  ;;  %v1859_v30 = vrot.slane %v26176_v35, 2  ;;  %v9501_v22 = vor.u32 %v9500_v27, %v9497_v12  ;;  %v22410_v35 = vshll.u32 %v22220_v15, 16  ;;  %v1864_v12 = vrot.slane %v26179_v62, 3 }
 0x16d   : > { %17824 = vmatprep.mubr.msk.bf16.mxu1 %vm316_vm2, %v1846_v52  ;;  %v9492_v52 = vor.u32 %v9491_v38, %v9488_v3  ;;  %26213 = vst [vmem:[#allocation39_spill] sm:$0xff] %v22400_v19  ;;  %v9506_v9 = vrot.slane %v22400_v19, 4  ;;  %v9515_v38 = vrot.slane %v22407_v20, 4  ;;  %v1867_v27 = vrot.slane %v26180_v40, 2 }
 0x16e   : > { %26216 = vst [vmem:[#allocation63_spill] sm:$0xff] %v22410_v35  ;;  %v1861_v59 = vor.u32 %v1860_v49, %v1859_v30  ;;  %v9518_v57 = vrot.slane %v22410_v35, 5  ;;  %v22437_v62 = vshrl.u32 %v22242_v48, 16  ;;  %v9524_v49 = vrot.slane %v22430_v17, 4 }
 0x16f   : > { %v9493_v46 = vsel %vm3438_vm11, %v9483_v47, %v9492_v52  ;;  %v9502_v3 = vsel %vm3438_vm11, %v9492_v52, %v9501_v22 }
 0x170   : > { %v1862_v47 = vsel %vm1834_vm4, %v1857_v29, %v1861_v59  ;;  %26219 = vst [vmem:[#allocation66_spill] sm:$0xff] %v22437_v62 }
 0x172   : > { %18653 = vmatmul.mubr.msk.bf16.gmra.mrb[12].mxu0 %vm316_vm2, %v9475_v14  ;;  %v9509_v14 = vrot.slane %v22403_v60, 5 }
 0x173   : > { %18656 = vmatprep.mubr.msk.bf16.mxu0 %vm316_vm2, %v9484_v24  ;;  %v1863_v24 = vrot.slane %v26178_v43, 2  ;;  %v9519_v43 = vor.u32 %v9518_v57, %v9515_v38  ;;  %v1871_v38 = vrot.slane %v26182_v42, 2  ;;  %v1872_v57 = vrot.slane %v26183_v44, 3 }
 0x174   : > { %17825 = vmatmul.mubr.msk.bf16.vlgmr.msra.gmra.mrb[0].mxu1 %vm316_vm2, %v1850_v18  ;;  %v1868_v18 = vrot.slane %v26181_v37, 3  ;;  %v9510_v16 = vor.u32 %v9509_v14, %v9506_v9  ;;  %v22449_v14 = vld [vmem:[#allocation2 + $0x108] sm:$0x1f] }
 0x175   : > { %17857 = vmatpush3.bf16.msra.mxu1 %v22203_v61  ;;  %17828 = vmatprep.mubr.msk.bf16.mxu1 %vm316_vm2, %v1854_v6  ;;  %v1858_v61 = vsel %vm1834_vm4, %v1853_v51, %v1857_v29  ;;  %v22433_v51 = vshll.u32 %v22240_v39, 16  ;;  %v22440_v6 = vshll.u32 %v22242_v48, 16  ;;  %v1865_v40 = vor.u32 %v1864_v12, %v1863_v24 }
 0x176   : > { %17890 = vmatprep.subr.bf16.mxu1 %v22396_v23  ;;  %v1869_v37 = vor.u32 %v1868_v18, %v1867_v27  ;;  %v9511_v30 = vsel %vm3438_vm11, %v9501_v22, %v9510_v16  ;;  %v9520_v29 = vsel %vm3438_vm11, %v9510_v16, %v9519_v43  ;;  %v1876_v24 = vrot.slane %v26185_v21, 3 }
 0x177   : > { %26218 = vst [vmem:[#allocation65_spill] sm:$0xff] %v22433_v51  ;;  %26220 = vst [vmem:[#allocation67_spill] sm:$0xff] %v22440_v6  ;;  %v9527_v52 = vrot.slane %v22433_v51, 5  ;;  %v9536_v9 = vrot.slane %v22440_v6, 5  ;;  %v9543_v27 = vshll.u32 %v22449_v14, 16  ;;  %v1873_v44 = vor.u32 %v1872_v57, %v1871_v38  ;;  %v26224_v38 = vld [vmem:[#allocation44_spill] sm:$0xff] }
 0x178   : > { %v1870_v22 = vsel %vm1834_vm4, %v1865_v40, %v1869_v37 }
 0x179   : > { %v9528_v12 = vor.u32 %v9527_v52, %v9524_v49  ;;  %v26221_v49 = vld [vmem:[#allocation43_spill] sm:$0xff] }
 0x17a   : > { %18657 = vmatmul.mubr.msk.bf16.gmra.mrb[16].mxu0 %vm316_vm2, %v9493_v46  ;;  %v9533_v46 = vrot.slane %v22437_v62, 4  ;;  %v1879_v52 = vrot.slane %v26221_v49, 2 }
 0x17b   : > { %18660 = vmatprep.mubr.msk.bf16.mxu0 %vm316_vm2, %v9502_v3  ;;  %v1866_v3 = vsel %vm1834_vm4, %v1861_v59, %v1865_v40  ;;  %v9529_v18 = vsel %vm3438_vm11, %v9519_v43, %v9528_v12  ;;  %v1874_v40 = vsel %vm1834_vm4, %v1869_v37, %v1873_v44  ;;  %v1884_v43 = vrot.slane %v26224_v38, 3 }
 0x17c   : > { %17829 = vmatmul.mubr.msk.bf16.gmra.mrb[4].mxu1 %vm316_vm2, %v1858_v61  ;;  %v1875_v61 = vrot.slane %v26184_v58, 2  ;;  %v9537_v42 = vor.u32 %v9536_v9, %v9533_v46  ;;  %v9545_v58 = vrot.slane %v9543_v27, 5  ;;  %v26223_v9 = vld [vmem:[#allocation46_spill] sm:$0xff] }
 0x17d   : > { %17832 = vmatprep.mubr.msk.bf16.mxu1 %vm316_vm2, %v1862_v47  ;;  %v9540_v47 = vshrl.u32 %v22449_v14, 16 }
 0x17e   : > { %v1877_v59 = vor.u32 %v1876_v24, %v1875_v61  ;;  %v9538_v21 = vsel %vm3438_vm11, %v9528_v12, %v9537_v42 }
 0x17f   : > { %v9542_v16 = vrot.slane %v9540_v47, 4 }
 0x180   : > { %v1878_v46 = vsel %vm1834_vm4, %v1873_v44, %v1877_v59  ;;  %v1887_v44 = vrot.slane %v21637_v33, 2 }
 0x181   : > { %v9546_v57 = vor.u32 %v9545_v58, %v9542_v16 }
 0x182   : > { %18661 = vmatmul.mubr.msk.bf16.gmra.mrb[20].mxu0 %vm316_vm2, %v9511_v30  ;;  %v22466_v30 = vld [vmem:[#allocation2 + $0x88] sm:$0xe0] }
 0x183   : > { %18664 = vmatprep.mubr.msk.bf16.mxu0 %vm316_vm2, %v9520_v29  ;;  %v26222_v29 = vld [vmem:[#allocation41_spill] sm:$0xff]  ;;  %v9797_v37 = vrot.slane %v22466_v30, 5  ;;  %v9547_v12 = vsel %vm3438_vm11, %v9537_v42, %v9546_v57  ;;  %v9802_v42 = vrot.slane %v22118_v53, 5 }
 0x184   : > { %17833 = vmatmul.mubr.msk.bf16.gmra.mrb[8].mxu1 %vm316_vm2, %v1866_v3  ;;  %v1880_v6 = vrot.slane %v26222_v29, 3  ;;  %v1883_v3 = vrot.slane %v26223_v9, 2  ;;  %v9804_v9 = vrot.slane %v22304_v36, 5 }
 0x185   : > { %17836 = vmatprep.mubr.msk.bf16.mxu1 %vm316_vm2, %v1870_v22  ;;  %v9798_v22 = vrot.slane %v22096_v54, 5  ;;  %v26225_v54 = vld [vmem:[#allocation48_spill] sm:$0xff] }
 0x186   : > { %v1881_v61 = vor.u32 %v1880_v6, %v1879_v52  ;;  %v1885_v24 = vor.u32 %v1884_v43, %v1883_v3  ;;  %v1891_v58 = vrot.slane %v26225_v54, 2  ;;  %v9800_v6 = vrot.slane %v22115_v0, 5  ;;  %v22510_v3 = vld [vmem:[#allocation2 + $0xb0] sm:$0xff]  ;;  %v26228_v54 = vld [vmem:[#allocation22_spill] sm:$0xff] }
 0x187   : > { %v9799_v47 = vsel %vm3765_vm12, %v9797_v37, %v9798_v22  ;;  %v9806_v38 = vrot.slane %v22510_v3, 5 }
 0x188   : > { %v1882_v27 = vsel %vm1834_vm4, %v1877_v59, %v1881_v61  ;;  %v1886_v16 = vsel %vm1834_vm4, %v1881_v61, %v1885_v24  ;;  %v9801_v49 = vsel %vm3765_vm12, %v9798_v22, %v9800_v6  ;;  %v9803_v52 = vsel %vm3765_vm12, %v9800_v6, %v9802_v42  ;;  %v26227_v22 = vld [vmem:[#allocation11_spill] sm:$0xff] }
 0x189   : > { %v9807_v37 = vsel %vm3765_vm12, %v9804_v9, %v9806_v38 }
 0x18a   : > { %18665 = vmatmul.mubr.msk.bf16.gmra.mrb[24].mxu0 %vm316_vm2, %v9529_v18  ;;  %v1888_v18 = vrot.slane %v21623_v50, 3  ;;  %v16524_v50 = vld [vmem:[%s25749_s1 + $0x40] sm:$0x3] }
 0x18b   : > { %18668 = vmatprep.mubr.msk.bf16.mxu0 %vm316_vm2, %v9538_v21  ;;  %v26226_v21 = vld [vmem:[#allocation47_spill] sm:$0xff]  ;;  %v22499_v29 = vand.u32 %v16524_v50, %v21247_v4 }
 0x18c   : > { %17837 = vmatmul.mubr.msk.bf16.gmra.mrb[12].mxu1 %vm316_vm2, %v1874_v40  ;;  %v1892_v40 = vrot.slane %v26226_v21, 3  ;;  %v1889_v33 = vor.u32 %v1888_v18, %v1887_v44  ;;  %v2156_v44 = vld [vmem:[#allocation2] sm:$0xf8] }
 0x18d   : > { %17840 = vmatprep.mubr.msk.bf16.mxu1 %vm316_vm2, %v1878_v46  ;;  %v22504_v46 = vld [vmem:[#allocation2 + $0x80] sm:$0x7]  ;;  %v2162_v21 = vrot.slane %v2156_v44, 3 }
 0x18e   : > { %v1893_v59 = vor.u32 %v1892_v40, %v1891_v58  ;;  %v1890_v0 = vsel %vm1834_vm4, %v1885_v24, %v1889_v33  ;;  %v1904_v43 = vshrl.u32 %v22504_v46, 16  ;;  %v1907_v57 = vshll.u32 %v22504_v46, 16  ;;  %v22527_v18 = vld [vmem:[#allocation2 + $0xc0] sm:$0xff] }
 0x18f   : > { %v2163_v40 = vrot.slane %v22177_v10, 3  ;;  %v22544_v10 = vld [vmem:[#allocation2 + $0xd0] sm:$0xff] }
 0x190   : > { %v1894_v53 = vsel %vm1834_vm4, %v1889_v33, %v1893_v59  ;;  %v1898_v61 = vsel %vm1834_vm4, %v1893_v59, %v26227_v22  ;;  %v1906_v24 = vrot.slane %v1904_v43, 2  ;;  %v26229_v33 = vld [vmem:[#allocation17_spill] sm:$0xff] }
 0x191   : > { %v2164_v59 = vsel %vm2161_vm5, %v2162_v21, %v2163_v40  ;;  %v16116_v43 = vld [vmem:[%s25749_s1 + $0x10] sm:$0x3]  ;;  %v26230_v21 = vld [vmem:[#allocation10_spill] sm:$0xff] }
 0x192   : > { %18669 = vmatmul.mubr.msk.bf16.gmra.mrb[28].mxu0 %vm316_vm2, %v9547_v12  ;;  %v1909_v12 = vrot.slane %v1907_v57, 3  ;;  %v22559_v22 = vand.u32 %v16116_v43, %v21247_v4 }
 0x193   : > { %18674 = vmatprep.mubr.msk.bf16.mxu0 %vm316_vm2, %v9799_v47  ;;  %v22523_v47 = vld [vmem:[#allocation2 + $0xb8] sm:$0xff] }
 0x194   : > { %17841 = vmatmul.mubr.msk.bf16.gmra.mrb[16].mxu1 %vm316_vm2, %v1882_v27  ;;  %v9808_v27 = vrot.slane %v22523_v47, 5  ;;  %v1910_v58 = vor.u32 %v1909_v12, %v1906_v24  ;;  %v2169_v12 = vrot.slane %v22210_v2, 3  ;;  %v9822_v2 = vrot.slane %v22220_v15, 5 }
 0x195   : > { %17844 = vmatprep.mubr.msk.bf16.mxu1 %vm316_vm2, %v1886_v16  ;;  %v9810_v16 = vrot.slane %v22527_v18, 5  ;;  %v9824_v15 = vrot.slane %v22240_v39, 5 }
 0x196   : > { %v9809_v6 = vsel %vm3765_vm12, %v9806_v38, %v9808_v27  ;;  %v1911_v50 = vsel %vm1834_vm4, %v26229_v33, %v1910_v58 }
 0x19a   : > { %18675 = vmatmul.mubr.msk.bf16.vlgmr.msra.gmra.mrb[0].mxu0 %vm316_vm2, %v9801_v49  ;;  %v22540_v49 = vld [vmem:[#allocation2 + $0xc8] sm:$0xff] }
 0x19b   : > { %18707 = vmatpush3.bf16.msra.mxu0 %v22330_v31  ;;  %18678 = vmatprep.mubr.msk.bf16.mxu0 %vm316_vm2, %v9803_v52  ;;  %v9805_v31 = vsel %vm3765_vm12, %v9802_v42, %v9804_v9  ;;  %v9811_v42 = vsel %vm3765_vm12, %v9808_v27, %v9810_v16  ;;  %v9812_v52 = vrot.slane %v22540_v49, 5  ;;  %v2167_v9 = vrot.slane %v22192_v32, 3 }
 0x19c   : > { %17845 = vmatmul.mubr.msk.bf16.gmra.mrb[20].mxu1 %vm316_vm2, %v1890_v0  ;;  %18740 = vmatprep.subr.bf16.mxu0 %v22499_v29  ;;  %v9814_v0 = vrot.slane %v22544_v10, 5  ;;  %v2171_v27 = vrot.slane %v22213_v28, 3  ;;  %v2173_v28 = vrot.slane %v22231_v5, 3  ;;  %v10078_v5 = vshrl.u32 %v22466_v30, 16 }
 0x19d   : > { %17848 = vmatprep.mubr.msk.bf16.mxu1 %vm316_vm2, %v1894_v53  ;;  %v2165_v53 = vrot.slane %v22189_v25, 3  ;;  %v9813_v38 = vsel %vm3765_vm12, %v9810_v16, %v9812_v52  ;;  %v22562_v25 = vld [vmem:[#allocation2 + $0xd8] sm:$0xff] }
 0x19e   : > { %v9815_v57 = vsel %vm3765_vm12, %v9812_v52, %v9814_v0  ;;  %v9816_v32 = vrot.slane %v22562_v25, 5  ;;  %v2172_v58 = vsel %vm2161_vm5, %v2169_v12, %v2171_v27  ;;  %v2174_v33 = vsel %vm2161_vm5, %v2171_v27, %v2173_v28  ;;  %v26231_v52 = vld [vmem:[#allocation21_spill] sm:$0xff] }
 0x1a0   : > { %v9817_v44 = vsel %vm3765_vm12, %v9814_v0, %v9816_v32  ;;  %v2177_v0 = vrot.slane %v26231_v52, 3  ;;  %v26240_v52 = vld [vmem:[#allocation31_spill] sm:$0xff] }
 0x1a2   : > { %18679 = vmatmul.mubr.msk.bf16.gmra.mrb[4].mxu0 %vm316_vm2, %v9805_v31  ;;  %v2166_v31 = vsel %vm2161_vm5, %v2163_v40, %v2165_v53  ;;  %v2175_v40 = vrot.slane %v26230_v21, 3  ;;  %v26237_v21 = vld [vmem:[#allocation26_spill] sm:$0xff] }
 0x1a3   : > { %18682 = vmatprep.mubr.msk.bf16.mxu0 %vm316_vm2, %v9807_v37  ;;  %v2168_v37 = vsel %vm2161_vm5, %v2165_v53, %v2167_v9  ;;  %v26232_v53 = vld [vmem:[#allocation18_spill] sm:$0xff] }
 0x1a4   : > { %17849 = vmatmul.mubr.msk.bf16.gmra.mrb[24].mxu1 %vm316_vm2, %v1898_v61  ;;  %v22566_v61 = vld [vmem:[#allocation2 + $0xe0] sm:$0xff] }
 0x1a5   : > { %17852 = vmatprep.mubr.msk.bf16.mxu1 %vm316_vm2, %v26228_v54  ;;  %v9818_v24 = vrot.slane %v22566_v61, 5  ;;  %v2170_v54 = vsel %vm2161_vm5, %v2167_v9, %v2169_v12  ;;  %v2179_v9 = vrot.slane %v26232_v53, 3  ;;  %v9828_v12 = vrot.slane %v22449_v14, 5  ;;  %v26238_v14 = vld [vmem:[#allocation23_spill] sm:$0xff] }
 0x1a6   : > { %v16541_v53 = vld [vmem:[%s25749_s1 + $0x42] sm:$0x3] }
 0x1a7   : > { %v9819_v16 = vsel %vm3765_vm12, %v9816_v32, %v9818_v24 }
 0x1aa   : > { %18683 = vmatmul.mubr.msk.bf16.gmra.mrb[8].mxu0 %vm316_vm2, %v9809_v6 }
 0x1ab   : > { %18686 = vmatprep.mubr.msk.bf16.mxu0 %vm316_vm2, %v9811_v42 }
 0x1ac   : > { %17853 = vmatmul.mubr.msk.bf16.gmra.mrb[28].mxu1 %vm316_vm2, %v1911_v50  ;;  %v9826_v50 = vrot.slane %v22242_v48, 5 }
 0x1ad   : > { %17858 = vmatprep.mubr.msk.bf16.mxu1 %vm316_vm2, %v2164_v59  ;;  %v10081_v59 = vshll.u32 %v22466_v30, 16  ;;  %v2180_v30 = vsel %vm2161_vm5, %v2177_v0, %v2179_v9 }
 0x1ae   : > { %v9827_v43 = vsel %vm3765_vm12, %v9824_v15, %v9826_v50 }
 0x1af   : > { %v10083_v39 = vrot.slane %v10081_v59, 6 }
 0x1b2   : > { %18687 = vmatmul.mubr.msk.bf16.gmra.mrb[12].mxu0 %vm316_vm2, %v9813_v38  ;;  %v9825_v38 = vsel %vm3765_vm12, %v9822_v2, %v9824_v15 }
 0x1b3   : > { %18690 = vmatprep.mubr.msk.bf16.mxu0 %vm316_vm2, %v9815_v57  ;;  %v10080_v57 = vrot.slane %v10078_v5, 5 }
 0x1b4   : > { %17859 = vmatmul.mubr.msk.bf16.vlgmr.msra.gmra.mrb[0].mxu1 %vm316_vm2, %v2166_v31  ;;  %v26233_v31 = vld [vmem:[#allocation16_spill] sm:$0xff] }
 0x1b5   : > { %17891 = vmatpush3.bf16.msra.mxu1 %v22396_v23  ;;  %17862 = vmatprep.mubr.msk.bf16.mxu1 %vm316_vm2, %v2168_v37  ;;  %v9820_v23 = vrot.slane %v22217_v34, 5  ;;  %v2176_v34 = vsel %vm2161_vm5, %v2173_v28, %v2175_v40  ;;  %v10085_v48 = vrot.slane %v26233_v31, 5  ;;  %v26234_v37 = vld [vmem:[#allocation13_spill] sm:$0xff]  ;;  %v10084_v27 = vor.u32 %v10083_v39, %v10080_v57 }
 0x1b6   : > { %17924 = vmatprep.subr.bf16.mxu1 %v22559_v22  ;;  %v10086_v32 = vrot.slane %v26234_v37, 6  ;;  %v10089_v28 = vrot.slane %v22275_v1, 5  ;;  %v10097_v57 = vrot.slane %v22307_v8, 5  ;;  %v10098_v39 = vrot.slane %v22310_v55, 6 }
 0x1b7   : > { %v9821_v6 = vsel %vm3765_vm12, %v9818_v24, %v9820_v23  ;;  %v9823_v42 = vsel %vm3765_vm12, %v9820_v23, %v9822_v2  ;;  %v2178_v24 = vsel %vm2161_vm5, %v2175_v40, %v2177_v0  ;;  %v9829_v2 = vsel %vm3765_vm12, %v9826_v50, %v9828_v12 }
 0x1b8   : > { %v10090_v40 = vrot.slane %v26237_v21, 6  ;;  %v2185_v0 = vrot.slane %v26240_v52, 3 }
 0x1ba   : > { %18691 = vmatmul.mubr.msk.bf16.gmra.mrb[16].mxu0 %vm316_vm2, %v9817_v44  ;;  %v10087_v44 = vor.u32 %v10086_v32, %v10085_v48  ;;  %v10091_v59 = vor.u32 %v10090_v40, %v10089_v28  ;;  %v26242_v32 = vld [vmem:[#allocation42_spill] sm:$0xff]  ;;  %v26245_v40 = vld [vmem:[#allocation40_spill] sm:$0xff] }
 0x1bb   : > { %18694 = vmatprep.mubr.msk.bf16.mxu0 %vm316_vm2, %v9819_v16  ;;  %v26235_v16 = vld [vmem:[#allocation27_spill] sm:$0xff] }
 0x1bc   : > { %17863 = vmatmul.mubr.msk.bf16.gmra.mrb[4].mxu1 %vm316_vm2, %v2170_v54  ;;  %v2181_v54 = vrot.slane %v26235_v16, 3 }
 0x1bd   : > { %17866 = vmatprep.mubr.msk.bf16.mxu1 %vm316_vm2, %v2172_v58  ;;  %v26236_v58 = vld [vmem:[#allocation34_spill] sm:$0xff] }
 0x1be   : > { %v2183_v23 = vrot.slane %v26236_v58, 3  ;;  %v2182_v15 = vsel %vm2161_vm5, %v2179_v9, %v2181_v54 }
 0x1c0   : > { %v2184_v5 = vsel %vm2161_vm5, %v2181_v54, %v2183_v23  ;;  %v2186_v16 = vsel %vm2161_vm5, %v2183_v23, %v2185_v0  ;;  %v2191_v23 = vrot.slane %v26245_v40, 3  ;;  %v10118_v40 = vrot.slane %v26208_v45, 6 }
 0x1c2   : > { %18695 = vmatmul.mubr.msk.bf16.gmra.mrb[20].mxu0 %vm316_vm2, %v9821_v6  ;;  %v10088_v6 = vsel %vm4046_vm13, %v10084_v27, %v10087_v44  ;;  %v22637_v27 = vand.u32 %v16541_v53, %v21247_v4 }
 0x1c3   : > { %18698 = vmatprep.mubr.msk.bf16.mxu0 %vm316_vm2, %v9823_v42  ;;  %v10093_v42 = vrot.slane %v26238_v14, 5 }
 0x1c4   : > { %17867 = vmatmul.mubr.msk.bf16.gmra.mrb[8].mxu1 %vm316_vm2, %v2174_v33  ;;  %v26239_v33 = vld [vmem:[#allocation30_spill] sm:$0xff] }
 0x1c5   : > { %17870 = vmatprep.mubr.msk.bf16.mxu1 %vm316_vm2, %v2176_v34  ;;  %v10094_v34 = vrot.slane %v26239_v33, 6 }
 0x1c7   : > { %v10095_v50 = vor.u32 %v10094_v34, %v10093_v42  ;;  %v26246_v42 = vld [vmem:[#allocation50_spill] sm:$0xff] }
 0x1c8   : > { %v10105_v34 = vrot.slane %v26246_v42, 5 }
 0x1c9   : > { %v10096_v48 = vsel %vm4046_vm13, %v10091_v59, %v10095_v50 }
 0x1ca   : > { %18699 = vmatmul.mubr.msk.bf16.gmra.mrb[24].mxu0 %vm316_vm2, %v9825_v38  ;;  %v26241_v38 = vld [vmem:[#allocation36_spill] sm:$0xff] }
 0x1cb   : > { %18702 = vmatprep.mubr.msk.bf16.mxu0 %vm316_vm2, %v9827_v43  ;;  %v2187_v9 = vrot.slane %v26241_v38, 3  ;;  %v10092_v43 = vsel %vm4046_vm13, %v10087_v44, %v10091_v59  ;;  %v10099_v44 = vor.u32 %v10098_v39, %v10097_v57  ;;  %v26248_v59 = vld [vmem:[#allocation9_spill] sm:$0xff]  ;;  %v22661_v39 = vld [vmem:[#allocation2 + $0x28] sm:$0xff] }
 0x1cc   : > { %17871 = vmatmul.mubr.msk.bf16.gmra.mrb[12].mxu1 %vm316_vm2, %v2178_v24  ;;  %v10101_v24 = vrot.slane %v26242_v32, 5  ;;  %v10109_v52 = vrot.slane %v26248_v59, 5 }
 0x1cd   : > { %17874 = vmatprep.mubr.msk.bf16.mxu1 %vm316_vm2, %v2180_v30  ;;  %v26243_v30 = vld [vmem:[#allocation49_spill] sm:$0xff]  ;;  %v2188_v54 = vsel %vm2161_vm5, %v2185_v0, %v2187_v9  ;;  %v26249_v0 = vld [vmem:[#allocation52_spill] sm:$0xff] }
 0x1ce   : > { %v10102_v12 = vrot.slane %v26243_v30, 6  ;;  %v10110_v53 = vrot.slane %v26249_v0, 6 }
 0x1d0   : > { %v10103_v58 = vor.u32 %v10102_v12, %v10101_v24  ;;  %v2193_v24 = vrot.slane %v22504_v46, 3  ;;  %v2476_v12 = vrot.slane %v22661_v39, 3 }
 0x1d2   : > { %18703 = vmatmul.mubr.msk.bf16.gmra.mrb[28].mxu0 %vm316_vm2, %v9829_v2  ;;  %v26244_v2 = vld [vmem:[#allocation35_spill] sm:$0xff] }
 0x1d3   : > { %18708 = vmatprep.mubr.msk.bf16.mxu0 %vm316_vm2, %v10088_v6  ;;  %v2189_v28 = vrot.slane %v26244_v2, 3  ;;  %v10100_v6 = vsel %vm4046_vm13, %v10095_v50, %v10099_v44  ;;  %v22659_v50 = vld [vmem:[#allocation2 + $0x20] sm:$0xf8] }
 0x1d4   : > { %17875 = vmatmul.mubr.msk.bf16.gmra.mrb[16].mxu1 %vm316_vm2, %v2182_v15  ;;  %v26247_v15 = vld [vmem:[#allocation51_spill] sm:$0xff] }
 0x1d5   : > { %17878 = vmatprep.mubr.msk.bf16.mxu1 %vm316_vm2, %v2184_v5  ;;  %v10104_v5 = vsel %vm4046_vm13, %v10099_v44, %v10103_v58  ;;  %v2190_v38 = vsel %vm2161_vm5, %v2187_v9, %v2189_v28  ;;  %v2475_v9 = vrot.slane %v22659_v50, 3  ;;  %v10114_v44 = vrot.slane %v26206_v56, 6 }
 0x1d7   : > { %v2477_v46 = vsel %vm2161_vm5, %v2475_v9, %v2476_v12  ;;  %v10125_v9 = vrot.slane %v26211_v41, 5 }
 0x1da   : > { %18709 = vmatmul.mubr.msk.bf16.vlgmr.msra.gmra.mrb[0].mxu0 %vm316_vm2, %v10092_v43  ;;  %v2192_v43 = vsel %vm2161_vm5, %v2189_v28, %v2191_v23  ;;  %v10117_v28 = vrot.slane %v26207_v63, 5 }
 0x1db   : > { %18741 = vmatpush3.bf16.msra.mxu0 %v22499_v29  ;;  %18712 = vmatprep.mubr.msk.bf16.mxu0 %vm316_vm2, %v10096_v48  ;;  %v10106_v29 = vrot.slane %v26247_v15, 6  ;;  %v10111_v48 = vor.u32 %v10110_v53, %v10109_v52 }
 0x1dc   : > { %17879 = vmatmul.mubr.msk.bf16.gmra.mrb[20].mxu1 %vm316_vm2, %v2186_v16  ;;  %18774 = vmatprep.subr.bf16.mxu0 %v22637_v27 }
 0x1dd   : > { %17882 = vmatprep.mubr.msk.bf16.mxu1 %vm316_vm2, %v2188_v54  ;;  %v10107_v57 = vor.u32 %v10106_v29, %v10105_v34  ;;  %v10113_v54 = vrot.slane %v26205_v13, 5  ;;  %v22677_v34 = vld [vmem:[#allocation2 + $0x30] sm:$0xff]  ;;  %v22680_v29 = vld [vmem:[#allocation2 + $0x38] sm:$0xff] }
 0x1de   : > { %v2478_v52 = vrot.slane %v22677_v34, 3 }
 0x1df   : > { %v10108_v16 = vsel %vm4046_vm13, %v10103_v58, %v10107_v57  ;;  %v10112_v2 = vsel %vm4046_vm13, %v10107_v57, %v10111_v48  ;;  %v10115_v58 = vor.u32 %v10114_v44, %v10113_v54  ;;  %v16133_v57 = vld [vmem:[%s25749_s1 + $0x12] sm:$0x3]  ;;  %v22698_v44 = vld [vmem:[#allocation2 + $0x40] sm:$0xff] }
 0x1e0   : > { %v2479_v54 = vsel %vm2161_vm5, %v2476_v12, %v2478_v52  ;;  %v2482_v12 = vrot.slane %v22698_v44, 3 }
 0x1e1   : > { %v10116_v53 = vsel %vm4046_vm13, %v10111_v48, %v10115_v58 }
 0x1e2   : > { %18713 = vmatmul.mubr.msk.bf16.gmra.mrb[4].mxu0 %vm316_vm2, %v10100_v6  ;;  %v2194_v6 = vsel %vm2161_vm5, %v2191_v23, %v2193_v24  ;;  %v2480_v23 = vrot.slane %v22680_v29, 3 }
 0x1e3   : > { %18716 = vmatprep.mubr.msk.bf16.mxu0 %vm316_vm2, %v10104_v5  ;;  %v10119_v5 = vor.u32 %v10118_v40, %v10117_v28  ;;  %v22704_v40 = vld [vmem:[#allocation2 + $0x48] sm:$0xff] }
 0x1e4   : > { %17883 = vmatmul.mubr.msk.bf16.gmra.mrb[24].mxu1 %vm316_vm2, %v2190_v38  ;;  %v10121_v38 = vrot.slane %v26209_v11, 5  ;;  %v2481_v48 = vsel %vm2161_vm5, %v2478_v52, %v2480_v23  ;;  %v10129_v52 = vrot.slane %v22400_v19, 5  ;;  %v2455_v19 = vld [vmem:[#allocation2 + $0xa0] sm:$0x7]  ;;  %v10414_v11 = vrot.slane %v22523_v47, 6 }
 0x1e5   : > { %17886 = vmatprep.mubr.msk.bf16.mxu1 %vm316_vm2, %v2192_v43  ;;  %v10122_v43 = vrot.slane %v26210_v7, 6  ;;  %v10120_v24 = vsel %vm4046_vm13, %v10115_v58, %v10119_v5  ;;  %v22846_v47 = vshll.u32 %v22680_v29, 16 }
 0x1e7   : > { %v10123_v28 = vor.u32 %v10122_v43, %v10121_v38  ;;  %v10133_v43 = vrot.slane %v22407_v20, 5  ;;  %v22755_v20 = vld [vmem:[#allocation2 + $0x88] sm:$0xc0]  ;;  %26254 = vst [vmem:[#allocation44_spill] sm:$0xff] %v22846_v47 }
 0x1e9   : > { %v10124_v58 = vsel %vm4046_vm13, %v10119_v5, %v10123_v28 }
 0x1ea   : > { %18717 = vmatmul.mubr.msk.bf16.gmra.mrb[8].mxu0 %vm316_vm2, %v10108_v16  ;;  %v10126_v16 = vrot.slane %v26212_v26, 6 }
 0x1eb   : > { %18720 = vmatprep.mubr.msk.bf16.mxu0 %vm316_vm2, %v10112_v2  ;;  %v22701_v2 = vand.u32 %v16133_v57, %v21247_v4  ;;  %v2483_v57 = vsel %vm2161_vm5, %v2480_v23, %v2482_v12 }
 0x1ec   : > { %17887 = vmatmul.mubr.msk.bf16.gmra.mrb[28].mxu1 %vm316_vm2, %v2194_v6  ;;  %v10127_v6 = vor.u32 %v10126_v16, %v10125_v9  ;;  %v22721_v9 = vld [vmem:[#allocation2 + $0x50] sm:$0xff]  ;;  %v22724_v16 = vld [vmem:[#allocation2 + $0x58] sm:$0xff] }
 0x1ed   : > { %17892 = vmatprep.mubr.msk.bf16.mxu1 %vm316_vm2, %v2477_v46  ;;  %v2484_v46 = vrot.slane %v22704_v40, 3  ;;  %v2488_v23 = vrot.slane %v22724_v16, 3 }
 0x1ee   : > { %v10128_v38 = vsel %vm4046_vm13, %v10123_v28, %v10127_v6 }
 0x1f2   : > { %18721 = vmatmul.mubr.msk.bf16.gmra.mrb[12].mxu0 %vm316_vm2, %v10116_v53  ;;  %v10130_v53 = vrot.slane %v22403_v60, 6  ;;  %v22805_v60 = vld [vmem:[#allocation2 + $0x98] sm:$0xff] }
 0x1f3   : > { %18724 = vmatprep.mubr.msk.bf16.mxu0 %vm316_vm2, %v10120_v24  ;;  %v2485_v24 = vsel %vm2161_vm5, %v2482_v12, %v2484_v46  ;;  %v10137_v12 = vrot.slane %v22430_v17, 5 }
 0x1f4   : > { %17893 = vmatmul.mubr.msk.bf16.vlgmr.msra.gmra.mrb[0].mxu1 %vm316_vm2, %v2479_v54  ;;  %v10131_v5 = vor.u32 %v10130_v53, %v10129_v52  ;;  %v10141_v52 = vrot.slane %v22437_v62, 5  ;;  %v26250_v53 = vld [vmem:[#allocation67_spill] sm:$0xff]  ;;  %v22746_v62 = vld [vmem:[#allocation2 + $0x68] sm:$0xff] }
 0x1f5   : > { %17925 = vmatpush3.bf16.msra.mxu1 %v22559_v22  ;;  %17896 = vmatprep.mubr.msk.bf16.mxu1 %vm316_vm2, %v2481_v48  ;;  %v10134_v22 = vrot.slane %v22410_v35, 6  ;;  %v2486_v48 = vrot.slane %v22721_v9, 3  ;;  %v10142_v35 = vrot.slane %v26250_v53, 6 }
 0x1f6   : > { %17958 = vmatprep.subr.bf16.mxu1 %v22701_v2  ;;  %v10132_v28 = vsel %vm4046_vm13, %v10127_v6, %v10131_v5 }
 0x1f7   : > { %v10135_v54 = vor.u32 %v10134_v22, %v10133_v43  ;;  %v2487_v43 = vsel %vm2161_vm5, %v2484_v46, %v2486_v48  ;;  %v2489_v22 = vsel %vm2161_vm5, %v2486_v48, %v2488_v23  ;;  %v10143_v53 = vor.u32 %v10142_v35, %v10141_v52  ;;  %v22759_v52 = vld [vmem:[#allocation2 + $0x70] sm:$0xff] }
 0x1f8   : > { %v2492_v48 = vrot.slane %v22746_v62, 3 }
 0x1fa   : > { %18725 = vmatmul.mubr.msk.bf16.gmra.mrb[16].mxu0 %vm316_vm2, %v10124_v58  ;;  %v10138_v58 = vrot.slane %v22433_v51, 6 }
 0x1fb   : > { %18728 = vmatprep.mubr.msk.bf16.mxu0 %vm316_vm2, %v10128_v38  ;;  %v10136_v38 = vsel %vm4046_vm13, %v10131_v5, %v10135_v54 }
 0x1fc   : > { %17897 = vmatmul.mubr.msk.bf16.gmra.mrb[4].mxu1 %vm316_vm2, %v2483_v57  ;;  %v22736_v57 = vld [vmem:[#allocation2 + $0x108] sm:$0x3f]  ;;  %v10139_v6 = vor.u32 %v10138_v58, %v10137_v12 }
 0x1fd   : > { %17900 = vmatprep.mubr.msk.bf16.mxu1 %vm316_vm2, %v2485_v24  ;;  %v22741_v24 = vld [vmem:[#allocation2 + $0x60] sm:$0xff]  ;;  %v10146_v51 = vshrl.u32 %v22736_v57, 16  ;;  %v10149_v5 = vshll.u32 %v22736_v57, 16 }
 0x1fe   : > { %v2490_v46 = vrot.slane %v22741_v24, 3  ;;  %v10144_v12 = vsel %vm4046_vm13, %v10139_v6, %v10143_v53 }
 0x1ff   : > { %v10148_v17 = vrot.slane %v10146_v51, 5  ;;  %v10403_v51 = vrot.slane %v22755_v20, 6 }
 0x200   : > { %v2491_v58 = vsel %vm2161_vm5, %v2488_v23, %v2490_v46  ;;  %v2493_v35 = vsel %vm2161_vm5, %v2490_v46, %v2492_v48 }
 0x202   : > { %18729 = vmatmul.mubr.msk.bf16.gmra.mrb[20].mxu0 %vm316_vm2, %v10132_v28  ;;  %v10140_v28 = vsel %vm4046_vm13, %v10135_v54, %v10139_v6  ;;  %v22766_v54 = vld [vmem:[#allocation2 + $0x90] sm:$0xff]  ;;  %v2494_v6 = vrot.slane %v22759_v52, 3 }
 0x203   : > { %18732 = vmatprep.mubr.msk.bf16.mxu0 %vm316_vm2, %v10136_v38  ;;  %v10151_v38 = vrot.slane %v10149_v5, 6  ;;  %26251 = vst [vmem:[#allocation43_spill] sm:$0xff] %v22766_v54  ;;  %v10404_v23 = vrot.slane %v22766_v54, 6  ;;  %v22783_v54 = vld [vmem:[#allocation2 + $0x88] sm:$0xff] }
 0x204   : > { %17901 = vmatmul.mubr.msk.bf16.gmra.mrb[8].mxu1 %vm316_vm2, %v2487_v43 }
 0x205   : > { %17904 = vmatprep.mubr.msk.bf16.mxu1 %vm316_vm2, %v2489_v22  ;;  %v10152_v43 = vor.u32 %v10151_v38, %v10148_v17  ;;  %v22762_v22 = vld [vmem:[#allocation2 + $0x78] sm:$0xff]  ;;  %v10405_v17 = vsel %vm562_vm1, %v10403_v51, %v10404_v23  ;;  %v16558_v51 = vld [vmem:[%s25749_s1 + $0x44] sm:$0x3] }
 0x206   : > { %v2496_v5 = vrot.slane %v22762_v22, 3 }
 0x207   : > { %v10153_v46 = vsel %vm4046_vm13, %v10143_v53, %v10152_v43  ;;  %v22786_v53 = vld [vmem:[#allocation2 + $0xa0] sm:$0xff] }
 0x208   : > { %v2497_v38 = vsel %vm2161_vm5, %v2494_v6, %v2496_v5  ;;  %26253 = vst [vmem:[#allocation46_spill] sm:$0xff] %v22786_v53 }
 0x20a   : > { %18733 = vmatmul.mubr.msk.bf16.gmra.mrb[24].mxu0 %vm316_vm2, %v10140_v28  ;;  %v2495_v28 = vsel %vm2161_vm5, %v2492_v48, %v2494_v6  ;;  %v10408_v48 = vrot.slane %v22786_v53, 6  ;;  %v2500_v6 = vrot.slane %v22783_v54, 3  ;;  %v22803_v53 = vld [vmem:[#allocation2 + $0x90] sm:$0xff] }
 0x20b   : > { %18736 = vmatprep.mubr.msk.bf16.mxu0 %vm316_vm2, %v10144_v12  ;;  %v22777_v12 = vld [vmem:[#allocation2 + $0x80] sm:$0xff] }
 0x20c   : > { %17905 = vmatmul.mubr.msk.bf16.gmra.mrb[12].mxu1 %vm316_vm2, %v2491_v58  ;;  %v22780_v58 = vld [vmem:[#allocation2 + $0x98] sm:$0xff]  ;;  %v2498_v43 = vrot.slane %v22777_v12, 3 }
 0x20d   : > { %17908 = vmatprep.mubr.msk.bf16.mxu1 %vm316_vm2, %v2493_v35  ;;  %26252 = vst [vmem:[#allocation41_spill] sm:$0xff] %v22780_v58  ;;  %v10406_v35 = vrot.slane %v22780_v58, 6 }
 0x20e   : > { %v2499_v58 = vsel %vm2161_vm5, %v2496_v5, %v2498_v43  ;;  %v2502_v5 = vrot.slane %v22803_v53, 3 }
 0x212   : > { %18737 = vmatmul.mubr.msk.bf16.gmra.mrb[28].mxu0 %vm316_vm2, %v10153_v46  ;;  %v10407_v46 = vsel %vm562_vm1, %v10404_v23, %v10406_v35  ;;  %v10410_v23 = vrot.slane %v22304_v36, 6  ;;  %v22822_v36 = vshll.u32 %v22661_v39, 16 }
 0x213   : > { %18742 = vmatprep.mubr.msk.bf16.mxu0 %vm316_vm2, %v10405_v17  ;;  %v10409_v17 = vsel %vm562_vm1, %v10406_v35, %v10408_v48  ;;  %v10412_v35 = vrot.slane %v22510_v3, 6 }
 0x214   : > { %17909 = vmatmul.mubr.msk.bf16.gmra.mrb[16].mxu1 %vm316_vm2, %v2495_v28  ;;  %v22798_v28 = vand.u32 %v16558_v51, %v21247_v4  ;;  %v2757_v51 = vshrl.u32 %v22659_v50, 16  ;;  %v10411_v3 = vsel %vm562_vm1, %v10408_v48, %v10410_v23  ;;  %v2770_v7 = vrot.slane %v22822_v36, 4 }
 0x215   : > { %17912 = vmatprep.mubr.msk.bf16.mxu1 %vm316_vm2, %v2497_v38  ;;  %v2501_v38 = vsel %vm2161_vm5, %v2498_v43, %v2500_v6  ;;  %v2504_v43 = vrot.slane %v22805_v60, 3  ;;  %v10416_v48 = vrot.slane %v22527_v18, 6 }
 0x216   : > { %v2759_v26 = vrot.slane %v2757_v51, 3 }
 0x217   : > { %v10417_v18 = vsel %vm562_vm1, %v10414_v11, %v10416_v48 }
 0x21a   : > { %18743 = vmatmul.mubr.msk.bf16.vlgmr.msra.gmra.mrb[0].mxu0 %vm316_vm2, %v10407_v46  ;;  %v22819_v46 = vshrl.u32 %v22661_v39, 16 }
 0x21b   : > { %18775 = vmatpush3.bf16.msra.mxu0 %v22637_v27  ;;  %18746 = vmatprep.mubr.msk.bf16.mxu0 %vm316_vm2, %v10409_v17  ;;  %v2760_v27 = vshll.u32 %v22659_v50, 16  ;;  %v2503_v17 = vsel %vm2161_vm5, %v2500_v6, %v2502_v5  ;;  %v2506_v6 = vrot.slane %v2455_v19, 3 }
 0x21c   : > { %17913 = vmatmul.mubr.msk.bf16.gmra.mrb[20].mxu1 %vm316_vm2, %v2499_v58  ;;  %18808 = vmatprep.subr.bf16.mxu0 %v22798_v28  ;;  %v10413_v58 = vsel %vm562_vm1, %v10410_v23, %v10412_v35  ;;  %v2767_v50 = vrot.slane %v22819_v46, 3  ;;  %v22837_v23 = vshrl.u32 %v22677_v34, 16 }
 0x21d   : > { %17916 = vmatprep.mubr.msk.bf16.mxu1 %vm316_vm2, %v2501_v38  ;;  %v2505_v38 = vsel %vm2161_vm5, %v2502_v5, %v2504_v43  ;;  %v2762_v41 = vrot.slane %v2760_v27, 4  ;;  %v22840_v5 = vshll.u32 %v22677_v34, 16  ;;  %v2507_v19 = vsel %vm2161_vm5, %v2504_v43, %v2506_v6 }
 0x21e   : > { %v2771_v27 = vor.u32 %v2770_v7, %v2767_v50  ;;  %v22863_v50 = vshrl.u32 %v22698_v44, 16  ;;  %v22866_v6 = vshll.u32 %v22698_v44, 16 }
 0x21f   : > { %v2763_v51 = vor.u32 %v2762_v41, %v2759_v26  ;;  %v2788_v26 = vrot.slane %v22846_v47, 4 }
 0x220   : > { %26255 = vst [vmem:[#allocation48_spill] sm:$0xff] %v22863_v50  ;;  %26256 = vst [vmem:[#allocation47_spill] sm:$0xff] %v22866_v6 }
 0x221   : > { %v2772_v7 = vsel %vm2755_vm6, %v2763_v51, %v2771_v27 }
 0x222   : > { %18747 = vmatmul.mubr.msk.bf16.gmra.mrb[4].mxu0 %vm316_vm2, %v10411_v3  ;;  %v22843_v3 = vshrl.u32 %v22680_v29, 16 }
 0x223   : > { %18750 = vmatprep.mubr.msk.bf16.mxu0 %vm316_vm2, %v10413_v58  ;;  %v10415_v58 = vsel %vm562_vm1, %v10412_v35, %v10414_v11  ;;  %v10418_v35 = vrot.slane %v22540_v49, 6  ;;  %v10420_v11 = vrot.slane %v22544_v10, 6  ;;  %v16150_v10 = vld [vmem:[%s25749_s1 + $0x14] sm:$0x3] }
 0x224   : > { %17917 = vmatmul.mubr.msk.bf16.gmra.mrb[24].mxu1 %vm316_vm2, %v2503_v17  ;;  %v2776_v17 = vrot.slane %v22837_v23, 3  ;;  %v2785_v41 = vrot.slane %v22843_v3, 3  ;;  %v22887_v47 = vand.u32 %v16150_v10, %v21247_v4 }
 0x225   : > { %17920 = vmatprep.mubr.msk.bf16.mxu1 %vm316_vm2, %v2505_v38  ;;  %v2779_v38 = vrot.slane %v22840_v5, 4  ;;  %v10419_v49 = vsel %vm562_vm1, %v10416_v48, %v10418_v35 }
 0x226   : > { %v2789_v51 = vor.u32 %v2788_v26, %v2785_v41 }
 0x227   : > { %v2780_v43 = vor.u32 %v2779_v38, %v2776_v17  ;;  %v2794_v38 = vrot.slane %v22863_v50, 3 }
 0x229   : > { %v2781_v17 = vsel %vm2755_vm6, %v2771_v27, %v2780_v43  ;;  %v2790_v41 = vsel %vm2755_vm6, %v2780_v43, %v2789_v51  ;;  %v10424_v27 = vrot.slane %v22566_v61, 6 }
 0x22a   : > { %18751 = vmatmul.mubr.msk.bf16.gmra.mrb[8].mxu0 %vm316_vm2, %v10415_v58  ;;  %v22869_v58 = vshrl.u32 %v22704_v40, 16 }
 0x22b   : > { %18754 = vmatprep.mubr.msk.bf16.mxu0 %vm316_vm2, %v10417_v18  ;;  %v22872_v18 = vshll.u32 %v22704_v40, 16 }
 0x22c   : > { %17921 = vmatmul.mubr.msk.bf16.gmra.mrb[28].mxu1 %vm316_vm2, %v2507_v19  ;;  %26257 = vst [vmem:[#allocation11_spill] sm:$0xff] %v22869_v58  ;;  %v10421_v19 = vsel %vm562_vm1, %v10418_v35, %v10420_v11  ;;  %v2803_v26 = vrot.slane %v22869_v58, 3  ;;  %v10422_v35 = vrot.slane %v22562_v25, 6  ;;  %v22905_v25 = vshll.u32 %v22724_v16, 16  ;;  %v22918_v58 = vld [vmem:[#allocation2 + $0xe8] sm:$0xff] }
 0x22d   : > { %17926 = vmatprep.mubr.msk.bf16.mxu1 %vm316_vm2, %v2772_v7  ;;  %26258 = vst [vmem:[#allocation22_spill] sm:$0xff] %v22872_v18  ;;  %v2797_v7 = vrot.slane %v22866_v6, 4  ;;  %v2806_v48 = vrot.slane %v22872_v18, 4  ;;  %v22899_v18 = vshll.u32 %v22721_v9, 16  ;;  %26263 = vst [vmem:[#allocation16_spill] sm:$0xff] %v22918_v58 }
 0x22e   : > { %26262 = vst [vmem:[#allocation18_spill] sm:$0xff] %v22905_v25  ;;  %v10423_v61 = vsel %vm562_vm1, %v10420_v11, %v10422_v35  ;;  %v10426_v11 = vrot.slane %v22918_v58, 6  ;;  %v22936_v58 = vshll.u32 %v22746_v62, 16 }
 0x22f   : > { %v2798_v43 = vor.u32 %v2797_v7, %v2794_v38  ;;  %26260 = vst [vmem:[#allocation10_spill] sm:$0xff] %v22899_v18  ;;  %v2807_v10 = vor.u32 %v2806_v48, %v2803_v26  ;;  %v2815_v7 = vrot.slane %v22899_v18, 4  ;;  %v2824_v48 = vrot.slane %v22905_v25, 4 }
 0x230   : > { %v22930_v25 = vshll.u32 %v22741_v24, 16  ;;  %26268 = vst [vmem:[#allocation23_spill] sm:$0xff] %v22936_v58  ;;  %v2842_v18 = vrot.slane %v22936_v58, 4  ;;  %v22959_v58 = vshrl.u32 %v22759_v52, 16 }
 0x232   : > { %18755 = vmatmul.mubr.msk.bf16.gmra.mrb[12].mxu0 %vm316_vm2, %v10419_v49  ;;  %v22896_v49 = vshrl.u32 %v22721_v9, 16  ;;  %26266 = vst [vmem:[#allocation34_spill] sm:$0xff] %v22930_v25 }
 0x233   : > { %18758 = vmatprep.mubr.msk.bf16.mxu0 %vm316_vm2, %v10421_v19  ;;  %v22902_v19 = vshrl.u32 %v22724_v16, 16 }
 0x234   : > { %17927 = vmatmul.mubr.msk.bf16.vlgmr.msra.gmra.mrb[0].mxu1 %vm316_vm2, %v2781_v17  ;;  %26259 = vst [vmem:[#allocation17_spill] sm:$0xff] %v22896_v49  ;;  %v2799_v17 = vsel %vm2755_vm6, %v2789_v51, %v2798_v43  ;;  %v2812_v38 = vrot.slane %v22896_v49, 3  ;;  %v22922_v51 = vld [vmem:[#allocation2 + $0xf0] sm:$0xff]  ;;  %v22948_v49 = vld [vmem:[#allocation2 + $0xf8] sm:$0xff] }
 0x235   : > { %17959 = vmatpush3.bf16.msra.mxu1 %v22701_v2  ;;  %17930 = vmatprep.mubr.msk.bf16.mxu1 %vm316_vm2, %v2790_v41  ;;  %26261 = vst [vmem:[#allocation21_spill] sm:$0xff] %v22902_v19  ;;  %v10425_v2 = vsel %vm562_vm1, %v10422_v35, %v10424_v27  ;;  %v2808_v41 = vsel %vm2755_vm6, %v2798_v43, %v2807_v10  ;;  %v2821_v26 = vrot.slane %v22902_v19, 3  ;;  %26264 = vst [vmem:[#allocation13_spill] sm:$0xff] %v22922_v51 }
 0x236   : > { %17992 = vmatprep.subr.bf16.mxu1 %v22887_v47  ;;  %v10428_v35 = vrot.slane %v22922_v51, 6  ;;  %v22927_v43 = vshrl.u32 %v22741_v24, 16  ;;  %v22933_v19 = vshrl.u32 %v22746_v62, 16  ;;  %26269 = vst [vmem:[#allocation30_spill] sm:$0xff] %v22948_v49 }
 0x238   : > { %26265 = vst [vmem:[#allocation27_spill] sm:$0xff] %v22927_v43  ;;  %26267 = vst [vmem:[#allocation26_spill] sm:$0xff] %v22933_v19  ;;  %v10429_v51 = vsel %vm562_vm1, %v10426_v11, %v10428_v35 }
 0x23a   : > { %18759 = vmatmul.mubr.msk.bf16.gmra.mrb[16].mxu0 %vm316_vm2, %v10423_v61  ;;  %v2816_v61 = vor.u32 %v2815_v7, %v2812_v38  ;;  %v2830_v38 = vrot.slane %v22927_v43, 3  ;;  %v2833_v7 = vrot.slane %v22930_v25, 4  ;;  %v22965_v25 = vshrl.u32 %v22762_v22, 16 }
 0x23b   : > { %18762 = vmatprep.mubr.msk.bf16.mxu0 %vm316_vm2, %v10425_v2  ;;  %v2825_v2 = vor.u32 %v2824_v48, %v2821_v26  ;;  %v2839_v48 = vrot.slane %v22933_v19, 3 }
 0x23c   : > { %17931 = vmatmul.mubr.msk.bf16.gmra.mrb[4].mxu1 %vm316_vm2, %v2799_v17  ;;  %v10427_v17 = vsel %vm562_vm1, %v10424_v27, %v10426_v11  ;;  %v10430_v27 = vrot.slane %v22948_v49, 6  ;;  %v22951_v11 = vld [vmem:[#allocation2 + $0x100] sm:$0xff]  ;;  %v2834_v19 = vor.u32 %v2833_v7, %v2830_v38  ;;  %v10691_v38 = vrot.slane %v26233_v31, 6 }
 0x23d   : > { %17934 = vmatprep.mubr.msk.bf16.mxu1 %vm316_vm2, %v2808_v41  ;;  %v2817_v41 = vsel %vm2755_vm6, %v2807_v10, %v2816_v61  ;;  %v2826_v26 = vsel %vm2755_vm6, %v2816_v61, %v2825_v2  ;;  %26270 = vst [vmem:[#allocation31_spill] sm:$0xff] %v22951_v11  ;;  %v10432_v10 = vrot.slane %v22951_v11, 6  ;;  %v10687_v61 = vshll.u32 %v22755_v20, 16 }
 0x23e   : > { %v2843_v49 = vor.u32 %v2842_v18, %v2839_v48  ;;  %v22968_v11 = vshll.u32 %v22762_v22, 16  ;;  %v10692_v7 = vrot.slane %v26234_v37, 7  ;;  %v2835_v6 = vsel %vm2755_vm6, %v2825_v2, %v2834_v19 }
 0x23f   : > { %v2848_v18 = vrot.slane %v22959_v58, 3  ;;  %v10434_v31 = vrot.slane %v22736_v57, 6  ;;  %v22995_v57 = vshll.u32 %v22783_v54, 16 }
 0x240   : > { %26271 = vst [vmem:[#allocation36_spill] sm:$0xff] %v22968_v11  ;;  %v2844_v50 = vsel %vm2755_vm6, %v2834_v19, %v2843_v49  ;;  %v10693_v2 = vor.u32 %v10692_v7, %v10691_v38  ;;  %v22989_v19 = vshll.u32 %v22777_v12, 16  ;;  %v10700_v38 = vrot.slane %v26239_v33, 7 }
 0x242   : > { %18763 = vmatmul.mubr.msk.bf16.gmra.mrb[20].mxu0 %vm316_vm2, %v10427_v17  ;;  %v10684_v17 = vshrl.u32 %v22755_v20, 16  ;;  %v10433_v20 = vsel %vm562_vm1, %v10430_v27, %v10432_v10 }
 0x243   : > { %18766 = vmatprep.mubr.msk.bf16.mxu0 %vm316_vm2, %v10429_v51  ;;  %v22962_v51 = vshll.u32 %v22759_v52, 16 }
 0x244   : > { %17935 = vmatmul.mubr.msk.bf16.gmra.mrb[8].mxu1 %vm316_vm2, %v2817_v41  ;;  %v10431_v41 = vsel %vm562_vm1, %v10428_v35, %v10430_v27  ;;  %v10686_v43 = vrot.slane %v10684_v17, 6  ;;  %v2857_v35 = vrot.slane %v22965_v25, 3  ;;  %v2860_v27 = vrot.slane %v22968_v11, 4 }
 0x245   : > { %17938 = vmatprep.mubr.msk.bf16.mxu1 %vm316_vm2, %v2826_v26  ;;  %v10689_v26 = vrot.slane %v10687_v61, 7  ;;  %v2851_v48 = vrot.slane %v22962_v51, 4  ;;  %v22986_v61 = vshrl.u32 %v22777_v12, 16  ;;  %v22992_v11 = vshrl.u32 %v22783_v54, 16 }
 0x247   : > { %v10690_v37 = vor.u32 %v10689_v26, %v10686_v43  ;;  %v2852_v17 = vor.u32 %v2851_v48, %v2848_v18  ;;  %v10695_v43 = vrot.slane %v22275_v1, 6  ;;  %v10699_v26 = vrot.slane %v26238_v14, 6 }
 0x248   : > { %v2866_v18 = vrot.slane %v22986_v61, 3  ;;  %v2869_v48 = vrot.slane %v22989_v19, 4  ;;  %v2875_v1 = vrot.slane %v22992_v11, 3 }
 0x249   : > { %v2853_v7 = vsel %vm2755_vm6, %v2843_v49, %v2852_v17  ;;  %v10701_v14 = vor.u32 %v10700_v38, %v10699_v26  ;;  %v23014_v49 = vshrl.u32 %v22803_v53, 16  ;;  %v10707_v38 = vrot.slane %v26242_v32, 6 }
 0x24a   : > { %18767 = vmatmul.mubr.msk.bf16.gmra.mrb[24].mxu0 %vm316_vm2, %v10431_v41  ;;  %v2861_v41 = vor.u32 %v2860_v27, %v2857_v35  ;;  %v2870_v33 = vor.u32 %v2869_v48, %v2866_v18  ;;  %v23017_v27 = vshll.u32 %v22803_v53, 16 }
 0x24b   : > { %18770 = vmatprep.mubr.msk.bf16.mxu0 %vm316_vm2, %v10433_v20  ;;  %v10694_v20 = vsel %vm4967_vm14, %v10690_v37, %v10693_v2  ;;  %26272 = vst [vmem:[#allocation35_spill] sm:$0xff] %v23014_v49 }
 0x24c   : > { %17939 = vmatmul.mubr.msk.bf16.gmra.mrb[12].mxu1 %vm316_vm2, %v2835_v6  ;;  %v10435_v6 = vsel %vm562_vm1, %v10432_v10, %v10434_v31  ;;  %v2862_v10 = vsel %vm2755_vm6, %v2852_v17, %v2861_v41  ;;  %26273 = vst [vmem:[#allocation40_spill] sm:$0xff] %v23017_v27  ;;  %v16575_v31 = vld [vmem:[%s25749_s1 + $0x46] sm:$0x3]  ;;  %v23023_v17 = vshrl.u32 %v22805_v60, 16  ;;  %v2871_v48 = vsel %vm2755_vm6, %v2861_v41, %v2870_v33 }
 0x24d   : > { %17942 = vmatprep.mubr.msk.bf16.mxu1 %vm316_vm2, %v2844_v50  ;;  %v10696_v50 = vrot.slane %v26237_v21, 7  ;;  %v2878_v21 = vrot.slane %v22995_v57, 4  ;;  %v23035_v18 = vand.u32 %v16575_v31, %v21247_v4 }
 0x24e   : > { %26274 = vst [vmem:[#allocation68_spill] sm:$0xff] %v23023_v17 }
 0x24f   : > { %v10697_v35 = vor.u32 %v10696_v50, %v10695_v43  ;;  %v2879_v37 = vor.u32 %v2878_v21, %v2875_v1  ;;  %v10703_v50 = vrot.slane %v22307_v8, 6  ;;  %v2887_v1 = vrot.slane %v23017_v27, 4  ;;  %v23044_v21 = vld [vmem:[#allocation2 + $0xa0] sm:$0xf] }
 0x251   : > { %v10698_v43 = vsel %vm4967_vm14, %v10693_v2, %v10697_v35  ;;  %v10702_v26 = vsel %vm4967_vm14, %v10697_v35, %v10701_v14  ;;  %v2880_v8 = vsel %vm2755_vm6, %v2870_v33, %v2879_v37  ;;  %v2900_v33 = vshrl.u32 %v23044_v21, 16 }
 0x252   : > { %18771 = vmatmul.mubr.msk.bf16.gmra.mrb[28].mxu0 %vm316_vm2, %v10435_v6  ;;  %v23026_v6 = vshll.u32 %v22805_v60, 16 }
 0x253   : > { %18776 = vmatprep.mubr.msk.bf16.mxu0 %vm316_vm2, %v10694_v20  ;;  %v10704_v20 = vrot.slane %v22310_v55, 7  ;;  %v2893_v55 = vrot.slane %v23023_v17, 3 }
 0x254   : > { %17943 = vmatmul.mubr.msk.bf16.gmra.mrb[16].mxu1 %vm316_vm2, %v2853_v7  ;;  %26275 = vst [vmem:[#allocation69_spill] sm:$0xff] %v23026_v6  ;;  %v10708_v7 = vrot.slane %v26243_v30, 7  ;;  %v2896_v2 = vrot.slane %v23026_v6, 4 }
 0x255   : > { %17946 = vmatprep.mubr.msk.bf16.mxu1 %vm316_vm2, %v2862_v10  ;;  %v2884_v10 = vrot.slane %v23014_v49, 3  ;;  %v10705_v35 = vor.u32 %v10704_v20, %v10703_v50  ;;  %v10715_v20 = vrot.slane %v26248_v59, 6 }
 0x256   : > { %v10709_v41 = vor.u32 %v10708_v7, %v10707_v38  ;;  %v2897_v30 = vor.u32 %v2896_v2, %v2893_v55  ;;  %v10716_v38 = vrot.slane %v26249_v0, 7 }
 0x257   : > { %v2888_v31 = vor.u32 %v2887_v1, %v2884_v10  ;;  %v10706_v32 = vsel %vm4967_vm14, %v10701_v14, %v10705_v35 }
 0x258   : > { %v10710_v50 = vsel %vm4967_vm14, %v10705_v35, %v10709_v41  ;;  %v10717_v55 = vor.u32 %v10716_v38, %v10715_v20  ;;  %v3161_v38 = vrot.slane %v22677_v34, 4 }
 0x259   : > { %v2889_v7 = vsel %vm2755_vm6, %v2879_v37, %v2888_v31  ;;  %v2898_v1 = vsel %vm2755_vm6, %v2888_v31, %v2897_v30  ;;  %v3159_v37 = vrot.slane %v22661_v39, 4  ;;  %v10720_v31 = vrot.slane %v26206_v56, 7 }
 0x25a   : > { %18777 = vmatmul.mubr.msk.bf16.vlgmr.msra.gmra.mrb[0].mxu0 %vm316_vm2, %v10698_v43  ;;  %v2903_v43 = vshll.u32 %v23044_v21, 16 }
 0x25b   : > { %18809 = vmatpush3.bf16.msra.mxu0 %v22798_v28  ;;  %18780 = vmatprep.mubr.msk.bf16.mxu0 %vm316_vm2, %v10702_v26  ;;  %v10711_v28 = vrot.slane %v26246_v42, 6  ;;  %v10712_v26 = vrot.slane %v26247_v15, 7  ;;  %v3162_v34 = vsel %vm3157_vm8, %v3159_v37, %v3161_v38  ;;  %v23400_v15 = vld [vmem:[#allocation2 + $0x108] sm:$0xff] }
 0x25c   : > { %17947 = vmatmul.mubr.msk.bf16.gmra.mrb[20].mxu1 %vm316_vm2, %v2871_v48  ;;  %18842 = vmatprep.subr.bf16.mxu0 %v23035_v18  ;;  %v2902_v48 = vrot.slane %v2900_v33, 3  ;;  %v2905_v10 = vrot.slane %v2903_v43, 4 }
 0x25d   : > { %17950 = vmatprep.mubr.msk.bf16.mxu1 %vm316_vm2, %v2880_v8  ;;  %v10713_v14 = vor.u32 %v10712_v26, %v10711_v28  ;;  %v23063_v8 = vld [vmem:[#allocation2 + $0x20] sm:$0xf0]  ;;  %v10723_v28 = vrot.slane %v26207_v63, 6  ;;  %v10724_v26 = vrot.slane %v26208_v45, 7  ;;  %v23332_v45 = vld [vmem:[#allocation2 + $0xd8] sm:$0xff] }
 0x25e   : > { %v2906_v2 = vor.u32 %v2905_v10, %v2902_v48  ;;  %v3158_v35 = vrot.slane %v23063_v8, 4  ;;  %v26276_v10 = vld [vmem:[#allocation57_spill] sm:$0xff]  ;;  %v23335_v63 = vld [vmem:[#allocation2 + $0xe0] sm:$0xff] }
 0x25f   : > { %v10714_v33 = vsel %vm4967_vm14, %v10709_v41, %v10713_v14  ;;  %v10718_v43 = vsel %vm4967_vm14, %v10713_v14, %v10717_v55  ;;  %v10725_v41 = vor.u32 %v10724_v26, %v10723_v28 }
 0x260   : > { %v3160_v20 = vsel %vm3157_vm8, %v3158_v35, %v3159_v37  ;;  %v3165_v37 = vrot.slane %v22698_v44, 4 }
 0x262   : > { %18781 = vmatmul.mubr.msk.bf16.gmra.mrb[4].mxu0 %vm316_vm2, %v10706_v32  ;;  %v10719_v32 = vrot.slane %v26205_v13, 6 }
 0x263   : > { %18784 = vmatprep.mubr.msk.bf16.mxu0 %vm316_vm2, %v10710_v50  ;;  %v2907_v50 = vsel %vm2755_vm6, %v2897_v30, %v2906_v2  ;;  %v10727_v30 = vrot.slane %v26276_v10, 6  ;;  %v16167_v2 = vld [vmem:[%s25749_s1 + $0x16] sm:$0x3] }
 0x264   : > { %17951 = vmatmul.mubr.msk.bf16.gmra.mrb[24].mxu1 %vm316_vm2, %v2889_v7  ;;  %v10721_v39 = vor.u32 %v10720_v31, %v10719_v32  ;;  %v3163_v7 = vrot.slane %v22680_v29, 4  ;;  %v26279_v31 = vld [vmem:[#allocation60_spill] sm:$0xff] }
 0x265   : > { %17954 = vmatprep.mubr.msk.bf16.mxu1 %vm316_vm2, %v2898_v1  ;;  %v26277_v1 = vld [vmem:[#allocation58_spill] sm:$0xff] }
 0x266   : > { %v10722_v48 = vsel %vm4967_vm14, %v10717_v55, %v10721_v39  ;;  %v10728_v14 = vrot.slane %v26277_v1, 7  ;;  %v10726_v35 = vsel %vm4967_vm14, %v10721_v39, %v10725_v41  ;;  %v3164_v29 = vsel %vm3157_vm8, %v3161_v38, %v3163_v7  ;;  %v26280_v39 = vld [vmem:[#allocation39_spill] sm:$0xff]  ;;  %v23311_v1 = vld [vmem:[#allocation2 + $0xd0] sm:$0xff] }
 0x267   : > { %v23096_v55 = vand.u32 %v16167_v2, %v21247_v4  ;;  %v10735_v38 = vrot.slane %v26280_v39, 6  ;;  %v3166_v44 = vsel %vm3157_vm8, %v3163_v7, %v3165_v37 }
 0x268   : > { %v10729_v28 = vor.u32 %v10728_v14, %v10727_v30  ;;  %v26282_v14 = vld [vmem:[#allocation62_spill] sm:$0xff] }
 0x269   : > { %v10739_v2 = vrot.slane %v26282_v14, 6  ;;  %v3169_v14 = vrot.slane %v22721_v9, 4 }
 0x26a   : > { %18785 = vmatmul.mubr.msk.bf16.gmra.mrb[8].mxu0 %vm316_vm2, %v10714_v33  ;;  %v26278_v33 = vld [vmem:[#allocation59_spill] sm:$0xff] }
 0x26b   : > { %18788 = vmatprep.mubr.msk.bf16.mxu0 %vm316_vm2, %v10718_v43  ;;  %v10731_v32 = vrot.slane %v26278_v33, 6  ;;  %v10732_v43 = vrot.slane %v26279_v31, 7  ;;  %v23268_v31 = vld [vmem:[#allocation2 + $0xb0] sm:$0xff]  ;;  %v23287_v33 = vld [vmem:[#allocation2 + $0xc0] sm:$0xff] }
 0x26c   : > { %17955 = vmatmul.mubr.msk.bf16.gmra.mrb[28].mxu1 %vm316_vm2, %v2907_v50  ;;  %v3167_v50 = vrot.slane %v22704_v40, 4 }
 0x26d   : > { %17960 = vmatprep.mubr.msk.bf16.mxu1 %vm316_vm2, %v3160_v20  ;;  %v10733_v26 = vor.u32 %v10732_v43, %v10731_v32  ;;  %v10730_v20 = vsel %vm4967_vm14, %v10725_v41, %v10729_v28  ;;  %v255_v43 = vld [vmem:[%s21272_s4 + $0x220] sm:$0xff] }
 0x26e   : > { %v3168_v40 = vsel %vm3157_vm8, %v3165_v37, %v3167_v50 }
 0x272   : > { %18789 = vmatmul.mubr.msk.bf16.gmra.mrb[12].mxu0 %vm316_vm2, %v10722_v48  ;;  %v26281_v48 = vld [vmem:[#allocation61_spill] sm:$0xff] }
 0x273   : > { %18792 = vmatprep.mubr.msk.bf16.mxu0 %vm316_vm2, %v10726_v35  ;;  %v10736_v30 = vrot.slane %v26281_v48, 7  ;;  %v26283_v35 = vld [vmem:[#allocation63_spill] sm:$0xff]  ;;  %v258_v48 = vld [vmem:[%s21272_s4 + $0x238] sm:$0xff]  ;;  %26310 = vst [vmem:[#allocation61_spill] sm:$0xff] %v23287_v33 }
 0x274   : > { %17961 = vmatmul.mubr.msk.bf16.vlgmr.msra.gmra.mrb[0].mxu1 %vm316_vm2, %v3162_v34  ;;  %v10740_v32 = vrot.slane %v26283_v35, 7  ;;  %v256_v34 = vld [vmem:[%s21272_s4 + $0x228] sm:$0xff] }
 0x275   : > { %17993 = vmatpush3.bf16.msra.mxu1 %v22887_v47  ;;  %17964 = vmatprep.mubr.msk.bf16.mxu1 %vm316_vm2, %v3164_v29  ;;  %v10734_v47 = vsel %vm4967_vm14, %v10729_v28, %v10733_v26  ;;  %v10737_v41 = vor.u32 %v10736_v30, %v10735_v38  ;;  %v307_v39 = vpack.c.bf16 %v256_v34, %v255_v43  ;;  %v257_v28 = vld [vmem:[%s21272_s4 + $0x230] sm:$0xff]  ;;  %v26284_v38 = vld [vmem:[#allocation64_spill] sm:$0xff] }
 0x276   : > { %18026 = vmatprep.subr.bf16.mxu1 %v23096_v55  ;;  %v10741_v29 = vor.u32 %v10740_v32, %v10739_v2  ;;  %v308_v7 = vpack.c.bf16 %v258_v48, %v257_v28  ;;  %v10743_v30 = vrot.slane %v26284_v38, 6  ;;  %v26286_v32 = vld [vmem:[#allocation66_spill] sm:$0xff]  ;;  %v3170_v43 = vsel %vm3157_vm8, %v3167_v50, %v3169_v14  ;;  %v259_v28 = vld [vmem:[%s21272_s4 + $0x240] sm:$0xff]  ;;  %v260_v48 = vld [vmem:[%s21272_s4 + $0x248] sm:$0xff] }
 0x277   : > { %351 = vst.msk [vmem:[#allocation2 + $0x110] sm:$0xff] %vm316_vm2, %v307_v39  ;;  %v10738_v37 = vsel %vm4967_vm14, %v10733_v26, %v10737_v41  ;;  %v10747_v9 = vrot.slane %v26286_v32, 6  ;;  %v309_v38 = vpack.c.bf16 %v260_v48, %v259_v28  ;;  %v262_v32 = vld [vmem:[%s21272_s4 + $0x258] sm:$0xff]  ;;  %v3173_v50 = vrot.slane %v22741_v24, 4 }
 0x278   : > { %352 = vst.msk [vmem:[#allocation2 + $0x118] sm:$0xff] %vm316_vm2, %v308_v7  ;;  %v10742_v35 = vsel %vm4967_vm14, %v10737_v41, %v10741_v29 }
 0x279   : > { %353 = vst.msk [vmem:[#allocation2 + $0x120] sm:$0xff] %vm316_vm2, %v309_v38  ;;  %v26289_v38 = vld [vmem:[#allocation41_spill] sm:$0xff] }
 0x27a   : > { %18793 = vmatmul.mubr.msk.bf16.gmra.mrb[16].mxu0 %vm316_vm2, %v10730_v20  ;;  %v3171_v20 = vrot.slane %v22724_v16, 4 }
 0x27b   : > { %18796 = vmatprep.mubr.msk.bf16.mxu0 %vm316_vm2, %v10734_v47  ;;  %v26285_v47 = vld [vmem:[#allocation65_spill] sm:$0xff] }
 0x27c   : > { %17965 = vmatmul.mubr.msk.bf16.gmra.mrb[4].mxu1 %vm316_vm2, %v3166_v44  ;;  %v10744_v2 = vrot.slane %v26285_v47, 7  ;;  %v26287_v44 = vld [vmem:[#allocation67_spill] sm:$0xff]  ;;  %v3172_v26 = vsel %vm3157_vm8, %v3169_v14, %v3171_v20  ;;  %v261_v47 = vld [vmem:[%s21272_s4 + $0x250] sm:$0xff] }
 0x27d   : > { %17968 = vmatprep.mubr.msk.bf16.mxu1 %vm316_vm2, %v3168_v40  ;;  %v10748_v16 = vrot.slane %v26287_v44, 7  ;;  %v23131_v40 = vld [vmem:[#allocation2 + $0x108] sm:$0x7f]  ;;  %v310_v14 = vpack.c.bf16 %v262_v32, %v261_v47  ;;  %v3174_v44 = vsel %vm3157_vm8, %v3171_v20, %v3173_v50  ;;  %v11012_v47 = vrot.slane %v26289_v38, 7  ;;  %v26290_v32 = vld [vmem:[#allocation46_spill] sm:$0xff] }
 0x27e   : > { %v10745_v34 = vor.u32 %v10744_v2, %v10743_v30  ;;  %v10752_v39 = vshrl.u32 %v23131_v40, 16  ;;  %v10755_v41 = vshll.u32 %v23131_v40, 16  ;;  %v3189_v38 = vrot.slane %v23044_v21, 4  ;;  %v23403_v42 = vld [vmem:[#allocation2 + $0x110] sm:$0xff] }
 0x27f   : > { %v10749_v7 = vor.u32 %v10748_v16, %v10747_v9  ;;  %354 = vst.msk [vmem:[#allocation2 + $0x128] sm:$0xff] %vm316_vm2, %v310_v14  ;;  %v11004_v16 = vld [vmem:[#allocation2 + $0x88] sm:$0x80] }
 0x280   : > { %v10746_v30 = vsel %vm4967_vm14, %v10741_v29, %v10745_v34  ;;  %v10754_v2 = vrot.slane %v10752_v39, 6  ;;  %v26288_v29 = vld [vmem:[#allocation43_spill] sm:$0xff]  ;;  %v3177_v39 = vrot.slane %v22759_v52, 4  ;;  %v11014_v52 = vrot.slane %v26290_v32, 7 }
 0x281   : > { %v10750_v9 = vsel %vm4967_vm14, %v10745_v34, %v10749_v7  ;;  %v3179_v34 = vrot.slane %v22762_v22, 4  ;;  %v3181_v22 = vrot.slane %v22777_v12, 4  ;;  %v20962_v12 = vld [vmem:[#allocation2 + $0xa8] sm:$0xff] }
 0x282   : > { %18797 = vmatmul.mubr.msk.bf16.gmra.mrb[20].mxu0 %vm316_vm2, %v10738_v37  ;;  %v3175_v37 = vrot.slane %v22746_v62, 4 }
 0x283   : > { %18800 = vmatprep.mubr.msk.bf16.mxu0 %vm316_vm2, %v10742_v35  ;;  %v10757_v35 = vrot.slane %v10755_v41, 7  ;;  %v3180_v48 = vsel %vm3157_vm8, %v3177_v39, %v3179_v34 }
 0x284   : > { %17969 = vmatmul.mubr.msk.bf16.gmra.mrb[8].mxu1 %vm316_vm2, %v3170_v43  ;;  %v3176_v24 = vsel %vm3157_vm8, %v3173_v50, %v3175_v37  ;;  %v11009_v43 = vrot.slane %v11004_v16, 7  ;;  %v3178_v28 = vsel %vm3157_vm8, %v3175_v37, %v3177_v39  ;;  %v3183_v50 = vrot.slane %v22783_v54, 4  ;;  %v20963_v54 = vld [vmem:[#allocation2 + $0xb0] sm:$0xff] }
 0x285   : > { %17972 = vmatprep.mubr.msk.bf16.mxu1 %vm316_vm2, %v3172_v26  ;;  %v10758_v62 = vor.u32 %v10757_v35, %v10754_v2  ;;  %v11010_v26 = vrot.slane %v26288_v29, 7  ;;  %v11015_v37 = vsel %vm561_vm0, %v11012_v47, %v11014_v52  ;;  %v3182_v2 = vsel %vm3157_vm8, %v3179_v34, %v3181_v22 }
 0x286   : > { %v3184_v35 = vsel %vm3157_vm8, %v3181_v22, %v3183_v50  ;;  %v3185_v16 = vrot.slane %v22803_v53, 4  ;;  %v3447_v53 = vrot.slane %v22819_v46, 4 }
 0x287   : > { %v10759_v20 = vsel %vm4967_vm14, %v10749_v7, %v10758_v62  ;;  %v11011_v41 = vsel %vm561_vm0, %v11009_v43, %v11010_v26  ;;  %v16592_v7 = vld [vmem:[%s25749_s1 + $0x48] sm:$0x3]  ;;  %v11013_v14 = vsel %vm561_vm0, %v11010_v26, %v11012_v47  ;;  %v3440_v62 = vshrl.u32 %v23063_v8, 16 }
 0x288   : > { %v3186_v26 = vsel %vm3157_vm8, %v3183_v50, %v3185_v16  ;;  %v3451_v50 = vrot.slane %v22837_v23, 4 }
 0x289   : > { %v3442_v34 = vrot.slane %v3440_v62, 4 }
 0x28a   : > { %18801 = vmatmul.mubr.msk.bf16.gmra.mrb[24].mxu0 %vm316_vm2, %v10746_v30  ;;  %v23178_v30 = vand.u32 %v16592_v7, %v21247_v4 }
 0x28b   : > { %18804 = vmatprep.mubr.msk.bf16.mxu0 %vm316_vm2, %v10750_v9  ;;  %v11016_v9 = vrot.slane %v20962_v12, 7  ;;  %v20966_v12 = vld [vmem:[#allocation2 + $0xc8] sm:$0xff] }
 0x28c   : > { %17973 = vmatmul.mubr.msk.bf16.gmra.mrb[12].mxu1 %vm316_vm2, %v3174_v44  ;;  %v11018_v44 = vrot.slane %v20963_v54, 7  ;;  %v20967_v54 = vld [vmem:[#allocation2 + $0xd0] sm:$0xff] }
 0x28d   : > { %17976 = vmatprep.mubr.msk.bf16.mxu1 %vm316_vm2, %v3176_v24  ;;  %v3187_v24 = vrot.slane %v22805_v60, 4  ;;  %v11017_v43 = vsel %vm561_vm0, %v11014_v52, %v11016_v9  ;;  %v3448_v60 = vrot.slane %v22822_v36, 5 }
 0x28e   : > { %v11019_v29 = vsel %vm561_vm0, %v11016_v9, %v11018_v44  ;;  %v11024_v9 = vrot.slane %v20966_v12, 7  ;;  %v26297_v12 = vld [vmem:[#allocation10_spill] sm:$0xff] }
 0x28f   : > { %v3188_v39 = vsel %vm3157_vm8, %v3185_v16, %v3187_v24  ;;  %v3449_v32 = vor.u32 %v3448_v60, %v3447_v53  ;;  %v3190_v7 = vsel %vm3157_vm8, %v3187_v24, %v3189_v38  ;;  %v26294_v60 = vld [vmem:[#allocation11_spill] sm:$0xff]  ;;  %v20968_v38 = vld [vmem:[#allocation2 + $0xd8] sm:$0xff] }
 0x292   : > { %18805 = vmatmul.mubr.msk.bf16.gmra.mrb[28].mxu0 %vm316_vm2, %v10759_v20 }
 0x293   : > { %18810 = vmatprep.mubr.msk.bf16.mxu0 %vm316_vm2, %v11011_v41  ;;  %v20964_v41 = vld [vmem:[#allocation2 + $0xb8] sm:$0xff] }
 0x294   : > { %17977 = vmatmul.mubr.msk.bf16.gmra.mrb[16].mxu1 %vm316_vm2, %v3178_v28  ;;  %v20965_v28 = vld [vmem:[#allocation2 + $0xc0] sm:$0xff] }
 0x295   : > { %17980 = vmatprep.mubr.msk.bf16.mxu1 %vm316_vm2, %v3180_v48  ;;  %v11022_v48 = vrot.slane %v20965_v28, 7 }
 0x297   : > { %v11025_v62 = vsel %vm561_vm0, %v11022_v48, %v11024_v9 }
 0x29a   : > { %18811 = vmatmul.mubr.msk.bf16.vlgmr.msra.gmra.mrb[0].mxu0 %vm316_vm2, %v11013_v14  ;;  %v3452_v14 = vrot.slane %v22840_v5, 5 }
 0x29b   : > { %18843 = vmatpush3.bf16.msra.mxu0 %v23035_v18  ;;  %18814 = vmatprep.mubr.msk.bf16.mxu0 %vm316_vm2, %v11015_v37  ;;  %v3443_v18 = vshll.u32 %v23063_v8, 16  ;;  %v11020_v8 = vrot.slane %v20964_v41, 7  ;;  %v3463_v41 = vrot.slane %v26294_v60, 4 }
 0x29c   : > { %17981 = vmatmul.mubr.msk.bf16.gmra.mrb[20].mxu1 %vm316_vm2, %v3182_v2  ;;  %18876 = vmatprep.subr.bf16.mxu0 %v23178_v30  ;;  %v3455_v2 = vrot.slane %v22843_v3, 4  ;;  %v3453_v16 = vor.u32 %v3452_v14, %v3451_v50 }
 0x29d   : > { %17984 = vmatprep.mubr.msk.bf16.mxu1 %vm316_vm2, %v3184_v35  ;;  %v3445_v20 = vrot.slane %v3443_v18, 5  ;;  %v11021_v52 = vsel %vm561_vm0, %v11018_v44, %v11020_v8  ;;  %v11023_v22 = vsel %vm561_vm0, %v11020_v8, %v11022_v48  ;;  %v26291_v35 = vld [vmem:[#allocation44_spill] sm:$0xff]  ;;  %v11026_v44 = vrot.slane %v20967_v54, 7  ;;  %v16184_v18 = vld [vmem:[%s25749_s1 + $0x18] sm:$0x3]  ;;  %v26298_v54 = vld [vmem:[#allocation21_spill] sm:$0xff] }
 0x29e   : > { %v3456_v21 = vrot.slane %v26291_v35, 5  ;;  %v26295_v8 = vld [vmem:[#allocation22_spill] sm:$0xff]  ;;  %v23228_v48 = vand.u32 %v16184_v18, %v21247_v4 }
 0x29f   : > { %v3446_v47 = vor.u32 %v3445_v20, %v3442_v34  ;;  %v26293_v34 = vld [vmem:[#allocation47_spill] sm:$0xff]  ;;  %v3464_v28 = vrot.slane %v26295_v8, 5 }
 0x2a0   : > { %v3457_v24 = vor.u32 %v3456_v21, %v3455_v2  ;;  %v3460_v20 = vrot.slane %v26293_v34, 5  ;;  %v26296_v2 = vld [vmem:[#allocation17_spill] sm:$0xff] }
 0x2a1   : > { %v3450_v37 = vsel %vm3438_vm11, %v3446_v47, %v3449_v32  ;;  %v11028_v47 = vrot.slane %v20968_v38, 7  ;;  %v3467_v21 = vrot.slane %v26296_v2, 4  ;;  %v26302_v38 = vld [vmem:[#allocation27_spill] sm:$0xff] }
 0x2a2   : > { %18815 = vmatmul.mubr.msk.bf16.gmra.mrb[4].mxu0 %vm316_vm2, %v11017_v43  ;;  %v11027_v43 = vsel %vm561_vm0, %v11024_v9, %v11026_v44  ;;  %v3458_v53 = vsel %vm3438_vm11, %v3453_v16, %v3457_v24  ;;  %v3468_v9 = vrot.slane %v26297_v12, 5 }
 0x2a3   : > { %18818 = vmatprep.mubr.msk.bf16.mxu0 %vm316_vm2, %v11019_v29  ;;  %v3454_v29 = vsel %vm3438_vm11, %v3449_v32, %v3453_v16  ;;  %v20969_v32 = vld [vmem:[#allocation2 + $0xe0] sm:$0xff]  ;;  %v11029_v50 = vsel %vm561_vm0, %v11026_v44, %v11028_v47  ;;  %v3471_v16 = vrot.slane %v26298_v54, 4 }
 0x2a4   : > { %17985 = vmatmul.mubr.msk.bf16.gmra.mrb[24].mxu1 %vm316_vm2, %v3186_v26  ;;  %v26292_v26 = vld [vmem:[#allocation48_spill] sm:$0xff] }
 0x2a5   : > { %17988 = vmatprep.mubr.msk.bf16.mxu1 %vm316_vm2, %v3188_v39  ;;  %v3459_v39 = vrot.slane %v26292_v26, 4 }
 0x2aa   : > { %18819 = vmatmul.mubr.msk.bf16.gmra.mrb[8].mxu0 %vm316_vm2, %v11021_v52  ;;  %v11030_v52 = vrot.slane %v20969_v32, 7  ;;  %v26303_v32 = vld [vmem:[#allocation34_spill] sm:$0xff] }
 0x2ab   : > { %18822 = vmatprep.mubr.msk.bf16.mxu0 %vm316_vm2, %v11023_v22  ;;  %v3461_v22 = vor.u32 %v3460_v20, %v3459_v39  ;;  %v3469_v39 = vor.u32 %v3468_v9, %v3467_v21  ;;  %v26306_v21 = vld [vmem:[#allocation30_spill] sm:$0xff]  ;;  %v26307_v9 = vld [vmem:[#allocation31_spill] sm:$0xff] }
 0x2ac   : > { %17989 = vmatmul.mubr.msk.bf16.gmra.mrb[28].mxu1 %vm316_vm2, %v3190_v7  ;;  %v3465_v7 = vor.u32 %v3464_v28, %v3463_v41  ;;  %v11031_v14 = vsel %vm561_vm0, %v11028_v47, %v11030_v52  ;;  %v3475_v47 = vrot.slane %v26302_v38, 4 }
 0x2ad   : > { %17994 = vmatprep.mubr.msk.bf16.mxu1 %vm316_vm2, %v3450_v37  ;;  %v3462_v37 = vsel %vm3438_vm11, %v3457_v24, %v3461_v22 }
 0x2ae   : > { %v3470_v28 = vsel %vm3438_vm11, %v3465_v7, %v3469_v39 }
 0x2b2   : > { %18823 = vmatmul.mubr.msk.bf16.gmra.mrb[12].mxu0 %vm316_vm2, %v11025_v62  ;;  %v26299_v62 = vld [vmem:[#allocation18_spill] sm:$0xff] }
 0x2b3   : > { %18826 = vmatprep.mubr.msk.bf16.mxu0 %vm316_vm2, %v11027_v43  ;;  %v3472_v18 = vrot.slane %v26299_v62, 5  ;;  %v26300_v43 = vld [vmem:[#allocation16_spill] sm:$0xff] }
 0x2b4   : > { %17995 = vmatmul.mubr.msk.bf16.vlgmr.msra.gmra.mrb[0].mxu1 %vm316_vm2, %v3454_v29  ;;  %v11032_v44 = vrot.slane %v26300_v43, 7  ;;  %v26301_v29 = vld [vmem:[#allocation13_spill] sm:$0xff]  ;;  %v26305_v43 = vld [vmem:[#allocation23_spill] sm:$0xff] }
 0x2b5   : > { %18027 = vmatpush3.bf16.msra.mxu1 %v23096_v55  ;;  %17998 = vmatprep.mubr.msk.bf16.mxu1 %vm316_vm2, %v3458_v53  ;;  %v3466_v55 = vsel %vm3438_vm11, %v3461_v22, %v3465_v7  ;;  %v11034_v24 = vrot.slane %v26301_v29, 7  ;;  %v3473_v20 = vor.u32 %v3472_v18, %v3471_v16  ;;  %v3476_v22 = vrot.slane %v26303_v32, 5 }
 0x2b6   : > { %18060 = vmatprep.subr.bf16.mxu1 %v23228_v48  ;;  %v11033_v53 = vsel %vm561_vm0, %v11030_v52, %v11032_v44  ;;  %v11036_v52 = vrot.slane %v26306_v21, 7  ;;  %v11038_v7 = vrot.slane %v26307_v9, 7 }
 0x2b7   : > { %v11035_v41 = vsel %vm561_vm0, %v11032_v44, %v11034_v24  ;;  %v3477_v16 = vor.u32 %v3476_v22, %v3475_v47  ;;  %v3487_v47 = vrot.slane %v22965_v25, 4  ;;  %v26308_v22 = vld [vmem:[#allocation36_spill] sm:$0xff] }
 0x2b8   : > { %v11037_v44 = vsel %vm561_vm0, %v11034_v24, %v11036_v52  ;;  %v11039_v29 = vsel %vm561_vm0, %v11036_v52, %v11038_v7  ;;  %v3488_v24 = vrot.slane %v26308_v22, 5 }
 0x2ba   : > { %18827 = vmatmul.mubr.msk.bf16.gmra.mrb[16].mxu0 %vm316_vm2, %v11029_v50  ;;  %v3474_v50 = vsel %vm3438_vm11, %v3469_v39, %v3473_v20  ;;  %v3478_v39 = vsel %vm3438_vm11, %v3473_v20, %v3477_v16  ;;  %v11040_v20 = vrot.slane %v23131_v40, 7  ;;  %v3489_v52 = vor.u32 %v3488_v24, %v3487_v47  ;;  %v16609_v24 = vld [vmem:[%s25749_s1 + $0x4a] sm:$0x3] }
 0x2bb   : > { %18830 = vmatprep.mubr.msk.bf16.mxu0 %vm316_vm2, %v11031_v14  ;;  %v26304_v14 = vld [vmem:[#allocation26_spill] sm:$0xff]  ;;  %v3491_v40 = vrot.slane %v22986_v61, 4 }
 0x2bc   : > { %17999 = vmatmul.mubr.msk.bf16.gmra.mrb[4].mxu1 %vm316_vm2, %v3462_v37  ;;  %v3479_v37 = vrot.slane %v26304_v14, 4  ;;  %v11041_v9 = vsel %vm561_vm0, %v11038_v7, %v11040_v20  ;;  %v3496_v7 = vrot.slane %v22995_v57, 5 }
 0x2bd   : > { %18002 = vmatprep.mubr.msk.bf16.mxu1 %vm316_vm2, %v3466_v55  ;;  %v3480_v55 = vrot.slane %v26305_v43, 5 }
 0x2bf   : > { %v3481_v18 = vor.u32 %v3480_v55, %v3479_v37  ;;  %v11323_v55 = vrot.slane %v23268_v31, 7 }
 0x2c2   : > { %18831 = vmatmul.mubr.msk.bf16.gmra.mrb[20].mxu0 %vm316_vm2, %v11033_v53  ;;  %v23266_v53 = vld [vmem:[#allocation2 + $0xa8] sm:$0x80] }
 0x2c3   : > { %18834 = vmatprep.mubr.msk.bf16.mxu0 %vm316_vm2, %v11035_v41  ;;  %v3483_v41 = vrot.slane %v22959_v58, 4  ;;  %v11322_v37 = vrot.slane %v23266_v53, 7 }
 0x2c4   : > { %18003 = vmatmul.mubr.msk.bf16.gmra.mrb[8].mxu1 %vm316_vm2, %v3470_v28  ;;  %v3484_v28 = vrot.slane %v22962_v51, 5 }
 0x2c5   : > { %18006 = vmatprep.mubr.msk.bf16.mxu1 %vm316_vm2, %v3474_v50  ;;  %v3482_v50 = vsel %vm3438_vm11, %v3477_v16, %v3481_v18  ;;  %v11324_v16 = vsel %vm561_vm0, %v11322_v37, %v11323_v55 }
 0x2c6   : > { %v3485_v21 = vor.u32 %v3484_v28, %v3483_v41  ;;  %v3495_v41 = vrot.slane %v22992_v11, 4 }
 0x2c8   : > { %v3497_v20 = vor.u32 %v3496_v7, %v3495_v41  ;;  %v3504_v41 = vrot.slane %v23026_v6, 5  ;;  %v23319_v7 = vld [vmem:[#allocation2 + $0xa0] sm:$0x1f]  ;;  %v11302_v6 = vld [vmem:[#allocation2 + $0x128] sm:$0x7f] }
 0x2ca   : > { %18835 = vmatmul.mubr.msk.bf16.gmra.mrb[24].mxu0 %vm316_vm2, %v11037_v44  ;;  %v23284_v44 = vld [vmem:[#allocation2 + $0xb8] sm:$0xff] }
 0x2cb   : > { %18838 = vmatprep.mubr.msk.bf16.mxu0 %vm316_vm2, %v11039_v29  ;;  %26309 = vst [vmem:[#allocation39_spill] sm:$0xff] %v23284_v44  ;;  %v3486_v29 = vsel %vm3438_vm11, %v3481_v18, %v3485_v21  ;;  %v11325_v28 = vrot.slane %v23284_v44, 7  ;;  %v11327_v18 = vrot.slane %v23287_v33, 7 }
 0x2cc   : > { %18007 = vmatmul.mubr.msk.bf16.gmra.mrb[12].mxu1 %vm316_vm2, %v3478_v39  ;;  %v3492_v39 = vrot.slane %v22989_v19, 5 }
 0x2cd   : > { %18010 = vmatprep.mubr.msk.bf16.mxu1 %vm316_vm2, %v3482_v50  ;;  %v3490_v50 = vsel %vm3438_vm11, %v3485_v21, %v3489_v52  ;;  %v11326_v37 = vsel %vm561_vm0, %v11323_v55, %v11325_v28  ;;  %v11328_v21 = vsel %vm561_vm0, %v11325_v28, %v11327_v18  ;;  %v3503_v55 = vrot.slane %v23023_v17, 4 }
 0x2ce   : > { %v3493_v47 = vor.u32 %v3492_v39, %v3491_v40  ;;  %v3499_v40 = vrot.slane %v23014_v49, 4  ;;  %v3500_v39 = vrot.slane %v23017_v27, 5  ;;  %v11331_v28 = vrot.slane %v23311_v1, 7 }
 0x2cf   : > { %v3505_v10 = vor.u32 %v3504_v41, %v3503_v55  ;;  %v23347_v41 = vld [vmem:[#allocation2 + $0x28] sm:$0xff]  ;;  %v23473_v49 = vshll.u32 %v23287_v33, 16 }
 0x2d0   : > { %26311 = vst [vmem:[#allocation62_spill] sm:$0xff] %v23347_v41 }
 0x2d1   : > { %26325 = vst [vmem:[#allocation17_spill] sm:$0xff] %v23473_v49 }
 0x2d2   : > { %18839 = vmatmul.mubr.msk.bf16.gmra.mrb[28].mxu0 %vm316_vm2, %v11041_v9  ;;  %v23305_v9 = vld [vmem:[#allocation2 + $0xc8] sm:$0xff] }
 0x2d3   : > { %18844 = vmatprep.mubr.msk.bf16.mxu0 %vm316_vm2, %v11324_v16  ;;  %v23308_v16 = vand.u32 %v16609_v24, %v21247_v4  ;;  %v3508_v24 = vshrl.u32 %v23319_v7, 16 }
 0x2d4   : > { %18011 = vmatmul.mubr.msk.bf16.gmra.mrb[16].mxu1 %vm316_vm2, %v3486_v29  ;;  %v3494_v29 = vsel %vm3438_vm11, %v3489_v52, %v3493_v47  ;;  %v11329_v52 = vrot.slane %v23305_v9, 7 }
 0x2d5   : > { %18014 = vmatprep.mubr.msk.bf16.mxu1 %vm316_vm2, %v3490_v50  ;;  %v3498_v50 = vsel %vm3438_vm11, %v3493_v47, %v3497_v20  ;;  %v3501_v47 = vor.u32 %v3500_v39, %v3499_v40  ;;  %v3510_v56 = vrot.slane %v3508_v24, 4  ;;  %v11333_v39 = vrot.slane %v23332_v45, 7 }
 0x2d7   : > { %v3506_v40 = vsel %vm3438_vm11, %v3501_v47, %v3505_v10 }
 0x2da   : > { %18845 = vmatmul.mubr.msk.bf16.vlgmr.msra.gmra.mrb[0].mxu0 %vm316_vm2, %v11326_v37  ;;  %v3511_v37 = vshll.u32 %v23319_v7, 16 }
 0x2db   : > { %18877 = vmatpush3.bf16.msra.mxu0 %v23178_v30  ;;  %18848 = vmatprep.mubr.msk.bf16.mxu0 %vm316_vm2, %v11328_v21  ;;  %v11330_v30 = vsel %vm561_vm0, %v11327_v18, %v11329_v52  ;;  %v11332_v21 = vsel %vm561_vm0, %v11329_v52, %v11331_v28  ;;  %v11335_v18 = vrot.slane %v23335_v63, 7  ;;  %v3767_v52 = vrot.slane %v23347_v41, 5  ;;  %v23436_v41 = vld [vmem:[#allocation2 + $0x68] sm:$0xff] }
 0x2dc   : > { %18015 = vmatmul.mubr.msk.bf16.gmra.mrb[20].mxu1 %vm316_vm2, %v3494_v29  ;;  %18910 = vmatprep.subr.bf16.mxu0 %v23308_v16  ;;  %v3502_v29 = vsel %vm3438_vm11, %v3497_v20, %v3501_v47  ;;  %v3513_v13 = vrot.slane %v3511_v37, 5  ;;  %v11334_v47 = vsel %vm561_vm0, %v11331_v28, %v11333_v39  ;;  %v23352_v37 = vld [vmem:[#allocation2 + $0xe8] sm:$0xff]  ;;  %26319 = vst [vmem:[#allocation46_spill] sm:$0xff] %v23436_v41 }
 0x2dd   : > { %18018 = vmatprep.mubr.msk.bf16.mxu1 %vm316_vm2, %v3498_v50  ;;  %v23341_v50 = vld [vmem:[#allocation2 + $0x20] sm:$0xe0]  ;;  %v11336_v24 = vsel %vm561_vm0, %v11333_v39, %v11335_v18 }
 0x2de   : > { %v3514_v20 = vor.u32 %v3513_v13, %v3510_v56  ;;  %v3766_v55 = vrot.slane %v23341_v50, 5  ;;  %v11337_v13 = vrot.slane %v23352_v37, 7 }
 0x2e0   : > { %v3768_v56 = vsel %vm3765_vm12, %v3766_v55, %v3767_v52  ;;  %v16201_v55 = vld [vmem:[%s25749_s1 + $0x1a] sm:$0x3] }
 0x2e1   : > { %v23383_v59 = vand.u32 %v16201_v55, %v21247_v4 }
 0x2e2   : > { %18849 = vmatmul.mubr.msk.bf16.gmra.mrb[4].mxu0 %vm316_vm2, %v11330_v30  ;;  %v3515_v30 = vsel %vm3438_vm11, %v3505_v10, %v3514_v20  ;;  %v11338_v20 = vsel %vm561_vm0, %v11335_v18, %v11337_v13 }
 0x2e3   : > { %18852 = vmatprep.mubr.msk.bf16.mxu0 %vm316_vm2, %v11332_v21  ;;  %v23355_v21 = vld [vmem:[#allocation2 + $0xf0] sm:$0xff] }
 0x2e4   : > { %18019 = vmatmul.mubr.msk.bf16.gmra.mrb[24].mxu1 %vm316_vm2, %v3502_v29  ;;  %v11339_v28 = vrot.slane %v23355_v21, 7  ;;  %v23364_v29 = vld [vmem:[#allocation2 + $0x30] sm:$0xff] }
 0x2e5   : > { %18022 = vmatprep.mubr.msk.bf16.mxu1 %vm316_vm2, %v3506_v40  ;;  %26312 = vst [vmem:[#allocation63_spill] sm:$0xff] %v23364_v29  ;;  %v3769_v10 = vrot.slane %v23364_v29, 5  ;;  %v23367_v40 = vld [vmem:[#allocation2 + $0x38] sm:$0xff]  ;;  %v23423_v29 = vld [vmem:[#allocation2 + $0x120] sm:$0xff] }
 0x2e6   : > { %26313 = vst [vmem:[#allocation64_spill] sm:$0xff] %v23367_v40  ;;  %v3771_v39 = vrot.slane %v23367_v40, 5  ;;  %v23420_v40 = vld [vmem:[#allocation2 + $0x118] sm:$0xff] }
 0x2e8   : > { %v3772_v0 = vsel %vm3765_vm12, %v3769_v10, %v3771_v39 }
 0x2ea   : > { %18853 = vmatmul.mubr.msk.bf16.gmra.mrb[8].mxu0 %vm316_vm2, %v11334_v47  ;;  %v11340_v47 = vsel %vm561_vm0, %v11337_v13, %v11339_v28 }
 0x2eb   : > { %18856 = vmatprep.mubr.msk.bf16.mxu0 %vm316_vm2, %v11336_v24  ;;  %v23375_v24 = vld [vmem:[#allocation2 + $0xf8] sm:$0xff] }
 0x2ec   : > { %18023 = vmatmul.mubr.msk.bf16.gmra.mrb[28].mxu1 %vm316_vm2, %v3515_v30  ;;  %v3770_v30 = vsel %vm3765_vm12, %v3767_v52, %v3769_v10  ;;  %v11341_v18 = vrot.slane %v23375_v24, 7  ;;  %v23391_v52 = vld [vmem:[#allocation2 + $0x40] sm:$0xff]  ;;  %v23394_v10 = vld [vmem:[#allocation2 + $0x48] sm:$0xff] }
 0x2ed   : > { %18028 = vmatprep.mubr.msk.bf16.mxu1 %vm316_vm2, %v3768_v56  ;;  %v23378_v56 = vld [vmem:[#allocation2 + $0x100] sm:$0xff]  ;;  %26314 = vst [vmem:[#allocation65_spill] sm:$0xff] %v23391_v52  ;;  %26315 = vst [vmem:[#allocation66_spill] sm:$0xff] %v23394_v10  ;;  %v3775_v55 = vrot.slane %v23394_v10, 5  ;;  %v11345_v10 = vrot.slane %v23400_v15, 7 }
 0x2ee   : > { %v11343_v13 = vrot.slane %v23378_v56, 7 }
 0x2f2   : > { %18857 = vmatmul.mubr.msk.bf16.gmra.mrb[12].mxu0 %vm316_vm2, %v11338_v20  ;;  %v3773_v20 = vrot.slane %v23391_v52, 5  ;;  %v23415_v52 = vld [vmem:[#allocation2 + $0x58] sm:$0xff] }
 0x2f3   : > { %18860 = vmatprep.mubr.msk.bf16.mxu0 %vm316_vm2, %v11340_v47  ;;  %v11342_v47 = vsel %vm561_vm0, %v11339_v28, %v11341_v18  ;;  %v11347_v28 = vrot.slane %v23403_v42, 7  ;;  %26317 = vst [vmem:[#allocation43_spill] sm:$0xff] %v23415_v52 }
 0x2f4   : > { %18029 = vmatmul.mubr.msk.bf16.vlgmr.msra.gmra.mrb[0].mxu1 %vm316_vm2, %v3770_v30  ;;  %v11344_v30 = vsel %vm561_vm0, %v11341_v18, %v11343_v13  ;;  %v23412_v18 = vld [vmem:[#allocation2 + $0x50] sm:$0xff] }
 0x2f5   : > { %18061 = vmatpush3.bf16.msra.mxu1 %v23228_v48  ;;  %18032 = vmatprep.mubr.msk.bf16.mxu1 %vm316_vm2, %v3772_v0  ;;  %v3774_v48 = vsel %vm3765_vm12, %v3771_v39, %v3773_v20  ;;  %v3776_v0 = vsel %vm3765_vm12, %v3773_v20, %v3775_v55  ;;  %26316 = vst [vmem:[#allocation67_spill] sm:$0xff] %v23412_v18  ;;  %v3777_v39 = vrot.slane %v23412_v18, 5  ;;  %v11349_v18 = vrot.slane %v23420_v40, 7 }
 0x2f6   : > { %18094 = vmatprep.subr.bf16.mxu1 %v23383_v59  ;;  %v11346_v20 = vsel %vm561_vm0, %v11343_v13, %v11345_v10  ;;  %v11351_v13 = vrot.slane %v23423_v29, 7 }
 0x2fa   : > { %18861 = vmatmul.mubr.msk.bf16.gmra.mrb[16].mxu0 %vm316_vm2, %v11342_v47  ;;  %v3779_v47 = vrot.slane %v23415_v52, 5  ;;  %v23433_v52 = vld [vmem:[#allocation2 + $0x60] sm:$0xff] }
 0x2fb   : > { %18864 = vmatprep.mubr.msk.bf16.mxu0 %vm316_vm2, %v11344_v30  ;;  %v11348_v30 = vsel %vm561_vm0, %v11345_v10, %v11347_v28  ;;  %v25946_v10 = vshrl.u32 %v23268_v31, 16  ;;  %26318 = vst [vmem:[#allocation41_spill] sm:$0xff] %v23433_v52 }
 0x2fc   : > { %18033 = vmatmul.mubr.msk.bf16.gmra.mrb[4].mxu1 %vm316_vm2, %v3774_v48  ;;  %v3778_v48 = vsel %vm3765_vm12, %v3775_v55, %v3777_v39  ;;  %v3781_v55 = vrot.slane %v23433_v52, 5 }
 0x2fd   : > { %18036 = vmatprep.mubr.msk.bf16.mxu1 %vm316_vm2, %v3776_v0  ;;  %v3780_v0 = vsel %vm3765_vm12, %v3777_v39, %v3779_v47  ;;  %v3783_v39 = vrot.slane %v23436_v41, 5  ;;  %v11609_v17 = vrot.slane %v25946_v10, 7  ;;  %v11353_v41 = vrot.slane %v11302_v6, 7  ;;  %v23462_v6 = vld [vmem:[#allocation2 + $0x78] sm:$0xff] }
 0x2fe   : > { %v3782_v27 = vsel %vm3765_vm12, %v3779_v47, %v3781_v55  ;;  %v23456_v10 = vshrl.u32 %v23287_v33, 16  ;;  %v23459_v47 = vld [vmem:[#allocation2 + $0x70] sm:$0xff]  ;;  %26323 = vst [vmem:[#allocation11_spill] sm:$0xff] %v23462_v6 }
 0x2ff   : > { %v3784_v52 = vsel %vm3765_vm12, %v3781_v55, %v3783_v39  ;;  %26322 = vst [vmem:[#allocation47_spill] sm:$0xff] %v23459_v47  ;;  %v3785_v55 = vrot.slane %v23459_v47, 5 }
 0x300   : > { %26321 = vst [vmem:[#allocation48_spill] sm:$0xff] %v23456_v10 }
 0x301   : > { %v3786_v47 = vsel %vm3765_vm12, %v3783_v39, %v3785_v55  ;;  %v23489_v39 = vld [vmem:[#allocation2 + $0x80] sm:$0xff] }
 0x302   : > { %18865 = vmatmul.mubr.msk.bf16.gmra.mrb[20].mxu0 %vm316_vm2, %v11346_v20  ;;  %v11350_v20 = vsel %vm561_vm0, %v11347_v28, %v11349_v18  ;;  %v23450_v28 = vshrl.u32 %v23284_v44, 16  ;;  %26328 = vst [vmem:[#allocation18_spill] sm:$0xff] %v23489_v39 }
 0x303   : > { %18868 = vmatprep.mubr.msk.bf16.mxu0 %vm316_vm2, %v11348_v30  ;;  %v11352_v30 = vsel %vm561_vm0, %v11349_v18, %v11351_v13 }
 0x304   : > { %18037 = vmatmul.mubr.msk.bf16.gmra.mrb[8].mxu1 %vm316_vm2, %v3778_v48  ;;  %v11603_v48 = vshrl.u32 %v23266_v53, 16  ;;  %26320 = vst [vmem:[#allocation44_spill] sm:$0xff] %v23450_v28 }
 0x305   : > { %18040 = vmatprep.mubr.msk.bf16.mxu1 %vm316_vm2, %v3780_v0  ;;  %v25947_v0 = vshll.u32 %v23268_v31, 16 }
 0x306   : > { %v11605_v53 = vrot.slane %v11603_v48, 7  ;;  %v23468_v48 = vshll.u32 %v23284_v44, 16 }
 0x307   : > { %v11612_v18 = vor.u32 %v25947_v0, %v11609_v17 }
 0x308   : > { %26324 = vst [vmem:[#allocation22_spill] sm:$0xff] %v23468_v48 }
 0x309   : > { %v11613_v0 = vsel %vm5650_vm15, %v11605_v53, %v11612_v18  ;;  %v23486_v18 = vshrl.u32 %v23311_v1, 16 }
 0x30a   : > { %18869 = vmatmul.mubr.msk.bf16.gmra.mrb[24].mxu0 %vm316_vm2, %v11350_v20  ;;  %v3787_v20 = vrot.slane %v23462_v6, 5 }
 0x30b   : > { %18872 = vmatprep.mubr.msk.bf16.mxu0 %vm316_vm2, %v11352_v30  ;;  %v11617_v30 = vrot.slane %v23450_v28, 7  ;;  %26327 = vst [vmem:[#allocation21_spill] sm:$0xff] %v23486_v18 }
 0x30c   : > { %18041 = vmatmul.mubr.msk.bf16.gmra.mrb[12].mxu1 %vm316_vm2, %v3782_v27  ;;  %v11354_v27 = vsel %vm561_vm0, %v11351_v13, %v11353_v41  ;;  %v3788_v6 = vsel %vm3765_vm12, %v3785_v55, %v3787_v20  ;;  %v23481_v13 = vshrl.u32 %v23305_v9, 16  ;;  %v3789_v55 = vrot.slane %v23489_v39, 5 }
 0x30d   : > { %18044 = vmatprep.mubr.msk.bf16.mxu1 %vm316_vm2, %v3784_v52  ;;  %v11625_v52 = vrot.slane %v23456_v10, 7  ;;  %v11620_v41 = vor.u32 %v23468_v48, %v11617_v30  ;;  %v11641_v48 = vrot.slane %v23486_v18, 7  ;;  %v23506_v39 = vshll.u32 %v23311_v1, 16 }
 0x30e   : > { %26326 = vst [vmem:[#allocation10_spill] sm:$0xff] %v23481_v13  ;;  %v11633_v28 = vrot.slane %v23481_v13, 7  ;;  %v3790_v44 = vsel %vm3765_vm12, %v3787_v20, %v3789_v55  ;;  %v23527_v20 = vld [vmem:[#allocation2 + $0x90] sm:$0xff] }
 0x30f   : > { %v11628_v53 = vor.u32 %v23473_v49, %v11625_v52  ;;  %v23501_v49 = vshll.u32 %v23305_v9, 16  ;;  %26331 = vst [vmem:[#allocation27_spill] sm:$0xff] %v23506_v39  ;;  %26334 = vst [vmem:[#allocation23_spill] sm:$0xff] %v23527_v20 }
 0x311   : > { %26330 = vst [vmem:[#allocation13_spill] sm:$0xff] %v23501_v49 }
 0x312   : > { %18873 = vmatmul.mubr.msk.bf16.gmra.mrb[28].mxu0 %vm316_vm2, %v11354_v27  ;;  %v23495_v27 = vld [vmem:[#allocation2 + $0x88] sm:$0xff] }
 0x313   : > { %18878 = vmatprep.mubr.msk.bf16.mxu0 %vm316_vm2, %v11613_v0  ;;  %v16626_v0 = vld [vmem:[%s25749_s1 + $0x4c] sm:$0x3]  ;;  %26329 = vst [vmem:[#allocation16_spill] sm:$0xff] %v23495_v27  ;;  %v3791_v10 = vrot.slane %v23495_v27, 5 }
 0x314   : > { %18045 = vmatmul.mubr.msk.bf16.gmra.mrb[16].mxu1 %vm316_vm2, %v3786_v47  ;;  %v11621_v47 = vsel %vm5650_vm15, %v11609_v17, %v11620_v41  ;;  %v23509_v33 = vand.u32 %v16626_v0, %v21247_v4  ;;  %v23518_v41 = vshrl.u32 %v23332_v45, 16  ;;  %v23523_v0 = vshrl.u32 %v23335_v63, 16 }
 0x315   : > { %18048 = vmatprep.mubr.msk.bf16.mxu1 %vm316_vm2, %v3788_v6  ;;  %v11629_v6 = vsel %vm5650_vm15, %v11617_v30, %v11628_v53  ;;  %v3792_v17 = vsel %vm3765_vm12, %v3789_v55, %v3791_v10  ;;  %v11636_v30 = vor.u32 %v23501_v49, %v11633_v28  ;;  %v11644_v53 = vor.u32 %v23506_v39, %v11641_v48  ;;  %v23530_v55 = vld [vmem:[#allocation2 + $0x98] sm:$0xff] }
 0x316   : > { %26332 = vst [vmem:[#allocation34_spill] sm:$0xff] %v23518_v41  ;;  %26333 = vst [vmem:[#allocation26_spill] sm:$0xff] %v23523_v0  ;;  %v11649_v13 = vrot.slane %v23518_v41, 7  ;;  %v23538_v39 = vshll.u32 %v23332_v45, 16  ;;  %v11657_v27 = vrot.slane %v23523_v0, 7  ;;  %v4056_v41 = vrot.slane %v22822_v36, 6 }
 0x317   : > { %26335 = vst [vmem:[#allocation30_spill] sm:$0xff] %v23530_v55  ;;  %v11637_v18 = vsel %vm5650_vm15, %v11625_v52, %v11636_v30  ;;  %v4055_v30 = vrot.slane %v22819_v46, 5  ;;  %v3797_v46 = vrot.slane %v23319_v7, 5  ;;  %v4059_v7 = vrot.slane %v22837_v23, 5 }
 0x319   : > { %v4057_v36 = vor.u32 %v4056_v41, %v4055_v30  ;;  %v4060_v41 = vrot.slane %v22840_v5, 6  ;;  %v23582_v30 = vshrl.u32 %v23375_v24, 16  ;;  %v23587_v5 = vshrl.u32 %v23378_v56, 16 }
 0x31a   : > { %18879 = vmatmul.mubr.msk.bf16.vlgmr.msra.gmra.mrb[0].mxu0 %vm316_vm2, %v11621_v47  ;;  %v3795_v47 = vrot.slane %v23530_v55, 5 }
 0x31b   : > { %18911 = vmatpush3.bf16.msra.mxu0 %v23308_v16  ;;  %18882 = vmatprep.mubr.msk.bf16.mxu0 %vm316_vm2, %v11629_v6  ;;  %v3793_v16 = vrot.slane %v23527_v20, 5  ;;  %v4048_v6 = vshrl.u32 %v23341_v50, 16  ;;  %v23543_v20 = vshll.u32 %v23335_v63, 16 }
 0x31c   : > { %18049 = vmatmul.mubr.msk.bf16.gmra.mrb[20].mxu1 %vm316_vm2, %v3790_v44  ;;  %18944 = vmatprep.subr.bf16.mxu0 %v23509_v33  ;;  %v4051_v44 = vshll.u32 %v23341_v50, 16 }
 0x31d   : > { %18052 = vmatprep.mubr.msk.bf16.mxu1 %vm316_vm2, %v3792_v17  ;;  %v11645_v17 = vsel %vm5650_vm15, %v11633_v28, %v11644_v53  ;;  %26336 = vst [vmem:[#allocation31_spill] sm:$0xff] %v23543_v20  ;;  %v3794_v55 = vsel %vm3765_vm12, %v3791_v10, %v3793_v16  ;;  %v3796_v49 = vsel %vm3765_vm12, %v3793_v16, %v3795_v47  ;;  %v4050_v50 = vrot.slane %v4048_v6, 5 }
 0x31e   : > { %v4053_v52 = vrot.slane %v4051_v44, 6  ;;  %v11652_v28 = vor.u32 %v23538_v39, %v11649_v13  ;;  %v23553_v53 = vshrl.u32 %v23352_v37, 16  ;;  %v11660_v10 = vor.u32 %v23543_v20, %v11657_v27 }
 0x31f   : > { %v23558_v16 = vshrl.u32 %v23355_v21, 16  ;;  %v23570_v20 = vshll.u32 %v23355_v21, 16 }
 0x320   : > { %v11653_v6 = vsel %vm5650_vm15, %v11641_v48, %v11652_v28  ;;  %v11665_v44 = vrot.slane %v23553_v53, 7  ;;  %v11681_v28 = vrot.slane %v23582_v30, 7 }
 0x321   : > { %v11673_v0 = vrot.slane %v23558_v16, 7 }
 0x322   : > { %18883 = vmatmul.mubr.msk.bf16.gmra.mrb[4].mxu0 %vm316_vm2, %v11637_v18  ;;  %v4054_v18 = vor.u32 %v4053_v52, %v4050_v50  ;;  %v4063_v50 = vrot.slane %v22843_v3, 5  ;;  %v4064_v52 = vrot.slane %v26291_v35, 6 }
 0x323   : > { %18886 = vmatprep.mubr.msk.bf16.mxu0 %vm316_vm2, %v11645_v17  ;;  %v23565_v17 = vshll.u32 %v23352_v37, 16  ;;  %v11676_v23 = vor.u32 %v23570_v20, %v11673_v0 }
 0x324   : > { %18053 = vmatmul.mubr.msk.bf16.gmra.mrb[24].mxu1 %vm316_vm2, %v3794_v55  ;;  %v11661_v55 = vsel %vm5650_vm15, %v11649_v13, %v11660_v10  ;;  %v4058_v48 = vsel %vm4046_vm13, %v4054_v18, %v4057_v36  ;;  %v4065_v3 = vor.u32 %v4064_v52, %v4063_v50  ;;  %v23593_v10 = vshll.u32 %v23375_v24, 16 }
 0x325   : > { %18056 = vmatprep.mubr.msk.bf16.mxu1 %vm316_vm2, %v3796_v49  ;;  %v3798_v49 = vsel %vm3765_vm12, %v3795_v47, %v3797_v46  ;;  %v11668_v13 = vor.u32 %v23565_v17, %v11665_v44  ;;  %v4061_v47 = vor.u32 %v4060_v41, %v4059_v7  ;;  %v16218_v46 = vld [vmem:[%s25749_s1 + $0x1c] sm:$0x3]  ;;  %v11677_v18 = vsel %vm5650_vm15, %v11665_v44, %v11676_v23 }
 0x326   : > { %v4068_v7 = vrot.slane %v26293_v34, 6  ;;  %v4072_v50 = vrot.slane %v26295_v8, 6  ;;  %v23611_v44 = vand.u32 %v16218_v46, %v21247_v4  ;;  %v11684_v52 = vor.u32 %v23593_v10, %v11681_v28 }
 0x327   : > { %v11669_v35 = vsel %vm5650_vm15, %v11657_v27, %v11668_v13  ;;  %v4067_v27 = vrot.slane %v26292_v26, 5  ;;  %v4066_v41 = vsel %vm4046_vm13, %v4061_v47, %v4065_v3  ;;  %v23621_v34 = vshrl.u32 %v23403_v42, 16 }
 0x328   : > { %v11685_v13 = vsel %vm5650_vm15, %v11673_v0, %v11684_v52  ;;  %v23657_v52 = vshll.u32 %v23420_v40, 16 }
 0x329   : > { %26337 = vst [vmem:[#allocation36_spill] sm:$0xff] %v23621_v34  ;;  %v11705_v46 = vrot.slane %v23621_v34, 7 }
 0x32a   : > { %18887 = vmatmul.mubr.msk.bf16.gmra.mrb[8].mxu0 %vm316_vm2, %v11653_v6  ;;  %v11689_v6 = vrot.slane %v23587_v5, 7  ;;  %26341 = vst [vmem:[#allocation73_spill] sm:$0xff] %v23657_v52 }
 0x32b   : > { %18890 = vmatprep.mubr.msk.bf16.mxu0 %vm316_vm2, %v11661_v55  ;;  %v23601_v55 = vshll.u32 %v23378_v56, 16 }
 0x32c   : > { %18057 = vmatmul.mubr.msk.bf16.gmra.mrb[28].mxu1 %vm316_vm2, %v3798_v49  ;;  %v4062_v49 = vsel %vm4046_vm13, %v4057_v36, %v4061_v47  ;;  %v23616_v36 = vshrl.u32 %v23400_v15, 16  ;;  %v23629_v47 = vshll.u32 %v23400_v15, 16 }
 0x32d   : > { %18062 = vmatprep.mubr.msk.bf16.mxu1 %vm316_vm2, %v4058_v48  ;;  %v4071_v48 = vrot.slane %v26294_v60, 5  ;;  %v11692_v26 = vor.u32 %v23601_v55, %v11689_v6  ;;  %v4069_v60 = vor.u32 %v4068_v7, %v4067_v27  ;;  %v4076_v27 = vrot.slane %v26297_v12, 6 }
 0x32e   : > { %v11697_v23 = vrot.slane %v23616_v36, 7  ;;  %v4079_v7 = vrot.slane %v26298_v54, 5  ;;  %v23651_v12 = vshrl.u32 %v23423_v29, 16 }
 0x32f   : > { %v4073_v8 = vor.u32 %v4072_v50, %v4071_v48  ;;  %v23646_v48 = vshrl.u32 %v23420_v40, 16 }
 0x330   : > { %26340 = vst [vmem:[#allocation72_spill] sm:$0xff] %v23651_v12 }
 0x331   : > { %v4074_v0 = vsel %vm4046_vm13, %v4069_v60, %v4073_v8  ;;  %26339 = vst [vmem:[#allocation71_spill] sm:$0xff] %v23646_v48  ;;  %v11713_v50 = vrot.slane %v23646_v48, 7 }
 0x332   : > { %18891 = vmatmul.mubr.msk.bf16.gmra.mrb[12].mxu0 %vm316_vm2, %v11669_v35  ;;  %v11693_v35 = vsel %vm5650_vm15, %v11681_v28, %v11692_v26  ;;  %v11700_v28 = vor.u32 %v23629_v47, %v11697_v23 }
 0x333   : > { %18894 = vmatprep.mubr.msk.bf16.mxu0 %vm316_vm2, %v11677_v18  ;;  %v23634_v18 = vshll.u32 %v23403_v42, 16 }
 0x334   : > { %18063 = vmatmul.mubr.msk.bf16.vlgmr.msra.gmra.mrb[0].mxu1 %vm316_vm2, %v4062_v49  ;;  %v4075_v49 = vrot.slane %v26296_v2, 5 }
 0x335   : > { %18095 = vmatpush3.bf16.msra.mxu1 %v23383_v59  ;;  %18066 = vmatprep.mubr.msk.bf16.mxu1 %vm316_vm2, %v4066_v41  ;;  %26338 = vst [vmem:[#allocation70_spill] sm:$0xff] %v23634_v18  ;;  %v4070_v59 = vsel %vm4046_vm13, %v4065_v3, %v4069_v60  ;;  %v4080_v41 = vrot.slane %v26299_v62, 6  ;;  %v11708_v2 = vor.u32 %v23634_v18, %v11705_v46  ;;  %v11721_v60 = vrot.slane %v23651_v12, 7 }
 0x336   : > { %18128 = vmatprep.subr.bf16.mxu1 %v23611_v44  ;;  %v4077_v3 = vor.u32 %v4076_v27, %v4075_v49  ;;  %v11701_v62 = vsel %vm5650_vm15, %v11689_v6, %v11700_v28  ;;  %v4083_v49 = vrot.slane %v26302_v38, 5  ;;  %v4084_v6 = vrot.slane %v26303_v32, 6 }
 0x337   : > { %v4081_v54 = vor.u32 %v4080_v41, %v4079_v7  ;;  %v11709_v26 = vsel %vm5650_vm15, %v11697_v23, %v11708_v2  ;;  %v4088_v23 = vrot.slane %v26305_v43, 6  ;;  %v263_v7 = vld [vmem:[%s21272_s4 + $0x260] sm:$0xff]  ;;  %v264_v41 = vld [vmem:[%s21272_s4 + $0x268] sm:$0xff]  ;;  %v11716_v28 = vor.u32 %v23657_v52, %v11713_v50 }
 0x338   : > { %v311_v38 = vpack.c.bf16 %v264_v41, %v263_v7  ;;  %v4085_v2 = vor.u32 %v4084_v6, %v4083_v49  ;;  %v4092_v41 = vrot.slane %v22962_v51, 6  ;;  %v4095_v6 = vrot.slane %v22965_v25, 5 }
 0x339   : > { %v4082_v27 = vsel %vm4046_vm13, %v4077_v3, %v4081_v54  ;;  %v11717_v43 = vsel %vm5650_vm15, %v11705_v46, %v11716_v28  ;;  %v4096_v46 = vrot.slane %v26308_v22, 6  ;;  %v4100_v25 = vrot.slane %v22989_v19, 6 }
 0x33a   : > { %18895 = vmatmul.mubr.msk.bf16.gmra.mrb[16].mxu0 %vm316_vm2, %v11685_v13  ;;  %v23662_v13 = vshll.u32 %v23423_v29, 16  ;;  %355 = vst.msk [vmem:[#allocation2 + $0x130] sm:$0xff] %vm316_vm2, %v311_v38  ;;  %v4086_v7 = vsel %vm4046_vm13, %v4081_v54, %v4085_v2  ;;  %v4104_v28 = vrot.slane %v22995_v57, 6 }
 0x33b   : > { %18898 = vmatprep.mubr.msk.bf16.mxu0 %vm316_vm2, %v11693_v35  ;;  %v23664_v35 = vld [vmem:[#allocation2 + $0x128] sm:$0xff] }
 0x33c   : > { %18067 = vmatmul.mubr.msk.bf16.gmra.mrb[4].mxu1 %vm316_vm2, %v4070_v59  ;;  %26342 = vst [vmem:[#allocation74_spill] sm:$0xff] %v23662_v13  ;;  %v4078_v59 = vsel %vm4046_vm13, %v4073_v8, %v4077_v3  ;;  %v23678_v8 = vshrl.u32 %v23664_v35, 16  ;;  %v11724_v32 = vor.u32 %v23662_v13, %v11721_v60 }
 0x33d   : > { %18070 = vmatprep.mubr.msk.bf16.mxu1 %vm316_vm2, %v4074_v0  ;;  %v4087_v0 = vrot.slane %v26304_v14, 5 }
 0x33e   : > { %26343 = vst [vmem:[#allocation75_spill] sm:$0xff] %v23678_v8  ;;  %v11729_v3 = vrot.slane %v23678_v8, 7 }
 0x33f   : > { %v4089_v14 = vor.u32 %v4088_v23, %v4087_v0  ;;  %v4099_v0 = vrot.slane %v22986_v61, 5  ;;  %v4103_v23 = vrot.slane %v22992_v11, 5  ;;  %v16643_v61 = vld [vmem:[%s25749_s1 + $0x4e] sm:$0x3] }
 0x340   : > { %v23717_v38 = vand.u32 %v16643_v61, %v21247_v4 }
 0x341   : > { %v4090_v49 = vsel %vm4046_vm13, %v4085_v2, %v4089_v14  ;;  %v4105_v19 = vor.u32 %v4104_v28, %v4103_v23  ;;  %v26346_v2 = vld [vmem:[#allocation40_spill] sm:$0xff]  ;;  %v26351_v28 = vld [vmem:[#allocation62_spill] sm:$0xff] }
 0x342   : > { %18899 = vmatmul.mubr.msk.bf16.gmra.mrb[20].mxu0 %vm316_vm2, %v11701_v62  ;;  %v23687_v62 = vshll.u32 %v23664_v35, 16 }
 0x343   : > { %18902 = vmatprep.mubr.msk.bf16.mxu0 %vm316_vm2, %v11709_v26  ;;  %v11725_v26 = vsel %vm5650_vm15, %v11713_v50, %v11724_v32  ;;  %v26345_v32 = vld [vmem:[#allocation35_spill] sm:$0xff] }
 0x344   : > { %18071 = vmatmul.mubr.msk.bf16.gmra.mrb[8].mxu1 %vm316_vm2, %v4078_v59  ;;  %26344 = vst [vmem:[#allocation76_spill] sm:$0xff] %v23687_v62  ;;  %v4091_v59 = vrot.slane %v22959_v58, 5  ;;  %v4097_v58 = vor.u32 %v4096_v46, %v4095_v6  ;;  %v4107_v57 = vrot.slane %v26345_v32, 5  ;;  %v26350_v6 = vld [vmem:[#allocation61_spill] sm:$0xff] }
 0x345   : > { %18074 = vmatprep.mubr.msk.bf16.mxu1 %vm316_vm2, %v4082_v27  ;;  %v11732_v27 = vor.u32 %v23687_v62, %v11729_v3 }
 0x346   : > { %v4093_v54 = vor.u32 %v4092_v41, %v4091_v59  ;;  %v26349_v59 = vld [vmem:[#allocation69_spill] sm:$0xff] }
 0x347   : > { %v11733_v51 = vsel %vm5650_vm15, %v11721_v60, %v11732_v27  ;;  %v4101_v60 = vor.u32 %v4100_v25, %v4099_v0  ;;  %v4112_v41 = vrot.slane %v26349_v59, 6  ;;  %v4368_v25 = vld [vmem:[#allocation2 + $0x20] sm:$0xc0] }
 0x348   : > { %v4094_v50 = vsel %vm4046_vm13, %v4089_v14, %v4093_v54  ;;  %v4098_v22 = vsel %vm4046_vm13, %v4093_v54, %v4097_v58  ;;  %v4108_v14 = vrot.slane %v26346_v2, 6  ;;  %v4374_v23 = vrot.slane %v4368_v25, 6  ;;  %v26357_v59 = vld [vmem:[#allocation43_spill] sm:$0xff] }
 0x349   : > { %v4102_v11 = vsel %vm4046_vm13, %v4097_v58, %v4101_v60  ;;  %v4106_v3 = vsel %vm4046_vm13, %v4101_v60, %v4105_v19  ;;  %v4375_v60 = vrot.slane %v26351_v28, 6  ;;  %v26364_v28 = vld [vmem:[#allocation11_spill] sm:$0xff] }
 0x34a   : > { %18903 = vmatmul.mubr.msk.bf16.gmra.mrb[24].mxu0 %vm316_vm2, %v11717_v43  ;;  %v26347_v43 = vld [vmem:[#allocation39_spill] sm:$0xff]  ;;  %v4109_v46 = vor.u32 %v4108_v14, %v4107_v57  ;;  %v16235_v57 = vld [vmem:[%s25749_s1 + $0x1e] sm:$0x3]  ;;  %v26354_v14 = vld [vmem:[#allocation65_spill] sm:$0xff] }
 0x34b   : > { %18906 = vmatprep.mubr.msk.bf16.mxu0 %vm316_vm2, %v11725_v26  ;;  %v26348_v26 = vld [vmem:[#allocation68_spill] sm:$0xff] }
 0x34c   : > { %18075 = vmatmul.mubr.msk.bf16.gmra.mrb[12].mxu1 %vm316_vm2, %v4086_v7  ;;  %v4111_v7 = vrot.slane %v26348_v26, 5 }
 0x34d   : > { %18078 = vmatprep.mubr.msk.bf16.mxu1 %vm316_vm2, %v4090_v49  ;;  %v23727_v49 = vld [vmem:[#allocation2 + $0xa0] sm:$0x3f] }
 0x34e   : > { %v4116_v27 = vshrl.u32 %v23727_v49, 16  ;;  %v4119_v54 = vshll.u32 %v23727_v49, 16  ;;  %v4113_v58 = vor.u32 %v4112_v41, %v4111_v7  ;;  %v4387_v41 = vrot.slane %v26357_v59, 6  ;;  %v26371_v59 = vld [vmem:[#allocation27_spill] sm:$0xff] }
 0x350   : > { %v4121_v0 = vrot.slane %v4119_v54, 6 }
 0x352   : > { %18907 = vmatmul.mubr.msk.bf16.gmra.mrb[28].mxu0 %vm316_vm2, %v11733_v51  ;;  %v4110_v51 = vsel %vm4046_vm13, %v4105_v19, %v4109_v46 }
 0x353   : > { %18912 = vmatprep.mubr.msk.bf16.mxu0 %vm316_vm2, %v23268_v31 }
 0x354   : > { %18079 = vmatmul.mubr.msk.bf16.gmra.mrb[16].mxu1 %vm316_vm2, %v4094_v50  ;;  %v4118_v50 = vrot.slane %v4116_v27, 5  ;;  %v26359_v27 = vld [vmem:[#allocation46_spill] sm:$0xff] }
 0x355   : > { %18082 = vmatprep.mubr.msk.bf16.mxu1 %vm316_vm2, %v4098_v22  ;;  %v4391_v54 = vrot.slane %v26359_v27, 6 }
 0x356   : > { %v4122_v22 = vor.u32 %v4121_v0, %v4118_v50 }
 0x358   : > { %v4123_v61 = vsel %vm4046_vm13, %v4113_v58, %v4122_v22  ;;  %v26363_v22 = vld [vmem:[#allocation47_spill] sm:$0xff] }
 0x35a   : > { %18913 = vmatmul.mubr.msk.bf16.vlgmr.msra.gmra.mrb[0].mxu0 %vm316_vm2, %v26347_v43  ;;  %v4381_v43 = vrot.slane %v26354_v14, 6 }
 0x35b   : > { %18945 = vmatpush3.bf16.msra.mxu0 %v23509_v33  ;;  %18916 = vmatprep.mubr.msk.bf16.mxu0 %vm316_vm2, %v26350_v6  ;;  %v4114_v33 = vsel %vm4046_vm13, %v4109_v46, %v4113_v58  ;;  %v26360_v58 = vshll.u32 %v23268_v31, 16 }
 0x35c   : > { %18083 = vmatmul.mubr.msk.bf16.gmra.mrb[20].mxu1 %vm316_vm2, %v4102_v11  ;;  %18978 = vmatprep.subr.bf16.mxu0 %v23717_v38  ;;  %v26353_v11 = vld [vmem:[#allocation64_spill] sm:$0xff] }
 0x35d   : > { %18086 = vmatprep.mubr.msk.bf16.mxu1 %vm316_vm2, %v4106_v3  ;;  %v4379_v32 = vrot.slane %v26353_v11, 6  ;;  %v26355_v3 = vld [vmem:[#allocation66_spill] sm:$0xff]  ;;  %v26367_v11 = vld [vmem:[#allocation48_spill] sm:$0xff] }
 0x35e   : > { %v4383_v26 = vrot.slane %v26355_v3, 6  ;;  %v26370_v3 = vld [vmem:[#allocation16_spill] sm:$0xff] }
 0x360   : > { %v4384_v7 = vsel %vm562_vm1, %v4381_v43, %v4383_v26 }
 0x362   : > { %18917 = vmatmul.mubr.msk.bf16.gmra.mrb[4].mxu0 %vm316_vm2, %v23305_v9  ;;  %v4376_v9 = vsel %vm562_vm1, %v4374_v23, %v4375_v60  ;;  %v4393_v23 = vrot.slane %v26363_v22, 6 }
 0x363   : > { %18920 = vmatprep.mubr.msk.bf16.mxu0 %vm316_vm2, %v23311_v1  ;;  %v26352_v1 = vld [vmem:[#allocation63_spill] sm:$0xff] }
 0x364   : > { %18087 = vmatmul.mubr.msk.bf16.gmra.mrb[24].mxu1 %vm316_vm2, %v4110_v51  ;;  %v4377_v19 = vrot.slane %v26352_v1, 6  ;;  %v12232_v51 = vrot.slane %v26360_v58, 1  ;;  %v26366_v1 = vld [vmem:[#allocation44_spill] sm:$0xff]  ;;  %v26374_v58 = vld [vmem:[#allocation23_spill] sm:$0xff] }
 0x365   : > { %18090 = vmatprep.mubr.msk.bf16.mxu1 %vm316_vm2, %v4114_v33  ;;  %v26362_v33 = vld [vmem:[#allocation22_spill] sm:$0xff] }
 0x366   : > { %v4378_v2 = vsel %vm562_vm1, %v4375_v60, %v4377_v19  ;;  %v12237_v25 = vrot.slane %v26362_v33, 1  ;;  %v4395_v60 = vrot.slane %v26364_v28, 6  ;;  %v26377_v28 = vld [vmem:[#allocation34_spill] sm:$0xff] }
 0x36a   : > { %18921 = vmatmul.mubr.msk.bf16.gmra.mrb[8].mxu0 %vm316_vm2, %v23332_v45  ;;  %v4380_v45 = vsel %vm562_vm1, %v4377_v19, %v4379_v32  ;;  %v12241_v19 = vor.u32 %v12237_v25, %v26366_v1 }
 0x36b   : > { %18924 = vmatprep.mubr.msk.bf16.mxu0 %vm316_vm2, %v23335_v63  ;;  %v23764_v63 = vand.u32 %v16235_v57, %v21247_v4  ;;  %v26368_v57 = vld [vmem:[#allocation13_spill] sm:$0xff] }
 0x36c   : > { %18091 = vmatmul.mubr.msk.bf16.gmra.mrb[28].mxu1 %vm316_vm2, %v4123_v61  ;;  %v4394_v61 = vsel %vm562_vm1, %v4391_v54, %v4393_v23 }
 0x36d   : > { %18096 = vmatprep.mubr.msk.bf16.mxu1 %vm316_vm2, %v4376_v9 }
 0x372   : > { %18925 = vmatmul.mubr.msk.bf16.gmra.mrb[12].mxu0 %vm316_vm2, %v23352_v37  ;;  %v4382_v37 = vsel %vm562_vm1, %v4379_v32, %v4381_v43  ;;  %v16660_v43 = vld [vmem:[%s25749_s1 + $0x50] sm:$0x3] }
 0x373   : > { %18928 = vmatprep.mubr.msk.bf16.mxu0 %vm316_vm2, %v23355_v21  ;;  %v26356_v21 = vld [vmem:[#allocation67_spill] sm:$0xff] }
 0x374   : > { %18097 = vmatmul.mubr.msk.bf16.vlgmr.msra.gmra.mrb[0].mxu1 %vm316_vm2, %v4378_v2  ;;  %v12253_v2 = vrot.slane %v26368_v57, 1 }
 0x375   : > { %18129 = vmatpush3.bf16.msra.mxu1 %v23611_v44  ;;  %18100 = vmatprep.mubr.msk.bf16.mxu1 %vm316_vm2, %v4380_v45  ;;  %v4385_v44 = vrot.slane %v26356_v21, 6  ;;  %v26369_v45 = vld [vmem:[#allocation18_spill] sm:$0xff]  ;;  %v23829_v21 = vand.u32 %v16660_v43, %v21247_v4 }
 0x376   : > { %18162 = vmatprep.subr.bf16.mxu1 %v23764_v63  ;;  %v4397_v14 = vrot.slane %v26369_v45, 6 }
 0x377   : > { %v4386_v6 = vsel %vm562_vm1, %v4383_v26, %v4385_v44  ;;  %v4399_v26 = vrot.slane %v26370_v3, 6 }
 0x37a   : > { %18929 = vmatmul.mubr.msk.bf16.gmra.mrb[16].mxu0 %vm316_vm2, %v23375_v24  ;;  %v4388_v24 = vsel %vm562_vm1, %v4385_v44, %v4387_v41  ;;  %v4398_v44 = vsel %vm562_vm1, %v4395_v60, %v4397_v14 }
 0x37b   : > { %18932 = vmatprep.mubr.msk.bf16.mxu0 %vm316_vm2, %v23378_v56  ;;  %v26358_v56 = vld [vmem:[#allocation41_spill] sm:$0xff] }
 0x37c   : > { %18101 = vmatmul.mubr.msk.bf16.gmra.mrb[4].mxu1 %vm316_vm2, %v4382_v37  ;;  %v4389_v46 = vrot.slane %v26358_v56, 6 }
 0x37d   : > { %18104 = vmatprep.mubr.msk.bf16.mxu1 %vm316_vm2, %v4384_v7 }
 0x37e   : > { %v4390_v50 = vsel %vm562_vm1, %v4387_v41, %v4389_v46  ;;  %v12261_v41 = vrot.slane %v26371_v59, 1 }
 0x382   : > { %18933 = vmatmul.mubr.msk.bf16.gmra.mrb[20].mxu0 %vm316_vm2, %v23400_v15  ;;  %v4392_v15 = vsel %vm562_vm1, %v4389_v46, %v4391_v54  ;;  %v26373_v46 = vld [vmem:[#allocation21_spill] sm:$0xff]  ;;  %v12269_v54 = vrot.slane %v23538_v39, 1 }
 0x383   : > { %18936 = vmatprep.mubr.msk.bf16.mxu0 %vm316_vm2, %v23403_v42  ;;  %v26361_v42 = vshrl.u32 %v23268_v31, 16  ;;  %v4396_v31 = vsel %vm562_vm1, %v4393_v23, %v4395_v60  ;;  %v12265_v27 = vor.u32 %v12261_v41, %v26373_v46 }
 0x384   : > { %18105 = vmatmul.mubr.msk.bf16.gmra.mrb[8].mxu1 %vm316_vm2, %v4386_v6  ;;  %v4400_v6 = vsel %vm562_vm1, %v4397_v14, %v4399_v26  ;;  %v12273_v60 = vor.u32 %v12269_v54, %v26377_v28 }
 0x385   : > { %18108 = vmatprep.mubr.msk.bf16.mxu1 %vm316_vm2, %v4388_v24  ;;  %v12233_v0 = vor.u32 %v12232_v51, %v26361_v42  ;;  %v26372_v24 = vld [vmem:[#allocation10_spill] sm:$0xff]  ;;  %v4401_v51 = vrot.slane %v26374_v58, 6  ;;  %v12270_v42 = vsel %vm380_vm3, %v12265_v27, %v12269_v54  ;;  %v16252_v58 = vld [vmem:[%s25749_s1 + $0x20] sm:$0x3] }
 0x386   : > { %v12257_v56 = vor.u32 %v12253_v2, %v26372_v24 }
 0x38a   : > { %18937 = vmatmul.mubr.msk.bf16.gmra.mrb[24].mxu0 %vm316_vm2, %v23420_v40  ;;  %v12238_v40 = vsel %vm380_vm3, %v12233_v0, %v12237_v25  ;;  %v4402_v0 = vsel %vm562_vm1, %v4399_v26, %v4401_v51  ;;  %v26376_v25 = vld [vmem:[#allocation31_spill] sm:$0xff]  ;;  %v12293_v26 = vrot.slane %v23570_v20, 1 }
 0x38b   : > { %18940 = vmatprep.mubr.msk.bf16.mxu0 %vm316_vm2, %v23423_v29  ;;  %v26365_v29 = vld [vmem:[#allocation17_spill] sm:$0xff]  ;;  %v12277_v22 = vrot.slane %v26376_v25, 1 }
 0x38c   : > { %18109 = vmatmul.mubr.msk.bf16.gmra.mrb[12].mxu1 %vm316_vm2, %v4390_v50  ;;  %v12245_v9 = vrot.slane %v26365_v29, 1  ;;  %v26375_v50 = vld [vmem:[#allocation30_spill] sm:$0xff] }
 0x38d   : > { %18112 = vmatprep.mubr.msk.bf16.mxu1 %vm316_vm2, %v4392_v15  ;;  %v4403_v15 = vrot.slane %v26375_v50, 6  ;;  %v12278_v14 = vsel %vm380_vm3, %v12273_v60, %v12277_v22 }
 0x38e   : > { %v12249_v32 = vor.u32 %v12245_v9, %v26367_v11  ;;  %v12246_v37 = vsel %vm380_vm3, %v12241_v19, %v12245_v9  ;;  %v26378_v9 = vld [vmem:[#allocation26_spill] sm:$0xff]  ;;  %v12285_v19 = vrot.slane %v23565_v17, 1 }
 0x38f   : > { %v4404_v23 = vsel %vm562_vm1, %v4401_v51, %v4403_v15 }
 0x390   : > { %v12254_v7 = vsel %vm380_vm3, %v12249_v32, %v12253_v2  ;;  %v4405_v32 = vrot.slane %v23727_v49, 6  ;;  %v12289_v49 = vor.u32 %v12285_v19, %v23553_v53 }
 0x392   : > { %18941 = vmatmul.mubr.msk.bf16.gmra.mrb[28].mxu0 %vm316_vm2, %v23664_v35  ;;  %v4406_v3 = vsel %vm562_vm1, %v4403_v15, %v4405_v32  ;;  %v12294_v54 = vsel %vm380_vm3, %v12289_v49, %v12293_v26  ;;  %v12309_v15 = vrot.slane %v23601_v55, 1 }
 0x393   : > { %18946 = vmatprep.mubr.msk.bf16.mxu0 %vm316_vm2, %v12238_v40  ;;  %v23853_v40 = vld [vmem:[#allocation2 + $0x40] sm:$0xc0] }
 0x394   : > { %18113 = vmatmul.mubr.msk.bf16.gmra.mrb[16].mxu1 %vm316_vm2, %v4394_v61  ;;  %v23855_v61 = vld [vmem:[#allocation2 + $0x48] sm:$0xff]  ;;  %v4687_v2 = vrot.slane %v23853_v40, 6  ;;  %v12313_v60 = vor.u32 %v12309_v15, %v23587_v5 }
 0x395   : > { %18116 = vmatprep.mubr.msk.bf16.mxu1 %vm316_vm2, %v4396_v31  ;;  %v12281_v31 = vor.u32 %v12277_v22, %v26378_v9  ;;  %v4688_v45 = vrot.slane %v23855_v61, 6 }
 0x397   : > { %v12286_v43 = vsel %vm380_vm3, %v12281_v31, %v12285_v19  ;;  %v12317_v31 = vrot.slane %v23629_v47, 1 }
 0x39a   : > { %18947 = vmatmul.mubr.msk.bf16.vlgmr.msra.gmra.mrb[0].mxu0 %vm316_vm2, %v12246_v37  ;;  %v4689_v37 = vsel %vm562_vm1, %v4687_v2, %v4688_v45 }
 0x39b   : > { %18979 = vmatpush3.bf16.msra.mxu0 %v23717_v38  ;;  %18950 = vmatprep.mubr.msk.bf16.mxu0 %vm316_vm2, %v12254_v7  ;;  %v12262_v38 = vsel %vm380_vm3, %v12257_v56, %v12261_v41  ;;  %v23870_v7 = vld [vmem:[#allocation2 + $0x50] sm:$0xff]  ;;  %v12297_v41 = vor.u32 %v12293_v26, %v23558_v16  ;;  %v12321_v26 = vor.u32 %v12317_v31, %v23616_v36 }
 0x39c   : > { %18117 = vmatmul.mubr.msk.bf16.gmra.mrb[20].mxu1 %vm316_vm2, %v4398_v44  ;;  %19012 = vmatprep.subr.bf16.mxu0 %v23829_v21  ;;  %v23874_v44 = vld [vmem:[#allocation2 + $0x58] sm:$0xff]  ;;  %v4690_v56 = vrot.slane %v23870_v7, 6 }
 0x39d   : > { %18120 = vmatprep.mubr.msk.bf16.mxu1 %vm316_vm2, %v4400_v6  ;;  %v12301_v6 = vrot.slane %v23593_v10, 1  ;;  %v4692_v27 = vrot.slane %v23874_v44, 6 }
 0x39e   : > { %v4691_v50 = vsel %vm562_vm1, %v4688_v45, %v4690_v56  ;;  %v12318_v45 = vsel %vm380_vm3, %v12313_v60, %v12317_v31  ;;  %v12349_v31 = vrot.slane %v23687_v62, 1 }
 0x39f   : > { %v12302_v51 = vsel %vm380_vm3, %v12297_v41, %v12301_v6  ;;  %v12305_v22 = vor.u32 %v12301_v6, %v23582_v30  ;;  %v12333_v41 = vrot.slane %v23657_v52, 1 }
 0x3a1   : > { %v12310_v2 = vsel %vm380_vm3, %v12305_v22, %v12309_v15  ;;  %v23932_v15 = vld [vmem:[#allocation2 + $0x80] sm:$0xff]  ;;  %v23936_v22 = vld [vmem:[#allocation2 + $0x88] sm:$0xff] }
 0x3a2   : > { %18951 = vmatmul.mubr.msk.bf16.gmra.mrb[4].mxu0 %vm316_vm2, %v12262_v38  ;;  %v4693_v38 = vsel %vm562_vm1, %v4690_v56, %v4692_v27 }
 0x3a3   : > { %18954 = vmatprep.mubr.msk.bf16.mxu0 %vm316_vm2, %v12270_v42  ;;  %v23891_v42 = vld [vmem:[#allocation2 + $0x60] sm:$0xff] }
 0x3a4   : > { %18121 = vmatmul.mubr.msk.bf16.gmra.mrb[24].mxu1 %vm316_vm2, %v4402_v0  ;;  %v23894_v0 = vand.u32 %v16252_v58, %v21247_v4  ;;  %v4694_v19 = vrot.slane %v23891_v42, 6 }
 0x3a5   : > { %18124 = vmatprep.mubr.msk.bf16.mxu1 %vm316_vm2, %v4404_v23  ;;  %v23898_v23 = vld [vmem:[#allocation2 + $0x68] sm:$0xff] }
 0x3a6   : > { %v4696_v32 = vrot.slane %v23898_v23, 6 }
 0x3aa   : > { %18955 = vmatmul.mubr.msk.bf16.gmra.mrb[8].mxu0 %vm316_vm2, %v12278_v14  ;;  %v4695_v14 = vsel %vm562_vm1, %v4692_v27, %v4694_v19 }
 0x3ab   : > { %18958 = vmatprep.mubr.msk.bf16.mxu0 %vm316_vm2, %v12286_v43  ;;  %v12325_v43 = vrot.slane %v23634_v18, 1  ;;  %v25995_v18 = vshll.u32 %v23874_v44, 16 }
 0x3ac   : > { %18125 = vmatmul.mubr.msk.bf16.gmra.mrb[28].mxu1 %vm316_vm2, %v4406_v3  ;;  %v23914_v3 = vld [vmem:[#allocation2 + $0x70] sm:$0xff] }
 0x3ad   : > { %18130 = vmatprep.mubr.msk.bf16.mxu1 %vm316_vm2, %v4689_v37  ;;  %v23918_v37 = vld [vmem:[#allocation2 + $0x78] sm:$0xff]  ;;  %v12329_v49 = vor.u32 %v12325_v43, %v23621_v34  ;;  %v4698_v6 = vrot.slane %v23914_v3, 6  ;;  %v12326_v27 = vsel %vm380_vm3, %v12321_v26, %v12325_v43  ;;  %v23950_v26 = vld [vmem:[#allocation2 + $0xb0] sm:$0xfe] }
 0x3ae   : > { %v4700_v56 = vrot.slane %v23918_v37, 6 }
 0x3af   : > { %v4699_v58 = vsel %vm562_vm1, %v4696_v32, %v4698_v6 }
 0x3b2   : > { %18959 = vmatmul.mubr.msk.bf16.gmra.mrb[12].mxu0 %vm316_vm2, %v12294_v54  ;;  %v12334_v54 = vsel %vm380_vm3, %v12329_v49, %v12333_v41 }
 0x3b3   : > { %18962 = vmatprep.mubr.msk.bf16.mxu0 %vm316_vm2, %v12302_v51  ;;  %v12341_v51 = vrot.slane %v23662_v13, 1  ;;  %v4667_v13 = vld [vmem:[#allocation2 + $0xc0] sm:$0x3f] }
 0x3b4   : > { %18131 = vmatmul.mubr.msk.bf16.vlgmr.msra.gmra.mrb[0].mxu1 %vm316_vm2, %v4691_v50  ;;  %v4701_v50 = vsel %vm562_vm1, %v4698_v6, %v4700_v56  ;;  %v12353_v6 = vor.u32 %v12349_v31, %v23678_v8 }
 0x3b5   : > { %18163 = vmatpush3.bf16.msra.mxu1 %v23764_v63  ;;  %18134 = vmatprep.mubr.msk.bf16.mxu1 %vm316_vm2, %v4693_v38  ;;  %v4697_v63 = vsel %vm562_vm1, %v4694_v19, %v4696_v32  ;;  %v12337_v38 = vor.u32 %v12333_v41, %v23646_v48  ;;  %v12345_v60 = vor.u32 %v12341_v51, %v23651_v12  ;;  %v23941_v19 = vld [vmem:[#allocation2 + $0x130] sm:$0x1]  ;;  %v4702_v32 = vrot.slane %v23932_v15, 6 }
 0x3b6   : > { %18196 = vmatprep.subr.bf16.mxu1 %v23894_v0  ;;  %v23954_v41 = vld [vmem:[#allocation2 + $0x90] sm:$0xff] }
 0x3b7   : > { %v12350_v43 = vsel %vm380_vm3, %v12345_v60, %v12349_v31 }
 0x3ba   : > { %18963 = vmatmul.mubr.msk.bf16.gmra.mrb[16].mxu0 %vm316_vm2, %v12310_v2  ;;  %v4704_v2 = vrot.slane %v23936_v22, 6 }
 0x3bb   : > { %18966 = vmatprep.mubr.msk.bf16.mxu0 %vm316_vm2, %v12318_v45  ;;  %v12342_v45 = vsel %vm380_vm3, %v12337_v38, %v12341_v51 }
 0x3bc   : > { %18135 = vmatmul.mubr.msk.bf16.gmra.mrb[4].mxu1 %vm316_vm2, %v4695_v14  ;;  %v12355_v14 = vshll.u32 %v23941_v19, 16  ;;  %v4705_v49 = vsel %vm562_vm1, %v4702_v32, %v4704_v2 }
 0x3bd   : > { %18138 = vmatprep.mubr.msk.bf16.mxu1 %vm316_vm2, %v4697_v63  ;;  %v4703_v63 = vsel %vm562_vm1, %v4700_v56, %v4702_v32  ;;  %v23962_v56 = vld [vmem:[#allocation2 + $0xb8] sm:$0xff] }
 0x3be   : > { %26379 = vst [vmem:[#allocation35_spill] sm:$0xff] %v23962_v56  ;;  %v12624_v51 = vrot.slane %v23962_v56, 1  ;;  %v24001_v56 = vld [vmem:[#allocation2 + $0xb8] sm:$0xff] }
 0x3c2   : > { %18967 = vmatmul.mubr.msk.bf16.gmra.mrb[20].mxu0 %vm316_vm2, %v12326_v27  ;;  %v12357_v27 = vrot.slane %v12355_v14, 1  ;;  %v23973_v14 = vld [vmem:[#allocation2 + $0xa0] sm:$0xff] }
 0x3c3   : > { %18970 = vmatprep.mubr.msk.bf16.mxu0 %vm316_vm2, %v12334_v54  ;;  %v23958_v54 = vld [vmem:[#allocation2 + $0x98] sm:$0xff] }
 0x3c4   : > { %18139 = vmatmul.mubr.msk.bf16.gmra.mrb[8].mxu1 %vm316_vm2, %v4699_v58  ;;  %v12623_v58 = vrot.slane %v23950_v26, 1  ;;  %v4708_v38 = vrot.slane %v23958_v54, 6  ;;  %v12358_v60 = vsel %vm380_vm3, %v12353_v6, %v12357_v27  ;;  %v23982_v6 = vld [vmem:[#allocation2 + $0xc8] sm:$0xff]  ;;  %v4710_v27 = vrot.slane %v23973_v14, 6 }
 0x3c5   : > { %18142 = vmatprep.mubr.msk.bf16.mxu1 %vm316_vm2, %v4701_v50  ;;  %v4706_v50 = vrot.slane %v23954_v41, 6  ;;  %26381 = vst [vmem:[#allocation39_spill] sm:$0xff] %v23982_v6 }
 0x3c6   : > { %v12625_v31 = vsel %vm945_vm7, %v12623_v58, %v12624_v51  ;;  %v16677_v58 = vld [vmem:[%s25749_s1 + $0x52] sm:$0x3] }
 0x3c7   : > { %v4707_v32 = vsel %vm562_vm1, %v4704_v2, %v4706_v50  ;;  %v12628_v2 = vrot.slane %v23982_v6, 1  ;;  %v23999_v6 = vld [vmem:[#allocation2 + $0xb0] sm:$0xff] }
 0x3ca   : > { %18971 = vmatmul.mubr.msk.bf16.gmra.mrb[24].mxu0 %vm316_vm2, %v12342_v45  ;;  %v4709_v45 = vsel %vm562_vm1, %v4706_v50, %v4708_v38 }
 0x3cb   : > { %18974 = vmatprep.mubr.msk.bf16.mxu0 %vm316_vm2, %v12350_v43  ;;  %v23976_v43 = vld [vmem:[#allocation2 + $0xc0] sm:$0xff] }
 0x3cc   : > { %18143 = vmatmul.mubr.msk.bf16.gmra.mrb[12].mxu1 %vm316_vm2, %v4703_v63  ;;  %26380 = vst [vmem:[#allocation40_spill] sm:$0xff] %v23976_v43  ;;  %v12626_v63 = vrot.slane %v23976_v43, 1  ;;  %v4711_v43 = vsel %vm562_vm1, %v4708_v38, %v4710_v27 }
 0x3cd   : > { %18146 = vmatprep.mubr.msk.bf16.mxu1 %vm316_vm2, %v4705_v49  ;;  %v23979_v49 = vld [vmem:[#allocation2 + $0xa8] sm:$0xff] }
 0x3ce   : > { %v4712_v50 = vrot.slane %v23979_v49, 6 }
 0x3d2   : > { %18975 = vmatmul.mubr.msk.bf16.gmra.mrb[28].mxu0 %vm316_vm2, %v12358_v60  ;;  %v12627_v60 = vsel %vm945_vm7, %v12624_v51, %v12626_v63  ;;  %v24005_v51 = vld [vmem:[#allocation2 + $0xd0] sm:$0xff] }
 0x3d3   : > { %18980 = vmatprep.mubr.msk.bf16.mxu0 %vm316_vm2, %v12625_v31  ;;  %v12629_v31 = vsel %vm945_vm7, %v12626_v63, %v12628_v2  ;;  %26382 = vst [vmem:[#allocation68_spill] sm:$0xff] %v24005_v51  ;;  %v12630_v63 = vrot.slane %v24005_v51, 1  ;;  %v25991_v51 = vshrl.u32 %v23855_v61, 16 }
 0x3d4   : > { %18147 = vmatmul.mubr.msk.bf16.gmra.mrb[16].mxu1 %vm316_vm2, %v4707_v32  ;;  %v23994_v32 = vand.u32 %v16677_v58, %v21247_v4  ;;  %v24009_v58 = vld [vmem:[#allocation2 + $0xd8] sm:$0xff] }
 0x3d5   : > { %18150 = vmatprep.mubr.msk.bf16.mxu1 %vm316_vm2, %v4709_v45  ;;  %v4713_v45 = vsel %vm562_vm1, %v4710_v27, %v4712_v50  ;;  %26383 = vst [vmem:[#allocation69_spill] sm:$0xff] %v24009_v58  ;;  %v12632_v38 = vrot.slane %v24009_v58, 1  ;;  %v4714_v27 = vrot.slane %v23999_v6, 6  ;;  %v12631_v62 = vsel %vm945_vm7, %v12628_v2, %v12630_v63  ;;  %v24030_v2 = vld [vmem:[#allocation2 + $0xe0] sm:$0xff] }
 0x3d6   : > { %26384 = vst [vmem:[#allocation61_spill] sm:$0xff] %v24030_v2 }
 0x3d7   : > { %v12633_v58 = vsel %vm945_vm7, %v12630_v63, %v12632_v38  ;;  %v4715_v8 = vsel %vm562_vm1, %v4712_v50, %v4714_v27  ;;  %v12634_v63 = vrot.slane %v24030_v2, 1  ;;  %v24034_v50 = vld [vmem:[#allocation2 + $0xe8] sm:$0xff] }
 0x3d9   : > { %v12635_v2 = vsel %vm945_vm7, %v12632_v38, %v12634_v63  ;;  %v24056_v38 = vld [vmem:[#allocation2 + $0xf0] sm:$0xff] }
 0x3da   : > { %18981 = vmatmul.mubr.msk.bf16.vlgmr.msra.gmra.mrb[0].mxu0 %vm316_vm2, %v12627_v60  ;;  %v4969_v60 = vshrl.u32 %v23853_v40, 16  ;;  %26385 = vst [vmem:[#allocation62_spill] sm:$0xff] %v24056_v38 }
 0x3db   : > { %19013 = vmatpush3.bf16.msra.mxu0 %v23829_v21  ;;  %18984 = vmatprep.mubr.msk.bf16.mxu0 %vm316_vm2, %v12629_v31  ;;  %v4716_v21 = vrot.slane %v24001_v56, 6  ;;  %v4972_v31 = vshll.u32 %v23853_v40, 16  ;;  %v4979_v40 = vrot.slane %v25991_v51, 6 }
 0x3dc   : > { %18151 = vmatmul.mubr.msk.bf16.gmra.mrb[20].mxu1 %vm316_vm2, %v4711_v43  ;;  %19046 = vmatprep.subr.bf16.mxu0 %v23994_v32  ;;  %v25990_v43 = vshll.u32 %v23855_v61, 16  ;;  %v4971_v12 = vrot.slane %v4969_v60, 6  ;;  %v25998_v60 = vshrl.u32 %v23870_v7, 16 }
 0x3dd   : > { %18154 = vmatprep.mubr.msk.bf16.mxu1 %vm316_vm2, %v4713_v45  ;;  %v4717_v45 = vsel %vm562_vm1, %v4714_v27, %v4716_v21  ;;  %v4974_v52 = vrot.slane %v4972_v31, 7  ;;  %v4718_v27 = vrot.slane %v4667_v13, 6  ;;  %v25996_v31 = vshll.u32 %v23870_v7, 16 }
 0x3de   : > { %v4982_v48 = vrot.slane %v25990_v43, 7 }
 0x3df   : > { %v4975_v43 = vor.u32 %v4974_v52, %v4971_v12  ;;  %v4719_v34 = vsel %vm562_vm1, %v4716_v21, %v4718_v27  ;;  %v4991_v13 = vrot.slane %v25996_v31, 7  ;;  %v5000_v52 = vrot.slane %v25995_v18, 7 }
 0x3e0   : > { %v4983_v51 = vor.u32 %v4982_v48, %v4979_v40  ;;  %v12638_v21 = vrot.slane %v24056_v38, 1  ;;  %v24060_v40 = vld [vmem:[#allocation2 + $0xf8] sm:$0xff]  ;;  %v26001_v27 = vshll.u32 %v23891_v42, 16  ;;  %v26000_v31 = vshll.u32 %v23898_v23, 16 }
 0x3e1   : > { %26386 = vst [vmem:[#allocation63_spill] sm:$0xff] %v24060_v40 }
 0x3e2   : > { %18985 = vmatmul.mubr.msk.bf16.gmra.mrb[4].mxu0 %vm316_vm2, %v12631_v62  ;;  %v12636_v62 = vrot.slane %v24034_v50, 1  ;;  %v4984_v48 = vsel %vm4967_vm14, %v4975_v43, %v4983_v51 }
 0x3e3   : > { %18988 = vmatprep.mubr.msk.bf16.mxu0 %vm316_vm2, %v12633_v58  ;;  %v25997_v58 = vshrl.u32 %v23874_v44, 16 }
 0x3e4   : > { %18155 = vmatmul.mubr.msk.bf16.gmra.mrb[24].mxu1 %vm316_vm2, %v4715_v8  ;;  %v12637_v8 = vsel %vm945_vm7, %v12634_v63, %v12636_v62  ;;  %v25999_v63 = vshrl.u32 %v23891_v42, 16 }
 0x3e5   : > { %18158 = vmatprep.mubr.msk.bf16.mxu1 %vm316_vm2, %v4717_v45  ;;  %v4988_v45 = vrot.slane %v25998_v60, 6  ;;  %v4997_v12 = vrot.slane %v25997_v58, 6  ;;  %v12639_v58 = vsel %vm945_vm7, %v12636_v62, %v12638_v21 }
 0x3e7   : > { %v4992_v43 = vor.u32 %v4991_v13, %v4988_v45  ;;  %v5001_v18 = vor.u32 %v5000_v52, %v4997_v12  ;;  %v5006_v45 = vrot.slane %v25999_v63, 6  ;;  %v5009_v13 = vrot.slane %v26001_v27, 7 }
 0x3e8   : > { %v5018_v52 = vrot.slane %v26000_v31, 7  ;;  %v26005_v27 = vshll.u32 %v23914_v3, 16 }
 0x3e9   : > { %v5002_v12 = vsel %vm4967_vm14, %v4992_v43, %v5001_v18  ;;  %v5010_v31 = vor.u32 %v5009_v13, %v5006_v45 }
 0x3ea   : > { %18989 = vmatmul.mubr.msk.bf16.gmra.mrb[8].mxu0 %vm316_vm2, %v12635_v2  ;;  %v12640_v2 = vrot.slane %v24060_v40, 1  ;;  %v5027_v13 = vrot.slane %v26005_v27, 7  ;;  %v26015_v27 = vshrl.u32 %v23932_v15, 16 }
 0x3eb   : > { %18992 = vmatprep.mubr.msk.bf16.mxu0 %vm316_vm2, %v12637_v8  ;;  %v26002_v8 = vshrl.u32 %v23898_v23, 16 }
 0x3ec   : > { %18159 = vmatmul.mubr.msk.bf16.gmra.mrb[28].mxu1 %vm316_vm2, %v4719_v34  ;;  %v16269_v34 = vld [vmem:[%s25749_s1 + $0x22] sm:$0x3]  ;;  %v12641_v60 = vsel %vm945_vm7, %v12638_v21, %v12640_v2 }
 0x3ed   : > { %18164 = vmatprep.mubr.msk.bf16.mxu1 %vm316_vm2, %v4984_v48  ;;  %v4993_v48 = vsel %vm4967_vm14, %v4983_v51, %v4992_v43  ;;  %v5015_v62 = vrot.slane %v26002_v8, 6  ;;  %v24085_v21 = vand.u32 %v16269_v34, %v21247_v4  ;;  %v24088_v51 = vld [vmem:[#allocation2 + $0x100] sm:$0xff]  ;;  %v26008_v34 = vshrl.u32 %v23914_v3, 16 }
 0x3ee   : > { %26387 = vst [vmem:[#allocation64_spill] sm:$0xff] %v24088_v51  ;;  %v12642_v63 = vrot.slane %v24088_v51, 1  ;;  %v26006_v8 = vshrl.u32 %v23918_v37, 16  ;;  %v26007_v51 = vshll.u32 %v23918_v37, 16 }
 0x3ef   : > { %v5024_v45 = vrot.slane %v26008_v34, 6  ;;  %v26013_v34 = vshll.u32 %v23936_v22, 16 }
 0x3f2   : > { %18993 = vmatmul.mubr.msk.bf16.gmra.mrb[12].mxu0 %vm316_vm2, %v12639_v58  ;;  %v24092_v58 = vld [vmem:[#allocation2 + $0x108] sm:$0xff] }
 0x3f3   : > { %18996 = vmatprep.mubr.msk.bf16.mxu0 %vm316_vm2, %v12641_v60  ;;  %26388 = vst [vmem:[#allocation65_spill] sm:$0xff] %v24092_v58  ;;  %v12644_v43 = vrot.slane %v24092_v58, 1  ;;  %v5019_v60 = vor.u32 %v5018_v52, %v5015_v62  ;;  %v5033_v62 = vrot.slane %v26006_v8, 6  ;;  %v24120_v52 = vld [vmem:[#allocation2 + $0x118] sm:$0xff]  ;;  %v26012_v8 = vshll.u32 %v23932_v15, 16 }
 0x3f4   : > { %18165 = vmatmul.mubr.msk.bf16.vlgmr.msra.gmra.mrb[0].mxu1 %vm316_vm2, %v4993_v48  ;;  %v12643_v48 = vsel %vm945_vm7, %v12640_v2, %v12642_v63  ;;  %v5036_v2 = vrot.slane %v26007_v51, 7  ;;  %26390 = vst [vmem:[#allocation67_spill] sm:$0xff] %v24120_v52 }
 0x3f5   : > { %18197 = vmatpush3.bf16.msra.mxu1 %v23894_v0  ;;  %18168 = vmatprep.mubr.msk.bf16.mxu1 %vm316_vm2, %v5002_v12  ;;  %v12645_v58 = vsel %vm945_vm7, %v12642_v63, %v12644_v43  ;;  %v5011_v0 = vsel %vm4967_vm14, %v5001_v18, %v5010_v31  ;;  %v5020_v12 = vsel %vm4967_vm14, %v5010_v31, %v5019_v60  ;;  %v24116_v63 = vld [vmem:[#allocation2 + $0x110] sm:$0xff] }
 0x3f6   : > { %18230 = vmatprep.subr.bf16.mxu1 %v24085_v21  ;;  %26389 = vst [vmem:[#allocation66_spill] sm:$0xff] %v24116_v63  ;;  %v12646_v18 = vrot.slane %v24116_v63, 1  ;;  %v5028_v31 = vor.u32 %v5027_v13, %v5024_v45  ;;  %v5037_v51 = vor.u32 %v5036_v2, %v5033_v62  ;;  %v5045_v45 = vrot.slane %v26012_v8, 7  ;;  %v24142_v62 = vld [vmem:[#allocation2 + $0x120] sm:$0xff] }
 0x3f7   : > { %26391 = vst [vmem:[#allocation43_spill] sm:$0xff] %v24142_v62  ;;  %v12652_v2 = vrot.slane %v23664_v35, 1  ;;  %v5058_v8 = vshrl.u32 %v23954_v41, 16 }
 0x3f8   : > { %v12647_v63 = vsel %vm945_vm7, %v12644_v43, %v12646_v18  ;;  %v5029_v40 = vsel %vm4967_vm14, %v5019_v60, %v5028_v31  ;;  %v5038_v13 = vsel %vm4967_vm14, %v5028_v31, %v5037_v51  ;;  %v5054_v43 = vrot.slane %v26013_v34, 7 }
 0x3f9   : > { %v12650_v60 = vrot.slane %v24142_v62, 1  ;;  %v26018_v34 = vshll.u32 %v23954_v41, 16 }
 0x3fa   : > { %18997 = vmatmul.mubr.msk.bf16.gmra.mrb[16].mxu0 %vm316_vm2, %v12643_v48  ;;  %v12648_v48 = vrot.slane %v24120_v52, 1  ;;  %v5042_v52 = vrot.slane %v26015_v27, 6  ;;  %v26019_v27 = vshll.u32 %v23958_v54, 16 }
 0x3fb   : > { %19000 = vmatprep.mubr.msk.bf16.mxu0 %vm316_vm2, %v12645_v58  ;;  %v26014_v58 = vshrl.u32 %v23936_v22, 16 }
 0x3fc   : > { %18169 = vmatmul.mubr.msk.bf16.gmra.mrb[4].mxu1 %vm316_vm2, %v5011_v0  ;;  %v12649_v0 = vsel %vm945_vm7, %v12646_v18, %v12648_v48  ;;  %v12907_v18 = vshll.u32 %v23950_v26, 16  ;;  %v5046_v31 = vor.u32 %v5045_v45, %v5042_v52  ;;  %v12651_v35 = vsel %vm945_vm7, %v12648_v48, %v12650_v60 }
 0x3fd   : > { %18172 = vmatprep.mubr.msk.bf16.mxu1 %vm316_vm2, %v5020_v12  ;;  %v5051_v12 = vrot.slane %v26014_v58, 6  ;;  %v5067_v58 = vshrl.u32 %v23958_v54, 16  ;;  %v5060_v45 = vrot.slane %v5058_v8, 6 }
 0x3fe   : > { %v12909_v38 = vrot.slane %v12907_v18, 2  ;;  %v5047_v52 = vsel %vm4967_vm14, %v5037_v51, %v5046_v31  ;;  %v5076_v18 = vshrl.u32 %v23973_v14, 16 }
 0x402   : > { %19001 = vmatmul.mubr.msk.bf16.gmra.mrb[20].mxu0 %vm316_vm2, %v12647_v63  ;;  %v12904_v63 = vshrl.u32 %v23950_v26, 16  ;;  %v12911_v26 = vrot.slane %v26366_v1, 1  ;;  %v5072_v1 = vrot.slane %v26019_v27, 7  ;;  %v5088_v27 = vshll.u32 %v23979_v49, 16 }
 0x403   : > { %19004 = vmatprep.mubr.msk.bf16.mxu0 %vm316_vm2, %v12649_v0  ;;  %v5055_v0 = vor.u32 %v5054_v43, %v5051_v12  ;;  %v5063_v12 = vrot.slane %v26018_v34, 7  ;;  %v5069_v43 = vrot.slane %v5067_v58, 6  ;;  %v5085_v34 = vshrl.u32 %v23979_v49, 16 }
 0x404   : > { %18173 = vmatmul.mubr.msk.bf16.gmra.mrb[8].mxu1 %vm316_vm2, %v5029_v40  ;;  %v12653_v40 = vsel %vm945_vm7, %v12650_v60, %v12652_v2  ;;  %v12906_v62 = vrot.slane %v12904_v63, 1 }
 0x405   : > { %18176 = vmatprep.mubr.msk.bf16.mxu1 %vm316_vm2, %v5038_v13  ;;  %v12912_v13 = vrot.slane %v26362_v33, 2  ;;  %v5056_v48 = vsel %vm4967_vm14, %v5046_v31, %v5055_v0  ;;  %v12654_v33 = vrot.slane %v23941_v19, 1  ;;  %v5064_v63 = vor.u32 %v5063_v12, %v5060_v45 }
 0x406   : > { %v12910_v51 = vor.u32 %v12909_v38, %v12906_v62  ;;  %v5079_v31 = vshll.u32 %v23973_v14, 16  ;;  %v12919_v62 = vrot.slane %v26372_v24, 1  ;;  %v5078_v45 = vrot.slane %v5076_v18, 6 }
 0x407   : > { %v12913_v60 = vor.u32 %v12912_v13, %v12911_v26  ;;  %v12655_v19 = vsel %vm945_vm7, %v12652_v2, %v12654_v33  ;;  %v12920_v26 = vrot.slane %v26368_v57, 2  ;;  %v5065_v13 = vsel %vm4967_vm14, %v5055_v0, %v5064_v63 }
 0x408   : > { %v5081_v12 = vrot.slane %v5079_v31, 7  ;;  %v5090_v24 = vrot.slane %v5088_v27, 7 }
 0x409   : > { %v12914_v38 = vsel %vm1226_vm9, %v12910_v51, %v12913_v60  ;;  %v12921_v2 = vor.u32 %v12920_v26, %v12919_v62  ;;  %v5103_v51 = vshrl.u32 %v24001_v56, 16  ;;  %v12927_v62 = vrot.slane %v26377_v28, 1  ;;  %v24224_v28 = vld [vmem:[#allocation2 + $0xc0] sm:$0x7f] }
 0x40a   : > { %19005 = vmatmul.mubr.msk.bf16.gmra.mrb[24].mxu0 %vm316_vm2, %v12651_v35  ;;  %v5073_v35 = vor.u32 %v5072_v1, %v5069_v43  ;;  %v5082_v0 = vor.u32 %v5081_v12, %v5078_v45  ;;  %v5097_v43 = vshll.u32 %v23999_v6, 16  ;;  %v16694_v1 = vld [vmem:[%s25749_s1 + $0x54] sm:$0x3]  ;;  %v12928_v26 = vrot.slane %v23538_v39, 2 }
 0x40b   : > { %19008 = vmatprep.mubr.msk.bf16.mxu0 %vm316_vm2, %v12653_v40  ;;  %v12915_v40 = vrot.slane %v26367_v11, 1 }
 0x40c   : > { %18177 = vmatmul.mubr.msk.bf16.gmra.mrb[12].mxu1 %vm316_vm2, %v5047_v52  ;;  %v12916_v52 = vrot.slane %v26365_v29, 2  ;;  %v5074_v11 = vsel %vm4967_vm14, %v5064_v63, %v5073_v35  ;;  %v5087_v29 = vrot.slane %v5085_v34, 6  ;;  %v5106_v63 = vshll.u32 %v24001_v56, 16 }
 0x40d   : > { %18180 = vmatprep.mubr.msk.bf16.mxu1 %vm316_vm2, %v5056_v48  ;;  %v5094_v48 = vshrl.u32 %v23999_v6, 16  ;;  %v5083_v45 = vsel %vm4967_vm14, %v5073_v35, %v5082_v0 }
 0x40e   : > { %v12917_v57 = vor.u32 %v12916_v52, %v12915_v40  ;;  %v5091_v33 = vor.u32 %v5090_v24, %v5087_v29  ;;  %v12924_v52 = vrot.slane %v26371_v59, 2  ;;  %v5108_v39 = vrot.slane %v5106_v63, 7 }
 0x40f   : > { %v5096_v12 = vrot.slane %v5094_v48, 6  ;;  %v5112_v24 = vshrl.u32 %v24224_v28, 16 }
 0x410   : > { %v12918_v40 = vsel %vm1226_vm9, %v12913_v60, %v12917_v57  ;;  %v5099_v60 = vrot.slane %v5097_v43, 7  ;;  %v5092_v59 = vsel %vm4967_vm14, %v5082_v0, %v5091_v33 }
 0x412   : > { %19009 = vmatmul.mubr.msk.bf16.gmra.mrb[28].mxu0 %vm316_vm2, %v12655_v19  ;;  %v12923_v19 = vrot.slane %v26373_v46, 1  ;;  %v5105_v46 = vrot.slane %v5103_v51, 6  ;;  %v5100_v29 = vor.u32 %v5099_v60, %v5096_v12 }
 0x413   : > { %19014 = vmatprep.mubr.msk.bf16.mxu0 %vm316_vm2, %v12914_v38  ;;  %v12922_v38 = vsel %vm1226_vm9, %v12917_v57, %v12921_v2  ;;  %v5115_v57 = vshll.u32 %v24224_v28, 16 }
 0x414   : > { %18181 = vmatmul.mubr.msk.bf16.gmra.mrb[16].mxu1 %vm316_vm2, %v5065_v13  ;;  %v24211_v13 = vand.u32 %v16694_v1, %v21247_v4  ;;  %v12925_v35 = vor.u32 %v12924_v52, %v12923_v19  ;;  %v5109_v0 = vor.u32 %v5108_v39, %v5105_v46  ;;  %v12935_v52 = vrot.slane %v23553_v53, 1 }
 0x415   : > { %18184 = vmatprep.mubr.msk.bf16.mxu1 %vm316_vm2, %v5074_v11  ;;  %v12929_v11 = vor.u32 %v12928_v26, %v12927_v62  ;;  %v5101_v62 = vsel %vm4967_vm14, %v5091_v33, %v5100_v29  ;;  %v5114_v26 = vrot.slane %v5112_v24, 6  ;;  %v5371_v33 = vrot.slane %v23855_v61, 7 }
 0x416   : > { %v12926_v1 = vsel %vm1226_vm9, %v12921_v2, %v12925_v35  ;;  %v5110_v12 = vsel %vm4967_vm14, %v5100_v29, %v5109_v0  ;;  %v12940_v46 = vrot.slane %v23570_v20, 2  ;;  %v12944_v29 = vrot.slane %v23593_v10, 2 }
 0x417   : > { %v12930_v19 = vsel %vm1226_vm9, %v12925_v35, %v12929_v11  ;;  %v12943_v35 = vrot.slane %v23582_v30, 1  ;;  %v5373_v20 = vrot.slane %v23870_v7, 7  ;;  %v5375_v30 = vrot.slane %v23874_v44, 7 }
 0x41a   : > { %19015 = vmatmul.mubr.msk.bf16.vlgmr.msra.gmra.mrb[0].mxu0 %vm316_vm2, %v12918_v40  ;;  %v12932_v40 = vrot.slane %v26376_v25, 2 }
 0x41b   : > { %19047 = vmatpush3.bf16.msra.mxu0 %v23994_v32  ;;  %19018 = vmatprep.mubr.msk.bf16.mxu0 %vm316_vm2, %v12922_v38  ;;  %v12931_v32 = vrot.slane %v26378_v9, 1  ;;  %v12936_v38 = vrot.slane %v23565_v17, 2  ;;  %v24243_v9 = vld [vmem:[#allocation2 + $0x40] sm:$0x80] }
 0x41c   : > { %18185 = vmatmul.mubr.msk.bf16.gmra.mrb[20].mxu1 %vm316_vm2, %v5083_v45  ;;  %19080 = vmatprep.subr.bf16.mxu0 %v24211_v13  ;;  %v5117_v45 = vrot.slane %v5115_v57, 7  ;;  %v5370_v17 = vrot.slane %v24243_v9, 7 }
 0x41d   : > { %18188 = vmatprep.mubr.msk.bf16.mxu1 %vm316_vm2, %v5092_v59  ;;  %v12933_v2 = vor.u32 %v12932_v40, %v12931_v32  ;;  %v12937_v25 = vor.u32 %v12936_v38, %v12935_v52  ;;  %v12939_v59 = vrot.slane %v23558_v16, 1  ;;  %v12945_v16 = vor.u32 %v12944_v29, %v12943_v35  ;;  %v16286_v32 = vld [vmem:[%s25749_s1 + $0x24] sm:$0x3]  ;;  %v265_v29 = vld [vmem:[%s21272_s4 + $0x270] sm:$0xff] }
 0x41e   : > { %v5118_v53 = vor.u32 %v5117_v45, %v5114_v26  ;;  %v5372_v57 = vsel %vm561_vm0, %v5370_v17, %v5371_v33  ;;  %v12952_v52 = vrot.slane %v23629_v47, 2  ;;  %v5374_v38 = vsel %vm561_vm0, %v5371_v33, %v5373_v20  ;;  %v26394_v17 = vld [vmem:[#allocation71_spill] sm:$0xff] }
 0x41f   : > { %v12934_v60 = vsel %vm1226_vm9, %v12929_v11, %v12933_v2  ;;  %v12938_v39 = vsel %vm1226_vm9, %v12933_v2, %v12937_v25  ;;  %v12947_v11 = vrot.slane %v23587_v5, 1  ;;  %v24276_v5 = vand.u32 %v16286_v32, %v21247_v4  ;;  %v26396_v32 = vld [vmem:[#allocation72_spill] sm:$0xff] }
 0x420   : > { %v5119_v24 = vsel %vm4967_vm14, %v5109_v0, %v5118_v53  ;;  %v12948_v0 = vrot.slane %v23601_v55, 2  ;;  %v5379_v47 = vrot.slane %v23898_v23, 7  ;;  %v12959_v33 = vrot.slane %v26394_v17, 1  ;;  %v269_v17 = vld [vmem:[%s21272_s4 + $0x290] sm:$0xff] }
 0x422   : > { %19019 = vmatmul.mubr.msk.bf16.gmra.mrb[4].mxu0 %vm316_vm2, %v12926_v1  ;;  %v12941_v1 = vor.u32 %v12940_v46, %v12939_v59  ;;  %v12949_v55 = vor.u32 %v12948_v0, %v12947_v11  ;;  %v5383_v11 = vrot.slane %v23918_v37, 7 }
 0x423   : > { %19022 = vmatprep.mubr.msk.bf16.mxu0 %vm316_vm2, %v12930_v19  ;;  %v12951_v19 = vrot.slane %v23616_v36, 1  ;;  %v5377_v36 = vrot.slane %v23891_v42, 7 }
 0x424   : > { %18189 = vmatmul.mubr.msk.bf16.gmra.mrb[24].mxu1 %vm316_vm2, %v5101_v62  ;;  %v12942_v10 = vsel %vm1226_vm9, %v12937_v25, %v12941_v1  ;;  %v12946_v40 = vsel %vm1226_vm9, %v12941_v1, %v12945_v16  ;;  %v5376_v62 = vsel %vm561_vm0, %v5373_v20, %v5375_v30  ;;  %v12950_v45 = vsel %vm1226_vm9, %v12945_v16, %v12949_v55  ;;  %v26393_v25 = vld [vmem:[#allocation70_spill] sm:$0xff]  ;;  %v267_v16 = vld [vmem:[%s21272_s4 + $0x280] sm:$0xff]  ;;  %v268_v20 = vld [vmem:[%s21272_s4 + $0x288] sm:$0xff] }
 0x425   : > { %18192 = vmatprep.mubr.msk.bf16.mxu1 %vm316_vm2, %v5110_v12  ;;  %v12953_v26 = vor.u32 %v12952_v52, %v12951_v19  ;;  %v26392_v12 = vld [vmem:[#allocation36_spill] sm:$0xff]  ;;  %v12956_v53 = vrot.slane %v26393_v25, 2  ;;  %v5378_v46 = vsel %vm561_vm0, %v5375_v30, %v5377_v36  ;;  %v313_v30 = vpack.c.bf16 %v268_v20, %v267_v16  ;;  %v26397_v19 = vld [vmem:[#allocation74_spill] sm:$0xff] }
 0x426   : > { %v12955_v2 = vrot.slane %v26392_v12, 1  ;;  %v12964_v52 = vrot.slane %v26397_v19, 2  ;;  %v24311_v12 = vld [vmem:[#allocation2 + $0x130] sm:$0x3] }
 0x427   : > { %357 = vst.msk [vmem:[#allocation2 + $0x140] sm:$0xff] %vm316_vm2, %v313_v30  ;;  %v13224_v30 = vld [vmem:[#allocation2 + $0xb0] sm:$0xfc] }
 0x428   : > { %v12957_v35 = vor.u32 %v12956_v53, %v12955_v2  ;;  %v12972_v53 = vshrl.u32 %v24311_v12, 16 }
 0x42a   : > { %19023 = vmatmul.mubr.msk.bf16.gmra.mrb[8].mxu0 %vm316_vm2, %v12934_v60  ;;  %v26395_v60 = vld [vmem:[#allocation73_spill] sm:$0xff]  ;;  %v12958_v0 = vsel %vm1226_vm9, %v12953_v26, %v12957_v35 }
 0x42b   : > { %19026 = vmatprep.mubr.msk.bf16.mxu0 %vm316_vm2, %v12938_v39  ;;  %v12960_v59 = vrot.slane %v26395_v60, 2  ;;  %v5380_v39 = vsel %vm561_vm0, %v5377_v36, %v5379_v47  ;;  %v26399_v36 = vld [vmem:[#allocation76_spill] sm:$0xff] }
 0x42c   : > { %18193 = vmatmul.mubr.msk.bf16.gmra.mrb[28].mxu1 %vm316_vm2, %v5119_v24  ;;  %v266_v24 = vld [vmem:[%s21272_s4 + $0x278] sm:$0xff] }
 0x42d   : > { %18198 = vmatprep.mubr.msk.bf16.mxu1 %vm316_vm2, %v5372_v57  ;;  %v12961_v57 = vor.u32 %v12960_v59, %v12959_v33  ;;  %v312_v1 = vpack.c.bf16 %v266_v24, %v265_v29  ;;  %v270_v33 = vld [vmem:[%s21272_s4 + $0x298] sm:$0xff]  ;;  %v5387_v29 = vrot.slane %v23936_v22, 7 }
 0x42e   : > { %v314_v59 = vpack.c.bf16 %v270_v33, %v269_v17  ;;  %v5395_v17 = vrot.slane %v23979_v49, 7 }
 0x42f   : > { %356 = vst.msk [vmem:[#allocation2 + $0x138] sm:$0xff] %vm316_vm2, %v312_v1  ;;  %v12974_v1 = vrot.slane %v12972_v53, 1  ;;  %v5393_v53 = vrot.slane %v23973_v14, 7  ;;  %v24523_v14 = vld [vmem:[#allocation2 + $0xf8] sm:$0xff] }
 0x430   : > { %358 = vst.msk [vmem:[#allocation2 + $0x148] sm:$0xff] %vm316_vm2, %v314_v59 }
 0x432   : > { %19027 = vmatmul.mubr.msk.bf16.gmra.mrb[12].mxu0 %vm316_vm2, %v12942_v10  ;;  %v5381_v10 = vrot.slane %v23914_v3, 7 }
 0x433   : > { %19030 = vmatprep.mubr.msk.bf16.mxu0 %vm316_vm2, %v12946_v40  ;;  %v12963_v40 = vrot.slane %v26396_v32, 1 }
 0x434   : > { %18199 = vmatmul.mubr.msk.bf16.vlgmr.msra.gmra.mrb[0].mxu1 %vm316_vm2, %v5374_v38  ;;  %v12962_v38 = vsel %vm1226_vm9, %v12957_v35, %v12961_v57  ;;  %v5382_v2 = vsel %vm561_vm0, %v5379_v47, %v5381_v10  ;;  %v5385_v47 = vrot.slane %v23932_v15, 7 }
 0x435   : > { %18231 = vmatpush3.bf16.msra.mxu1 %v24085_v21  ;;  %18202 = vmatprep.mubr.msk.bf16.mxu1 %vm316_vm2, %v5376_v62  ;;  %v12954_v21 = vsel %vm1226_vm9, %v12949_v55, %v12953_v26  ;;  %v26398_v62 = vld [vmem:[#allocation75_spill] sm:$0xff]  ;;  %v5384_v26 = vsel %vm561_vm0, %v5381_v10, %v5383_v11  ;;  %v12965_v25 = vor.u32 %v12964_v52, %v12963_v40  ;;  %v13229_v40 = vrot.slane %v13224_v30, 2 }
 0x436   : > { %18264 = vmatprep.subr.bf16.mxu1 %v24276_v5  ;;  %v12967_v55 = vrot.slane %v26398_v62, 1  ;;  %v5386_v10 = vsel %vm561_vm0, %v5383_v11, %v5385_v47  ;;  %v5389_v52 = vrot.slane %v23954_v41, 7 }
 0x437   : > { %v12966_v24 = vsel %vm1226_vm9, %v12961_v57, %v12965_v25  ;;  %v26400_v57 = vld [vmem:[#allocation35_spill] sm:$0xff] }
 0x438   : > { %v13230_v19 = vrot.slane %v26400_v57, 2  ;;  %v26406_v57 = vld [vmem:[#allocation61_spill] sm:$0xff] }
 0x43a   : > { %19031 = vmatmul.mubr.msk.bf16.gmra.mrb[16].mxu0 %vm316_vm2, %v12950_v45  ;;  %v12968_v45 = vrot.slane %v26399_v36, 2  ;;  %v13231_v62 = vsel %vm1553_vm10, %v13229_v40, %v13230_v19 }
 0x43b   : > { %19034 = vmatprep.mubr.msk.bf16.mxu0 %vm316_vm2, %v12954_v21  ;;  %v12975_v21 = vshll.u32 %v24311_v12, 16 }
 0x43c   : > { %18203 = vmatmul.mubr.msk.bf16.gmra.mrb[4].mxu1 %vm316_vm2, %v5378_v46  ;;  %v12969_v60 = vor.u32 %v12968_v45, %v12967_v55  ;;  %v271_v46 = vld [vmem:[%s21272_s4 + $0x2a0] sm:$0xff]  ;;  %v5390_v55 = vsel %vm561_vm0, %v5387_v29, %v5389_v52  ;;  %v26401_v45 = vld [vmem:[#allocation40_spill] sm:$0xff] }
 0x43d   : > { %18206 = vmatprep.mubr.msk.bf16.mxu1 %vm316_vm2, %v5380_v39  ;;  %v272_v39 = vld [vmem:[%s21272_s4 + $0x2a8] sm:$0xff]  ;;  %v12977_v16 = vrot.slane %v12975_v21, 2  ;;  %v16711_v21 = vld [vmem:[%s25749_s1 + $0x56] sm:$0x3]  ;;  %s16815_s4 = sshll.u32 %s21125_s15, 5 }
 0x43e   : > { %v315_v35 = vpack.c.bf16 %v272_v39, %v271_v46  ;;  %v12970_v20 = vsel %vm1226_vm9, %v12965_v25, %v12969_v60  ;;  %v24358_v59 = vand.u32 %v16711_v21, %v21247_v4  ;;  %v5396_v39 = vsel %vm561_vm0, %v5393_v53, %v5395_v17  ;;  %v26411_v21 = vld [vmem:[#allocation63_spill] sm:$0xff]  ;;  %s15892_s16 = sadd.s32 %s20857_s7, %s16815_s4 }
 0x43f   : > { %v12978_v32 = vor.u32 %v12977_v16, %v12974_v1  ;;  %v5397_v1 = vrot.slane %v23999_v6, 7  ;;  %v5399_v16 = vrot.slane %v24001_v56, 7  ;;  %s16816_s15 = sshll.u32 %s15892_s16, 7 }
 0x440   : > { %359 = vst.msk [vmem:[#allocation2 + $0x150] sm:$0xff] %vm316_vm2, %v315_v35  ;;  %s25687_s11 = scalar_lea.hbm %s25751_s3, %s16816_s15 }
 0x441   : > { %v12979_v11 = vsel %vm1226_vm9, %v12969_v60, %v12978_v32  ;;  %v5400_v30 = vsel %vm561_vm0, %v5397_v1, %v5399_v16  ;;  %v26405_v32 = vshrl.u32 %v23855_v61, 16 }
 0x442   : > { %19035 = vmatmul.mubr.msk.bf16.gmra.mrb[20].mxu0 %vm316_vm2, %v12958_v0  ;;  %v5388_v0 = vsel %vm561_vm0, %v5385_v47, %v5387_v29  ;;  %v26403_v47 = vld [vmem:[#allocation68_spill] sm:$0xff]  ;;  %v26404_v29 = vld [vmem:[#allocation69_spill] sm:$0xff] }
 0x443   : > { %19038 = vmatprep.mubr.msk.bf16.mxu0 %vm316_vm2, %v12962_v38  ;;  %v5391_v38 = vrot.slane %v23958_v54, 7  ;;  %v13236_v35 = vrot.slane %v26403_v47, 2  ;;  %v5655_v40 = vrot.slane %v26405_v32, 7 }
 0x444   : > { %18207 = vmatmul.mubr.msk.bf16.gmra.mrb[8].mxu1 %vm316_vm2, %v5382_v2  ;;  %v13232_v2 = vrot.slane %v26401_v45, 2 }
 0x445   : > { %18210 = vmatprep.mubr.msk.bf16.mxu1 %vm316_vm2, %v5384_v26  ;;  %v5392_v36 = vsel %vm561_vm0, %v5389_v52, %v5391_v38  ;;  %v26402_v26 = vld [vmem:[#allocation39_spill] sm:$0xff]  ;;  %v5394_v46 = vsel %vm561_vm0, %v5391_v38, %v5393_v53  ;;  %v13242_v52 = vrot.slane %v24034_v50, 2  ;;  %v5401_v38 = vrot.slane %v24224_v28, 7 }
 0x446   : > { %v13234_v25 = vrot.slane %v26402_v26, 2  ;;  %v13233_v33 = vsel %vm1553_vm10, %v13230_v19, %v13232_v2  ;;  %v13240_v19 = vrot.slane %v26406_v57, 2 }
 0x447   : > { %v5402_v45 = vsel %vm561_vm0, %v5399_v16, %v5401_v38 }
 0x448   : > { %v13235_v60 = vsel %vm1553_vm10, %v13232_v2, %v13234_v25  ;;  %v26408_v2 = vshrl.u32 %v23870_v7, 16 }
 0x44a   : > { %19039 = vmatmul.mubr.msk.bf16.gmra.mrb[24].mxu0 %vm316_vm2, %v12966_v24  ;;  %v13238_v24 = vrot.slane %v26404_v29, 2  ;;  %v5658_v26 = vrot.slane %v26408_v2, 7  ;;  %v26423_v2 = vld [vmem:[#allocation67_spill] sm:$0xff] }
 0x44b   : > { %19042 = vmatprep.mubr.msk.bf16.mxu0 %vm316_vm2, %v12970_v20  ;;  %v13237_v20 = vsel %vm1553_vm10, %v13234_v25, %v13236_v35  ;;  %v26409_v25 = vshrl.u32 %v23874_v44, 16 }
 0x44c   : > { %18211 = vmatmul.mubr.msk.bf16.gmra.mrb[12].mxu1 %vm316_vm2, %v5386_v10  ;;  %v5398_v10 = vsel %vm561_vm0, %v5395_v17, %v5397_v1  ;;  %v13246_v17 = vrot.slane %v26411_v21, 2  ;;  %v26414_v1 = vshrl.u32 %v23891_v42, 16 }
 0x44d   : > { %18214 = vmatprep.mubr.msk.bf16.mxu1 %vm316_vm2, %v5388_v0  ;;  %v5652_v0 = vshrl.u32 %v24243_v9, 16  ;;  %v13241_v9 = vsel %vm1553_vm10, %v13238_v24, %v13240_v19  ;;  %v5661_v28 = vrot.slane %v26409_v25, 7 }
 0x44e   : > { %v5664_v16 = vrot.slane %v26414_v1, 7 }
 0x452   : > { %19043 = vmatmul.mubr.msk.bf16.gmra.mrb[28].mxu0 %vm316_vm2, %v12979_v11  ;;  %v5654_v11 = vrot.slane %v5652_v0, 7  ;;  %v26417_v0 = vld [vmem:[#allocation65_spill] sm:$0xff] }
 0x453   : > { %19048 = vmatprep.mubr.msk.bf16.mxu0 %vm316_vm2, %v13231_v62  ;;  %v26407_v62 = vshll.u32 %v23855_v61, 16  ;;  %v26410_v61 = vld [vmem:[#allocation62_spill] sm:$0xff]  ;;  %v13250_v32 = vrot.slane %v26417_v0, 2 }
 0x454   : > { %18215 = vmatmul.mubr.msk.bf16.gmra.mrb[16].mxu1 %vm316_vm2, %v5390_v55  ;;  %v13244_v53 = vrot.slane %v26410_v61, 2  ;;  %v24472_v0 = vld [vmem:[#allocation2 + $0xd8] sm:$0xff] }
 0x455   : > { %18218 = vmatprep.mubr.msk.bf16.mxu1 %vm316_vm2, %v5392_v36  ;;  %v5656_v55 = vor.u32 %v5655_v40, %v26407_v62  ;;  %v13243_v36 = vsel %vm1553_vm10, %v13240_v19, %v13242_v52  ;;  %v26419_v19 = vshll.u32 %v23898_v23, 16 }
 0x456   : > { %v13245_v47 = vsel %vm1553_vm10, %v13242_v52, %v13244_v53  ;;  %v13247_v29 = vsel %vm1553_vm10, %v13244_v53, %v13246_v17 }
 0x457   : > { %v5657_v50 = vsel %vm5650_vm15, %v5654_v11, %v5656_v55  ;;  %v26420_v55 = vshrl.u32 %v23914_v3, 16 }
 0x45a   : > { %19049 = vmatmul.mubr.msk.bf16.vlgmr.msra.gmra.mrb[0].mxu0 %vm316_vm2, %v13233_v33  ;;  %v26412_v33 = vshll.u32 %v23870_v7, 16 }
 0x45b   : > { %19081 = vmatpush3.bf16.msra.mxu0 %v24211_v13  ;;  %19052 = vmatprep.mubr.msk.bf16.mxu0 %vm316_vm2, %v13235_v60  ;;  %v13239_v13 = vsel %vm1553_vm10, %v13236_v35, %v13238_v24  ;;  %v16303_v35 = vld [vmem:[%s25749_s1 + $0x26] sm:$0x3] }
 0x45c   : > { %18219 = vmatmul.mubr.msk.bf16.gmra.mrb[20].mxu1 %vm316_vm2, %v5394_v46  ;;  %19114 = vmatprep.subr.bf16.mxu0 %v24358_v59  ;;  %v5659_v60 = vor.u32 %v5658_v26, %v26412_v33  ;;  %v26413_v46 = vshll.u32 %v23874_v44, 16  ;;  %v26415_v44 = vshrl.u32 %v23898_v23, 16  ;;  %v26422_v23 = vld [vmem:[#allocation66_spill] sm:$0xff]  ;;  %v26426_v33 = vshrl.u32 %v23932_v15, 16 }
 0x45d   : > { %18222 = vmatprep.mubr.msk.bf16.mxu1 %vm316_vm2, %v5396_v39 }
 0x45e   : > { %v5662_v39 = vor.u32 %v5661_v28, %v26413_v46  ;;  %v5660_v24 = vsel %vm5650_vm15, %v5655_v40, %v5659_v60  ;;  %v26418_v40 = vshll.u32 %v23891_v42, 16  ;;  %v26421_v42 = vshrl.u32 %v23918_v37, 16 }
 0x45f   : > { %v5676_v60 = vrot.slane %v26426_v33, 7  ;;  %v24547_v33 = vld [vmem:[#allocation2 + $0x100] sm:$0xff] }
 0x460   : > { %v5663_v7 = vsel %vm5650_vm15, %v5658_v26, %v5662_v39  ;;  %v5665_v57 = vor.u32 %v5664_v16, %v26418_v40  ;;  %v13254_v26 = vrot.slane %v26423_v2, 2  ;;  %v26427_v39 = vshrl.u32 %v23936_v22, 16 }
 0x461   : > { %v13260_v40 = vrot.slane %v24311_v12, 2 }
 0x462   : > { %19053 = vmatmul.mubr.msk.bf16.gmra.mrb[4].mxu0 %vm316_vm2, %v13237_v20  ;;  %v5667_v20 = vrot.slane %v26415_v44, 7  ;;  %v5666_v62 = vsel %vm5650_vm15, %v5661_v28, %v5665_v57  ;;  %v26425_v28 = vshll.u32 %v23918_v37, 16  ;;  %v26428_v37 = vld [vmem:[#allocation43_spill] sm:$0xff] }
 0x463   : > { %19056 = vmatprep.mubr.msk.bf16.mxu0 %vm316_vm2, %v13239_v13  ;;  %v24419_v13 = vand.u32 %v16303_v35, %v21247_v4  ;;  %v20999_v35 = vld [vmem:[#allocation2 + $0x128] sm:$0xff] }
 0x464   : > { %18223 = vmatmul.mubr.msk.bf16.gmra.mrb[24].mxu1 %vm316_vm2, %v5398_v10  ;;  %v26416_v10 = vld [vmem:[#allocation64_spill] sm:$0xff]  ;;  %v5668_v52 = vor.u32 %v5667_v20, %v26419_v19  ;;  %v13543_v19 = vrot.slane %v24472_v0, 2 }
 0x465   : > { %18226 = vmatprep.mubr.msk.bf16.mxu1 %vm316_vm2, %v5400_v30  ;;  %v13248_v30 = vrot.slane %v26416_v10, 2 }
 0x467   : > { %v13249_v38 = vsel %vm1553_vm10, %v13246_v17, %v13248_v30  ;;  %v13251_v11 = vsel %vm1553_vm10, %v13248_v30, %v13250_v32  ;;  %v24470_v30 = vld [vmem:[#allocation2 + $0xd0] sm:$0xfc] }
 0x468   : > { %v13542_v57 = vrot.slane %v24470_v30, 2 }
 0x46a   : > { %19057 = vmatmul.mubr.msk.bf16.gmra.mrb[8].mxu0 %vm316_vm2, %v13241_v9  ;;  %v5670_v9 = vrot.slane %v26420_v55, 7  ;;  %v24492_v55 = vld [vmem:[#allocation2 + $0xe0] sm:$0xff] }
 0x46b   : > { %19060 = vmatprep.mubr.msk.bf16.mxu0 %vm316_vm2, %v13243_v36  ;;  %v5673_v36 = vrot.slane %v26421_v42, 7  ;;  %v13545_v42 = vrot.slane %v24492_v55, 2 }
 0x46c   : > { %18227 = vmatmul.mubr.msk.bf16.gmra.mrb[28].mxu1 %vm316_vm2, %v5402_v45  ;;  %v13252_v45 = vrot.slane %v26422_v23, 2  ;;  %v16728_v23 = vld [vmem:[%s25749_s1 + $0x58] sm:$0x3] }
 0x46d   : > { %18232 = vmatprep.mubr.msk.bf16.mxu1 %vm316_vm2, %v5657_v50  ;;  %v26424_v50 = vshll.u32 %v23914_v3, 16  ;;  %v5674_v61 = vor.u32 %v5673_v36, %v26425_v28  ;;  %v5679_v3 = vrot.slane %v26427_v39, 7  ;;  %v24531_v28 = vld [vmem:[#allocation2 + $0xc0] sm:$0xff] }
 0x46e   : > { %v13253_v53 = vsel %vm1553_vm10, %v13250_v32, %v13252_v45  ;;  %v13255_v21 = vsel %vm1553_vm10, %v13252_v45, %v13254_v26  ;;  %v5682_v32 = vrot.slane %v5058_v8, 7  ;;  %v26431_v8 = vshll.u32 %v23954_v41, 16 }
 0x46f   : > { %v5671_v25 = vor.u32 %v5670_v9, %v26424_v50  ;;  %v5675_v46 = vsel %vm5650_vm15, %v5670_v9, %v5674_v61  ;;  %v24495_v9 = vld [vmem:[#allocation2 + $0xe8] sm:$0xff]  ;;  %v13546_v45 = vsel %vm1553_vm10, %v13543_v19, %v13545_v42  ;;  %v24520_v50 = vand.u32 %v16728_v23, %v21247_v4 }
 0x470   : > { %v26022_v6 = vshll.u32 %v24531_v28, 16 }
 0x471   : > { %v5672_v17 = vsel %vm5650_vm15, %v5667_v20, %v5671_v25 }
 0x472   : > { %19061 = vmatmul.mubr.msk.bf16.gmra.mrb[12].mxu0 %vm316_vm2, %v13245_v47  ;;  %v13256_v47 = vrot.slane %v26428_v37, 2 }
 0x473   : > { %19064 = vmatprep.mubr.msk.bf16.mxu0 %vm316_vm2, %v13247_v29  ;;  %v13258_v29 = vrot.slane %v20999_v35, 2  ;;  %v24566_v35 = vld [vmem:[#allocation2 + $0x110] sm:$0xff] }
 0x474   : > { %18233 = vmatmul.mubr.msk.bf16.vlgmr.msra.gmra.mrb[0].mxu1 %vm316_vm2, %v5660_v24  ;;  %v26429_v24 = vshll.u32 %v23932_v15, 16  ;;  %v13257_v44 = vsel %vm1553_vm10, %v13254_v26, %v13256_v47  ;;  %v24517_v26 = vld [vmem:[#allocation2 + $0xf0] sm:$0xff] }
 0x475   : > { %18265 = vmatpush3.bf16.msra.mxu1 %v24276_v5  ;;  %18236 = vmatprep.mubr.msk.bf16.mxu1 %vm316_vm2, %v5663_v7  ;;  %v5669_v5 = vsel %vm5650_vm15, %v5664_v16, %v5668_v52  ;;  %v26430_v16 = vshll.u32 %v23936_v22, 16  ;;  %v13259_v20 = vsel %vm1553_vm10, %v13256_v47, %v13258_v29  ;;  %v5685_v22 = vrot.slane %v5067_v58, 7 }
 0x476   : > { %18298 = vmatprep.subr.bf16.mxu1 %v24419_v13  ;;  %v5677_v1 = vor.u32 %v5676_v60, %v26429_v24  ;;  %v5683_v52 = vor.u32 %v5682_v32, %v26431_v8  ;;  %v13261_v58 = vsel %vm1553_vm10, %v13258_v29, %v13260_v40  ;;  %v13549_v61 = vrot.slane %v24517_v26, 2  ;;  %v24569_v24 = vld [vmem:[#allocation2 + $0x118] sm:$0xff] }
 0x477   : > { %v5680_v7 = vor.u32 %v5679_v3, %v26430_v16  ;;  %v13559_v16 = vrot.slane %v24569_v24, 2 }
 0x478   : > { %v5678_v10 = vsel %vm5650_vm15, %v5673_v36, %v5677_v1  ;;  %v5684_v12 = vsel %vm5650_vm15, %v5679_v3, %v5683_v52  ;;  %v13547_v36 = vrot.slane %v24495_v9, 2  ;;  %v13557_v1 = vrot.slane %v24566_v35, 2 }
 0x479   : > { %v5681_v15 = vsel %vm5650_vm15, %v5676_v60, %v5680_v7  ;;  %v21000_v7 = vld [vmem:[#allocation2 + $0x48] sm:$0xff] }
 0x47a   : > { %19065 = vmatmul.mubr.msk.bf16.gmra.mrb[16].mxu0 %vm316_vm2, %v13249_v38  ;;  %v26432_v38 = vshll.u32 %v23958_v54, 16  ;;  %v5691_v54 = vrot.slane %v5085_v34, 7  ;;  %v13548_v2 = vsel %vm1553_vm10, %v13545_v42, %v13547_v36  ;;  %v24614_v42 = vld [vmem:[#allocation2 + $0x60] sm:$0xff] }
 0x47b   : > { %19068 = vmatprep.mubr.msk.bf16.mxu0 %vm316_vm2, %v13251_v11 }
 0x47c   : > { %18237 = vmatmul.mubr.msk.bf16.gmra.mrb[4].mxu1 %vm316_vm2, %v5666_v62  ;;  %v5686_v11 = vor.u32 %v5685_v22, %v26432_v38  ;;  %v13544_v62 = vsel %vm1553_vm10, %v13542_v57, %v13543_v19  ;;  %v5692_v34 = vor.u32 %v5691_v54, %v5088_v27  ;;  %v5697_v27 = vrot.slane %v5103_v51, 7  ;;  %v24592_v57 = vld [vmem:[#allocation2 + $0x58] sm:$0xff]  ;;  %v21001_v38 = vld [vmem:[#allocation2 + $0x50] sm:$0xff] }
 0x47d   : > { %18240 = vmatprep.mubr.msk.bf16.mxu1 %vm316_vm2, %v5669_v5  ;;  %v5688_v5 = vrot.slane %v5076_v18, 7  ;;  %v26021_v51 = vshrl.u32 %v24531_v28, 16  ;;  %v6600_v52 = vrot.slane %v24592_v57, 1 }
 0x47e   : > { %v5687_v41 = vsel %vm5650_vm15, %v5682_v32, %v5686_v11  ;;  %v24582_v32 = vld [vmem:[#allocation2 + $0x120] sm:$0xff] }
 0x47f   : > { %v5689_v18 = vor.u32 %v5688_v5, %v5079_v31  ;;  %v5694_v31 = vrot.slane %v5094_v48, 7  ;;  %v5693_v49 = vsel %vm5650_vm15, %v5688_v5, %v5692_v34  ;;  %v5703_v39 = vrot.slane %v26021_v51, 7  ;;  %v21003_v34 = vld [vmem:[#allocation2 + $0x60] sm:$0xff]  ;;  %v24745_v51 = vld [vmem:[#allocation2 + $0xa8] sm:$0xff] }
 0x480   : > { %v13561_v8 = vrot.slane %v24582_v32, 2 }
 0x481   : > { %v5690_v25 = vsel %vm5650_vm15, %v5685_v22, %v5689_v18  ;;  %v5695_v48 = vor.u32 %v5694_v31, %v5097_v43  ;;  %v13553_v43 = vrot.slane %v24547_v33, 2  ;;  %v5706_v3 = vor.u32 %v26022_v6, %v5703_v39  ;;  %v24586_v22 = vld [vmem:[#allocation2 + $0x50] sm:$0xff]  ;;  %v6182_v6 = vld [vmem:[#allocation2 + $0x48] sm:$0xff] }
 0x482   : > { %19069 = vmatmul.mubr.msk.bf16.gmra.mrb[20].mxu0 %vm316_vm2, %v13253_v53  ;;  %v13551_v53 = vrot.slane %v24523_v14, 2  ;;  %v26020_v19 = vrot.slane %v24586_v22, 1  ;;  %v13826_v39 = vshll.u32 %v24470_v30, 16 }
 0x483   : > { %19072 = vmatprep.mubr.msk.bf16.mxu0 %vm316_vm2, %v13255_v21  ;;  %v13550_v21 = vsel %vm1553_vm10, %v13547_v36, %v13549_v61  ;;  %v5696_v60 = vsel %vm5650_vm15, %v5691_v54, %v5695_v48  ;;  %v5707_v29 = vsel %vm5650_vm15, %v5697_v27, %v5706_v3  ;;  %v24612_v54 = vld [vmem:[#allocation2 + $0x138] sm:$0xff]  ;;  %v6602_v36 = vrot.slane %v24614_v42, 1  ;;  %v24638_v48 = vld [vmem:[#allocation2 + $0x70] sm:$0xff] }
 0x484   : > { %18241 = vmatmul.mubr.msk.bf16.gmra.mrb[8].mxu1 %vm316_vm2, %v5672_v17  ;;  %v13552_v17 = vsel %vm1553_vm10, %v13549_v61, %v13551_v53  ;;  %v13554_v37 = vsel %vm1553_vm10, %v13551_v53, %v13553_v43  ;;  %v24634_v61 = vld [vmem:[#allocation2 + $0x140] sm:$0xff]  ;;  %v24636_v53 = vld [vmem:[#allocation2 + $0x148] sm:$0xff]  ;;  %v24652_v3 = vshrl.u32 %v24472_v0, 16 }
 0x485   : > { %18244 = vmatprep.mubr.msk.bf16.mxu1 %vm316_vm2, %v5675_v46  ;;  %v24550_v46 = vld [vmem:[#allocation2 + $0x108] sm:$0xff] }
 0x48a   : > { %19073 = vmatmul.mubr.msk.bf16.gmra.mrb[24].mxu0 %vm316_vm2, %v13257_v44 }
 0x48b   : > { %19076 = vmatprep.mubr.msk.bf16.mxu0 %vm316_vm2, %v13259_v20  ;;  %v16320_v20 = vld [vmem:[%s25749_s1 + $0x28] sm:$0x3] }
 0x48c   : > { %18245 = vmatmul.mubr.msk.bf16.gmra.mrb[12].mxu1 %vm316_vm2, %v5678_v10  ;;  %v13560_v10 = vsel %vm1553_vm10, %v13557_v1, %v13559_v16  ;;  %v24590_v40 = vand.u32 %v16320_v20, %v21247_v4 }
 0x48d   : > { %18248 = vmatprep.mubr.msk.bf16.mxu1 %vm316_vm2, %v5681_v15  ;;  %v24584_v15 = vld [vmem:[#allocation2 + $0x128] sm:$0xff] }
 0x48e   : > { %v13563_v11 = vrot.slane %v24584_v15, 2 }
 0x490   : > { %v13564_v5 = vsel %vm1553_vm10, %v13561_v8, %v13563_v11 }
 0x492   : > { %19077 = vmatmul.mubr.msk.bf16.gmra.mrb[28].mxu0 %vm316_vm2, %v13261_v58  ;;  %v21002_v58 = vld [vmem:[#allocation2 + $0x58] sm:$0xff] }
 0x493   : > { %19082 = vmatprep.mubr.msk.bf16.mxu0 %vm316_vm2, %v13544_v62  ;;  %v24605_v62 = vsel %vm945_vm7, %v26020_v19, %v6600_v52 }
 0x494   : > { %18249 = vmatmul.mubr.msk.bf16.gmra.mrb[16].mxu1 %vm316_vm2, %v5684_v12  ;;  %v13562_v12 = vsel %vm1553_vm10, %v13559_v16, %v13561_v8  ;;  %v13522_v16 = vld [vmem:[#allocation2 + $0x150] sm:$0x3] }
 0x495   : > { %18252 = vmatprep.mubr.msk.bf16.mxu1 %vm316_vm2, %v5687_v41  ;;  %v24610_v41 = vld [vmem:[#allocation2 + $0x130] sm:$0xff] }
 0x496   : > { %v13565_v18 = vrot.slane %v24610_v41, 2 }
 0x49a   : > { %19083 = vmatmul.mubr.msk.bf16.vlgmr.msra.gmra.mrb[0].mxu0 %vm316_vm2, %v13546_v45  ;;  %v13567_v45 = vrot.slane %v24612_v54, 2 }
 0x49b   : > { %19115 = vmatpush3.bf16.msra.mxu0 %v24358_v59  ;;  %19086 = vmatprep.mubr.msk.bf16.mxu0 %vm316_vm2, %v13548_v2  ;;  %v5698_v59 = vor.u32 %v5697_v27, %v5106_v63  ;;  %v13555_v63 = vrot.slane %v24550_v46, 2  ;;  %v24626_v2 = vsel %vm945_vm7, %v6600_v52, %v6602_v36  ;;  %v24668_v52 = vld [vmem:[#allocation2 + $0x80] sm:$0xff] }
 0x49c   : > { %18253 = vmatmul.mubr.msk.bf16.gmra.mrb[20].mxu1 %vm316_vm2, %v5690_v25  ;;  %19148 = vmatprep.subr.bf16.mxu0 %v24520_v50  ;;  %v21004_v25 = vld [vmem:[#allocation2 + $0x68] sm:$0xff]  ;;  %v13568_v27 = vsel %vm1553_vm10, %v13565_v18, %v13567_v45 }
 0x49d   : > { %18256 = vmatprep.mubr.msk.bf16.mxu1 %vm316_vm2, %v5693_v49  ;;  %v5699_v56 = vsel %vm5650_vm15, %v5694_v31, %v5698_v59  ;;  %v13556_v47 = vsel %vm1553_vm10, %v13553_v43, %v13555_v63  ;;  %v13558_v44 = vsel %vm1553_vm10, %v13555_v63, %v13557_v1  ;;  %v13566_v49 = vsel %vm1553_vm10, %v13563_v11, %v13565_v18  ;;  %v24641_v59 = vld [vmem:[#allocation2 + $0x78] sm:$0xff]  ;;  %v21005_v43 = vld [vmem:[#allocation2 + $0x70] sm:$0xff]  ;;  %v24671_v11 = vld [vmem:[#allocation2 + $0x88] sm:$0xff] }
 0x49e   : > { %v13571_v63 = vrot.slane %v24636_v53, 2  ;;  %v6612_v18 = vrot.slane %v24671_v11, 1 }
 0x4a2   : > { %19087 = vmatmul.mubr.msk.bf16.gmra.mrb[4].mxu0 %vm316_vm2, %v13550_v21  ;;  %v6606_v21 = vrot.slane %v24638_v48, 1 }
 0x4a3   : > { %19090 = vmatprep.mubr.msk.bf16.mxu0 %vm316_vm2, %v13552_v17  ;;  %v13569_v17 = vrot.slane %v24634_v61, 2 }
 0x4a4   : > { %18257 = vmatmul.mubr.msk.bf16.gmra.mrb[24].mxu1 %vm316_vm2, %v5696_v60  ;;  %v13823_v60 = vshrl.u32 %v24470_v30, 16 }
 0x4a5   : > { %18260 = vmatprep.mubr.msk.bf16.mxu1 %vm316_vm2, %v5699_v56  ;;  %v6608_v56 = vrot.slane %v24641_v59, 1  ;;  %v13570_v1 = vsel %vm1553_vm10, %v13567_v45, %v13569_v17  ;;  %v13572_v20 = vsel %vm1553_vm10, %v13569_v17, %v13571_v63  ;;  %v24684_v45 = vshrl.u32 %v24495_v9, 16 }
 0x4a7   : > { %v24662_v30 = vsel %vm945_vm7, %v6606_v21, %v6608_v56  ;;  %26435 = vst [vmem:[#allocation22_spill] sm:$0xff] %v24684_v45 }
 0x4aa   : > { %19091 = vmatmul.mubr.msk.bf16.gmra.mrb[8].mxu0 %vm316_vm2, %v13554_v37  ;;  %v24655_v37 = vshll.u32 %v24472_v0, 16 }
 0x4ab   : > { %19094 = vmatprep.mubr.msk.bf16.mxu0 %vm316_vm2, %v13556_v47 }
 0x4ac   : > { %18261 = vmatmul.mubr.msk.bf16.gmra.mrb[28].mxu1 %vm316_vm2, %v5707_v29  ;;  %v21006_v29 = vld [vmem:[#allocation2 + $0x78] sm:$0xff]  ;;  %v13836_v8 = vrot.slane %v24655_v37, 3 }
 0x4ad   : > { %18266 = vmatprep.mubr.msk.bf16.mxu1 %vm316_vm2, %v21000_v7  ;;  %v13825_v7 = vrot.slane %v13823_v60, 2 }
 0x4b2   : > { %19095 = vmatmul.mubr.msk.bf16.gmra.mrb[12].mxu0 %vm316_vm2, %v13558_v44  ;;  %v13828_v44 = vrot.slane %v13826_v39, 3 }
 0x4b3   : > { %19098 = vmatprep.mubr.msk.bf16.mxu0 %vm316_vm2, %v13560_v10  ;;  %v13833_v10 = vrot.slane %v24652_v3, 2 }
 0x4b4   : > { %18267 = vmatmul.mubr.msk.bf16.vlgmr.msra.gmra.mrb[0].mxu1 %vm316_vm2, %v21001_v38  ;;  %v13573_v38 = vrot.slane %v13522_v16, 2  ;;  %v24706_v16 = vshrl.u32 %v24517_v26, 16 }
 0x4b5   : > { %18299 = vmatpush3.bf16.msra.mxu1 %v24419_v13  ;;  %18270 = vmatprep.mubr.msk.bf16.mxu1 %vm316_vm2, %v21002_v58  ;;  %v24617_v13 = vld [vmem:[#allocation2 + $0x68] sm:$0xff]  ;;  %v6610_v58 = vrot.slane %v24668_v52, 1 }
 0x4b6   : > { %18332 = vmatprep.subr.bf16.mxu1 %v24590_v40  ;;  %v6604_v23 = vrot.slane %v24617_v13, 1  ;;  %v13574_v17 = vsel %vm1553_vm10, %v13571_v63, %v13573_v38  ;;  %26438 = vst [vmem:[#allocation17_spill] sm:$0xff] %v24706_v16  ;;  %v24711_v63 = vld [vmem:[#allocation2 + $0x98] sm:$0xff] }
 0x4b8   : > { %v24630_v31 = vsel %vm945_vm7, %v6602_v36, %v6604_v23  ;;  %v24658_v47 = vsel %vm945_vm7, %v6604_v23, %v6606_v21  ;;  %v24679_v36 = vshll.u32 %v24492_v55, 16  ;;  %v21007_v23 = vld [vmem:[#allocation2 + $0x80] sm:$0xff]  ;;  %v24694_v21 = vsel %vm945_vm7, %v6610_v58, %v6612_v18 }
 0x4b9   : > { %26437 = vst [vmem:[#allocation11_spill] sm:$0xff] %v24694_v21  ;;  %v6213_v21 = vshrl.u32 %v24586_v22, 16 }
 0x4ba   : > { %19099 = vmatmul.mubr.msk.bf16.gmra.mrb[16].mxu0 %vm316_vm2, %v13562_v12  ;;  %v13829_v12 = vor.u32 %v13828_v44, %v13825_v7  ;;  %26434 = vst [vmem:[#allocation46_spill] sm:$0xff] %v24679_v36  ;;  %v13845_v39 = vrot.slane %v24679_v36, 3  ;;  %v24709_v7 = vshll.u32 %v24517_v26, 16 }
 0x4bb   : > { %19102 = vmatprep.mubr.msk.bf16.mxu0 %vm316_vm2, %v13564_v5  ;;  %v24676_v5 = vshrl.u32 %v24492_v55, 16 }
 0x4bc   : > { %18271 = vmatmul.mubr.msk.bf16.gmra.mrb[4].mxu1 %vm316_vm2, %v21003_v34  ;;  %v13837_v34 = vor.u32 %v13836_v8, %v13833_v10  ;;  %26439 = vst [vmem:[#allocation44_spill] sm:$0xff] %v24709_v7  ;;  %v6616_v10 = vrot.slane %v24711_v63, 1  ;;  %v21009_v8 = vld [vmem:[#allocation2 + $0x90] sm:$0xff] }
 0x4bd   : > { %18274 = vmatprep.mubr.msk.bf16.mxu1 %vm316_vm2, %v21004_v25  ;;  %26433 = vst [vmem:[#allocation41_spill] sm:$0xff] %v24676_v5  ;;  %v24687_v25 = vshll.u32 %v24495_v9, 16  ;;  %v13842_v60 = vrot.slane %v24676_v5, 2 }
 0x4bf   : > { %26436 = vst [vmem:[#allocation47_spill] sm:$0xff] %v24687_v25 }
 0x4c2   : > { %19103 = vmatmul.mubr.msk.bf16.gmra.mrb[20].mxu0 %vm316_vm2, %v13566_v49  ;;  %v24690_v49 = vsel %vm945_vm7, %v6608_v56, %v6610_v58  ;;  %v24702_v56 = vld [vmem:[#allocation2 + $0x90] sm:$0xff]  ;;  %v24718_v58 = vshrl.u32 %v24523_v14, 16 }
 0x4c3   : > { %19106 = vmatprep.mubr.msk.bf16.mxu0 %vm316_vm2, %v13568_v27  ;;  %v21008_v27 = vld [vmem:[#allocation2 + $0x88] sm:$0xff]  ;;  %v6614_v44 = vrot.slane %v24702_v56, 1 }
 0x4c4   : > { %18275 = vmatmul.mubr.msk.bf16.gmra.mrb[8].mxu1 %vm316_vm2, %v21005_v43  ;;  %v13838_v43 = vsel %vm1834_vm4, %v13829_v12, %v13837_v34  ;;  %26440 = vst [vmem:[#allocation48_spill] sm:$0xff] %v24718_v58  ;;  %v24721_v12 = vshll.u32 %v24523_v14, 16 }
 0x4c5   : > { %18278 = vmatprep.mubr.msk.bf16.mxu1 %vm316_vm2, %v21006_v29  ;;  %v13851_v29 = vrot.slane %v24684_v45, 2 }
 0x4c6   : > { %26441 = vst [vmem:[#allocation13_spill] sm:$0xff] %v24721_v12 }
 0x4ca   : > { %19107 = vmatmul.mubr.msk.bf16.gmra.mrb[24].mxu0 %vm316_vm2, %v13570_v1  ;;  %v13854_v1 = vrot.slane %v24687_v25, 3 }
 0x4cb   : > { %19110 = vmatprep.mubr.msk.bf16.mxu0 %vm316_vm2, %v13572_v20  ;;  %v13846_v20 = vor.u32 %v13845_v39, %v13842_v60  ;;  %v24731_v60 = vsel %vm945_vm7, %v6614_v44, %v6616_v10  ;;  %v13860_v39 = vrot.slane %v24706_v16, 2  ;;  %v6204_v16 = vshll.u32 %v6182_v6, 16 }
 0x4cc   : > { %18279 = vmatmul.mubr.msk.bf16.gmra.mrb[12].mxu1 %vm316_vm2, %v21007_v23  ;;  %v13855_v38 = vor.u32 %v13854_v1, %v13851_v29  ;;  %v24724_v23 = vsel %vm945_vm7, %v6612_v18, %v6614_v44  ;;  %26443 = vst [vmem:[#allocation16_spill] sm:$0xff] %v24731_v60  ;;  %v13869_v18 = vrot.slane %v24718_v58, 2  ;;  %v24743_v44 = vld [vmem:[#allocation2 + $0xa0] sm:$0xff] }
 0x4cd   : > { %18282 = vmatprep.mubr.msk.bf16.mxu1 %vm316_vm2, %v21008_v27  ;;  %26442 = vst [vmem:[#allocation18_spill] sm:$0xff] %v24724_v23  ;;  %v21010_v27 = vld [vmem:[#allocation2 + $0x98] sm:$0xff]  ;;  %v13847_v29 = vsel %vm1834_vm4, %v13837_v34, %v13846_v20  ;;  %v24750_v34 = vshrl.u32 %v24547_v33, 16 }
 0x4ce   : > { %v13856_v1 = vsel %vm1834_vm4, %v13846_v20, %v13855_v38  ;;  %v24753_v20 = vshll.u32 %v24547_v33, 16 }
 0x4cf   : > { %26444 = vst [vmem:[#allocation27_spill] sm:$0xff] %v24750_v34 }
 0x4d0   : > { %26445 = vst [vmem:[#allocation10_spill] sm:$0xff] %v24753_v20 }
 0x4d2   : > { %19111 = vmatmul.mubr.msk.bf16.gmra.mrb[28].mxu0 %vm316_vm2, %v13574_v17  ;;  %v16745_v17 = vld [vmem:[%s25749_s1 + $0x5a] sm:$0x3] }
 0x4d3   : > { %19116 = vmatprep.mubr.msk.bf16.mxu0 %vm316_vm2, %v13838_v43  ;;  %v13863_v43 = vrot.slane %v24709_v7, 3 }
 0x4d4   : > { %18283 = vmatmul.mubr.msk.bf16.gmra.mrb[16].mxu1 %vm316_vm2, %v21009_v8  ;;  %v13872_v8 = vrot.slane %v24721_v12, 3  ;;  %v24759_v12 = vshrl.u32 %v24550_v46, 16 }
 0x4d5   : > { %18286 = vmatprep.mubr.msk.bf16.mxu1 %vm316_vm2, %v21010_v27  ;;  %v24740_v27 = vand.u32 %v16745_v17, %v21247_v4  ;;  %v13864_v19 = vor.u32 %v13863_v43, %v13860_v39  ;;  %v6618_v17 = vrot.slane %v24743_v44, 1  ;;  %v21011_v39 = vld [vmem:[#allocation2 + $0xa0] sm:$0xff] }
 0x4d6   : > { %v13873_v43 = vor.u32 %v13872_v8, %v13869_v18  ;;  %26446 = vst [vmem:[#allocation21_spill] sm:$0xff] %v24759_v12  ;;  %v13878_v8 = vrot.slane %v24750_v34, 2  ;;  %v13887_v25 = vrot.slane %v24759_v12, 2  ;;  %v24798_v34 = vshll.u32 %v24569_v24, 16 }
 0x4d7   : > { %v24767_v58 = vsel %vm945_vm7, %v6616_v10, %v6618_v17  ;;  %v13865_v18 = vsel %vm1834_vm4, %v13855_v38, %v13864_v19  ;;  %v6202_v10 = vshrl.u32 %v6182_v6, 16 }
 0x4d8   : > { %26448 = vst [vmem:[#allocation30_spill] sm:$0xff] %v24767_v58  ;;  %v13874_v60 = vsel %vm1834_vm4, %v13864_v19, %v13873_v43  ;;  %v24782_v58 = vld [vmem:[#allocation2 + $0xb8] sm:$0xff]  ;;  %v24787_v19 = vshrl.u32 %v24566_v35, 16  ;;  %26452 = vst [vmem:[#allocation36_spill] sm:$0xff] %v24798_v34 }
 0x4d9   : > { %v26047_v12 = vrot.slane %v24782_v58, 1 }
 0x4da   : > { %19117 = vmatmul.mubr.msk.bf16.vlgmr.msra.gmra.mrb[0].mxu0 %vm316_vm2, %v13847_v29  ;;  %v6620_v29 = vrot.slane %v24745_v51, 1 }
 0x4db   : > { %19149 = vmatpush3.bf16.msra.mxu0 %v24520_v50  ;;  %19120 = vmatprep.mubr.msk.bf16.mxu0 %vm316_vm2, %v13856_v1  ;;  %v24762_v50 = vshll.u32 %v24550_v46, 16  ;;  %v21012_v1 = vld [vmem:[#allocation2 + $0xa8] sm:$0xff] }
 0x4dc   : > { %18287 = vmatmul.mubr.msk.bf16.gmra.mrb[20].mxu1 %vm316_vm2, %v21011_v39  ;;  %19182 = vmatprep.subr.bf16.mxu0 %v24740_v27  ;;  %v24770_v7 = vsel %vm945_vm7, %v6618_v17, %v6620_v29  ;;  %v13881_v39 = vrot.slane %v24753_v20, 3  ;;  %v6206_v17 = vrot.slane %v6204_v16, 1  ;;  %v24795_v16 = vshrl.u32 %v24569_v24, 16 }
 0x4dd   : > { %26447 = vst [vmem:[#allocation23_spill] sm:$0xff] %v24762_v50  ;;  %18290 = vmatprep.mubr.msk.bf16.mxu1 %vm316_vm2, %v21012_v1  ;;  %26449 = vst [vmem:[#allocation31_spill] sm:$0xff] %v24770_v7  ;;  %v13890_v45 = vrot.slane %v24762_v50, 3  ;;  %v24778_v1 = vld [vmem:[#allocation2 + $0xb0] sm:$0xff]  ;;  %v6209_v7 = vshll.u32 %v24586_v22, 16  ;;  %v24790_v50 = vshll.u32 %v24566_v35, 16 }
 0x4de   : > { %v6622_v38 = vrot.slane %v24778_v1, 1  ;;  %v13882_v20 = vor.u32 %v13881_v39, %v13878_v8  ;;  %26451 = vst [vmem:[#allocation26_spill] sm:$0xff] %v24795_v16  ;;  %v21014_v8 = vld [vmem:[#allocation2 + $0xb8] sm:$0xff]  ;;  %v6207_v36 = vor.u32 %v6206_v17, %v6202_v10  ;;  %v6225_v10 = vshll.u32 %v24614_v42, 16 }
 0x4df   : > { %26450 = vst [vmem:[#allocation34_spill] sm:$0xff] %v24790_v50  ;;  %v13891_v6 = vor.u32 %v13890_v45, %v13887_v25  ;;  %v13896_v25 = vrot.slane %v24787_v19, 2  ;;  %v13899_v5 = vrot.slane %v24790_v50, 3 }
 0x4e0   : > { %v24807_v39 = vsel %vm945_vm7, %v6622_v38, %v26047_v12  ;;  %v13883_v45 = vsel %vm1834_vm4, %v13873_v43, %v13882_v20  ;;  %v6221_v43 = vshrl.u32 %v24592_v57, 16 }
 0x4e1   : > { %v13892_v23 = vsel %vm1834_vm4, %v13882_v20, %v13891_v6  ;;  %v13900_v17 = vor.u32 %v13899_v5, %v13896_v25  ;;  %v24823_v20 = vshrl.u32 %v24582_v32, 16 }
 0x4e2   : > { %19121 = vmatmul.mubr.msk.bf16.gmra.mrb[4].mxu0 %vm316_vm2, %v13865_v18  ;;  %v21013_v18 = vld [vmem:[#allocation2 + $0xb0] sm:$0xff] }
 0x4e3   : > { %19124 = vmatprep.mubr.msk.bf16.mxu0 %vm316_vm2, %v13874_v60  ;;  %v24801_v60 = vsel %vm945_vm7, %v6620_v29, %v6622_v38  ;;  %v13905_v29 = vrot.slane %v24795_v16, 2  ;;  %v24826_v38 = vshll.u32 %v24582_v32, 16  ;;  %v13901_v25 = vsel %vm1834_vm4, %v13891_v6, %v13900_v17 }
 0x4e4   : > { %18291 = vmatmul.mubr.msk.bf16.gmra.mrb[24].mxu1 %vm316_vm2, %v21013_v18  ;;  %26453 = vst [vmem:[#allocation70_spill] sm:$0xff] %v24801_v60  ;;  %v6211_v18 = vrot.slane %v6209_v7, 1  ;;  %v13908_v60 = vrot.slane %v24798_v34, 3  ;;  %v13914_v16 = vrot.slane %v24823_v20, 2  ;;  %v6229_v6 = vshrl.u32 %v24614_v42, 16 }
 0x4e5   : > { %18294 = vmatprep.mubr.msk.bf16.mxu1 %vm316_vm2, %v21014_v8  ;;  %v6217_v8 = vshll.u32 %v24592_v57, 16  ;;  %26454 = vst [vmem:[#allocation71_spill] sm:$0xff] %v24826_v38  ;;  %v24834_v57 = vshll.u32 %v24584_v15, 16  ;;  %v13917_v50 = vrot.slane %v24826_v38, 3  ;;  %v6241_v38 = vshll.u32 %v24638_v48, 16 }
 0x4e6   : > { %v6212_v7 = vsel %vm380_vm3, %v6207_v36, %v6211_v18  ;;  %v13909_v12 = vor.u32 %v13908_v60, %v13905_v29  ;;  %v24831_v36 = vshrl.u32 %v24584_v15, 16  ;;  %v6215_v34 = vor.u32 %v6213_v21, %v6211_v18  ;;  %v16337_v60 = vld [vmem:[%s25749_s1 + $0x2a] sm:$0x3] }
 0x4e7   : > { %26456 = vst [vmem:[#allocation72_spill] sm:$0xff] %v24834_v57  ;;  %v13926_v21 = vrot.slane %v24834_v57, 3  ;;  %v6233_v18 = vshll.u32 %v24617_v13, 16  ;;  %v13918_v57 = vor.u32 %v13917_v50, %v13914_v16 }
 0x4e8   : > { %26455 = vst [vmem:[#allocation73_spill] sm:$0xff] %v24831_v36  ;;  %v13910_v29 = vsel %vm1834_vm4, %v13900_v17, %v13909_v12  ;;  %v24854_v17 = vand.u32 %v16337_v60, %v21247_v4 }
 0x4e9   : > { %v13919_v60 = vsel %vm1834_vm4, %v13909_v12, %v13918_v57 }
 0x4ea   : > { %19125 = vmatmul.mubr.msk.bf16.gmra.mrb[8].mxu0 %vm316_vm2, %v13883_v45  ;;  %v6219_v45 = vrot.slane %v6217_v8, 1  ;;  %v13923_v8 = vrot.slane %v24831_v36, 2  ;;  %v24858_v36 = vshrl.u32 %v24610_v41, 16 }
 0x4eb   : > { %19128 = vmatprep.mubr.msk.bf16.mxu0 %vm316_vm2, %v13892_v23  ;;  %v6227_v23 = vrot.slane %v6225_v10, 1  ;;  %v6237_v10 = vshrl.u32 %v24617_v13, 16  ;;  %v24865_v13 = vshrl.u32 %v24612_v54, 16 }
 0x4ec   : > { %18295 = vmatmul.mubr.msk.bf16.gmra.mrb[28].mxu1 %vm316_vm2, %v24531_v28  ;;  %v6223_v5 = vor.u32 %v6221_v43, %v6219_v45  ;;  %v13927_v42 = vor.u32 %v13926_v21, %v13923_v8 }
 0x4ed   : > { %18300 = vmatprep.mubr.msk.bf16.mxu1 %vm316_vm2, %v6212_v7  ;;  %v6220_v7 = vsel %vm380_vm3, %v6215_v34, %v6219_v45  ;;  %v24861_v34 = vshll.u32 %v24610_v41, 16  ;;  %v6235_v45 = vrot.slane %v6233_v18, 1  ;;  %26458 = vst [vmem:[#allocation75_spill] sm:$0xff] %v24865_v13  ;;  %v6231_v50 = vor.u32 %v6229_v6, %v6227_v23 }
 0x4ee   : > { %v6228_v43 = vsel %vm380_vm3, %v6223_v5, %v6227_v23  ;;  %v24868_v5 = vshll.u32 %v24612_v54, 16  ;;  %v13928_v21 = vsel %vm1834_vm4, %v13918_v57, %v13927_v42  ;;  %v13941_v18 = vrot.slane %v24865_v13, 2 }
 0x4ef   : > { %26457 = vst [vmem:[#allocation74_spill] sm:$0xff] %v24861_v34  ;;  %v6239_v16 = vor.u32 %v6237_v10, %v6235_v45  ;;  %v13935_v8 = vrot.slane %v24861_v34, 3  ;;  %v6236_v23 = vsel %vm380_vm3, %v6231_v50, %v6235_v45  ;;  %v6253_v6 = vshrl.u32 %v24641_v59, 16  ;;  %v24908_v34 = vld [vmem:[#allocation2 + $0x150] sm:$0x7] }
 0x4f0   : > { %26459 = vst [vmem:[#allocation76_spill] sm:$0xff] %v24868_v5  ;;  %v24888_v10 = vshrl.u32 %v24634_v61, 16  ;;  %v24895_v50 = vshrl.u32 %v24636_v53, 16 }
 0x4f2   : > { %19129 = vmatmul.mubr.msk.bf16.gmra.mrb[12].mxu0 %vm316_vm2, %v13901_v25  ;;  %v6243_v25 = vrot.slane %v6241_v38, 1  ;;  %v6245_v38 = vshrl.u32 %v24638_v48, 16  ;;  %26460 = vst [vmem:[#allocation35_spill] sm:$0xff] %v24888_v10  ;;  %26462 = vst [vmem:[#allocation39_spill] sm:$0xff] %v24895_v50 }
 0x4f3   : > { %19132 = vmatprep.mubr.msk.bf16.mxu0 %vm316_vm2, %v13910_v29  ;;  %v13932_v29 = vrot.slane %v24858_v36, 2 }
 0x4f4   : > { %18301 = vmatmul.mubr.msk.bf16.vlgmr.msra.gmra.mrb[0].mxu1 %vm316_vm2, %v6220_v7  ;;  %v13944_v7 = vrot.slane %v24868_v5, 3  ;;  %v6244_v12 = vsel %vm380_vm3, %v6239_v16, %v6243_v25  ;;  %v24891_v5 = vshll.u32 %v24634_v61, 16  ;;  %v6247_v16 = vor.u32 %v6245_v38, %v6243_v25 }
 0x4f5   : > { %18333 = vmatpush3.bf16.msra.mxu1 %v24590_v40  ;;  %18304 = vmatprep.mubr.msk.bf16.mxu1 %vm316_vm2, %v6228_v43  ;;  %v6249_v40 = vshll.u32 %v24641_v59, 16  ;;  %v6257_v43 = vshll.u32 %v24668_v52, 16  ;;  %v13936_v57 = vor.u32 %v13935_v8, %v13932_v29  ;;  %v24898_v59 = vshll.u32 %v24636_v53, 16 }
 0x4f6   : > { %18366 = vmatprep.subr.bf16.mxu1 %v24854_v17  ;;  %26461 = vst [vmem:[#allocation40_spill] sm:$0xff] %v24891_v5  ;;  %v13945_v48 = vor.u32 %v13944_v7, %v13941_v18  ;;  %v13953_v13 = vrot.slane %v24891_v5, 3  ;;  %v13959_v7 = vrot.slane %v24895_v50, 2  ;;  %v6261_v38 = vshrl.u32 %v24668_v52, 16 }
 0x4f7   : > { %v6251_v45 = vrot.slane %v6249_v40, 1  ;;  %26463 = vst [vmem:[#allocation68_spill] sm:$0xff] %v24898_v59  ;;  %v6259_v29 = vrot.slane %v6257_v43, 1  ;;  %v13937_v8 = vsel %vm1834_vm4, %v13927_v42, %v13936_v57  ;;  %v13962_v40 = vrot.slane %v24898_v59, 3 }
 0x4f8   : > { %v13946_v18 = vsel %vm1834_vm4, %v13936_v57, %v13945_v48  ;;  %v13966_v57 = vshrl.u32 %v24908_v34, 16  ;;  %v13969_v59 = vshll.u32 %v24908_v34, 16 }
 0x4f9   : > { %v6252_v25 = vsel %vm380_vm3, %v6247_v16, %v6251_v45  ;;  %v6263_v52 = vor.u32 %v6261_v38, %v6259_v29 }
 0x4fa   : > { %19133 = vmatmul.mubr.msk.bf16.gmra.mrb[16].mxu0 %vm316_vm2, %v13919_v60  ;;  %v6255_v60 = vor.u32 %v6253_v6, %v6251_v45  ;;  %v6273_v6 = vshll.u32 %v24702_v56, 16  ;;  %v13963_v45 = vor.u32 %v13962_v40, %v13959_v7  ;;  %v13968_v50 = vrot.slane %v13966_v57, 2 }
 0x4fb   : > { %19136 = vmatprep.mubr.msk.bf16.mxu0 %vm316_vm2, %v13928_v21  ;;  %v13950_v21 = vrot.slane %v24888_v10, 2  ;;  %v13971_v5 = vrot.slane %v13969_v59, 3  ;;  %v24925_v10 = vld [vmem:[#allocation2 + $0xd0] sm:$0xf8]  ;;  %v6277_v7 = vshrl.u32 %v24702_v56, 16  ;;  %v6285_v40 = vshrl.u32 %v24711_v63, 16 }
 0x4fc   : > { %18305 = vmatmul.mubr.msk.bf16.gmra.mrb[4].mxu1 %vm316_vm2, %v6236_v23  ;;  %v6265_v23 = vshll.u32 %v24671_v11, 16  ;;  %v6260_v42 = vsel %vm380_vm3, %v6255_v60, %v6259_v29  ;;  %v6275_v60 = vrot.slane %v6273_v6, 1  ;;  %v6301_v57 = vshrl.u32 %v24745_v51, 16 }
 0x4fd   : > { %18308 = vmatprep.mubr.msk.bf16.mxu1 %vm316_vm2, %v6244_v12  ;;  %v6269_v12 = vshrl.u32 %v24671_v11, 16  ;;  %v13954_v43 = vor.u32 %v13953_v13, %v13950_v21  ;;  %v6281_v13 = vshll.u32 %v24711_v63, 16  ;;  %v13972_v59 = vor.u32 %v13971_v5, %v13968_v50 }
 0x4fe   : > { %v6267_v16 = vrot.slane %v6265_v23, 1  ;;  %v14223_v23 = vrot.slane %v24925_v10, 3  ;;  %v6279_v56 = vor.u32 %v6277_v7, %v6275_v60  ;;  %v6293_v50 = vshrl.u32 %v24743_v44, 16 }
 0x4ff   : > { %v13955_v11 = vsel %vm1834_vm4, %v13945_v48, %v13954_v43  ;;  %v6289_v48 = vshll.u32 %v24743_v44, 16  ;;  %v6283_v38 = vrot.slane %v6281_v13, 1  ;;  %v13973_v6 = vsel %vm1834_vm4, %v13963_v45, %v13972_v59 }
 0x500   : > { %v6268_v21 = vsel %vm380_vm3, %v6263_v52, %v6267_v16  ;;  %v14228_v52 = vrot.slane %v24495_v9, 3  ;;  %v6309_v7 = vshrl.u32 %v24778_v1, 16  ;;  %v14232_v59 = vrot.slane %v24523_v14, 3 }
 0x501   : > { %v6284_v5 = vsel %vm380_vm3, %v6279_v56, %v6283_v38 }
 0x502   : > { %19137 = vmatmul.mubr.msk.bf16.gmra.mrb[20].mxu0 %vm316_vm2, %v13937_v8  ;;  %v6271_v8 = vor.u32 %v6269_v12, %v6267_v16  ;;  %v6291_v12 = vrot.slane %v6289_v48, 1  ;;  %v6305_v16 = vshll.u32 %v24778_v1, 16  ;;  %v14230_v48 = vrot.slane %v24517_v26, 3 }
 0x503   : > { %19140 = vmatprep.mubr.msk.bf16.mxu0 %vm316_vm2, %v13946_v18  ;;  %v13964_v18 = vsel %vm1834_vm4, %v13954_v43, %v13963_v45  ;;  %v6297_v43 = vshll.u32 %v24745_v51, 16  ;;  %v14226_v45 = vrot.slane %v24492_v55, 3  ;;  %v6313_v55 = vshll.u32 %v24782_v58, 16 }
 0x504   : > { %18309 = vmatmul.mubr.msk.bf16.gmra.mrb[8].mxu1 %vm316_vm2, %v6252_v25  ;;  %v6276_v29 = vsel %vm380_vm3, %v6271_v8, %v6275_v60  ;;  %v14224_v25 = vrot.slane %v24472_v0, 3  ;;  %v6295_v44 = vor.u32 %v6293_v50, %v6291_v12  ;;  %v16762_v60 = vld [vmem:[%s25749_s1 + $0x5c] sm:$0x3]  ;;  %v6307_v51 = vrot.slane %v6305_v16, 1 }
 0x505   : > { %18312 = vmatprep.mubr.msk.bf16.mxu1 %vm316_vm2, %v6260_v42  ;;  %v6287_v42 = vor.u32 %v6285_v40, %v6283_v38  ;;  %v6299_v8 = vrot.slane %v6297_v43, 1  ;;  %v14229_v13 = vsel %vm2161_vm5, %v14226_v45, %v14228_v52  ;;  %v6317_v40 = vshrl.u32 %v24782_v58, 16  ;;  %v6577_v43 = vld [vmem:[#allocation2 + $0x48] sm:$0xfe] }
 0x506   : > { %v14225_v63 = vsel %vm2161_vm5, %v14223_v23, %v14224_v25  ;;  %v6315_v23 = vrot.slane %v6313_v55, 1  ;;  %v6311_v1 = vor.u32 %v6309_v7, %v6307_v51  ;;  %v26464_v38 = vshll.u32 %v24531_v28, 16 }
 0x507   : > { %v6292_v0 = vsel %vm380_vm3, %v6287_v42, %v6291_v12  ;;  %v6300_v9 = vsel %vm380_vm3, %v6295_v44, %v6299_v8  ;;  %v24974_v42 = vld [vmem:[#allocation2 + $0xc8] sm:$0x1]  ;;  %v14233_v26 = vsel %vm2161_vm5, %v14230_v48, %v14232_v59  ;;  %v26465_v50 = vshrl.u32 %v24531_v28, 16 }
 0x508   : > { %v6323_v56 = vrot.slane %v26464_v38, 1  ;;  %v6316_v12 = vsel %vm380_vm3, %v6311_v1, %v6315_v23  ;;  %v6329_v14 = vshll.u32 %v24974_v42, 16  ;;  %v6597_v16 = vrot.slane %v6577_v43, 1  ;;  %v26474_v43 = vld [vmem:[#allocation30_spill] sm:$0xff] }
 0x50a   : > { %19141 = vmatmul.mubr.msk.bf16.gmra.mrb[24].mxu0 %vm316_vm2, %v13955_v11  ;;  %v6303_v11 = vor.u32 %v6301_v57, %v6299_v8  ;;  %v6331_v57 = vrot.slane %v6329_v14, 1 }
 0x50b   : > { %19144 = vmatprep.mubr.msk.bf16.mxu0 %vm316_vm2, %v13964_v18  ;;  %v14227_v18 = vsel %vm2161_vm5, %v14224_v25, %v14226_v45  ;;  %v6319_v25 = vor.u32 %v6317_v40, %v6315_v23  ;;  %v26469_v23 = vld [vmem:[#allocation41_spill] sm:$0xff] }
 0x50c   : > { %18313 = vmatmul.mubr.msk.bf16.gmra.mrb[12].mxu1 %vm316_vm2, %v6268_v21  ;;  %v24958_v21 = vand.u32 %v16762_v60, %v21247_v4  ;;  %v14240_v60 = vrot.slane %v24569_v24, 3  ;;  %v14244_v24 = vrot.slane %v24584_v15, 3  ;;  %v14248_v15 = vrot.slane %v24612_v54, 3 }
 0x50d   : > { %18316 = vmatprep.mubr.msk.bf16.mxu1 %vm316_vm2, %v6276_v29  ;;  %v6308_v29 = vsel %vm380_vm3, %v6303_v11, %v6307_v51  ;;  %v16354_v51 = vld [vmem:[%s25749_s1 + $0x2c] sm:$0x3]  ;;  %v14504_v54 = vshrl.u32 %v24925_v10, 16  ;;  %v14515_v1 = vrot.slane %v26469_v23, 3 }
 0x50f   : > { %v14506_v7 = vrot.slane %v14504_v54, 3 }
 0x512   : > { %19145 = vmatmul.mubr.msk.bf16.gmra.mrb[28].mxu0 %vm316_vm2, %v13973_v6  ;;  %v6324_v6 = vsel %vm380_vm3, %v6319_v25, %v6323_v56  ;;  %v26470_v25 = vld [vmem:[#allocation46_spill] sm:$0xff] }
 0x513   : > { %19150 = vmatprep.mubr.msk.bf16.mxu0 %vm316_vm2, %v14225_v63  ;;  %v14234_v63 = vrot.slane %v24547_v33, 3  ;;  %v26466_v33 = vrot.slane %v24586_v22, 1  ;;  %v14516_v38 = vrot.slane %v26470_v25, 4 }
 0x514   : > { %18317 = vmatmul.mubr.msk.bf16.gmra.mrb[16].mxu1 %vm316_vm2, %v6284_v5  ;;  %v14236_v5 = vrot.slane %v24550_v46, 3  ;;  %v14238_v46 = vrot.slane %v24566_v35, 3  ;;  %v14242_v35 = vrot.slane %v24582_v32, 3  ;;  %v14246_v32 = vrot.slane %v24610_v41, 3 }
 0x515   : > { %18320 = vmatprep.mubr.msk.bf16.mxu1 %vm316_vm2, %v6292_v0  ;;  %v6327_v0 = vor.u32 %v6323_v56, %v26465_v50  ;;  %v14235_v45 = vsel %vm2161_vm5, %v14232_v59, %v14234_v63  ;;  %v6599_v44 = vsel %vm945_vm7, %v6597_v16, %v26466_v33  ;;  %v14252_v41 = vrot.slane %v24636_v53, 3  ;;  %v26476_v16 = vld [vmem:[#allocation44_spill] sm:$0xff] }
 0x516   : > { %v14239_v11 = vsel %vm2161_vm5, %v14236_v5, %v14238_v46  ;;  %v14241_v22 = vsel %vm2161_vm5, %v14238_v46, %v14240_v60  ;;  %v14245_v55 = vsel %vm2161_vm5, %v14242_v35, %v14244_v24  ;;  %v14512_v53 = vrot.slane %v24655_v37, 4 }
 0x517   : > { %v6332_v8 = vsel %vm380_vm3, %v6327_v0, %v6331_v57  ;;  %v14517_v14 = vor.u32 %v14516_v38, %v14515_v1  ;;  %v26475_v0 = vld [vmem:[#allocation17_spill] sm:$0xff]  ;;  %v26488_v1 = vld [vmem:[#allocation36_spill] sm:$0xff] }
 0x518   : > { %v14523_v57 = vrot.slane %v26475_v0, 3  ;;  %v14544_v38 = vrot.slane %v26488_v1, 4 }
 0x51a   : > { %19151 = vmatmul.mubr.msk.bf16.vlgmr.msra.gmra.mrb[0].mxu0 %vm316_vm2, %v14227_v18  ;;  %v25008_v18 = vand.u32 %v16354_v51, %v21247_v4  ;;  %v26479_v51 = vld [vmem:[#allocation31_spill] sm:$0xff] }
 0x51b   : > { %19183 = vmatpush3.bf16.msra.mxu0 %v24740_v27  ;;  %19154 = vmatprep.mubr.msk.bf16.mxu0 %vm316_vm2, %v14229_v13  ;;  %v14231_v27 = vsel %vm2161_vm5, %v14228_v52, %v14230_v48  ;;  %v14237_v52 = vsel %vm2161_vm5, %v14234_v63, %v14236_v5  ;;  %v14243_v13 = vsel %vm2161_vm5, %v14240_v60, %v14242_v35  ;;  %v26468_v48 = vld [vmem:[#allocation18_spill] sm:$0xff] }
 0x51c   : > { %18321 = vmatmul.mubr.msk.bf16.gmra.mrb[20].mxu1 %vm316_vm2, %v6300_v9  ;;  %19216 = vmatprep.subr.bf16.mxu0 %v24958_v21  ;;  %v16779_v5 = vld [vmem:[%s25749_s1 + $0x5e] sm:$0x3] }
 0x51d   : > { %18324 = vmatprep.mubr.msk.bf16.mxu1 %vm316_vm2, %v6308_v29  ;;  %v25074_v60 = vand.u32 %v16779_v5, %v21247_v4  ;;  %v26480_v35 = vld [vmem:[#allocation70_spill] sm:$0xff] }
 0x522   : > { %19155 = vmatmul.mubr.msk.bf16.gmra.mrb[4].mxu0 %vm316_vm2, %v14231_v27  ;;  %v26471_v27 = vld [vmem:[#allocation22_spill] sm:$0xff] }
 0x523   : > { %19158 = vmatprep.mubr.msk.bf16.mxu0 %vm316_vm2, %v14233_v26  ;;  %v14519_v26 = vrot.slane %v26471_v27, 3 }
 0x524   : > { %18325 = vmatmul.mubr.msk.bf16.gmra.mrb[24].mxu1 %vm316_vm2, %v6316_v12  ;;  %v26472_v12 = vld [vmem:[#allocation47_spill] sm:$0xff] }
 0x525   : > { %18328 = vmatprep.mubr.msk.bf16.mxu1 %vm316_vm2, %v6324_v6  ;;  %v26473_v6 = vld [vmem:[#allocation16_spill] sm:$0xff] }
 0x52a   : > { %19159 = vmatmul.mubr.msk.bf16.gmra.mrb[8].mxu0 %vm316_vm2, %v14235_v45  ;;  %v14524_v45 = vrot.slane %v26476_v16, 4 }
 0x52b   : > { %19162 = vmatprep.mubr.msk.bf16.mxu0 %vm316_vm2, %v14237_v52 }
 0x52c   : > { %18329 = vmatmul.mubr.msk.bf16.gmra.mrb[28].mxu1 %vm316_vm2, %v6332_v8  ;;  %v26477_v8 = vld [vmem:[#allocation48_spill] sm:$0xff] }
 0x52d   : > { %18334 = vmatprep.mubr.msk.bf16.mxu1 %vm316_vm2, %v6599_v44  ;;  %v14527_v33 = vrot.slane %v26477_v8, 3  ;;  %v26478_v44 = vld [vmem:[#allocation13_spill] sm:$0xff] }
 0x52e   : > { %v14528_v46 = vrot.slane %v26478_v44, 4 }
 0x532   : > { %19163 = vmatmul.mubr.msk.bf16.gmra.mrb[12].mxu0 %vm316_vm2, %v14239_v11  ;;  %v14525_v11 = vor.u32 %v14524_v45, %v14523_v57  ;;  %v26489_v57 = vld [vmem:[#allocation71_spill] sm:$0xff] }
 0x533   : > { %19166 = vmatprep.mubr.msk.bf16.mxu0 %vm316_vm2, %v14241_v22  ;;  %v14529_v22 = vor.u32 %v14528_v46, %v14527_v33  ;;  %v14548_v45 = vrot.slane %v26489_v57, 4  ;;  %v26490_v46 = vld [vmem:[#allocation73_spill] sm:$0xff] }
 0x534   : > { %18335 = vmatmul.mubr.msk.bf16.vlgmr.msra.gmra.mrb[0].mxu1 %vm316_vm2, %v24605_v62  ;;  %v14247_v62 = vsel %vm2161_vm5, %v14244_v24, %v14246_v32  ;;  %v6626_v24 = vrot.slane %v24531_v28, 1 }
 0x535   : > { %18367 = vmatpush3.bf16.msra.mxu1 %v24854_v17  ;;  %18338 = vmatprep.mubr.msk.bf16.mxu1 %vm316_vm2, %v24626_v2  ;;  %v14249_v2 = vsel %vm2161_vm5, %v14246_v32, %v14248_v15  ;;  %v14250_v17 = vrot.slane %v24634_v61, 3  ;;  %v14511_v61 = vrot.slane %v24652_v3, 3 }
 0x536   : > { %18400 = vmatprep.subr.bf16.mxu1 %v25008_v18 }
 0x537   : > { %v14253_v9 = vsel %vm2161_vm5, %v14250_v17, %v14252_v41  ;;  %v14513_v40 = vor.u32 %v14512_v53, %v14511_v61  ;;  %v25103_v53 = vld [vmem:[#allocation2 + $0x70] sm:$0xff] }
 0x539   : > { %v14518_v50 = vsel %vm2755_vm6, %v14513_v40, %v14517_v14 }
 0x53a   : > { %19167 = vmatmul.mubr.msk.bf16.gmra.mrb[16].mxu0 %vm316_vm2, %v14243_v13 }
 0x53b   : > { %19170 = vmatprep.mubr.msk.bf16.mxu0 %vm316_vm2, %v14245_v55  ;;  %v26481_v55 = vld [vmem:[#allocation27_spill] sm:$0xff] }
 0x53c   : > { %18339 = vmatmul.mubr.msk.bf16.gmra.mrb[4].mxu1 %vm316_vm2, %v24630_v31  ;;  %v14507_v31 = vshll.u32 %v24925_v10, 16  ;;  %v26467_v10 = vld [vmem:[#allocation11_spill] sm:$0xff]  ;;  %v14531_v32 = vrot.slane %v26481_v55, 3 }
 0x53d   : > { %18342 = vmatprep.mubr.msk.bf16.mxu1 %vm316_vm2, %v24658_v47  ;;  %v14251_v47 = vsel %vm2161_vm5, %v14248_v15, %v14250_v17  ;;  %v26482_v15 = vld [vmem:[#allocation10_spill] sm:$0xff] }
 0x53e   : > { %v14509_v29 = vrot.slane %v14507_v31, 4  ;;  %v26485_v31 = vrot.slane %v24782_v58, 1  ;;  %v6911_v58 = vrot.slane %v25103_v53, 1 }
 0x542   : > { %19171 = vmatmul.mubr.msk.bf16.gmra.mrb[20].mxu0 %vm316_vm2, %v14247_v62  ;;  %v14530_v62 = vsel %vm2755_vm6, %v14525_v11, %v14529_v22 }
 0x543   : > { %19174 = vmatprep.mubr.msk.bf16.mxu0 %vm316_vm2, %v14249_v2  ;;  %v26483_v2 = vld [vmem:[#allocation21_spill] sm:$0xff] }
 0x544   : > { %18343 = vmatmul.mubr.msk.bf16.gmra.mrb[8].mxu1 %vm316_vm2, %v24662_v30  ;;  %v14254_v30 = vrot.slane %v24908_v34, 3  ;;  %v14520_v34 = vrot.slane %v26472_v12, 4  ;;  %v14535_v17 = vrot.slane %v26483_v2, 3 }
 0x545   : > { %18346 = vmatprep.mubr.msk.bf16.mxu1 %vm316_vm2, %v24690_v49  ;;  %v14510_v49 = vor.u32 %v14509_v29, %v14506_v7  ;;  %v6628_v29 = vrot.slane %v24974_v42, 1 }
 0x546   : > { %v14255_v59 = vsel %vm2161_vm5, %v14252_v41, %v14254_v30  ;;  %v14521_v63 = vor.u32 %v14520_v34, %v14519_v26  ;;  %v26484_v41 = vld [vmem:[#allocation23_spill] sm:$0xff] }
 0x547   : > { %v14514_v56 = vsel %vm2755_vm6, %v14510_v49, %v14513_v40  ;;  %v14536_v54 = vrot.slane %v26484_v41, 4  ;;  %v26486_v49 = vld [vmem:[#allocation34_spill] sm:$0xff]  ;;  %v6629_v42 = vsel %vm945_vm7, %v6626_v24, %v6628_v29 }
 0x548   : > { %v14522_v52 = vsel %vm2755_vm6, %v14517_v14, %v14521_v63  ;;  %v14526_v13 = vsel %vm2755_vm6, %v14521_v63, %v14525_v11  ;;  %v14540_v40 = vrot.slane %v26486_v49, 4  ;;  %v25118_v14 = vld [vmem:[#allocation2 + $0x78] sm:$0xff]  ;;  %v25121_v63 = vld [vmem:[#allocation2 + $0x80] sm:$0xff]  ;;  %v14551_v11 = vrot.slane %v26490_v46, 3 }
 0x549   : > { %v14537_v7 = vor.u32 %v14536_v54, %v14535_v17  ;;  %v25146_v54 = vld [vmem:[#allocation2 + $0x90] sm:$0xff] }
 0x54a   : > { %19175 = vmatmul.mubr.msk.bf16.gmra.mrb[24].mxu0 %vm316_vm2, %v14251_v47  ;;  %v6627_v47 = vsel %vm945_vm7, %v26485_v31, %v6626_v24  ;;  %v6919_v31 = vrot.slane %v25146_v54, 1 }
 0x54b   : > { %19178 = vmatprep.mubr.msk.bf16.mxu0 %vm316_vm2, %v14253_v9  ;;  %v25096_v9 = vld [vmem:[#allocation2 + $0x68] sm:$0xfe] }
 0x54c   : > { %18347 = vmatmul.mubr.msk.bf16.gmra.mrb[12].mxu1 %vm316_vm2, %v26467_v10  ;;  %v6910_v61 = vrot.slane %v25096_v9, 1  ;;  %v14539_v10 = vrot.slane %v24787_v19, 3 }
 0x54d   : > { %18350 = vmatprep.mubr.msk.bf16.mxu1 %vm316_vm2, %v26468_v48 }
 0x54e   : > { %v14541_v26 = vor.u32 %v14540_v40, %v14539_v10 }
 0x550   : > { %v14542_v5 = vsel %vm2755_vm6, %v14537_v7, %v14541_v26 }
 0x552   : > { %19179 = vmatmul.mubr.msk.bf16.gmra.mrb[28].mxu0 %vm316_vm2, %v14255_v59 }
 0x553   : > { %19184 = vmatprep.mubr.msk.bf16.mxu0 %vm316_vm2, %v14514_v56  ;;  %v6912_v56 = vsel %vm945_vm7, %v6910_v61, %v6911_v58  ;;  %v26493_v61 = vld [vmem:[#allocation75_spill] sm:$0xff] }
 0x554   : > { %18351 = vmatmul.mubr.msk.bf16.gmra.mrb[16].mxu1 %vm316_vm2, %v26473_v6  ;;  %v6913_v6 = vrot.slane %v25118_v14, 1 }
 0x555   : > { %18354 = vmatprep.mubr.msk.bf16.mxu1 %vm316_vm2, %v26474_v43  ;;  %v6915_v43 = vrot.slane %v25121_v63, 1 }
 0x557   : > { %v6916_v24 = vsel %vm945_vm7, %v6913_v6, %v6915_v43 }
 0x55a   : > { %19185 = vmatmul.mubr.msk.bf16.vlgmr.msra.gmra.mrb[0].mxu0 %vm316_vm2, %v14518_v50  ;;  %v14547_v50 = vrot.slane %v24823_v20, 3 }
 0x55b   : > { %19217 = vmatpush3.bf16.msra.mxu0 %v24958_v21  ;;  %19188 = vmatprep.mubr.msk.bf16.mxu0 %vm316_vm2, %v14522_v52  ;;  %v14532_v21 = vrot.slane %v26482_v15, 4  ;;  %v16371_v52 = vld [vmem:[%s25749_s1 + $0x2e] sm:$0x3] }
 0x55c   : > { %18355 = vmatmul.mubr.msk.bf16.gmra.mrb[20].mxu1 %vm316_vm2, %v26479_v51  ;;  %19250 = vmatprep.subr.bf16.mxu0 %v25074_v60  ;;  %v26491_v51 = vld [vmem:[#allocation72_spill] sm:$0xff] }
 0x55d   : > { %18358 = vmatprep.mubr.msk.bf16.mxu1 %vm316_vm2, %v26480_v35  ;;  %v14533_v28 = vor.u32 %v14532_v21, %v14531_v32  ;;  %v6914_v35 = vsel %vm945_vm7, %v6911_v58, %v6913_v6  ;;  %v14549_v32 = vor.u32 %v14548_v45, %v14547_v50  ;;  %v14559_v58 = vrot.slane %v26493_v61, 3  ;;  %v26496_v50 = vld [vmem:[#allocation40_spill] sm:$0xff] }
 0x55e   : > { %v14564_v45 = vrot.slane %v26496_v50, 4 }
 0x55f   : > { %v14534_v30 = vsel %vm2755_vm6, %v14529_v22, %v14533_v28  ;;  %v14538_v48 = vsel %vm2755_vm6, %v14533_v28, %v14537_v7  ;;  %v14552_v22 = vrot.slane %v26491_v51, 4  ;;  %v14555_v28 = vrot.slane %v24858_v36, 3  ;;  %v26492_v7 = vld [vmem:[#allocation74_spill] sm:$0xff] }
 0x560   : > { %v14556_v29 = vrot.slane %v26492_v7, 4 }
 0x561   : > { %v14553_v21 = vor.u32 %v14552_v22, %v14551_v11  ;;  %v26498_v22 = vld [vmem:[#allocation68_spill] sm:$0xff] }
 0x562   : > { %19189 = vmatmul.mubr.msk.bf16.gmra.mrb[4].mxu0 %vm316_vm2, %v14526_v13  ;;  %v25137_v13 = vand.u32 %v16371_v52, %v21247_v4 }
 0x563   : > { %19192 = vmatprep.mubr.msk.bf16.mxu0 %vm316_vm2, %v14530_v62  ;;  %v25143_v62 = vld [vmem:[#allocation2 + $0x88] sm:$0xff] }
 0x564   : > { %18359 = vmatmul.mubr.msk.bf16.gmra.mrb[24].mxu1 %vm316_vm2, %v24807_v39  ;;  %v26487_v39 = vld [vmem:[#allocation26_spill] sm:$0xff]  ;;  %v6917_v17 = vrot.slane %v25143_v62, 1 }
 0x565   : > { %18362 = vmatprep.mubr.msk.bf16.mxu1 %vm316_vm2, %v6627_v47  ;;  %v14543_v59 = vrot.slane %v26487_v39, 3 }
 0x566   : > { %v6918_v40 = vsel %vm945_vm7, %v6915_v43, %v6917_v17  ;;  %v26495_v43 = vld [vmem:[#allocation35_spill] sm:$0xff] }
 0x567   : > { %v14545_v34 = vor.u32 %v14544_v38, %v14543_v59  ;;  %v14557_v59 = vor.u32 %v14556_v29, %v14555_v28 }
 0x569   : > { %v14546_v33 = vsel %vm2755_vm6, %v14541_v26, %v14545_v34  ;;  %v14550_v47 = vsel %vm2755_vm6, %v14545_v34, %v14549_v32  ;;  %v25165_v26 = vld [vmem:[#allocation2 + $0xa0] sm:$0xff]  ;;  %v14558_v6 = vsel %vm2755_vm6, %v14553_v21, %v14557_v59 }
 0x56a   : > { %19193 = vmatmul.mubr.msk.bf16.gmra.mrb[8].mxu0 %vm316_vm2, %v14534_v30  ;;  %v26494_v30 = vld [vmem:[#allocation76_spill] sm:$0xff]  ;;  %v6923_v34 = vrot.slane %v25165_v26, 1 }
 0x56b   : > { %19196 = vmatprep.mubr.msk.bf16.mxu0 %vm316_vm2, %v14538_v48  ;;  %v14560_v10 = vrot.slane %v26494_v30, 4  ;;  %v6920_v48 = vsel %vm945_vm7, %v6917_v17, %v6919_v31 }
 0x56c   : > { %18363 = vmatmul.mubr.msk.bf16.gmra.mrb[28].mxu1 %vm316_vm2, %v6629_v42  ;;  %v25162_v42 = vld [vmem:[#allocation2 + $0x98] sm:$0xff] }
 0x56d   : > { %18368 = vmatprep.mubr.msk.bf16.mxu1 %vm316_vm2, %v6912_v56  ;;  %v14561_v38 = vor.u32 %v14560_v10, %v14559_v58  ;;  %v6921_v56 = vrot.slane %v25162_v42, 1  ;;  %v25187_v58 = vld [vmem:[#allocation2 + $0xb0] sm:$0xff] }
 0x56e   : > { %26500 = vst [vmem:[#allocation61_spill] sm:$0xff] %v25187_v58  ;;  %v6927_v10 = vrot.slane %v25187_v58, 1  ;;  %v26537_v58 = vld [vmem:[#allocation49_spill] sm:$0xff] }
 0x56f   : > { %v14562_v52 = vsel %vm2755_vm6, %v14557_v59, %v14561_v38  ;;  %v6924_v17 = vsel %vm945_vm7, %v6921_v56, %v6923_v34 }
 0x572   : > { %19197 = vmatmul.mubr.msk.bf16.gmra.mrb[12].mxu0 %vm316_vm2, %v14542_v5  ;;  %v14563_v5 = vrot.slane %v26495_v43, 3 }
 0x573   : > { %19200 = vmatprep.mubr.msk.bf16.mxu0 %vm316_vm2, %v14546_v33  ;;  %v26497_v33 = vld [vmem:[#allocation39_spill] sm:$0xff] }
 0x574   : > { %18369 = vmatmul.mubr.msk.bf16.vlgmr.msra.gmra.mrb[0].mxu1 %vm316_vm2, %v6914_v35  ;;  %v14567_v11 = vrot.slane %v26497_v33, 3  ;;  %v14568_v35 = vrot.slane %v26498_v22, 4 }
 0x575   : > { %18401 = vmatpush3.bf16.msra.mxu1 %v25008_v18  ;;  %18372 = vmatprep.mubr.msk.bf16.mxu1 %vm316_vm2, %v6916_v24  ;;  %v14554_v18 = vsel %vm2755_vm6, %v14549_v32, %v14553_v21  ;;  %v25174_v24 = vld [vmem:[#allocation2 + $0x150] sm:$0xf]  ;;  %v6922_v32 = vsel %vm945_vm7, %v6919_v31, %v6921_v56  ;;  %v14565_v21 = vor.u32 %v14564_v45, %v14563_v5  ;;  %v25193_v5 = vld [vmem:[#allocation2 + $0xd0] sm:$0xf0] }
 0x576   : > { %18434 = vmatprep.subr.bf16.mxu1 %v25137_v13  ;;  %v14575_v28 = vshll.u32 %v25174_v24, 16  ;;  %v14569_v29 = vor.u32 %v14568_v35, %v14567_v11  ;;  %v14829_v11 = vrot.slane %v25193_v5, 4 }
 0x578   : > { %v14577_v59 = vrot.slane %v14575_v28, 4  ;;  %v14570_v56 = vsel %vm2755_vm6, %v14565_v21, %v14569_v29 }
 0x57a   : > { %19201 = vmatmul.mubr.msk.bf16.gmra.mrb[16].mxu0 %vm316_vm2, %v14550_v47  ;;  %v14572_v47 = vshrl.u32 %v25174_v24, 16 }
 0x57b   : > { %19204 = vmatprep.mubr.msk.bf16.mxu0 %vm316_vm2, %v14554_v18  ;;  %v25184_v18 = vld [vmem:[#allocation2 + $0xa8] sm:$0xff] }
 0x57c   : > { %18373 = vmatmul.mubr.msk.bf16.gmra.mrb[4].mxu1 %vm316_vm2, %v6918_v40  ;;  %26499 = vst [vmem:[#allocation69_spill] sm:$0xff] %v25184_v18  ;;  %v6925_v31 = vrot.slane %v25184_v18, 1  ;;  %v14566_v40 = vsel %vm2755_vm6, %v14561_v38, %v14565_v21  ;;  %v25200_v38 = vld [vmem:[#allocation2 + $0xd8] sm:$0xff]  ;;  %v26541_v18 = vld [vmem:[#allocation51_spill] sm:$0xff] }
 0x57d   : > { %18376 = vmatprep.mubr.msk.bf16.mxu1 %vm316_vm2, %v6920_v48  ;;  %v14574_v48 = vrot.slane %v14572_v47, 3  ;;  %26501 = vst [vmem:[#allocation62_spill] sm:$0xff] %v25200_v38  ;;  %v14830_v35 = vrot.slane %v25200_v38, 4  ;;  %v26536_v38 = vld [vmem:[#allocation42_spill] sm:$0xff] }
 0x57e   : > { %v6928_v45 = vsel %vm945_vm7, %v6925_v31, %v6927_v10 }
 0x57f   : > { %v14831_v28 = vsel %vm3157_vm8, %v14829_v11, %v14830_v35 }
 0x582   : > { %19205 = vmatmul.mubr.msk.bf16.gmra.mrb[20].mxu0 %vm316_vm2, %v14558_v6  ;;  %v6926_v6 = vsel %vm945_vm7, %v6923_v34, %v6925_v31  ;;  %v25204_v34 = vld [vmem:[#allocation2 + $0xb8] sm:$0xff] }
 0x583   : > { %19208 = vmatprep.mubr.msk.bf16.mxu0 %vm316_vm2, %v14562_v52  ;;  %v14578_v52 = vor.u32 %v14577_v59, %v14574_v48  ;;  %26502 = vst [vmem:[#allocation63_spill] sm:$0xff] %v25204_v34  ;;  %v25216_v48 = vld [vmem:[#allocation2 + $0xe0] sm:$0xff] }
 0x584   : > { %18377 = vmatmul.mubr.msk.bf16.gmra.mrb[8].mxu1 %vm316_vm2, %v6922_v32  ;;  %v6929_v32 = vrot.slane %v25204_v34, 1  ;;  %26504 = vst [vmem:[#allocation65_spill] sm:$0xff] %v25216_v48  ;;  %v14832_v59 = vrot.slane %v25216_v48, 4 }
 0x585   : > { %18380 = vmatprep.mubr.msk.bf16.mxu1 %vm316_vm2, %v6924_v17  ;;  %v25207_v17 = vld [vmem:[#allocation2 + $0xc0] sm:$0xff]  ;;  %v14579_v47 = vsel %vm2755_vm6, %v14569_v29, %v14578_v52  ;;  %v25230_v52 = vld [vmem:[#allocation2 + $0xd0] sm:$0xff] }
 0x586   : > { %26503 = vst [vmem:[#allocation64_spill] sm:$0xff] %v25207_v17  ;;  %v6931_v21 = vrot.slane %v25207_v17, 1  ;;  %v6930_v31 = vsel %vm945_vm7, %v6927_v10, %v6929_v32  ;;  %26507 = vst [vmem:[#allocation43_spill] sm:$0xff] %v25230_v52  ;;  %v6935_v11 = vrot.slane %v25230_v52, 1  ;;  %v26516_v17 = vld [vmem:[#allocation15_spill] sm:$0xff] }
 0x587   : > { %v7222_v34 = vrot.slane %v26516_v17, 2  ;;  %v26519_v17 = vld [vmem:[#allocation19_spill] sm:$0xff] }
 0x58a   : > { %19209 = vmatmul.mubr.msk.bf16.gmra.mrb[24].mxu0 %vm316_vm2, %v14566_v40  ;;  %v6932_v40 = vsel %vm945_vm7, %v6929_v32, %v6931_v21  ;;  %v14833_v32 = vsel %vm3157_vm8, %v14830_v35, %v14832_v59  ;;  %v25247_v35 = vld [vmem:[#allocation2 + $0xf8] sm:$0xff] }
 0x58b   : > { %19212 = vmatprep.mubr.msk.bf16.mxu0 %vm316_vm2, %v14570_v56  ;;  %v25220_v56 = vld [vmem:[#allocation2 + $0xe8] sm:$0xff]  ;;  %26509 = vst [vmem:[#allocation18_spill] sm:$0xff] %v25247_v35 }
 0x58c   : > { %18381 = vmatmul.mubr.msk.bf16.gmra.mrb[12].mxu1 %vm316_vm2, %v6926_v6  ;;  %26505 = vst [vmem:[#allocation66_spill] sm:$0xff] %v25220_v56  ;;  %v14834_v29 = vrot.slane %v25220_v56, 4  ;;  %v25224_v6 = vld [vmem:[#allocation2 + $0xc8] sm:$0xff] }
 0x58d   : > { %18384 = vmatprep.mubr.msk.bf16.mxu1 %vm316_vm2, %v6928_v45  ;;  %26506 = vst [vmem:[#allocation67_spill] sm:$0xff] %v25224_v6  ;;  %v6933_v10 = vrot.slane %v25224_v6, 1  ;;  %v16796_v45 = vld [vmem:[%s25749_s1 + $0x60] sm:$0x3]  ;;  %v25243_v6 = vld [vmem:[#allocation2 + $0xf0] sm:$0xff] }
 0x58e   : > { %26508 = vst [vmem:[#allocation11_spill] sm:$0xff] %v25243_v6  ;;  %v14836_v52 = vrot.slane %v25243_v6, 4  ;;  %v6890_v6 = vld [vmem:[#allocation2 + $0xe8] sm:$0x1] }
 0x592   : > { %19213 = vmatmul.mubr.msk.bf16.gmra.mrb[28].mxu0 %vm316_vm2, %v14579_v47  ;;  %v14835_v47 = vsel %vm3157_vm8, %v14832_v59, %v14834_v29  ;;  %v25255_v59 = vld [vmem:[#allocation2 + $0xe0] sm:$0xff] }
 0x593   : > { %19218 = vmatprep.mubr.msk.bf16.mxu0 %vm316_vm2, %v14831_v28  ;;  %v25236_v28 = vand.u32 %v16796_v45, %v21247_v4  ;;  %v14838_v4 = vrot.slane %v25247_v35, 4  ;;  %26511 = vst [vmem:[#allocation46_spill] sm:$0xff] %v25255_v59  ;;  %v7191_v45 = vshrl.u32 %v25096_v9, 16 }
 0x594   : > { %18385 = vmatmul.mubr.msk.bf16.gmra.mrb[16].mxu1 %vm316_vm2, %v6930_v31  ;;  %v6934_v31 = vsel %vm945_vm7, %v6931_v21, %v6933_v10  ;;  %v25252_v21 = vld [vmem:[#allocation2 + $0xd8] sm:$0xff] }
 0x595   : > { %18388 = vmatprep.mubr.msk.bf16.mxu1 %vm316_vm2, %v6932_v40  ;;  %v6936_v40 = vsel %vm945_vm7, %v6933_v10, %v6935_v11  ;;  %26510 = vst [vmem:[#allocation41_spill] sm:$0xff] %v25252_v21  ;;  %v6939_v10 = vrot.slane %v25255_v59, 1  ;;  %v25266_v59 = vld [vmem:[#allocation2 + $0x100] sm:$0xff] }
 0x596   : > { %26512 = vst [vmem:[#allocation22_spill] sm:$0xff] %v25266_v59  ;;  %v14840_v48 = vrot.slane %v25266_v59, 4 }
 0x59a   : > { %19219 = vmatmul.mubr.msk.bf16.vlgmr.msra.gmra.mrb[0].mxu0 %vm316_vm2, %v14833_v32  ;;  %v7194_v32 = vshll.u32 %v25096_v9, 16  ;;  %v25270_v9 = vld [vmem:[#allocation2 + $0x108] sm:$0xff] }
 0x59b   : > { %19251 = vmatpush3.bf16.msra.mxu0 %v25074_v60  ;;  %19222 = vmatprep.mubr.msk.bf16.mxu0 %vm316_vm2, %v14835_v47  ;;  %v6937_v60 = vrot.slane %v25252_v21, 1  ;;  %v14837_v47 = vsel %vm3157_vm8, %v14834_v29, %v14836_v52  ;;  %v7193_v21 = vrot.slane %v7191_v45, 1  ;;  %26513 = vst [vmem:[#allocation47_spill] sm:$0xff] %v25270_v9  ;;  %v14842_v29 = vrot.slane %v25270_v9, 4 }
 0x59c   : > { %18389 = vmatmul.mubr.msk.bf16.gmra.mrb[20].mxu1 %vm316_vm2, %v6934_v31  ;;  %19284 = vmatprep.subr.bf16.mxu0 %v25236_v28  ;;  %v14839_v31 = vsel %vm3157_vm8, %v14836_v52, %v14838_v4  ;;  %v7196_v56 = vrot.slane %v7194_v32, 2  ;;  %v6941_v52 = vrot.slane %v6890_v6, 1 }
 0x59d   : > { %18392 = vmatprep.mubr.msk.bf16.mxu1 %vm316_vm2, %v6936_v40  ;;  %v6938_v35 = vsel %vm945_vm7, %v6935_v11, %v6937_v60  ;;  %v6940_v40 = vsel %vm945_vm7, %v6937_v60, %v6939_v10  ;;  %v14841_v60 = vsel %vm3157_vm8, %v14838_v4, %v14840_v48  ;;  %v14843_v45 = vsel %vm3157_vm8, %v14840_v48, %v14842_v29  ;;  %v25287_v48 = vld [vmem:[#allocation2 + $0x118] sm:$0xff] }
 0x59e   : > { %v7197_v11 = vor.u32 %v7196_v56, %v7193_v21  ;;  %v6942_v32 = vsel %vm945_vm7, %v6939_v10, %v6941_v52  ;;  %26518 = vst [vmem:[#allocation30_spill] sm:$0xff] %v25287_v48  ;;  %v14846_v6 = vrot.slane %v25287_v48, 4  ;;  %v7228_v52 = vrot.slane %v26519_v17, 1 }
 0x5a2   : > { %19223 = vmatmul.mubr.msk.bf16.gmra.mrb[4].mxu0 %vm316_vm2, %v14837_v47  ;;  %v26514_v47 = vld [vmem:[#allocation8_spill] sm:$0xff] }
 0x5a3   : > { %19226 = vmatprep.mubr.msk.bf16.mxu0 %vm316_vm2, %v14839_v31  ;;  %v7206_v31 = vsel %vm1226_vm9, %v7197_v11, %v26514_v47  ;;  %v26520_v11 = vld [vmem:[#allocation20_spill] sm:$0xff] }
 0x5a4   : > { %18393 = vmatmul.mubr.msk.bf16.gmra.mrb[24].mxu1 %vm316_vm2, %v6938_v35  ;;  %v26515_v35 = vld [vmem:[#allocation14_spill] sm:$0xff]  ;;  %v26522_v47 = vld [vmem:[#allocation24_spill] sm:$0xff] }
 0x5a5   : > { %18396 = vmatprep.mubr.msk.bf16.mxu1 %vm316_vm2, %v6940_v40  ;;  %v7219_v59 = vrot.slane %v26515_v35, 1  ;;  %v25283_v40 = vld [vmem:[#allocation2 + $0x110] sm:$0xff]  ;;  %v7237_v35 = vrot.slane %v26522_v47, 1  ;;  %v26528_v47 = vld [vmem:[#allocation28_spill] sm:$0xff] }
 0x5a6   : > { %26517 = vst [vmem:[#allocation16_spill] sm:$0xff] %v25283_v40  ;;  %v14844_v56 = vrot.slane %v25283_v40, 4  ;;  %v26523_v40 = vld [vmem:[#allocation25_spill] sm:$0xff] }
 0x5a7   : > { %v7223_v4 = vor.u32 %v7222_v34, %v7219_v59  ;;  %v7240_v48 = vrot.slane %v26523_v40, 2  ;;  %v25301_v34 = vld [vmem:[#allocation2 + $0x120] sm:$0xff]  ;;  %v26527_v40 = vld [vmem:[#allocation6_spill] sm:$0xff] }
 0x5a8   : > { %v14845_v21 = vsel %vm3157_vm8, %v14842_v29, %v14844_v56  ;;  %v14847_v10 = vsel %vm3157_vm8, %v14844_v56, %v14846_v6  ;;  %26524 = vst [vmem:[#allocation17_spill] sm:$0xff] %v25301_v34  ;;  %v14848_v59 = vrot.slane %v25301_v34, 4  ;;  %v26525_v29 = vld [vmem:[#allocation12_spill] sm:$0xff]  ;;  %v26529_v34 = vld [vmem:[#allocation29_spill] sm:$0xff] }
 0x5a9   : > { %v7241_v17 = vor.u32 %v7240_v48, %v7237_v35  ;;  %v7249_v9 = vrot.slane %v26529_v34, 2 }
 0x5aa   : > { %19227 = vmatmul.mubr.msk.bf16.gmra.mrb[8].mxu0 %vm316_vm2, %v14841_v60  ;;  %v7231_v60 = vrot.slane %v26520_v11, 2 }
 0x5ab   : > { %19230 = vmatprep.mubr.msk.bf16.mxu0 %vm316_vm2, %v14843_v45  ;;  %v26521_v45 = vld [vmem:[#allocation7_spill] sm:$0xff] }
 0x5ac   : > { %18397 = vmatmul.mubr.msk.bf16.gmra.mrb[28].mxu1 %vm316_vm2, %v6942_v32  ;;  %v7224_v32 = vsel %vm1226_vm9, %v26521_v45, %v7223_v4 }
 0x5ad   : > { %18402 = vmatprep.mubr.msk.bf16.mxu1 %vm316_vm2, %v7206_v31  ;;  %v25306_v31 = vld [vmem:[#allocation2 + $0x128] sm:$0xff] }
 0x5ae   : > { %26526 = vst [vmem:[#allocation44_spill] sm:$0xff] %v25306_v31  ;;  %v14850_v56 = vrot.slane %v25306_v31, 4  ;;  %v26530_v31 = vld [vmem:[#allocation32_spill] sm:$0xff] }
 0x5b0   : > { %v14851_v11 = vsel %vm3157_vm8, %v14848_v59, %v14850_v56 }
 0x5b2   : > { %19231 = vmatmul.mubr.msk.bf16.gmra.mrb[12].mxu0 %vm316_vm2, %v14845_v21  ;;  %v7232_v21 = vor.u32 %v7231_v60, %v7228_v52  ;;  %v26531_v52 = vld [vmem:[#allocation33_spill] sm:$0xff] }
 0x5b3   : > { %19234 = vmatprep.mubr.msk.bf16.mxu0 %vm316_vm2, %v14847_v10  ;;  %v14849_v10 = vsel %vm3157_vm8, %v14846_v6, %v14848_v59  ;;  %v7258_v48 = vrot.slane %v26531_v52, 2  ;;  %v25322_v60 = vld [vmem:[#allocation2 + $0x130] sm:$0xff]  ;;  %v26535_v52 = vld [vmem:[#allocation38_spill] sm:$0xff] }
 0x5b4   : > { %18403 = vmatmul.mubr.msk.bf16.vlgmr.msra.gmra.mrb[0].mxu1 %vm316_vm2, %v26525_v29  ;;  %v7233_v45 = vsel %vm1226_vm9, %v7223_v4, %v7232_v21  ;;  %v7246_v29 = vrot.slane %v26528_v47, 1  ;;  %26532 = vst [vmem:[#allocation48_spill] sm:$0xff] %v25322_v60  ;;  %v14852_v6 = vrot.slane %v25322_v60, 4  ;;  %v25326_v4 = vld [vmem:[#allocation2 + $0x138] sm:$0xff]  ;;  %v7267_v60 = vrot.slane %v26535_v52, 2 }
 0x5b5   : > { %18435 = vmatpush3.bf16.msra.mxu1 %v25137_v13  ;;  %18406 = vmatprep.mubr.msk.bf16.mxu1 %vm316_vm2, %v7224_v32  ;;  %v7242_v13 = vsel %vm1226_vm9, %v7232_v21, %v7241_v17  ;;  %v7255_v32 = vrot.slane %v26530_v31, 1  ;;  %26533 = vst [vmem:[#allocation13_spill] sm:$0xff] %v25326_v4  ;;  %v14854_v35 = vrot.slane %v25326_v4, 4  ;;  %v7273_v4 = vrot.slane %v26536_v38, 1 }
 0x5b6   : > { %19318 = vmatprep.subr.bf16.mxu1 %v26527_v40  ;;  %v7250_v34 = vor.u32 %v7249_v9, %v7246_v29  ;;  %v14853_v31 = vsel %vm3157_vm8, %v14850_v56, %v14852_v6  ;;  %v25340_v9 = vld [vmem:[#allocation2 + $0x140] sm:$0xff]  ;;  %v25343_v29 = vld [vmem:[#allocation2 + $0x148] sm:$0xff] }
 0x5b7   : > { %v7259_v59 = vor.u32 %v7258_v48, %v7255_v32  ;;  %v14855_v21 = vsel %vm3157_vm8, %v14852_v6, %v14854_v35  ;;  %26538 = vst [vmem:[#allocation31_spill] sm:$0xff] %v25340_v9  ;;  %v14856_v56 = vrot.slane %v25340_v9, 4  ;;  %26539 = vst [vmem:[#allocation70_spill] sm:$0xff] %v25343_v29  ;;  %v15110_v32 = vshrl.u32 %v25193_v5, 16 }
 0x5b8   : > { %v15113_v48 = vshll.u32 %v25193_v5, 16  ;;  %v15117_v9 = vrot.slane %v24652_v3, 4  ;;  %v7285_v5 = vrot.slane %v26541_v18, 2  ;;  %v14860_v3 = vrot.slane %v25174_v24, 4 }
 0x5b9   : > { %v15126_v24 = vrot.slane %v26472_v12, 5 }
 0x5ba   : > { %19235 = vmatmul.mubr.msk.bf16.gmra.mrb[16].mxu0 %vm316_vm2, %v14849_v10  ;;  %v7251_v10 = vsel %vm1226_vm9, %v7241_v17, %v7250_v34  ;;  %v14858_v17 = vrot.slane %v25343_v29, 4  ;;  %v15115_v52 = vrot.slane %v15113_v48, 5  ;;  %v15118_v29 = vrot.slane %v24655_v37, 5 }
 0x5bb   : > { %19238 = vmatprep.mubr.msk.bf16.mxu0 %vm316_vm2, %v14851_v11  ;;  %v26534_v11 = vld [vmem:[#allocation37_spill] sm:$0xff]  ;;  %v15121_v48 = vrot.slane %v26469_v23, 4 }
 0x5bc   : > { %18407 = vmatmul.mubr.msk.bf16.gmra.mrb[4].mxu1 %vm316_vm2, %v7233_v45  ;;  %v7264_v47 = vrot.slane %v26534_v11, 1  ;;  %v7260_v45 = vsel %vm1226_vm9, %v7250_v34, %v7259_v59  ;;  %v15112_v11 = vrot.slane %v15110_v32, 4  ;;  %v14861_v32 = vsel %vm3157_vm8, %v14858_v17, %v14860_v3 }
 0x5bd   : > { %18410 = vmatprep.mubr.msk.bf16.mxu1 %vm316_vm2, %v7242_v13  ;;  %v7276_v13 = vrot.slane %v26537_v58, 2  ;;  %v26540_v58 = vld [vmem:[#allocation50_spill] sm:$0xff]  ;;  %v15130_v3 = vrot.slane %v26476_v16, 5 }
 0x5be   : > { %v7268_v6 = vor.u32 %v7267_v60, %v7264_v47  ;;  %v7282_v38 = vrot.slane %v26540_v58, 1  ;;  %v26543_v47 = vld [vmem:[#allocation52_spill] sm:$0xff]  ;;  %v15116_v37 = vor.u32 %v15115_v52, %v15112_v11  ;;  %v26544_v11 = vld [vmem:[#allocation53_spill] sm:$0xff] }
 0x5bf   : > { %v7277_v34 = vor.u32 %v7276_v13, %v7273_v4  ;;  %v26542_v4 = vld [vmem:[#allocation9_spill] sm:$0xff] }
 0x5c0   : > { %v7286_v13 = vor.u32 %v7285_v5, %v7282_v38  ;;  %v26547_v5 = vld [vmem:[#allocation56_spill] sm:$0xff] }
 0x5c1   : > { %v7278_v60 = vsel %vm1226_vm9, %v7268_v6, %v7277_v34 }
 0x5c2   : > { %19239 = vmatmul.mubr.msk.bf16.gmra.mrb[20].mxu0 %vm316_vm2, %v14853_v31  ;;  %v14857_v31 = vsel %vm3157_vm8, %v14854_v35, %v14856_v56  ;;  %v7291_v35 = vrot.slane %v26542_v4, 1 }
 0x5c3   : > { %19242 = vmatprep.mubr.msk.bf16.mxu0 %vm316_vm2, %v14855_v21  ;;  %v14859_v21 = vsel %vm3157_vm8, %v14856_v56, %v14858_v17  ;;  %v26546_v17 = vld [vmem:[#allocation55_spill] sm:$0xff] }
 0x5c4   : > { %18411 = vmatmul.mubr.msk.bf16.gmra.mrb[8].mxu1 %vm316_vm2, %v7251_v10  ;;  %v7269_v10 = vsel %vm1226_vm9, %v7259_v59, %v7268_v6  ;;  %v15119_v59 = vor.u32 %v15118_v29, %v15117_v9  ;;  %v15122_v6 = vrot.slane %v26470_v25, 5  ;;  %v7300_v9 = vrot.slane %v26544_v11, 1  ;;  %v26545_v29 = vld [vmem:[#allocation54_spill] sm:$0xff] }
 0x5c5   : > { %18414 = vmatprep.mubr.msk.bf16.mxu1 %vm316_vm2, %v7260_v45  ;;  %v7294_v45 = vrot.slane %v26543_v47, 2  ;;  %v7303_v52 = vrot.slane %v26545_v29, 2  ;;  %v7309_v23 = vrot.slane %v26546_v17, 1  ;;  %v7312_v25 = vrot.slane %v26547_v5, 2 }
 0x5c7   : > { %v7295_v56 = vor.u32 %v7294_v45, %v7291_v35  ;;  %v7304_v12 = vor.u32 %v7303_v52, %v7300_v9  ;;  %v15129_v45 = vrot.slane %v26475_v0, 4  ;;  %v26551_v9 = vld [vmem:[#allocation60_spill] sm:$0xff] }
 0x5c8   : > { %v7330_v16 = vrot.slane %v26551_v9, 2  ;;  %v25394_v52 = vld [vmem:[#allocation2 + $0xe8] sm:$0x3] }
 0x5c9   : > { %v7296_v38 = vsel %vm1226_vm9, %v7286_v13, %v7295_v56 }
 0x5ca   : > { %19243 = vmatmul.mubr.msk.bf16.gmra.mrb[24].mxu0 %vm316_vm2, %v14857_v31  ;;  %v15120_v31 = vsel %vm3438_vm11, %v15116_v37, %v15119_v59 }
 0x5cb   : > { %19246 = vmatprep.mubr.msk.bf16.mxu0 %vm316_vm2, %v14859_v21  ;;  %v15125_v21 = vrot.slane %v26471_v27, 4 }
 0x5cc   : > { %18415 = vmatmul.mubr.msk.bf16.gmra.mrb[12].mxu1 %vm316_vm2, %v7269_v10  ;;  %v7287_v10 = vsel %vm1226_vm9, %v7277_v34, %v7286_v13  ;;  %v7313_v34 = vor.u32 %v7312_v25, %v7309_v23  ;;  %v15133_v13 = vrot.slane %v26477_v8, 4  ;;  %v15131_v8 = vor.u32 %v15130_v3, %v15129_v45 }
 0x5cd   : > { %18418 = vmatprep.mubr.msk.bf16.mxu1 %vm316_vm2, %v7278_v60  ;;  %v15123_v60 = vor.u32 %v15122_v6, %v15121_v48  ;;  %v15127_v27 = vor.u32 %v15126_v24, %v15125_v21  ;;  %v7305_v48 = vsel %vm1226_vm9, %v7295_v56, %v7304_v12  ;;  %v26548_v6 = vld [vmem:[#allocation57_spill] sm:$0xff]  ;;  %v26549_v21 = vld [vmem:[#allocation58_spill] sm:$0xff]  ;;  %v7337_v23 = vshll.u32 %v25394_v52, 16 }
 0x5ce   : > { %v7321_v24 = vrot.slane %v26549_v21, 2  ;;  %v15141_v45 = vrot.slane %v26483_v2, 4  ;;  %v15142_v3 = vrot.slane %v26484_v41, 5  ;;  %v21045_v2 = vld [vmem:[#allocation2 + $0x68] sm:$0xfc]  ;;  %v7592_v41 = vrot.slane %v25103_v53, 2 }
 0x5cf   : > { %v15124_v35 = vsel %vm3438_vm11, %v15119_v59, %v15123_v60  ;;  %v15128_v37 = vsel %vm3438_vm11, %v15123_v60, %v15127_v27  ;;  %v7314_v59 = vsel %vm1226_vm9, %v7304_v12, %v7313_v34  ;;  %v15132_v60 = vsel %vm3438_vm11, %v15127_v27, %v15131_v8 }
 0x5d0   : > { %v15137_v12 = vrot.slane %v26481_v55, 4  ;;  %v15143_v55 = vor.u32 %v15142_v3, %v15141_v45  ;;  %v15162_v45 = vrot.slane %v26492_v7, 5  ;;  %v7602_v7 = vrot.slane %v25162_v42, 2 }
 0x5d2   : > { %19247 = vmatmul.mubr.msk.bf16.gmra.mrb[28].mxu0 %vm316_vm2, %v14861_v32  ;;  %v15134_v32 = vrot.slane %v26478_v44, 5 }
 0x5d3   : > { %19252 = vmatprep.mubr.msk.bf16.mxu0 %vm316_vm2, %v15120_v31  ;;  %v7318_v31 = vrot.slane %v26548_v6, 1 }
 0x5d4   : > { %18419 = vmatmul.mubr.msk.bf16.gmra.mrb[16].mxu1 %vm316_vm2, %v7287_v10  ;;  %v26550_v10 = vld [vmem:[#allocation59_spill] sm:$0xff]  ;;  %v15135_v44 = vor.u32 %v15134_v32, %v15133_v13  ;;  %v7339_v32 = vrot.slane %v7337_v23, 2  ;;  %v15154_v23 = vrot.slane %v26489_v57, 5  ;;  %v7598_v57 = vrot.slane %v25143_v62, 2 }
 0x5d5   : > { %18422 = vmatprep.mubr.msk.bf16.mxu1 %vm316_vm2, %v7296_v38  ;;  %v7327_v0 = vrot.slane %v26550_v10, 1  ;;  %v7322_v56 = vor.u32 %v7321_v24, %v7318_v31  ;;  %v7334_v38 = vshrl.u32 %v25394_v52, 16  ;;  %v7591_v31 = vrot.slane %v21045_v2, 2  ;;  %v25464_v2 = vld [vmem:[#allocation2 + $0x150] sm:$0x1f] }
 0x5d6   : > { %v15145_v24 = vrot.slane %v24787_v19, 4 }
 0x5d7   : > { %v7331_v25 = vor.u32 %v7330_v16, %v7327_v0  ;;  %v7336_v13 = vrot.slane %v7334_v38, 1  ;;  %v15149_v16 = vrot.slane %v26487_v39, 4  ;;  %v7593_v38 = vsel %vm1553_vm10, %v7591_v31, %v7592_v41 }
 0x5d8   : > { %v7596_v39 = vrot.slane %v25121_v63, 2 }
 0x5da   : > { %19253 = vmatmul.mubr.msk.bf16.vlgmr.msra.gmra.mrb[0].mxu0 %vm316_vm2, %v15124_v35  ;;  %v15136_v35 = vsel %vm3438_vm11, %v15131_v8, %v15135_v44  ;;  %v15150_v8 = vrot.slane %v26488_v1, 5 }
 0x5db   : > { %19285 = vmatpush3.bf16.msra.mxu0 %v25236_v28  ;;  %19256 = vmatprep.mubr.msk.bf16.mxu0 %vm316_vm2, %v15128_v37  ;;  %v15138_v28 = vrot.slane %v26482_v15, 5  ;;  %v7323_v37 = vsel %vm1226_vm9, %v7313_v34, %v7322_v56  ;;  %v7340_v15 = vor.u32 %v7339_v32, %v7336_v13  ;;  %v15166_v13 = vrot.slane %v26494_v30, 5 }
 0x5dc   : > { %18423 = vmatmul.mubr.msk.bf16.gmra.mrb[20].mxu1 %vm316_vm2, %v7305_v48  ;;  %v7332_v48 = vsel %vm1226_vm9, %v7322_v56, %v7331_v25  ;;  %v15151_v19 = vor.u32 %v15150_v8, %v15149_v16  ;;  %v15169_v32 = vrot.slane %v26495_v43, 4  ;;  %v15178_v43 = vshrl.u32 %v25464_v2, 16 }
 0x5dd   : > { %18426 = vmatprep.mubr.msk.bf16.mxu1 %vm316_vm2, %v7314_v59  ;;  %v15139_v27 = vor.u32 %v15138_v28, %v15137_v12  ;;  %v15146_v59 = vrot.slane %v26486_v49, 5  ;;  %v7341_v56 = vsel %vm1226_vm9, %v7331_v25, %v7340_v15  ;;  %v7594_v49 = vrot.slane %v25118_v14, 2 }
 0x5de   : > { %v15158_v12 = vrot.slane %v26491_v51, 5  ;;  %v15174_v15 = vrot.slane %v26498_v22, 5  ;;  %v26552_v22 = vld [vmem:[#allocation69_spill] sm:$0xff] }
 0x5df   : > { %v15140_v34 = vsel %vm3438_vm11, %v15135_v44, %v15139_v27  ;;  %v15144_v0 = vsel %vm3438_vm11, %v15139_v27, %v15143_v55  ;;  %v15147_v53 = vor.u32 %v15146_v59, %v15145_v24  ;;  %v15153_v44 = vrot.slane %v24823_v20, 4 }
 0x5e0   : > { %v7595_v28 = vsel %vm1553_vm10, %v7592_v41, %v7594_v49  ;;  %v7597_v14 = vsel %vm1553_vm10, %v7594_v49, %v7596_v39  ;;  %v7606_v41 = vrot.slane %v26552_v22, 2 }
 0x5e1   : > { %v15148_v1 = vsel %vm3438_vm11, %v15143_v55, %v15147_v53  ;;  %v15152_v25 = vsel %vm3438_vm11, %v15147_v53, %v15151_v19  ;;  %v15155_v63 = vor.u32 %v15154_v23, %v15153_v44  ;;  %v15173_v55 = vrot.slane %v26497_v33, 4  ;;  %v26555_v44 = vld [vmem:[#allocation63_spill] sm:$0xff] }
 0x5e2   : > { %19257 = vmatmul.mubr.msk.bf16.gmra.mrb[4].mxu0 %vm316_vm2, %v15132_v60  ;;  %v15157_v60 = vrot.slane %v26490_v46, 4  ;;  %v7600_v46 = vrot.slane %v25146_v54, 2  ;;  %v7610_v23 = vrot.slane %v26555_v44, 2  ;;  %v26570_v44 = vld [vmem:[#allocation16_spill] sm:$0xff] }
 0x5e3   : > { %19260 = vmatprep.mubr.msk.bf16.mxu0 %vm316_vm2, %v15136_v35  ;;  %v15156_v51 = vsel %vm3438_vm11, %v15151_v19, %v15155_v63  ;;  %v15161_v35 = vrot.slane %v24858_v36, 4  ;;  %v15175_v33 = vor.u32 %v15174_v15, %v15173_v55 }
 0x5e4   : > { %18427 = vmatmul.mubr.msk.bf16.gmra.mrb[24].mxu1 %vm316_vm2, %v7323_v37  ;;  %v15159_v20 = vor.u32 %v15158_v12, %v15157_v60  ;;  %v15165_v37 = vrot.slane %v26493_v61, 4  ;;  %v7601_v62 = vsel %vm1553_vm10, %v7598_v57, %v7600_v46  ;;  %v7604_v61 = vrot.slane %v25165_v26, 2 }
 0x5e5   : > { %18430 = vmatprep.mubr.msk.bf16.mxu1 %vm316_vm2, %v7332_v48  ;;  %v15163_v54 = vor.u32 %v15162_v45, %v15161_v35  ;;  %v15170_v48 = vrot.slane %v26496_v50, 5  ;;  %v7603_v31 = vsel %vm1553_vm10, %v7600_v46, %v7602_v7  ;;  %v15181_v50 = vshll.u32 %v25464_v2, 16  ;;  %v26558_v46 = vld [vmem:[#allocation66_spill] sm:$0xff]  ;;  %v26559_v35 = vld [vmem:[#allocation67_spill] sm:$0xff] }
 0x5e6   : > { %v15160_v3 = vsel %vm3438_vm11, %v15155_v63, %v15159_v20  ;;  %v15167_v36 = vor.u32 %v15166_v13, %v15165_v37  ;;  %v7605_v42 = vsel %vm1553_vm10, %v7602_v7, %v7604_v61  ;;  %v7614_v45 = vrot.slane %v26559_v35, 2  ;;  %v26573_v35 = vld [vmem:[#allocation44_spill] sm:$0xff] }
 0x5e7   : > { %v15164_v30 = vsel %vm3438_vm11, %v15159_v20, %v15163_v54  ;;  %v15171_v26 = vor.u32 %v15170_v48, %v15169_v32  ;;  %v15183_v16 = vrot.slane %v15181_v50, 5  ;;  %v26557_v20 = vld [vmem:[#allocation65_spill] sm:$0xff] }
 0x5e8   : > { %v15168_v27 = vsel %vm3438_vm11, %v15163_v54, %v15167_v36  ;;  %v26563_v32 = vld [vmem:[#allocation41_spill] sm:$0xff] }
 0x5e9   : > { %v15172_v59 = vsel %vm3438_vm11, %v15167_v36, %v15171_v26  ;;  %v15176_v8 = vsel %vm3438_vm11, %v15171_v26, %v15175_v33  ;;  %v26561_v36 = vld [vmem:[#allocation11_spill] sm:$0xff]  ;;  %v7618_v48 = vrot.slane %v26563_v32, 2 }
 0x5ea   : > { %19261 = vmatmul.mubr.msk.bf16.gmra.mrb[8].mxu0 %vm316_vm2, %v15140_v34  ;;  %v26553_v34 = vld [vmem:[#allocation61_spill] sm:$0xff]  ;;  %v15442_v7 = vrot.slane %v26561_v36, 5  ;;  %v26574_v36 = vld [vmem:[#allocation48_spill] sm:$0xff] }
 0x5eb   : > { %19264 = vmatprep.mubr.msk.bf16.mxu0 %vm316_vm2, %v15144_v0  ;;  %v7608_v24 = vrot.slane %v26553_v34, 2  ;;  %v15180_v0 = vrot.slane %v15178_v43, 4  ;;  %v26565_v43 = vld [vmem:[#allocation42_spill] sm:$0xff] }
 0x5ec   : > { %18431 = vmatmul.mubr.msk.bf16.gmra.mrb[28].mxu1 %vm316_vm2, %v7341_v56  ;;  %v7607_v56 = vsel %vm1553_vm10, %v7604_v61, %v7606_v41  ;;  %v26562_v61 = vld [vmem:[#allocation18_spill] sm:$0xff]  ;;  %v7911_v50 = vrot.slane %v26565_v43, 2 }
 0x5ed   : > { %18436 = vmatprep.mubr.msk.bf16.mxu1 %vm316_vm2, %v7593_v38  ;;  %v15430_v38 = vld [vmem:[#allocation2 + $0xd0] sm:$0xe0]  ;;  %v7609_v53 = vsel %vm1553_vm10, %v7606_v41, %v7608_v24  ;;  %v15184_v19 = vor.u32 %v15183_v16, %v15180_v0  ;;  %v26567_v41 = vld [vmem:[#allocation22_spill] sm:$0xff]  ;;  %v7622_v0 = vrot.slane %v25394_v52, 2  ;;  %v7920_v52 = vrot.slane %v26543_v47, 3 }
 0x5ee   : > { %v15435_v49 = vrot.slane %v15430_v38, 5  ;;  %v15446_v34 = vrot.slane %v26567_v41, 5  ;;  %v7923_v47 = vrot.slane %v26544_v11, 2 }
 0x5ef   : > { %v15185_v12 = vsel %vm3438_vm11, %v15175_v33, %v15184_v19  ;;  %v26566_v33 = vld [vmem:[#allocation49_spill] sm:$0xff]  ;;  %v7916_v19 = vrot.slane %v26541_v18, 3 }
 0x5f0   : > { %v7912_v22 = vrot.slane %v26566_v33, 3 }
 0x5f2   : > { %19265 = vmatmul.mubr.msk.bf16.gmra.mrb[12].mxu0 %vm316_vm2, %v15148_v1  ;;  %v7913_v16 = vor.u32 %v7912_v22, %v7911_v50  ;;  %v26577_v50 = vld [vmem:[#allocation70_spill] sm:$0xff] }
 0x5f3   : > { %19268 = vmatprep.mubr.msk.bf16.mxu0 %vm316_vm2, %v15152_v25  ;;  %v26556_v25 = vld [vmem:[#allocation64_spill] sm:$0xff]  ;;  %v15464_v33 = vrot.slane %v26577_v50, 5 }
 0x5f4   : > { %18437 = vmatmul.mubr.msk.bf16.vlgmr.msra.gmra.mrb[0].mxu1 %vm316_vm2, %v7595_v28  ;;  %v7612_v60 = vrot.slane %v26556_v25, 2  ;;  %v26571_v25 = vld [vmem:[#allocation30_spill] sm:$0xff] }
 0x5f5   : > { %19319 = vmatpush3.bf16.msra.mxu1 %v26527_v40  ;;  %18440 = vmatprep.mubr.msk.bf16.mxu1 %vm316_vm2, %v7597_v14  ;;  %v7599_v40 = vsel %vm1553_vm10, %v7596_v39, %v7598_v57  ;;  %v26554_v39 = vld [vmem:[#allocation62_spill] sm:$0xff]  ;;  %v7611_v14 = vsel %vm1553_vm10, %v7608_v24, %v7610_v23  ;;  %v15438_v57 = vrot.slane %v26557_v20, 5  ;;  %v26568_v24 = vld [vmem:[#allocation47_spill] sm:$0xff]  ;;  %v7927_v20 = vrot.slane %v26546_v17, 2 }
 0x5f6   : > { %v15436_v1 = vrot.slane %v26554_v39, 5  ;;  %v7613_v63 = vsel %vm1553_vm10, %v7610_v23, %v7612_v60  ;;  %v15450_v23 = vrot.slane %v26570_v44, 5 }
 0x5f8   : > { %v15437_v28 = vsel %vm3765_vm12, %v15435_v49, %v15436_v1  ;;  %v15439_v13 = vsel %vm3765_vm12, %v15436_v1, %v15438_v57  ;;  %v26569_v49 = vld [vmem:[#allocation45_spill] sm:$0xff]  ;;  %v7919_v1 = vrot.slane %v26542_v4, 2 }
 0x5f9   : > { %v7914_v39 = vsel %vm1834_vm4, %v26569_v49, %v7913_v16 }
 0x5fa   : > { %19269 = vmatmul.mubr.msk.bf16.gmra.mrb[16].mxu0 %vm316_vm2, %v15156_v51  ;;  %v15440_v51 = vrot.slane %v26558_v46, 5  ;;  %v26572_v46 = vld [vmem:[#allocation17_spill] sm:$0xff] }
 0x5fb   : > { %19272 = vmatprep.mubr.msk.bf16.mxu0 %vm316_vm2, %v15160_v3  ;;  %v26560_v3 = vld [vmem:[#allocation43_spill] sm:$0xff] }
 0x5fc   : > { %18441 = vmatmul.mubr.msk.bf16.gmra.mrb[4].mxu1 %vm316_vm2, %v7599_v40  ;;  %v7616_v37 = vrot.slane %v26560_v3, 2  ;;  %v15441_v40 = vsel %vm3765_vm12, %v15438_v57, %v15440_v51  ;;  %v15443_v15 = vsel %vm3765_vm12, %v15440_v51, %v15442_v7  ;;  %v7928_v57 = vrot.slane %v26547_v5, 3 }
 0x5fd   : > { %18444 = vmatprep.mubr.msk.bf16.mxu1 %vm316_vm2, %v7601_v62  ;;  %v7615_v62 = vsel %vm1553_vm10, %v7612_v60, %v7614_v45  ;;  %v15452_v60 = vrot.slane %v26571_v25, 5  ;;  %v15454_v51 = vrot.slane %v26572_v46, 5  ;;  %v7931_v5 = vrot.slane %v26548_v6, 2 }
 0x5fe   : > { %v7617_v54 = vsel %vm1553_vm10, %v7614_v45, %v7616_v37  ;;  %v15456_v45 = vrot.slane %v26573_v35, 5 }
 0x5ff   : > { %v15455_v3 = vsel %vm3765_vm12, %v15452_v60, %v15454_v51 }
 0x602   : > { %19273 = vmatmul.mubr.msk.bf16.gmra.mrb[20].mxu0 %vm316_vm2, %v15164_v30  ;;  %v15444_v30 = vrot.slane %v26562_v61, 5  ;;  %v26575_v61 = vld [vmem:[#allocation13_spill] sm:$0xff] }
 0x603   : > { %19276 = vmatprep.mubr.msk.bf16.mxu0 %vm316_vm2, %v15168_v27  ;;  %v26564_v27 = vld [vmem:[#allocation46_spill] sm:$0xff] }
 0x604   : > { %18445 = vmatmul.mubr.msk.bf16.gmra.mrb[8].mxu1 %vm316_vm2, %v7603_v31  ;;  %v7620_v55 = vrot.slane %v26564_v27, 2  ;;  %v15445_v31 = vsel %vm3765_vm12, %v15442_v7, %v15444_v30  ;;  %v15458_v7 = vrot.slane %v26574_v36, 5 }
 0x605   : > { %18448 = vmatprep.mubr.msk.bf16.mxu1 %vm316_vm2, %v7605_v42  ;;  %v7619_v42 = vsel %vm1553_vm10, %v7616_v37, %v7618_v48  ;;  %v15457_v37 = vsel %vm3765_vm12, %v15454_v51, %v15456_v45 }
 0x606   : > { %v7621_v26 = vsel %vm1553_vm10, %v7618_v48, %v7620_v55  ;;  %v7623_v38 = vsel %vm1553_vm10, %v7620_v55, %v7622_v0  ;;  %v15459_v55 = vsel %vm3765_vm12, %v15456_v45, %v15458_v7 }
 0x60a   : > { %19277 = vmatmul.mubr.msk.bf16.gmra.mrb[24].mxu0 %vm316_vm2, %v15172_v59  ;;  %v15448_v59 = vrot.slane %v26568_v24, 5 }
 0x60b   : > { %19280 = vmatprep.mubr.msk.bf16.mxu0 %vm316_vm2, %v15176_v8  ;;  %v15447_v8 = vsel %vm3765_vm12, %v15444_v30, %v15446_v34  ;;  %v15460_v30 = vrot.slane %v26575_v61, 5 }
 0x60c   : > { %18449 = vmatmul.mubr.msk.bf16.gmra.mrb[12].mxu1 %vm316_vm2, %v7607_v56  ;;  %v15449_v56 = vsel %vm3765_vm12, %v15446_v34, %v15448_v59 }
 0x60d   : > { %18452 = vmatprep.mubr.msk.bf16.mxu1 %vm316_vm2, %v7609_v53  ;;  %v7915_v53 = vrot.slane %v26540_v58, 2  ;;  %v7921_v58 = vor.u32 %v7920_v52, %v7919_v1 }
 0x60f   : > { %v7917_v18 = vor.u32 %v7916_v19, %v7915_v53 }
 0x611   : > { %v7918_v4 = vsel %vm1834_vm4, %v7913_v16, %v7917_v18 }
 0x612   : > { %19281 = vmatmul.mubr.msk.bf16.gmra.mrb[28].mxu0 %vm316_vm2, %v15185_v12  ;;  %v15451_v12 = vsel %vm3765_vm12, %v15448_v59, %v15450_v23  ;;  %v15466_v59 = vrot.slane %v25464_v2, 5 }
 0x613   : > { %19286 = vmatprep.mubr.msk.bf16.mxu0 %vm316_vm2, %v15437_v28  ;;  %v15453_v28 = vsel %vm3765_vm12, %v15450_v23, %v15452_v60 }
 0x614   : > { %18453 = vmatmul.mubr.msk.bf16.gmra.mrb[16].mxu1 %vm316_vm2, %v7611_v14  ;;  %v7924_v14 = vrot.slane %v26545_v29, 3  ;;  %v7929_v29 = vor.u32 %v7928_v57, %v7927_v20  ;;  %v15467_v0 = vsel %vm3765_vm12, %v15464_v33, %v15466_v59 }
 0x615   : > { %18456 = vmatprep.mubr.msk.bf16.mxu1 %vm316_vm2, %v7613_v63  ;;  %v7922_v63 = vsel %vm1834_vm4, %v7917_v18, %v7921_v58 }
 0x616   : > { %v7925_v11 = vor.u32 %v7924_v14, %v7923_v47 }
 0x618   : > { %v7926_v17 = vsel %vm1834_vm4, %v7921_v58, %v7925_v11 }
 0x61a   : > { %19287 = vmatmul.mubr.msk.bf16.vlgmr.msra.gmra.mrb[0].mxu0 %vm316_vm2, %v15439_v13  ;;  %v7932_v13 = vrot.slane %v26549_v21, 3  ;;  %v21046_v21 = vld [vmem:[#allocation2 + $0xe8] sm:$0x7] }
 0x61b   : > { %19290 = vmatprep.mubr.msk.bf16.mxu0 %vm316_vm2, %v15441_v40  ;;  %v7930_v40 = vsel %vm1834_vm4, %v7925_v11, %v7929_v29  ;;  %v7940_v32 = vshrl.u32 %v21046_v21, 16  ;;  %v7943_v48 = vshll.u32 %v21046_v21, 16 }
 0x61c   : > { %18457 = vmatmul.mubr.msk.bf16.gmra.mrb[20].mxu1 %vm316_vm2, %v7615_v62  ;;  %v7935_v62 = vrot.slane %v26550_v10, 2  ;;  %v7933_v6 = vor.u32 %v7932_v13, %v7931_v5  ;;  %v15461_v10 = vsel %vm3765_vm12, %v15458_v7, %v15460_v30 }
 0x61d   : > { %18460 = vmatprep.mubr.msk.bf16.mxu1 %vm316_vm2, %v7617_v54  ;;  %v7936_v54 = vrot.slane %v26551_v9, 3 }
 0x61e   : > { %v7934_v9 = vsel %vm1834_vm4, %v7929_v29, %v7933_v6 }
 0x61f   : > { %v7937_v27 = vor.u32 %v7936_v54, %v7935_v62 }
 0x622   : > { %19291 = vmatmul.mubr.msk.bf16.gmra.mrb[4].mxu0 %vm316_vm2, %v15443_v15  ;;  %v7942_v15 = vrot.slane %v7940_v32, 2 }
 0x623   : > { %19294 = vmatprep.mubr.msk.bf16.mxu0 %vm316_vm2, %v15445_v31  ;;  %v7945_v31 = vrot.slane %v7943_v48, 3 }
 0x624   : > { %18461 = vmatmul.mubr.msk.bf16.gmra.mrb[24].mxu1 %vm316_vm2, %v7619_v42  ;;  %v7938_v42 = vsel %vm1834_vm4, %v7933_v6, %v7937_v27 }
 0x625   : > { %18464 = vmatprep.mubr.msk.bf16.mxu1 %vm316_vm2, %v7621_v26  ;;  %v26576_v26 = vld [vmem:[#allocation31_spill] sm:$0xff]  ;;  %v7946_v22 = vor.u32 %v7945_v31, %v7942_v15 }
 0x626   : > { %v15462_v43 = vrot.slane %v26576_v26, 5 }
 0x627   : > { %v7947_v24 = vsel %vm1834_vm4, %v7937_v27, %v7946_v22 }
 0x628   : > { %v15463_v41 = vsel %vm3765_vm12, %v15460_v30, %v15462_v43  ;;  %v15465_v34 = vsel %vm3765_vm12, %v15462_v43, %v15464_v33 }
 0x62a   : > { %19295 = vmatmul.mubr.msk.bf16.gmra.mrb[8].mxu0 %vm316_vm2, %v15447_v8 }
 0x62b   : > { %19298 = vmatprep.mubr.msk.bf16.mxu0 %vm316_vm2, %v15449_v56 }
 0x62c   : > { %18465 = vmatmul.mubr.msk.bf16.gmra.mrb[28].mxu1 %vm316_vm2, %v7623_v38 }
 0x62d   : > { %18486 = vmatprep.mubr.msk.bf16.mxu1 %vm316_vm2, %v7914_v39 }
 0x632   : > { %19299 = vmatmul.mubr.msk.bf16.gmra.mrb[12].mxu0 %vm316_vm2, %v15451_v12  ;;  %v25606_v12 = vld [vmem:[%s25750_s2] ss:$0 sm:$0xff] }
 0x633   : > { %19302 = vmatprep.mubr.msk.bf16.mxu0 %vm316_vm2, %v15453_v28 }
 0x634   : > { %18487 = vmatmul.mubr.msk.bf16.vlgmr.msra.gmra.mrb[16].mxu1 %vm316_vm2, %v7918_v4 }
 0x635   : > { %18490 = vmatprep.mubr.msk.bf16.mxu1 %vm316_vm2, %v7922_v63 }
 0x63a   : > { %19303 = vmatmul.mubr.msk.bf16.gmra.mrb[16].mxu0 %vm316_vm2, %v15455_v3 }
 0x63b   : > { %19306 = vmatprep.mubr.msk.bf16.mxu0 %vm316_vm2, %v15457_v37 }
 0x63c   : > { %18491 = vmatmul.mubr.msk.bf16.gmra.mrb[20].mxu1 %vm316_vm2, %v7926_v17 }
 0x63d   : > { %18494 = vmatprep.mubr.msk.bf16.mxu1 %vm316_vm2, %v7930_v40 }
 0x642   : > { %19307 = vmatmul.mubr.msk.bf16.gmra.mrb[20].mxu0 %vm316_vm2, %v15459_v55 }
 0x643   : > { %19310 = vmatprep.mubr.msk.bf16.mxu0 %vm316_vm2, %v15461_v10 }
 0x644   : > { %18495 = vmatmul.mubr.msk.bf16.gmra.mrb[24].mxu1 %vm316_vm2, %v7934_v9 }
 0x645   : > { %18498 = vmatprep.mubr.msk.bf16.mxu1 %vm316_vm2, %v7938_v42 }
 0x64a   : > { %19311 = vmatmul.mubr.msk.bf16.gmra.mrb[24].mxu0 %vm316_vm2, %v15463_v41 }
 0x64b   : > { %19314 = vmatprep.mubr.msk.bf16.mxu0 %vm316_vm2, %v15465_v34 }
 0x64c   : > { %18499 = vmatmul.mubr.msk.bf16.gmra.mrb[28].mxu1 %vm316_vm2, %v7947_v24 }
 0x652   : > { %19315 = vmatmul.mubr.msk.bf16.gmra.mrb[28].mxu0 %vm316_vm2, %v15467_v0 }
 0x6c7   : > { %v18438_v16 = vpop.f32.mrb[0].mxu1 }
 0x6c8   : > { %v7709_v8 = vpop.f32.mrb[1].mxu1 }
 0x6c9   : > { %v18439_v56 = vpop.f32.mrb[2].mxu1 }
 0x6ca   : > { %v7712_v38 = vpop.f32.mrb[3].mxu1 }
 0x6cf   : > { %v18442_v53 = vpop.f32.mrb[4].mxu1 }
 0x6d0   : > { %v7725_v19 = vpop.f32.mrb[5].mxu1 }
 0x6d1   : > { %v18443_v49 = vpop.f32.mrb[6].mxu1 }
 0x6d2   : > { %v7728_v39 = vpop.f32.mrb[7].mxu1 }
 0x6d7   : > { %v25586_v1 = vpop.f32.mrb[8].mxu1 }
 0x6d8   : > { %v25588_v52 = vpop.f32.mrb[9].mxu1 }
 0x6d9   : > { %v25590_v2 = vpop.f32.mrb[10].mxu1 }
 0x6da   : > { %v25592_v44 = vpop.f32.mrb[11].mxu1 }
 0x6df   : > { %v25594_v23 = vpop.f32.mrb[12].mxu1 }
 0x6e0   : > { %v25596_v25 = vpop.f32.mrb[13].mxu1 }
 0x6e1   : > { %v25598_v60 = vpop.f32.mrb[14].mxu1 }
 0x6e2   : > { %v25600_v18 = vpop.f32.mrb[15].mxu1 }
 0x6ed   : > { %v19288_v58 = vpop.f32.mrb[0].mxu0 }
 0x6ee   : > { %v19320_v28 = vadd.f32 %v19288_v58, %v18438_v16  ;;  %v15553_v4 = vpop.f32.mrb[1].mxu0 }
 0x6ef   : > { %v19321_v47 = vadd.f32 %v15553_v4, %v7709_v8  ;;  %v19289_v14 = vpop.f32.mrb[2].mxu0 }
 0x6f0   : > { %v15721_v63 = vadd.f32 %v19320_v28, %v25606_v12  ;;  %v19322_v20 = vadd.f32 %v19289_v14, %v18439_v56  ;;  %v15556_v57 = vpop.f32.mrb[3].mxu0 }
 0x6f1   : > { %v15719_v46 = vadd.f32 %v19321_v47, %v25606_v12  ;;  %v19323_v51 = vadd.f32 %v15556_v57, %v7712_v38 }
 0x6f2   : > { %vm15753_vm0 = vcmp.ge.f32.partialorder %v15721_v63, 0.0  ;;  %v15785_v35 = vmul.f32 0.1, %v15721_v63  ;;  %v15722_v45 = vadd.f32 %v19322_v20, %v25606_v12 }
 0x6f3   : > { %vm15751_vm1 = vcmp.ge.f32.partialorder %v15719_v46, 0.0  ;;  %v15783_v11 = vmul.f32 0.1, %v15719_v46  ;;  %v15720_v29 = vadd.f32 %v19323_v51, %v25606_v12 }
 0x6f4   : > { %v15817_v3 = vsel %vm15753_vm0, %v15721_v63, %v15785_v35  ;;  %vm15754_vm2 = vcmp.ge.f32.partialorder %v15722_v45, 0.0  ;;  %v15786_v37 = vmul.f32 0.1, %v15722_v45 }
 0x6f5   : > { %15849 = vst [vmem:[%s25614_s6 + $0x10] sm:$0xff] %v15817_v3  ;;  %v15815_v17 = vsel %vm15751_vm1, %v15719_v46, %v15783_v11  ;;  %vm15752_vm3 = vcmp.ge.f32.partialorder %v15720_v29, 0.0  ;;  %v15784_v5 = vmul.f32 0.1, %v15720_v29  ;;  %v19292_v13 = vpop.f32.mrb[4].mxu0 }
 0x6f6   : > { %15847 = vst [vmem:[%s25614_s6] sm:$0xff] %v15815_v17  ;;  %v15818_v40 = vsel %vm15754_vm2, %v15722_v45, %v15786_v37  ;;  %v19324_v62 = vadd.f32 %v19292_v13, %v18442_v53  ;;  %v15569_v54 = vpop.f32.mrb[5].mxu0 }
 0x6f7   : > { %15850 = vst [vmem:[%s25614_s6 + $0x18] sm:$0xff] %v15818_v40  ;;  %v15816_v36 = vsel %vm15752_vm3, %v15720_v29, %v15784_v5  ;;  %v19325_v7 = vadd.f32 %v15569_v54, %v7725_v19  ;;  %v19293_v61 = vpop.f32.mrb[6].mxu0 }
 0x6f8   : > { %15848 = vst [vmem:[%s25614_s6 + $0x8] sm:$0xff] %v15816_v36  ;;  %v15725_v30 = vadd.f32 %v19324_v62, %v25606_v12  ;;  %v19326_v6 = vadd.f32 %v19293_v61, %v18443_v49  ;;  %v15572_v21 = vpop.f32.mrb[7].mxu0 }
 0x6f9   : > { %v15723_v32 = vadd.f32 %v19325_v7, %v25606_v12  ;;  %v19327_v48 = vadd.f32 %v15572_v21, %v7728_v39 }
 0x6fa   : > { %vm15757_vm4 = vcmp.ge.f32.partialorder %v15725_v30, 0.0  ;;  %v15789_v27 = vmul.f32 0.1, %v15725_v30  ;;  %v15726_v55 = vadd.f32 %v19326_v6, %v25606_v12 }
 0x6fb   : > { %vm15755_vm5 = vcmp.ge.f32.partialorder %v15723_v32, 0.0  ;;  %v15787_v10 = vmul.f32 0.1, %v15723_v32  ;;  %v15724_v9 = vadd.f32 %v19327_v48, %v25606_v12 }
 0x6fc   : > { %v15821_v15 = vsel %vm15757_vm4, %v15725_v30, %v15789_v27  ;;  %vm15758_vm6 = vcmp.ge.f32.partialorder %v15726_v55, 0.0  ;;  %v15790_v31 = vmul.f32 0.1, %v15726_v55 }
 0x6fd   : > { %15853 = vst [vmem:[%s25614_s6 + $0x30] sm:$0xff] %v15821_v15  ;;  %v15819_v42 = vsel %vm15755_vm5, %v15723_v32, %v15787_v10  ;;  %vm15756_vm7 = vcmp.ge.f32.partialorder %v15724_v9, 0.0  ;;  %v15788_v26 = vmul.f32 0.1, %v15724_v9  ;;  %v19296_v43 = vpop.f32.mrb[8].mxu0 }
 0x6fe   : > { %15851 = vst [vmem:[%s25614_s6 + $0x20] sm:$0xff] %v15819_v42  ;;  %v15822_v50 = vsel %vm15758_vm6, %v15726_v55, %v15790_v31  ;;  %v19328_v33 = vadd.f32 %v19296_v43, %v25586_v1  ;;  %v15585_v22 = vpop.f32.mrb[9].mxu0 }
 0x6ff   : > { %15854 = vst [vmem:[%s25614_s6 + $0x38] sm:$0xff] %v15822_v50  ;;  %v15820_v41 = vsel %vm15756_vm7, %v15724_v9, %v15788_v26  ;;  %v19329_v34 = vadd.f32 %v15585_v22, %v25588_v52  ;;  %v19297_v24 = vpop.f32.mrb[10].mxu0 }
 0x700   : > { %15852 = vst [vmem:[%s25614_s6 + $0x28] sm:$0xff] %v15820_v41  ;;  %v15729_v59 = vadd.f32 %v19328_v33, %v25606_v12  ;;  %v19330_v0 = vadd.f32 %v19297_v24, %v25590_v2  ;;  %v15588_v16 = vpop.f32.mrb[11].mxu0 }
 0x701   : > { %v15727_v8 = vadd.f32 %v19329_v34, %v25606_v12  ;;  %v19331_v56 = vadd.f32 %v15588_v16, %v25592_v44 }
 0x702   : > { %vm15761_vm8 = vcmp.ge.f32.partialorder %v15729_v59, 0.0  ;;  %v15793_v38 = vmul.f32 0.1, %v15729_v59  ;;  %v15730_v53 = vadd.f32 %v19330_v0, %v25606_v12 }
 0x703   : > { %vm15759_vm9 = vcmp.ge.f32.partialorder %v15727_v8, 0.0  ;;  %v15791_v19 = vmul.f32 0.1, %v15727_v8  ;;  %v15728_v49 = vadd.f32 %v19331_v56, %v25606_v12 }
 0x704   : > { %v15825_v39 = vsel %vm15761_vm8, %v15729_v59, %v15793_v38  ;;  %vm15762_vm10 = vcmp.ge.f32.partialorder %v15730_v53, 0.0  ;;  %v15794_v1 = vmul.f32 0.1, %v15730_v53 }
 0x705   : > { %15857 = vst [vmem:[%s25614_s6 + $0x50] sm:$0xff] %v15825_v39  ;;  %v15823_v52 = vsel %vm15759_vm9, %v15727_v8, %v15791_v19  ;;  %vm15760_vm11 = vcmp.ge.f32.partialorder %v15728_v49, 0.0  ;;  %v15792_v2 = vmul.f32 0.1, %v15728_v49  ;;  %v19300_v58 = vpop.f32.mrb[12].mxu0 }
 0x706   : > { %15855 = vst [vmem:[%s25614_s6 + $0x40] sm:$0xff] %v15823_v52  ;;  %v15826_v44 = vsel %vm15762_vm10, %v15730_v53, %v15794_v1  ;;  %v19332_v28 = vadd.f32 %v19300_v58, %v25594_v23  ;;  %v15601_v4 = vpop.f32.mrb[13].mxu0 }
 0x707   : > { %15858 = vst [vmem:[%s25614_s6 + $0x58] sm:$0xff] %v15826_v44  ;;  %v15824_v47 = vsel %vm15760_vm11, %v15728_v49, %v15792_v2  ;;  %v19333_v14 = vadd.f32 %v15601_v4, %v25596_v25  ;;  %v19301_v63 = vpop.f32.mrb[14].mxu0  ;;  %v18488_v20 = vpop.f32.mrb[16].mxu1 }
 0x708   : > { %15856 = vst [vmem:[%s25614_s6 + $0x48] sm:$0xff] %v15824_v47  ;;  %v15733_v57 = vadd.f32 %v19332_v28, %v25606_v12  ;;  %v19334_v46 = vadd.f32 %v19301_v63, %v25598_v60  ;;  %v15604_v51 = vpop.f32.mrb[15].mxu0  ;;  %v8097_v35 = vpop.f32.mrb[17].mxu1 }
 0x709   : > { %v15731_v45 = vadd.f32 %v19333_v14, %v25606_v12  ;;  %v19335_v11 = vadd.f32 %v15604_v51, %v25600_v18  ;;  %v18489_v23 = vpop.f32.mrb[18].mxu1 }
 0x70a   : > { %vm15765_vm12 = vcmp.ge.f32.partialorder %v15733_v57, 0.0  ;;  %v15797_v29 = vmul.f32 0.1, %v15733_v57  ;;  %v15734_v25 = vadd.f32 %v19334_v46, %v25606_v12  ;;  %v8100_v3 = vpop.f32.mrb[19].mxu1 }
 0x70b   : > { %vm15763_vm13 = vcmp.ge.f32.partialorder %v15731_v45, 0.0  ;;  %v15795_v37 = vmul.f32 0.1, %v15731_v45  ;;  %v15732_v17 = vadd.f32 %v19335_v11, %v25606_v12 }
 0x70c   : > { %v15829_v60 = vsel %vm15765_vm12, %v15733_v57, %v15797_v29  ;;  %vm15766_vm14 = vcmp.ge.f32.partialorder %v15734_v25, 0.0  ;;  %v15798_v5 = vmul.f32 0.1, %v15734_v25 }
 0x70d   : > { %15861 = vst [vmem:[%s25614_s6 + $0x70] sm:$0xff] %v15829_v60  ;;  %v15827_v13 = vsel %vm15763_vm13, %v15731_v45, %v15795_v37  ;;  %vm15764_vm15 = vcmp.ge.f32.partialorder %v15732_v17, 0.0  ;;  %v15796_v18 = vmul.f32 0.1, %v15732_v17  ;;  %v19304_v40 = vpop.f32.mrb[16].mxu0 }
 0x70e   : > { %15859 = vst [vmem:[%s25614_s6 + $0x60] sm:$0xff] %v15827_v13  ;;  %v15830_v62 = vsel %vm15766_vm14, %v15734_v25, %v15798_v5  ;;  %v19336_v54 = vadd.f32 %v19304_v40, %v18488_v20  ;;  %v15617_v36 = vpop.f32.mrb[17].mxu0 }
 0x70f   : > { %15862 = vst [vmem:[%s25614_s6 + $0x78] sm:$0xff] %v15830_v62  ;;  %v15828_v7 = vsel %vm15764_vm15, %v15732_v17, %v15796_v18  ;;  %v19337_v61 = vadd.f32 %v15617_v36, %v8097_v35  ;;  %v19305_v30 = vpop.f32.mrb[18].mxu0  ;;  %v18492_v6 = vpop.f32.mrb[20].mxu1 }
 0x710   : > { %15860 = vst [vmem:[%s25614_s6 + $0x68] sm:$0xff] %v15828_v7  ;;  %v15737_v21 = vadd.f32 %v19336_v54, %v25606_v12  ;;  %v19338_v32 = vadd.f32 %v19305_v30, %v18489_v23  ;;  %v15620_v48 = vpop.f32.mrb[19].mxu0  ;;  %v8113_v27 = vpop.f32.mrb[21].mxu1 }
 0x711   : > { %v15735_v55 = vadd.f32 %v19337_v61, %v25606_v12  ;;  %v19339_v10 = vadd.f32 %v15620_v48, %v8100_v3  ;;  %v18493_v9 = vpop.f32.mrb[22].mxu1 }
 0x712   : > { %vm15769_vm0 = vcmp.ge.f32.partialorder %v15737_v21, 0.0  ;;  %v15801_v15 = vmul.f32 0.1, %v15737_v21  ;;  %v15738_v31 = vadd.f32 %v19338_v32, %v25606_v12  ;;  %v8116_v42 = vpop.f32.mrb[23].mxu1 }
 0x713   : > { %vm15767_vm1 = vcmp.ge.f32.partialorder %v15735_v55, 0.0  ;;  %v15799_v26 = vmul.f32 0.1, %v15735_v55  ;;  %v15736_v43 = vadd.f32 %v19339_v10, %v25606_v12 }
 0x714   : > { %v15833_v50 = vsel %vm15769_vm0, %v15737_v21, %v15801_v15  ;;  %vm15770_vm2 = vcmp.ge.f32.partialorder %v15738_v31, 0.0  ;;  %v15802_v33 = vmul.f32 0.1, %v15738_v31 }
 0x715   : > { %15865 = vst [vmem:[%s25614_s6 + $0x90] sm:$0xff] %v15833_v50  ;;  %v15831_v22 = vsel %vm15767_vm1, %v15735_v55, %v15799_v26  ;;  %vm15768_vm3 = vcmp.ge.f32.partialorder %v15736_v43, 0.0  ;;  %v15800_v41 = vmul.f32 0.1, %v15736_v43  ;;  %v19308_v34 = vpop.f32.mrb[20].mxu0 }
 0x716   : > { %15863 = vst [vmem:[%s25614_s6 + $0x80] sm:$0xff] %v15831_v22  ;;  %v15834_v24 = vsel %vm15770_vm2, %v15738_v31, %v15802_v33  ;;  %v19340_v59 = vadd.f32 %v19308_v34, %v18492_v6  ;;  %v15633_v0 = vpop.f32.mrb[21].mxu0 }
 0x717   : > { %15866 = vst [vmem:[%s25614_s6 + $0x98] sm:$0xff] %v15834_v24  ;;  %v15832_v16 = vsel %vm15768_vm3, %v15736_v43, %v15800_v41  ;;  %v19341_v8 = vadd.f32 %v15633_v0, %v8113_v27  ;;  %v19309_v56 = vpop.f32.mrb[22].mxu0  ;;  %v18496_v38 = vpop.f32.mrb[24].mxu1 }
 0x718   : > { %15864 = vst [vmem:[%s25614_s6 + $0x88] sm:$0xff] %v15832_v16  ;;  %v15741_v53 = vadd.f32 %v19340_v59, %v25606_v12  ;;  %v19342_v19 = vadd.f32 %v19309_v56, %v18493_v9  ;;  %v15636_v49 = vpop.f32.mrb[23].mxu0  ;;  %v8129_v39 = vpop.f32.mrb[25].mxu1 }
 0x719   : > { %v15739_v1 = vadd.f32 %v19341_v8, %v25606_v12  ;;  %v19343_v52 = vadd.f32 %v15636_v49, %v8116_v42  ;;  %v18497_v2 = vpop.f32.mrb[26].mxu1 }
 0x71a   : > { %vm15773_vm4 = vcmp.ge.f32.partialorder %v15741_v53, 0.0  ;;  %v15805_v58 = vmul.f32 0.1, %v15741_v53  ;;  %v15742_v44 = vadd.f32 %v19342_v19, %v25606_v12  ;;  %v8132_v28 = vpop.f32.mrb[27].mxu1 }
 0x71b   : > { %vm15771_vm5 = vcmp.ge.f32.partialorder %v15739_v1, 0.0  ;;  %v15803_v4 = vmul.f32 0.1, %v15739_v1  ;;  %v15740_v47 = vadd.f32 %v19343_v52, %v25606_v12 }
 0x71c   : > { %v15837_v14 = vsel %vm15773_vm4, %v15741_v53, %v15805_v58  ;;  %vm15774_vm6 = vcmp.ge.f32.partialorder %v15742_v44, 0.0  ;;  %v15806_v63 = vmul.f32 0.1, %v15742_v44 }
 0x71d   : > { %15869 = vst [vmem:[%s25614_s6 + $0xb0] sm:$0xff] %v15837_v14  ;;  %v15835_v20 = vsel %vm15771_vm5, %v15739_v1, %v15803_v4  ;;  %vm15772_vm7 = vcmp.ge.f32.partialorder %v15740_v47, 0.0  ;;  %v15804_v57 = vmul.f32 0.1, %v15740_v47  ;;  %v19312_v46 = vpop.f32.mrb[24].mxu0 }
 0x71e   : > { %15867 = vst [vmem:[%s25614_s6 + $0xa0] sm:$0xff] %v15835_v20  ;;  %v15838_v51 = vsel %vm15774_vm6, %v15742_v44, %v15806_v63  ;;  %v19344_v35 = vadd.f32 %v19312_v46, %v18496_v38  ;;  %v15649_v45 = vpop.f32.mrb[25].mxu0 }
 0x71f   : > { %15870 = vst [vmem:[%s25614_s6 + $0xb8] sm:$0xff] %v15838_v51  ;;  %v15836_v11 = vsel %vm15772_vm7, %v15740_v47, %v15804_v57  ;;  %v19345_v23 = vadd.f32 %v15649_v45, %v8129_v39  ;;  %v19313_v29 = vpop.f32.mrb[26].mxu0  ;;  %v18500_v25 = vpop.f32.mrb[28].mxu1 }
 0x720   : > { %15868 = vst [vmem:[%s25614_s6 + $0xa8] sm:$0xff] %v15836_v11  ;;  %v15745_v3 = vadd.f32 %v19344_v35, %v25606_v12  ;;  %v19346_v37 = vadd.f32 %v19313_v29, %v18497_v2  ;;  %v15652_v17 = vpop.f32.mrb[27].mxu0  ;;  %v8145_v60 = vpop.f32.mrb[29].mxu1 }
 0x721   : > { %v15743_v5 = vadd.f32 %v19345_v23, %v25606_v12  ;;  %v19347_v13 = vadd.f32 %v15652_v17, %v8132_v28  ;;  %v18501_v18 = vpop.f32.mrb[30].mxu1 }
 0x722   : > { %vm15777_vm8 = vcmp.ge.f32.partialorder %v15745_v3, 0.0  ;;  %v15809_v40 = vmul.f32 0.1, %v15745_v3  ;;  %v15746_v62 = vadd.f32 %v19346_v37, %v25606_v12  ;;  %v8148_v54 = vpop.f32.mrb[31].mxu1 }
 0x723   : > { %vm15775_vm9 = vcmp.ge.f32.partialorder %v15743_v5, 0.0  ;;  %v15807_v36 = vmul.f32 0.1, %v15743_v5  ;;  %v15744_v7 = vadd.f32 %v19347_v13, %v25606_v12 }
 0x724   : > { %v15841_v61 = vsel %vm15777_vm8, %v15745_v3, %v15809_v40  ;;  %vm15778_vm10 = vcmp.ge.f32.partialorder %v15746_v62, 0.0  ;;  %v15810_v30 = vmul.f32 0.1, %v15746_v62 }
 0x725   : > { %15873 = vst [vmem:[%s25614_s6 + $0xd0] sm:$0xff] %v15841_v61  ;;  %v15839_v6 = vsel %vm15775_vm9, %v15743_v5, %v15807_v36  ;;  %vm15776_vm11 = vcmp.ge.f32.partialorder %v15744_v7, 0.0  ;;  %v15808_v21 = vmul.f32 0.1, %v15744_v7  ;;  %v19316_v32 = vpop.f32.mrb[28].mxu0 }
 0x726   : > { %15871 = vst [vmem:[%s25614_s6 + $0xc0] sm:$0xff] %v15839_v6  ;;  %v15842_v48 = vsel %vm15778_vm10, %v15746_v62, %v15810_v30  ;;  %v19348_v27 = vadd.f32 %v19316_v32, %v18500_v25  ;;  %v15665_v55 = vpop.f32.mrb[29].mxu0 }
 0x727   : > { %15874 = vst [vmem:[%s25614_s6 + $0xd8] sm:$0xff] %v15842_v48  ;;  %v15840_v10 = vsel %vm15776_vm11, %v15744_v7, %v15808_v21  ;;  %v19349_v9 = vadd.f32 %v15665_v55, %v8145_v60  ;;  %v19317_v15 = vpop.f32.mrb[30].mxu0 }
 0x728   : > { %15872 = vst [vmem:[%s25614_s6 + $0xc8] sm:$0xff] %v15840_v10  ;;  %v15749_v31 = vadd.f32 %v19348_v27, %v25606_v12  ;;  %v19350_v42 = vadd.f32 %v19317_v15, %v18501_v18  ;;  %v15668_v26 = vpop.f32.mrb[31].mxu0 }
 0x729   : > { %v15747_v43 = vadd.f32 %v19349_v9, %v25606_v12  ;;  %v19351_v50 = vadd.f32 %v15668_v26, %v8148_v54 }
 0x72a   : > { %vm15781_vm12 = vcmp.ge.f32.partialorder %v15749_v31, 0.0  ;;  %v15813_v33 = vmul.f32 0.1, %v15749_v31  ;;  %v15750_v22 = vadd.f32 %v19350_v42, %v25606_v12 }
 0x72b   : > { %vm15779_vm13 = vcmp.ge.f32.partialorder %v15747_v43, 0.0  ;;  %v15811_v41 = vmul.f32 0.1, %v15747_v43  ;;  %v15748_v34 = vadd.f32 %v19351_v50, %v25606_v12 }
 0x72c   : > { %v15845_v24 = vsel %vm15781_vm12, %v15749_v31, %v15813_v33  ;;  %vm15782_vm14 = vcmp.ge.f32.partialorder %v15750_v22, 0.0  ;;  %v15814_v59 = vmul.f32 0.1, %v15750_v22 }
 0x72d   : > { %15877 = vst [vmem:[%s25614_s6 + $0xf0] sm:$0xff] %v15845_v24  ;;  %v15843_v0 = vsel %vm15779_vm13, %v15747_v43, %v15811_v41  ;;  %vm15780_vm15 = vcmp.ge.f32.partialorder %v15748_v34, 0.0  ;;  %v15812_v16 = vmul.f32 0.1, %v15748_v34 }
 0x72e   : > { %15875 = vst [vmem:[%s25614_s6 + $0xe0] sm:$0xff] %v15843_v0  ;;  %v15846_v12 = vsel %vm15782_vm14, %v15750_v22, %v15814_v59 }
 0x72f   : > { %15878 = vst [vmem:[%s25614_s6 + $0xf8] sm:$0xff] %v15846_v12  ;;  %v15844_v8 = vsel %vm15780_vm15, %v15748_v34, %v15812_v16 }
 0x730   : > { %15876 = vst [vmem:[%s25614_s6 + $0xe8] sm:$0xff] %v15844_v8 }
 0x731   : > { %21060 = shalt.err (!%p21057_p6)
}
 0x732   : > { %s21061_s27 = scalar_lea.hbm %s25687_s11, 4096  ;;  %s21065_s7 = scalar_lea.hbm %s25751_s3, 147456 }
 0x733   : > { %p21062_p7 = scmp.ne.s32.totalorder %s25687_s11, %s21061_s27  ;;  %p21066_p11 = scmp.lt.u32.totalorder %s25687_s11, %s25751_s3 }
 0x734   : > { %p21067_p12 = scmp.lt.u32.totalorder %s21065_s7, %s21061_s27  ;;  %p21069_p0 = scmp.lt.u32.totalorder %s21061_s27, %s25687_s11 }
 0x735   : > { %p21063_p9 = pnand %p21062_p7, %p21218_p3 }
 0x736   : > { %p21068_p13 = por %p21067_p12, %p21066_p11 }
 0x737   : > { %p21064_p10 = pneg %p21063_p9 }
 0x738   : > { %p21070_p1 = por %p21069_p0, %p21068_p13 }
 0x73a   : > { %p21071_p2 = pnand %p21070_p1, %p21064_p10 }
 0x73c   : > { %21074 = shalt.err (!%p21071_p2)
}
 0x73d   : > { %s21145_s15 = smov 128   ;;  %s21146_s9 = smov 8  }
 0x73e   : > { %20858 = dma.vmem_to_hbm [thread:$0]  (%p21218_p3), %s25689_s8, 4096, %s25687_s11, %s25696_s20, %s21145_s15, %s21145_s15, %s21146_s9  }
 0x73f PF: > { %p20864_p4 = scmp.ge.s32.totalorder %s21141_s19, 2  ;;  %s15910_s10 = sand.u32 1, %s21113_s12  }
 0x740   : > { %s15911_s21 = scalar_lea.sflag [#allocation4], %s15910_s10 }
 0x741   : > { %p20861_p5 = pnand %p20864_p4, %p21227_p8 }
 0x743   : > { %21108 = dma.done.wait (!%p20861_p5), %s15911_s21, 4096  }
 0x744   : > { %21110 = vsyncadd (!%p20861_p5), %s15911_s21, 4294963200  ;;  %s16_s19 = sadd.s32 1, %s21141_s19   ;;  %s26578_s12 = smov %s21117_s13 }
 0x745   : > { %p13_p6 = scmp.ge.s32.totalorder %s16_s19, 38   ;;  %s26579_s13 = smov %s21121_s14 }
 0x746   : > { %s26580_s14 = smov %s21236_s30  ;;  %s26581_s15 = smov %s21133_s17 }
 0x747   : > { %s26582_s16 = smov %s21137_s18  ;;  %s26583_s17 = smov %s26586_s22 }
 0x748   : > { %s26584_s18 = smov %s26590_s23  ;;  %15 = sbr.rel (!%p13_p6) target bundleno = 5 (0x5), region = 116 }
 0x74f   :  { %15916 = vsyncpa [#allocation4], 1 }
 0x750   :  { %15918 = vsyncpa [#allocation4 + $0x1], 1 }

</bundles_post_ra>
